<compile_context>
chip_gen: v6e
topology: v6e:2x2x1
jax: 0.10.0
libtpu: 0.0.40
codegen_flags: <defaults>
</compile_context>

<pallas_src>
import functools

import jax
import jax.numpy as jnp
from jax.experimental import pallas as pl
from jax.experimental.pallas import tpu as pltpu


# ----------------------------- in-kernel helpers -----------------------------

def _gn_silu_f32(x2d, gamma, beta, cg, gc, *, eps):
    """Lane-dense GroupNorm (biased var, PyTorch-style) + SiLU, all stats in f32.

    x2d:   (P, C) f32 with channels on the lane axis.
    gamma: (1, C) f32, beta: (1, C) f32.
    cg:    (C, G) f32 one-hot channel->group map (constant input, built in wrapper).
    gc:    (G, C) f32 one-hot group->channel map.
    """
    P, C = x2d.shape
    G = cg.shape[-1]
    cnt = float(P * (C // G))

    # per-channel sums via sublane reduce (channels stay on the 128-lane axis)
    s = jnp.sum(x2d, axis=0, keepdims=True)                    # (1, C)
    ss = jnp.sum(x2d * x2d, axis=0, keepdims=True)             # (1, C)

    mean_g = jnp.dot(s, cg, preferred_element_type=jnp.float32) / cnt    # (1, G)
    ex2_g = jnp.dot(ss, cg, preferred_element_type=jnp.float32) / cnt    # (1, G)
    var_g = ex2_g - mean_g * mean_g                                      # biased var
    inv_g = jax.lax.rsqrt(var_g + eps)

    mean_c = jnp.dot(mean_g, gc, preferred_element_type=jnp.float32)     # (1, C)
    inv_c = jnp.dot(inv_g, gc, preferred_element_type=jnp.float32)       # (1, C)

    scale = inv_c * gamma
    shift = beta - mean_c * scale
    y = x2d * scale + shift
    return y * jax.nn.sigmoid(y)                               # SiLU


def _zero_halo(ap_ref, pad, hw):
    """Zero only the halo rows of the flat padded buffer (interior is fully rewritten)."""
    C = ap_ref.shape[-1]
    ap_ref[0:pad, :] = jnp.zeros((pad, C), ap_ref.dtype)
    ap_ref[pad + hw:pad + hw + pad, :] = jnp.zeros((pad, C), ap_ref.dtype)


def _conv3x3_flat(ap_ref, w_ref, bias, mask_l, mask_r, *, H, W, pad):
    """3x3 conv, stride 1, 'same' zero padding, on a flat halo-padded activation buffer.

    ap_ref : (H*W + 2*pad, C) bf16 VMEM scratch; rows [pad, pad+H*W) hold the activation
             in row-major (pixel, channel) order, halo rows are zero.
    w_ref  : (9, C, Cout) bf16 weights (HWIO flattened over the 3x3 taps).
    bias   : (1, Cout) f32.
    mask_l : (H*W, 1) f32, zero where the output pixel column j == 0   (kills dw=-1 wrap)
    mask_r : (H*W, 1) f32, zero where the output pixel column j == W-1 (kills dw=+1 wrap)
    Returns (H*W, Cout) f32.

    Tap (kh, kw) reads flat pixel p + (kh-1)*W + (kw-1): out-of-image rows land in the
    zero halo, out-of-image columns wrap to the neighbouring row and are cancelled by
    mask_l / mask_r.  Every patch is a pure sublane-offset slice (no reshape/relayout).
    """
    HW = H * W

    def _taps(kw):
        t = None
        for kh in range(3):
            start = pad + (kh - 1) * W + (kw - 1)
            patch = ap_ref[start:start + HW, :]                              # (HW, C) bf16
            d = jnp.dot(patch, w_ref[kh * 3 + kw],
                        preferred_element_type=jnp.float32)                 # (HW, Cout) f32
            t = d if t is None else t + d
        return t

    acc = _taps(1)                       # kw == 1: never wraps
    acc = acc + mask_l * _taps(0)        # kw == 0: wraps only at j == 0
    acc = acc + mask_r * _taps(2)        # kw == 2: wraps only at j == W-1
    return acc + bias


# ------------------------------- fused kernel --------------------------------

def _resnet_block_kernel(*refs, eps, H, W, pad, use_nin):
    if use_nin:
        (x_ref, g1_ref, b1_ref, cg1_ref, gc1_ref, w1_ref, cb1_ref,
         g2_ref, b2_ref, cg2_ref, gc2_ref, w2_ref, cb2_ref, nw_ref, nb_ref,
         o_ref, ap1_ref, ap2_ref) = refs
    else:
        (x_ref, g1_ref, b1_ref, cg1_ref, gc1_ref, w1_ref, cb1_ref,
         g2_ref, b2_ref, cg2_ref, gc2_ref, w2_ref, cb2_ref,
         o_ref, ap1_ref, ap2_ref) = refs
        nw_ref = nb_ref = None

    HW = H * W
    x_bf = x_ref[0]                               # (HW, Cin) bf16
    x32 = x_bf.astype(jnp.float32)

    # column-wrap masks for the flat-shift conv (tiny: HW x 1)
    col = jax.lax.broadcasted_iota(jnp.int32, (HW, 1), 0) % W
    mask_l = (col != 0).astype(jnp.float32)
    mask_r = (col != W - 1).astype(jnp.float32)

    # ---- GroupNorm1 + SiLU, stored straight into halo buffer 1 as bf16 ----
    _zero_halo(ap1_ref, pad, HW)
    a1 = _gn_silu_f32(x32, g1_ref[...], b1_ref[...], cg1_ref[...], gc1_ref[...], eps=eps)
    ap1_ref[pad:pad + HW, :] = a1.astype(ap1_ref.dtype)

    # ---- conv1: 9 accumulating K=Cin matmuls (bf16 operands, f32 accumulation) ----
    h1 = _conv3x3_flat(ap1_ref, w1_ref, cb1_ref[...], mask_l, mask_r,
                       H=H, W=W, pad=pad)                     # (HW, Cout) f32

    # ---- GroupNorm2 + SiLU -> halo buffer 2 ----
    _zero_halo(ap2_ref, pad, HW)
    a2 = _gn_silu_f32(h1, g2_ref[...], b2_ref[...], cg2_ref[...], gc2_ref[...], eps=eps)
    ap2_ref[pad:pad + HW, :] = a2.astype(ap2_ref.dtype)

    # ---- conv2 ----
    h2 = _conv3x3_flat(ap2_ref, w2_ref, cb2_ref[...], mask_l, mask_r,
                       H=H, W=W, pad=pad)                     # (HW, Cout) f32

    # ---- shortcut (1x1 conv when channels change) + residual, cast on store ----
    if use_nin:
        sc = jnp.dot(x_bf, nw_ref[...], preferred_element_type=jnp.float32) + nb_ref[...]
    else:
        sc = x32
    o_ref[0] = (sc + h2).astype(o_ref.dtype)


# ------------------------------ wrapper helpers -------------------------------

def _group_onehots(C, G):
    ch = jnp.arange(C, dtype=jnp.int32)
    gr = jnp.arange(G, dtype=jnp.int32)
    cg = (ch[:, None] // (C // G) == gr[None, :]).astype(jnp.float32)     # (C, G)
    return cg, jnp.transpose(cg)                                          # (C,G), (G,C)


def _vmem_limit_bytes(HW, Cin, Cout, G, use_nin, pad):
    """Scoped-VMEM request: blocks (double-buffered) + scratch + f32 internals + headroom."""
    bf, f4 = 2, 4
    est = 0
    est += 2 * HW * Cin * bf                              # input block, double-buffered
    est += 2 * HW * Cout * bf                             # output block, double-buffered
    est += 2 * 9 * (Cin * Cout + Cout * Cout) * bf        # conv weights, double-buffered
    if use_nin:
        est += 2 * Cin * Cout * bf
    est += 2 * (2 * Cin + 6 * Cout) * f4                  # gammas / betas / biases
    est += 2 * 2 * G * (Cin + Cout) * f4                  # group one-hot maps
    est += (HW + 2 * pad) * (Cin + Cout) * bf             # halo scratch buffers
    est += (3 * max(Cin, Cout) + 3 * Cout) * HW * f4      # f32 internal temporaries
    est = int(est * 1.3)                                  # ~30% headroom
    return int(min(max(est, 32 * 1024 * 1024), 128 * 1024 * 1024))


# ------------------------------ wrappers --------------------------------------

def resnet_block_forward_nhwc(x_nhwc, params, *, in_channels, out_channels,
                              num_groups=32, out_dtype=jnp.bfloat16):
    """NHWC in -> NHWC out.  Preferred entry point: no layout transposes."""
    N, H, W, Cin = x_nhwc.shape
    assert Cin == in_channels
    assert in_channels % num_groups == 0 and out_channels % num_groups == 0
    Cout = out_channels
    HW = H * W
    G = num_groups
    use_nin = in_channels != out_channels
    pad = ((W + 1 + 15) // 16) * 16        # >= W+1 halo rows, sublane-aligned for bf16

    x = x_nhwc.reshape(N, HW, Cin).astype(jnp.bfloat16)

    g1 = params["norm1_gamma"].reshape(1, Cin).astype(jnp.float32)
    b1 = params["norm1_beta"].reshape(1, Cin).astype(jnp.float32)
    w1 = params["conv1_w"].reshape(9, Cin, Cout).astype(jnp.bfloat16)
    cb1 = params["conv1_b"].reshape(1, Cout).astype(jnp.float32)
    g2 = params["norm2_gamma"].reshape(1, Cout).astype(jnp.float32)
    b2 = params["norm2_beta"].reshape(1, Cout).astype(jnp.float32)
    w2 = params["conv2_w"].reshape(9, Cout, Cout).astype(jnp.bfloat16)
    cb2 = params["conv2_b"].reshape(1, Cout).astype(jnp.float32)
    cg1, gc1 = _group_onehots(Cin, G)
    cg2, gc2 = _group_onehots(Cout, G)

    inputs = [x, g1, b1, cg1, gc1, w1, cb1, g2, b2, cg2, gc2, w2, cb2]
    in_specs = [
        pl.BlockSpec((1, HW, Cin), lambda n: (n, 0, 0)),
        pl.BlockSpec((1, Cin), lambda n: (0, 0)),
        pl.BlockSpec((1, Cin), lambda n: (0, 0)),
        pl.BlockSpec((Cin, G), lambda n: (0, 0)),
        pl.BlockSpec((G, Cin), lambda n: (0, 0)),
        pl.BlockSpec((9, Cin, Cout), lambda n: (0, 0, 0)),
        pl.BlockSpec((1, Cout), lambda n: (0, 0)),
        pl.BlockSpec((1, Cout), lambda n: (0, 0)),
        pl.BlockSpec((1, Cout), lambda n: (0, 0)),
        pl.BlockSpec((Cout, G), lambda n: (0, 0)),
        pl.BlockSpec((G, Cout), lambda n: (0, 0)),
        pl.BlockSpec((9, Cout, Cout), lambda n: (0, 0, 0)),
        pl.BlockSpec((1, Cout), lambda n: (0, 0)),
    ]
    if use_nin:
        inputs += [params["nin_w"].astype(jnp.bfloat16),
                   params["nin_b"].reshape(1, Cout).astype(jnp.float32)]
        in_specs += [pl.BlockSpec((Cin, Cout), lambda n: (0, 0)),
                     pl.BlockSpec((1, Cout), lambda n: (0, 0))]

    flops = 2 * N * HW * (9 * Cin * Cout + 9 * Cout * Cout
                          + (Cin * Cout if use_nin else 0))
    transcendentals = N * HW * (Cin + Cout)        # one sigmoid-exp per GN+SiLU element
    bytes_accessed = (N * HW * (Cin + Cout) * 2
                      + 9 * (Cin * Cout + Cout * Cout) * 2
                      + (Cin * Cout * 2 if use_nin else 0))

    out = pl.pallas_call(
        functools.partial(_resnet_block_kernel, eps=1e-6, H=H, W=W, pad=pad,
                          use_nin=use_nin),
        out_shape=jax.ShapeDtypeStruct((N, HW, Cout), out_dtype),
        grid=(N,),
        in_specs=in_specs,
        out_specs=pl.BlockSpec((1, HW, Cout), lambda n: (n, 0, 0)),
        scratch_shapes=[
            pltpu.VMEM((HW + 2 * pad, Cin), jnp.bfloat16),    # halo buffer for conv1
            pltpu.VMEM((HW + 2 * pad, Cout), jnp.bfloat16),   # halo buffer for conv2
        ],
        compiler_params=pltpu.CompilerParams(
            dimension_semantics=("parallel",),
            vmem_limit_bytes=_vmem_limit_bytes(HW, Cin, Cout, G, use_nin, pad)),
        cost_estimate=pl.CostEstimate(flops=flops, transcendentals=transcendentals,
                                      bytes_accessed=bytes_accessed),
    )(*inputs)

    return out.reshape(N, H, W, Cout)


def resnet_block_forward(x_nchw, params, *, in_channels, out_channels, num_groups=32,
                         out_dtype=jnp.bfloat16):
    """PyTorch-convention NCHW in / NCHW out (thin layout shim around the NHWC kernel)."""
    x_nhwc = jnp.transpose(x_nchw, (0, 2, 3, 1))
    y = resnet_block_forward_nhwc(x_nhwc, params, in_channels=in_channels,
                                  out_channels=out_channels, num_groups=num_groups,
                                  out_dtype=out_dtype)
    return jnp.transpose(y, (0, 3, 1, 2))


# ------------------------------ param init ------------------------------------

def init_resnet_block_params(key, in_channels, out_channels):
    ks = jax.random.split(key, 8)
    p = {
        "norm1_gamma": 1.0 + 0.05 * jax.random.normal(ks[0], (in_channels,), jnp.float32),
        "norm1_beta": 0.05 * jax.random.normal(ks[1], (in_channels,), jnp.float32),
        "conv1_w": 0.05 * jax.random.normal(ks[2], (3, 3, in_channels, out_channels), jnp.float32),
        "conv1_b": 0.05 * jax.random.normal(ks[3], (out_channels,), jnp.float32),
        "norm2_gamma": 1.0 + 0.05 * jax.random.normal(ks[4], (out_channels,), jnp.float32),
        "norm2_beta": 0.05 * jax.random.normal(ks[5], (out_channels,), jnp.float32),
        "conv2_w": 0.05 * jax.random.normal(ks[6], (3, 3, out_channels, out_channels), jnp.float32),
        "conv2_b": 0.05 * jax.random.normal(ks[7], (out_channels,), jnp.float32),
    }
    if in_channels != out_channels:
        k1, k2 = jax.random.split(jax.random.fold_in(key, 99))
        p["nin_w"] = 0.05 * jax.random.normal(k1, (in_channels, out_channels), jnp.float32)
        p["nin_b"] = 0.05 * jax.random.normal(k2, (out_channels,), jnp.float32)
    return p


# ------------------------------ pure-JAX references ---------------------------

def _ref_groupnorm_silu(x, gamma, beta, ng, eps=1e-6):
    N, H, W, C = x.shape
    xg = x.reshape(N, H, W, ng, C // ng)
    mean = xg.mean(axis=(1, 2, 4), keepdims=True)
    var = ((xg - mean) ** 2).mean(axis=(1, 2, 4), keepdims=True)
    y = ((xg - mean) / jnp.sqrt(var + eps)).reshape(N, H, W, C)
    y = y * gamma + beta
    return y * jax.nn.sigmoid(y)


def _ref_conv(x, w_hwio, b, pad, bf16=False):
    if bf16:
        x = x.astype(jnp.bfloat16)
        w_hwio = w_hwio.astype(jnp.bfloat16)
    out = jax.lax.conv_general_dilated(
        x, w_hwio, window_strides=(1, 1),
        padding=[(pad, pad), (pad, pad)],
        dimension_numbers=("NHWC", "HWIO", "NHWC"),
        preferred_element_type=jnp.float32)
    return out + b


def _ref_forward(x_nchw, p, in_c, out_c, ng=32, bf16=False):
    x = jnp.transpose(x_nchw, (0, 2, 3, 1))
    if bf16:
        x = x.astype(jnp.bfloat16).astype(jnp.float32)
    h = _ref_groupnorm_silu(x, p["norm1_gamma"], p["norm1_beta"], ng)
    h = _ref_conv(h, p["conv1_w"], p["conv1_b"], 1, bf16)
    h = _ref_groupnorm_silu(h, p["norm2_gamma"], p["norm2_beta"], ng)
    h = _ref_conv(h, p["conv2_w"], p["conv2_b"], 1, bf16)
    if in_c != out_c:
        x = _ref_conv(x, p["nin_w"].reshape(1, 1, in_c, out_c), p["nin_b"], 0, bf16)
    return jnp.transpose(x + h, (0, 3, 1, 2))


# ----------------------------------- main --------------------------------------

if __name__ == "__main__":
    # GroupNorm uses 32 groups -> channels must be multiples of 32.
    # Test both the nin-shortcut path (Cin != Cout) and the identity path (Cin == Cout).
    configs = [(2, 32, 64, 16, 16), (2, 32, 32, 16, 16)]

    for (N, Cin, Cout, H, W) in configs:
        key = jax.random.PRNGKey(0)
        kx, kp = jax.random.split(key)
        x = jax.random.normal(kx, (N, Cin, H, W), jnp.float32)   # NCHW (PyTorch convention)
        params = init_resnet_block_params(kp, Cin, Cout)

        fwd = jax.jit(functools.partial(
            resnet_block_forward, in_channels=Cin, out_channels=Cout, num_groups=32))
        out = fwd(x, params)
        jax.block_until_ready(out)
        assert out.shape == (N, Cout, H, W)
        out32 = out.astype(jnp.float32)

        # check vs. a bf16-matmul-matched reference (same precision policy; bf16 output)
        ref_bf = _ref_forward(x, params, Cin, Cout, bf16=True)
        err_bf = float(jnp.max(jnp.abs(out32 - ref_bf)))
        assert jnp.allclose(out32, ref_bf, atol=2e-2, rtol=2e-2), err_bf

        # loose sanity check vs. the pure-f32 reference (bf16 operand/output rounding bound)
        ref_f32 = _ref_forward(x, params, Cin, Cout, bf16=False)
        err_f32 = float(jnp.max(jnp.abs(out32 - ref_f32)))
        assert jnp.allclose(out32, ref_f32, atol=1.5e-1, rtol=5e-2), err_f32

    print("KERNEL_OK")
</pallas_src>

<mosaic_0001>
module attributes {stable_mosaic.version = 11 : i64} {
  func.func @_resnet_block_kernel(%arg0: i32, %arg1: memref<1x256x32xbf16, #tpu.memory_space<vmem>>, %arg2: memref<1x32xf32, #tpu.memory_space<vmem>>, %arg3: memref<1x32xf32, #tpu.memory_space<vmem>>, %arg4: memref<32x32xf32, #tpu.memory_space<vmem>>, %arg5: memref<32x32xf32, #tpu.memory_space<vmem>>, %arg6: memref<9x32x64xbf16, #tpu.memory_space<vmem>>, %arg7: memref<1x64xf32, #tpu.memory_space<vmem>>, %arg8: memref<1x64xf32, #tpu.memory_space<vmem>>, %arg9: memref<1x64xf32, #tpu.memory_space<vmem>>, %arg10: memref<64x32xf32, #tpu.memory_space<vmem>>, %arg11: memref<32x64xf32, #tpu.memory_space<vmem>>, %arg12: memref<9x64x64xbf16, #tpu.memory_space<vmem>>, %arg13: memref<1x64xf32, #tpu.memory_space<vmem>>, %arg14: memref<32x64xbf16, #tpu.memory_space<vmem>>, %arg15: memref<1x64xf32, #tpu.memory_space<vmem>>, %arg16: memref<1x256x64xbf16, #tpu.memory_space<vmem>>, %arg17: memref<320x32xbf16, #tpu.memory_space<vmem>>, %arg18: memref<320x64xbf16, #tpu.memory_space<vmem>>) attributes {dimension_semantics = [#tpu.dimension_semantics<parallel>], iteration_bounds = array<i64: 2>, scalar_prefetch = 0 : i64, scratch_operands = 2 : i64, tpu.core_type = #tpu.core_type<tc>, window_params = [{transform_indices = @transform_0, window_bounds = array<i64: 1, 256, 32>}, {pipeline_mode = #tpu.pipeline_mode<synchronous>, transform_indices = @transform_1, window_bounds = array<i64: 1, 32>}, {pipeline_mode = #tpu.pipeline_mode<synchronous>, transform_indices = @transform_2, window_bounds = array<i64: 1, 32>}, {pipeline_mode = #tpu.pipeline_mode<synchronous>, transform_indices = @transform_3, window_bounds = array<i64: 32, 32>}, {pipeline_mode = #tpu.pipeline_mode<synchronous>, transform_indices = @transform_4, window_bounds = array<i64: 32, 32>}, {pipeline_mode = #tpu.pipeline_mode<synchronous>, transform_indices = @transform_5, window_bounds = array<i64: 9, 32, 64>}, {pipeline_mode = #tpu.pipeline_mode<synchronous>, transform_indices = @transform_6, window_bounds = array<i64: 1, 64>}, {pipeline_mode = #tpu.pipeline_mode<synchronous>, transform_indices = @transform_7, window_bounds = array<i64: 1, 64>}, {pipeline_mode = #tpu.pipeline_mode<synchronous>, transform_indices = @transform_8, window_bounds = array<i64: 1, 64>}, {pipeline_mode = #tpu.pipeline_mode<synchronous>, transform_indices = @transform_9, window_bounds = array<i64: 64, 32>}, {pipeline_mode = #tpu.pipeline_mode<synchronous>, transform_indices = @transform_10, window_bounds = array<i64: 32, 64>}, {pipeline_mode = #tpu.pipeline_mode<synchronous>, transform_indices = @transform_11, window_bounds = array<i64: 9, 64, 64>}, {pipeline_mode = #tpu.pipeline_mode<synchronous>, transform_indices = @transform_12, window_bounds = array<i64: 1, 64>}, {pipeline_mode = #tpu.pipeline_mode<synchronous>, transform_indices = @transform_13, window_bounds = array<i64: 32, 64>}, {pipeline_mode = #tpu.pipeline_mode<synchronous>, transform_indices = @transform_14, window_bounds = array<i64: 1, 64>}, {transform_indices = @transform_15, window_bounds = array<i64: 1, 256, 64>}]} {
    %c0 = arith.constant 0 : index
    %c0_0 = arith.constant 0 : index
    %c0_1 = arith.constant 0 : index
    %0 = vector.load %arg1[%c0, %c0_0, %c0_1] : memref<1x256x32xbf16, #tpu.memory_space<vmem>>, vector<1x256x32xbf16>
    %1 = vector.shape_cast %0 : vector<1x256x32xbf16> to vector<256x32xbf16>
    %2 = arith.extf %1 : vector<256x32xbf16> to vector<256x32xf32>
    %3 = tpu.iota {dimensions = array<i32: 0>} : vector<256x1xi32>
    %c16_i32 = arith.constant 16 : i32
    %c0_i32 = arith.constant 0 : i32
    %4 = arith.cmpi eq, %c16_i32, %c0_i32 : i32
    %c1_i32 = arith.constant 1 : i32
    %5 = arith.select %4, %c1_i32, %c16_i32 : i32
    %6 = vector.broadcast %5 : i32 to vector<256x1xi32>
    %7 = arith.remsi %3, %6 : vector<256x1xi32>
    %c0_i32_2 = arith.constant 0 : i32
    %8 = vector.broadcast %c0_i32_2 : i32 to vector<256x1xi32>
    %9 = arith.cmpi ne, %7, %8 : vector<256x1xi32>
    %c0_i32_3 = arith.constant 0 : i32
    %10 = vector.broadcast %c0_i32_3 : i32 to vector<256x1xi32>
    %11 = arith.cmpi slt, %7, %10 : vector<256x1xi32>
    %c0_i32_4 = arith.constant 0 : i32
    %12 = arith.cmpi slt, %5, %c0_i32_4 : i32
    %13 = vector.broadcast %12 : i1 to vector<256x1xi1>
    %14 = vector.broadcast %13 : vector<256x1xi1> to vector<256x1xi1>
    %15 = arith.xori %11, %14 : vector<256x1xi1>
    %16 = arith.andi %15, %9 : vector<256x1xi1>
    %17 = vector.broadcast %5 : i32 to vector<256x1xi32>
    %18 = arith.addi %7, %17 : vector<256x1xi32>
    %19 = arith.select %16, %18, %7 : vector<256x1xi1>, vector<256x1xi32>
    %c0_i32_5 = arith.constant 0 : i32
    %20 = vector.broadcast %c0_i32_5 : i32 to vector<256x1xi32>
    %21 = arith.cmpi ne, %19, %20 : vector<256x1xi32>
    %22 = arith.extui %21 : vector<256x1xi1> to vector<256x1xi32>
    %23 = arith.sitofp %22 : vector<256x1xi32> to vector<256x1xf32>
    %c15_i32 = arith.constant 15 : i32
    %24 = vector.broadcast %c15_i32 : i32 to vector<256x1xi32>
    %25 = arith.cmpi ne, %19, %24 : vector<256x1xi32>
    %26 = arith.extui %25 : vector<256x1xi1> to vector<256x1xi32>
    %27 = arith.sitofp %26 : vector<256x1xi32> to vector<256x1xf32>
    %cst = arith.constant 0.000000e+00 : bf16
    %28 = vector.broadcast %cst : bf16 to vector<32x32xbf16>
    %c0_6 = arith.constant 0 : index
    %c0_7 = arith.constant 0 : index
    %29 = vector.load %arg17[%c0_6, %c0_7] : memref<320x32xbf16, #tpu.memory_space<vmem>>, vector<32x32xbf16>
    tpu.vector_store %arg17[%c0_6, %c0_7], %28 {strides = array<i32>} : memref<320x32xbf16, #tpu.memory_space<vmem>>, vector<32x32xbf16>,
    %cst_8 = arith.constant 0.000000e+00 : bf16
    %30 = vector.broadcast %cst_8 : bf16 to vector<32x32xbf16>
    %c288 = arith.constant 288 : index
    %c0_9 = arith.constant 0 : index
    %31 = vector.load %arg17[%c288, %c0_9] : memref<320x32xbf16, #tpu.memory_space<vmem>>, vector<32x32xbf16>
    tpu.vector_store %arg17[%c288, %c0_9], %30 {strides = array<i32>} : memref<320x32xbf16, #tpu.memory_space<vmem>>, vector<32x32xbf16>,
    %c0_10 = arith.constant 0 : index
    %c0_11 = arith.constant 0 : index
    %32 = vector.load %arg2[%c0_10, %c0_11] : memref<1x32xf32, #tpu.memory_space<vmem>>, vector<1x32xf32>
    %c0_12 = arith.constant 0 : index
    %c0_13 = arith.constant 0 : index
    %33 = vector.load %arg3[%c0_12, %c0_13] : memref<1x32xf32, #tpu.memory_space<vmem>>, vector<1x32xf32>
    %c0_14 = arith.constant 0 : index
    %c0_15 = arith.constant 0 : index
    %34 = vector.load %arg4[%c0_14, %c0_15] : memref<32x32xf32, #tpu.memory_space<vmem>>, vector<32x32xf32>
    %c0_16 = arith.constant 0 : index
    %c0_17 = arith.constant 0 : index
    %35 = vector.load %arg5[%c0_16, %c0_17] : memref<32x32xf32, #tpu.memory_space<vmem>>, vector<32x32xf32>
    %cst_18 = arith.constant dense<0.000000e+00> : vector<32xf32>
    %36 = vector.multi_reduction <add>, %2, %cst_18 [0] : vector<256x32xf32> to vector<32xf32>
    %37 = vector.shape_cast %36 : vector<32xf32> to vector<1x32xf32>
    %38 = arith.mulf %2, %2 : vector<256x32xf32>
    %cst_19 = arith.constant dense<0.000000e+00> : vector<32xf32>
    %39 = vector.multi_reduction <add>, %38, %cst_19 [0] : vector<256x32xf32> to vector<32xf32>
    %40 = vector.shape_cast %39 : vector<32xf32> to vector<1x32xf32>
    %cst_20 = arith.constant dense<0.000000e+00> : vector<1x32xf32>
    %41 = tpu.matmul %37, %34, %cst_20 {dimension_numbers = #tpu.dot_dimension_numbers<[1], [0], [0], [1], [0, 0, 1, 1], [], []>} : vector<1x32xf32>, vector<32x32xf32>, vector<1x32xf32> -> vector<1x32xf32>
    %cst_21 = arith.constant 2.560000e+02 : f32
    %42 = vector.broadcast %cst_21 : f32 to vector<1x32xf32>
    %43 = arith.divf %41, %42 : vector<1x32xf32>
    %cst_22 = arith.constant dense<0.000000e+00> : vector<1x32xf32>
    %44 = tpu.matmul %40, %34, %cst_22 {dimension_numbers = #tpu.dot_dimension_numbers<[1], [0], [0], [1], [0, 0, 1, 1], [], []>} : vector<1x32xf32>, vector<32x32xf32>, vector<1x32xf32> -> vector<1x32xf32>
    %cst_23 = arith.constant 2.560000e+02 : f32
    %45 = vector.broadcast %cst_23 : f32 to vector<1x32xf32>
    %46 = arith.divf %44, %45 : vector<1x32xf32>
    %47 = arith.mulf %43, %43 : vector<1x32xf32>
    %48 = arith.subf %46, %47 : vector<1x32xf32>
    %cst_24 = arith.constant 9.99999997E-7 : f32
    %49 = vector.broadcast %cst_24 : f32 to vector<1x32xf32>
    %50 = arith.addf %48, %49 : vector<1x32xf32>
    %51 = math.rsqrt %50 : vector<1x32xf32>
    %cst_25 = arith.constant dense<0.000000e+00> : vector<1x32xf32>
    %52 = tpu.matmul %43, %35, %cst_25 {dimension_numbers = #tpu.dot_dimension_numbers<[1], [0], [0], [1], [0, 0, 1, 1], [], []>} : vector<1x32xf32>, vector<32x32xf32>, vector<1x32xf32> -> vector<1x32xf32>
    %cst_26 = arith.constant dense<0.000000e+00> : vector<1x32xf32>
    %53 = tpu.matmul %51, %35, %cst_26 {dimension_numbers = #tpu.dot_dimension_numbers<[1], [0], [0], [1], [0, 0, 1, 1], [], []>} : vector<1x32xf32>, vector<32x32xf32>, vector<1x32xf32> -> vector<1x32xf32>
    %54 = arith.mulf %53, %32 : vector<1x32xf32>
    %55 = arith.mulf %52, %54 : vector<1x32xf32>
    %56 = arith.subf %33, %55 : vector<1x32xf32>
    %57 = vector.broadcast %54 : vector<1x32xf32> to vector<256x32xf32>
    %58 = arith.mulf %2, %57 : vector<256x32xf32>
    %59 = vector.broadcast %56 : vector<1x32xf32> to vector<256x32xf32>
    %60 = arith.addf %58, %59 : vector<256x32xf32>
    %61 = arith.negf %60 : vector<256x32xf32>
    %62 = math.exp %61 : vector<256x32xf32>
    %cst_27 = arith.constant 1.000000e+00 : f32
    %63 = vector.broadcast %cst_27 : f32 to vector<256x32xf32>
    %64 = arith.addf %63, %62 : vector<256x32xf32>
    %65 = arith.divf %63, %64 : vector<256x32xf32>
    %66 = arith.mulf %60, %65 : vector<256x32xf32>
    %67 = arith.truncf %66 : vector<256x32xf32> to vector<256x32xbf16>
    %c32 = arith.constant 32 : index
    %c0_28 = arith.constant 0 : index
    %68 = vector.load %arg17[%c32, %c0_28] : memref<320x32xbf16, #tpu.memory_space<vmem>>, vector<256x32xbf16>
    tpu.vector_store %arg17[%c32, %c0_28], %67 {strides = array<i32>} : memref<320x32xbf16, #tpu.memory_space<vmem>>, vector<256x32xbf16>,
    %c0_29 = arith.constant 0 : index
    %c0_30 = arith.constant 0 : index
    %69 = vector.load %arg7[%c0_29, %c0_30] : memref<1x64xf32, #tpu.memory_space<vmem>>, vector<1x64xf32>
    %c16 = arith.constant 16 : index
    %c0_31 = arith.constant 0 : index
    %70 = vector.load %arg17[%c16, %c0_31] : memref<320x32xbf16, #tpu.memory_space<vmem>>, vector<256x32xbf16>
    %c1 = arith.constant 1 : index
    %c0_32 = arith.constant 0 : index
    %c0_33 = arith.constant 0 : index
    %71 = vector.load %arg6[%c1, %c0_32, %c0_33] : memref<9x32x64xbf16, #tpu.memory_space<vmem>>, vector<1x32x64xbf16>
    %72 = vector.shape_cast %71 : vector<1x32x64xbf16> to vector<32x64xbf16>
    %cst_34 = arith.constant dense<0.000000e+00> : vector<256x64xf32>
    %73 = tpu.matmul %70, %72, %cst_34 {dimension_numbers = #tpu.dot_dimension_numbers<[1], [0], [0], [1], [0, 0, 1, 1], [], []>} : vector<256x32xbf16>, vector<32x64xbf16>, vector<256x64xf32> -> vector<256x64xf32>
    %c32_35 = arith.constant 32 : index
    %c0_36 = arith.constant 0 : index
    %74 = vector.load %arg17[%c32_35, %c0_36] : memref<320x32xbf16, #tpu.memory_space<vmem>>, vector<256x32xbf16>
    %c4 = arith.constant 4 : index
    %c0_37 = arith.constant 0 : index
    %c0_38 = arith.constant 0 : index
    %75 = vector.load %arg6[%c4, %c0_37, %c0_38] : memref<9x32x64xbf16, #tpu.memory_space<vmem>>, vector<1x32x64xbf16>
    %76 = vector.shape_cast %75 : vector<1x32x64xbf16> to vector<32x64xbf16>
    %cst_39 = arith.constant dense<0.000000e+00> : vector<256x64xf32>
    %77 = tpu.matmul %74, %76, %cst_39 {dimension_numbers = #tpu.dot_dimension_numbers<[1], [0], [0], [1], [0, 0, 1, 1], [], []>} : vector<256x32xbf16>, vector<32x64xbf16>, vector<256x64xf32> -> vector<256x64xf32>
    %78 = arith.addf %73, %77 : vector<256x64xf32>
    %c48 = arith.constant 48 : index
    %c0_40 = arith.constant 0 : index
    %79 = vector.load %arg17[%c48, %c0_40] : memref<320x32xbf16, #tpu.memory_space<vmem>>, vector<256x32xbf16>
    %c7 = arith.constant 7 : index
    %c0_41 = arith.constant 0 : index
    %c0_42 = arith.constant 0 : index
    %80 = vector.load %arg6[%c7, %c0_41, %c0_42] : memref<9x32x64xbf16, #tpu.memory_space<vmem>>, vector<1x32x64xbf16>
    %81 = vector.shape_cast %80 : vector<1x32x64xbf16> to vector<32x64xbf16>
    %cst_43 = arith.constant dense<0.000000e+00> : vector<256x64xf32>
    %82 = tpu.matmul %79, %81, %cst_43 {dimension_numbers = #tpu.dot_dimension_numbers<[1], [0], [0], [1], [0, 0, 1, 1], [], []>} : vector<256x32xbf16>, vector<32x64xbf16>, vector<256x64xf32> -> vector<256x64xf32>
    %83 = arith.addf %78, %82 : vector<256x64xf32>
    %c15 = arith.constant 15 : index
    %c0_44 = arith.constant 0 : index
    %84 = vector.load %arg17[%c15, %c0_44] : memref<320x32xbf16, #tpu.memory_space<vmem>>, vector<256x32xbf16>
    %c0_45 = arith.constant 0 : index
    %c0_46 = arith.constant 0 : index
    %c0_47 = arith.constant 0 : index
    %85 = vector.load %arg6[%c0_45, %c0_46, %c0_47] : memref<9x32x64xbf16, #tpu.memory_space<vmem>>, vector<1x32x64xbf16>
    %86 = vector.shape_cast %85 : vector<1x32x64xbf16> to vector<32x64xbf16>
    %cst_48 = arith.constant dense<0.000000e+00> : vector<256x64xf32>
    %87 = tpu.matmul %84, %86, %cst_48 {dimension_numbers = #tpu.dot_dimension_numbers<[1], [0], [0], [1], [0, 0, 1, 1], [], []>} : vector<256x32xbf16>, vector<32x64xbf16>, vector<256x64xf32> -> vector<256x64xf32>
    %c31 = arith.constant 31 : index
    %c0_49 = arith.constant 0 : index
    %88 = vector.load %arg17[%c31, %c0_49] : memref<320x32xbf16, #tpu.memory_space<vmem>>, vector<256x32xbf16>
    %c3 = arith.constant 3 : index
    %c0_50 = arith.constant 0 : index
    %c0_51 = arith.constant 0 : index
    %89 = vector.load %arg6[%c3, %c0_50, %c0_51] : memref<9x32x64xbf16, #tpu.memory_space<vmem>>, vector<1x32x64xbf16>
    %90 = vector.shape_cast %89 : vector<1x32x64xbf16> to vector<32x64xbf16>
    %cst_52 = arith.constant dense<0.000000e+00> : vector<256x64xf32>
    %91 = tpu.matmul %88, %90, %cst_52 {dimension_numbers = #tpu.dot_dimension_numbers<[1], [0], [0], [1], [0, 0, 1, 1], [], []>} : vector<256x32xbf16>, vector<32x64xbf16>, vector<256x64xf32> -> vector<256x64xf32>
    %92 = arith.addf %87, %91 : vector<256x64xf32>
    %c47 = arith.constant 47 : index
    %c0_53 = arith.constant 0 : index
    %93 = vector.load %arg17[%c47, %c0_53] : memref<320x32xbf16, #tpu.memory_space<vmem>>, vector<256x32xbf16>
    %c6 = arith.constant 6 : index
    %c0_54 = arith.constant 0 : index
    %c0_55 = arith.constant 0 : index
    %94 = vector.load %arg6[%c6, %c0_54, %c0_55] : memref<9x32x64xbf16, #tpu.memory_space<vmem>>, vector<1x32x64xbf16>
    %95 = vector.shape_cast %94 : vector<1x32x64xbf16> to vector<32x64xbf16>
    %cst_56 = arith.constant dense<0.000000e+00> : vector<256x64xf32>
    %96 = tpu.matmul %93, %95, %cst_56 {dimension_numbers = #tpu.dot_dimension_numbers<[1], [0], [0], [1], [0, 0, 1, 1], [], []>} : vector<256x32xbf16>, vector<32x64xbf16>, vector<256x64xf32> -> vector<256x64xf32>
    %97 = arith.addf %92, %96 : vector<256x64xf32>
    %98 = vector.broadcast %23 : vector<256x1xf32> to vector<256x64xf32>
    %99 = arith.mulf %98, %97 : vector<256x64xf32>
    %100 = arith.addf %83, %99 : vector<256x64xf32>
    %c17 = arith.constant 17 : index
    %c0_57 = arith.constant 0 : index
    %101 = vector.load %arg17[%c17, %c0_57] : memref<320x32xbf16, #tpu.memory_space<vmem>>, vector<256x32xbf16>
    %c2 = arith.constant 2 : index
    %c0_58 = arith.constant 0 : index
    %c0_59 = arith.constant 0 : index
    %102 = vector.load %arg6[%c2, %c0_58, %c0_59] : memref<9x32x64xbf16, #tpu.memory_space<vmem>>, vector<1x32x64xbf16>
    %103 = vector.shape_cast %102 : vector<1x32x64xbf16> to vector<32x64xbf16>
    %cst_60 = arith.constant dense<0.000000e+00> : vector<256x64xf32>
    %104 = tpu.matmul %101, %103, %cst_60 {dimension_numbers = #tpu.dot_dimension_numbers<[1], [0], [0], [1], [0, 0, 1, 1], [], []>} : vector<256x32xbf16>, vector<32x64xbf16>, vector<256x64xf32> -> vector<256x64xf32>
    %c33 = arith.constant 33 : index
    %c0_61 = arith.constant 0 : index
    %105 = vector.load %arg17[%c33, %c0_61] : memref<320x32xbf16, #tpu.memory_space<vmem>>, vector<256x32xbf16>
    %c5 = arith.constant 5 : index
    %c0_62 = arith.constant 0 : index
    %c0_63 = arith.constant 0 : index
    %106 = vector.load %arg6[%c5, %c0_62, %c0_63] : memref<9x32x64xbf16, #tpu.memory_space<vmem>>, vector<1x32x64xbf16>
    %107 = vector.shape_cast %106 : vector<1x32x64xbf16> to vector<32x64xbf16>
    %cst_64 = arith.constant dense<0.000000e+00> : vector<256x64xf32>
    %108 = tpu.matmul %105, %107, %cst_64 {dimension_numbers = #tpu.dot_dimension_numbers<[1], [0], [0], [1], [0, 0, 1, 1], [], []>} : vector<256x32xbf16>, vector<32x64xbf16>, vector<256x64xf32> -> vector<256x64xf32>
    %109 = arith.addf %104, %108 : vector<256x64xf32>
    %c49 = arith.constant 49 : index
    %c0_65 = arith.constant 0 : index
    %110 = vector.load %arg17[%c49, %c0_65] : memref<320x32xbf16, #tpu.memory_space<vmem>>, vector<256x32xbf16>
    %c8 = arith.constant 8 : index
    %c0_66 = arith.constant 0 : index
    %c0_67 = arith.constant 0 : index
    %111 = vector.load %arg6[%c8, %c0_66, %c0_67] : memref<9x32x64xbf16, #tpu.memory_space<vmem>>, vector<1x32x64xbf16>
    %112 = vector.shape_cast %111 : vector<1x32x64xbf16> to vector<32x64xbf16>
    %cst_68 = arith.constant dense<0.000000e+00> : vector<256x64xf32>
    %113 = tpu.matmul %110, %112, %cst_68 {dimension_numbers = #tpu.dot_dimension_numbers<[1], [0], [0], [1], [0, 0, 1, 1], [], []>} : vector<256x32xbf16>, vector<32x64xbf16>, vector<256x64xf32> -> vector<256x64xf32>
    %114 = arith.addf %109, %113 : vector<256x64xf32>
    %115 = vector.broadcast %27 : vector<256x1xf32> to vector<256x64xf32>
    %116 = arith.mulf %115, %114 : vector<256x64xf32>
    %117 = arith.addf %100, %116 : vector<256x64xf32>
    %118 = vector.broadcast %69 : vector<1x64xf32> to vector<256x64xf32>
    %119 = arith.addf %117, %118 : vector<256x64xf32>
    %cst_69 = arith.constant 0.000000e+00 : bf16
    %120 = vector.broadcast %cst_69 : bf16 to vector<32x64xbf16>
    %c0_70 = arith.constant 0 : index
    %c0_71 = arith.constant 0 : index
    %121 = vector.load %arg18[%c0_70, %c0_71] : memref<320x64xbf16, #tpu.memory_space<vmem>>, vector<32x64xbf16>
    tpu.vector_store %arg18[%c0_70, %c0_71], %120 {strides = array<i32>} : memref<320x64xbf16, #tpu.memory_space<vmem>>, vector<32x64xbf16>,
    %cst_72 = arith.constant 0.000000e+00 : bf16
    %122 = vector.broadcast %cst_72 : bf16 to vector<32x64xbf16>
    %c288_73 = arith.constant 288 : index
    %c0_74 = arith.constant 0 : index
    %123 = vector.load %arg18[%c288_73, %c0_74] : memref<320x64xbf16, #tpu.memory_space<vmem>>, vector<32x64xbf16>
    tpu.vector_store %arg18[%c288_73, %c0_74], %122 {strides = array<i32>} : memref<320x64xbf16, #tpu.memory_space<vmem>>, vector<32x64xbf16>,
    %c0_75 = arith.constant 0 : index
    %c0_76 = arith.constant 0 : index
    %124 = vector.load %arg8[%c0_75, %c0_76] : memref<1x64xf32, #tpu.memory_space<vmem>>, vector<1x64xf32>
    %c0_77 = arith.constant 0 : index
    %c0_78 = arith.constant 0 : index
    %125 = vector.load %arg9[%c0_77, %c0_78] : memref<1x64xf32, #tpu.memory_space<vmem>>, vector<1x64xf32>
    %c0_79 = arith.constant 0 : index
    %c0_80 = arith.constant 0 : index
    %126 = vector.load %arg10[%c0_79, %c0_80] : memref<64x32xf32, #tpu.memory_space<vmem>>, vector<64x32xf32>
    %c0_81 = arith.constant 0 : index
    %c0_82 = arith.constant 0 : index
    %127 = vector.load %arg11[%c0_81, %c0_82] : memref<32x64xf32, #tpu.memory_space<vmem>>, vector<32x64xf32>
    %cst_83 = arith.constant dense<0.000000e+00> : vector<64xf32>
    %128 = vector.multi_reduction <add>, %119, %cst_83 [0] : vector<256x64xf32> to vector<64xf32>
    %129 = vector.shape_cast %128 : vector<64xf32> to vector<1x64xf32>
    %130 = arith.mulf %119, %119 : vector<256x64xf32>
    %cst_84 = arith.constant dense<0.000000e+00> : vector<64xf32>
    %131 = vector.multi_reduction <add>, %130, %cst_84 [0] : vector<256x64xf32> to vector<64xf32>
    %132 = vector.shape_cast %131 : vector<64xf32> to vector<1x64xf32>
    %cst_85 = arith.constant dense<0.000000e+00> : vector<1x32xf32>
    %133 = tpu.matmul %129, %126, %cst_85 {dimension_numbers = #tpu.dot_dimension_numbers<[1], [0], [0], [1], [0, 0, 1, 1], [], []>} : vector<1x64xf32>, vector<64x32xf32>, vector<1x32xf32> -> vector<1x32xf32>
    %cst_86 = arith.constant 5.120000e+02 : f32
    %134 = vector.broadcast %cst_86 : f32 to vector<1x32xf32>
    %135 = arith.divf %133, %134 : vector<1x32xf32>
    %cst_87 = arith.constant dense<0.000000e+00> : vector<1x32xf32>
    %136 = tpu.matmul %132, %126, %cst_87 {dimension_numbers = #tpu.dot_dimension_numbers<[1], [0], [0], [1], [0, 0, 1, 1], [], []>} : vector<1x64xf32>, vector<64x32xf32>, vector<1x32xf32> -> vector<1x32xf32>
    %cst_88 = arith.constant 5.120000e+02 : f32
    %137 = vector.broadcast %cst_88 : f32 to vector<1x32xf32>
    %138 = arith.divf %136, %137 : vector<1x32xf32>
    %139 = arith.mulf %135, %135 : vector<1x32xf32>
    %140 = arith.subf %138, %139 : vector<1x32xf32>
    %cst_89 = arith.constant 9.99999997E-7 : f32
    %141 = vector.broadcast %cst_89 : f32 to vector<1x32xf32>
    %142 = arith.addf %140, %141 : vector<1x32xf32>
    %143 = math.rsqrt %142 : vector<1x32xf32>
    %cst_90 = arith.constant dense<0.000000e+00> : vector<1x64xf32>
    %144 = tpu.matmul %135, %127, %cst_90 {dimension_numbers = #tpu.dot_dimension_numbers<[1], [0], [0], [1], [0, 0, 1, 1], [], []>} : vector<1x32xf32>, vector<32x64xf32>, vector<1x64xf32> -> vector<1x64xf32>
    %cst_91 = arith.constant dense<0.000000e+00> : vector<1x64xf32>
    %145 = tpu.matmul %143, %127, %cst_91 {dimension_numbers = #tpu.dot_dimension_numbers<[1], [0], [0], [1], [0, 0, 1, 1], [], []>} : vector<1x32xf32>, vector<32x64xf32>, vector<1x64xf32> -> vector<1x64xf32>
    %146 = arith.mulf %145, %124 : vector<1x64xf32>
    %147 = arith.mulf %144, %146 : vector<1x64xf32>
    %148 = arith.subf %125, %147 : vector<1x64xf32>
    %149 = vector.broadcast %146 : vector<1x64xf32> to vector<256x64xf32>
    %150 = arith.mulf %119, %149 : vector<256x64xf32>
    %151 = vector.broadcast %148 : vector<1x64xf32> to vector<256x64xf32>
    %152 = arith.addf %150, %151 : vector<256x64xf32>
    %153 = arith.negf %152 : vector<256x64xf32>
    %154 = math.exp %153 : vector<256x64xf32>
    %cst_92 = arith.constant 1.000000e+00 : f32
    %155 = vector.broadcast %cst_92 : f32 to vector<256x64xf32>
    %156 = arith.addf %155, %154 : vector<256x64xf32>
    %157 = arith.divf %155, %156 : vector<256x64xf32>
    %158 = arith.mulf %152, %157 : vector<256x64xf32>
    %159 = arith.truncf %158 : vector<256x64xf32> to vector<256x64xbf16>
    %c32_93 = arith.constant 32 : index
    %c0_94 = arith.constant 0 : index
    %160 = vector.load %arg18[%c32_93, %c0_94] : memref<320x64xbf16, #tpu.memory_space<vmem>>, vector<256x64xbf16>
    tpu.vector_store %arg18[%c32_93, %c0_94], %159 {strides = array<i32>} : memref<320x64xbf16, #tpu.memory_space<vmem>>, vector<256x64xbf16>,
    %c0_95 = arith.constant 0 : index
    %c0_96 = arith.constant 0 : index
    %161 = vector.load %arg13[%c0_95, %c0_96] : memref<1x64xf32, #tpu.memory_space<vmem>>, vector<1x64xf32>
    %c16_97 = arith.constant 16 : index
    %c0_98 = arith.constant 0 : index
    %162 = vector.load %arg18[%c16_97, %c0_98] : memref<320x64xbf16, #tpu.memory_space<vmem>>, vector<256x64xbf16>
    %c1_99 = arith.constant 1 : index
    %c0_100 = arith.constant 0 : index
    %c0_101 = arith.constant 0 : index
    %163 = vector.load %arg12[%c1_99, %c0_100, %c0_101] : memref<9x64x64xbf16, #tpu.memory_space<vmem>>, vector<1x64x64xbf16>
    %164 = vector.shape_cast %163 : vector<1x64x64xbf16> to vector<64x64xbf16>
    %cst_102 = arith.constant dense<0.000000e+00> : vector<256x64xf32>
    %165 = tpu.matmul %162, %164, %cst_102 {dimension_numbers = #tpu.dot_dimension_numbers<[1], [0], [0], [1], [0, 0, 1, 1], [], []>} : vector<256x64xbf16>, vector<64x64xbf16>, vector<256x64xf32> -> vector<256x64xf32>
    %c32_103 = arith.constant 32 : index
    %c0_104 = arith.constant 0 : index
    %166 = vector.load %arg18[%c32_103, %c0_104] : memref<320x64xbf16, #tpu.memory_space<vmem>>, vector<256x64xbf16>
    %c4_105 = arith.constant 4 : index
    %c0_106 = arith.constant 0 : index
    %c0_107 = arith.constant 0 : index
    %167 = vector.load %arg12[%c4_105, %c0_106, %c0_107] : memref<9x64x64xbf16, #tpu.memory_space<vmem>>, vector<1x64x64xbf16>
    %168 = vector.shape_cast %167 : vector<1x64x64xbf16> to vector<64x64xbf16>
    %cst_108 = arith.constant dense<0.000000e+00> : vector<256x64xf32>
    %169 = tpu.matmul %166, %168, %cst_108 {dimension_numbers = #tpu.dot_dimension_numbers<[1], [0], [0], [1], [0, 0, 1, 1], [], []>} : vector<256x64xbf16>, vector<64x64xbf16>, vector<256x64xf32> -> vector<256x64xf32>
    %170 = arith.addf %165, %169 : vector<256x64xf32>
    %c48_109 = arith.constant 48 : index
    %c0_110 = arith.constant 0 : index
    %171 = vector.load %arg18[%c48_109, %c0_110] : memref<320x64xbf16, #tpu.memory_space<vmem>>, vector<256x64xbf16>
    %c7_111 = arith.constant 7 : index
    %c0_112 = arith.constant 0 : index
    %c0_113 = arith.constant 0 : index
    %172 = vector.load %arg12[%c7_111, %c0_112, %c0_113] : memref<9x64x64xbf16, #tpu.memory_space<vmem>>, vector<1x64x64xbf16>
    %173 = vector.shape_cast %172 : vector<1x64x64xbf16> to vector<64x64xbf16>
    %cst_114 = arith.constant dense<0.000000e+00> : vector<256x64xf32>
    %174 = tpu.matmul %171, %173, %cst_114 {dimension_numbers = #tpu.dot_dimension_numbers<[1], [0], [0], [1], [0, 0, 1, 1], [], []>} : vector<256x64xbf16>, vector<64x64xbf16>, vector<256x64xf32> -> vector<256x64xf32>
    %175 = arith.addf %170, %174 : vector<256x64xf32>
    %c15_115 = arith.constant 15 : index
    %c0_116 = arith.constant 0 : index
    %176 = vector.load %arg18[%c15_115, %c0_116] : memref<320x64xbf16, #tpu.memory_space<vmem>>, vector<256x64xbf16>
    %c0_117 = arith.constant 0 : index
    %c0_118 = arith.constant 0 : index
    %c0_119 = arith.constant 0 : index
    %177 = vector.load %arg12[%c0_117, %c0_118, %c0_119] : memref<9x64x64xbf16, #tpu.memory_space<vmem>>, vector<1x64x64xbf16>
    %178 = vector.shape_cast %177 : vector<1x64x64xbf16> to vector<64x64xbf16>
    %cst_120 = arith.constant dense<0.000000e+00> : vector<256x64xf32>
    %179 = tpu.matmul %176, %178, %cst_120 {dimension_numbers = #tpu.dot_dimension_numbers<[1], [0], [0], [1], [0, 0, 1, 1], [], []>} : vector<256x64xbf16>, vector<64x64xbf16>, vector<256x64xf32> -> vector<256x64xf32>
    %c31_121 = arith.constant 31 : index
    %c0_122 = arith.constant 0 : index
    %180 = vector.load %arg18[%c31_121, %c0_122] : memref<320x64xbf16, #tpu.memory_space<vmem>>, vector<256x64xbf16>
    %c3_123 = arith.constant 3 : index
    %c0_124 = arith.constant 0 : index
    %c0_125 = arith.constant 0 : index
    %181 = vector.load %arg12[%c3_123, %c0_124, %c0_125] : memref<9x64x64xbf16, #tpu.memory_space<vmem>>, vector<1x64x64xbf16>
    %182 = vector.shape_cast %181 : vector<1x64x64xbf16> to vector<64x64xbf16>
    %cst_126 = arith.constant dense<0.000000e+00> : vector<256x64xf32>
    %183 = tpu.matmul %180, %182, %cst_126 {dimension_numbers = #tpu.dot_dimension_numbers<[1], [0], [0], [1], [0, 0, 1, 1], [], []>} : vector<256x64xbf16>, vector<64x64xbf16>, vector<256x64xf32> -> vector<256x64xf32>
    %184 = arith.addf %179, %183 : vector<256x64xf32>
    %c47_127 = arith.constant 47 : index
    %c0_128 = arith.constant 0 : index
    %185 = vector.load %arg18[%c47_127, %c0_128] : memref<320x64xbf16, #tpu.memory_space<vmem>>, vector<256x64xbf16>
    %c6_129 = arith.constant 6 : index
    %c0_130 = arith.constant 0 : index
    %c0_131 = arith.constant 0 : index
    %186 = vector.load %arg12[%c6_129, %c0_130, %c0_131] : memref<9x64x64xbf16, #tpu.memory_space<vmem>>, vector<1x64x64xbf16>
    %187 = vector.shape_cast %186 : vector<1x64x64xbf16> to vector<64x64xbf16>
    %cst_132 = arith.constant dense<0.000000e+00> : vector<256x64xf32>
    %188 = tpu.matmul %185, %187, %cst_132 {dimension_numbers = #tpu.dot_dimension_numbers<[1], [0], [0], [1], [0, 0, 1, 1], [], []>} : vector<256x64xbf16>, vector<64x64xbf16>, vector<256x64xf32> -> vector<256x64xf32>
    %189 = arith.addf %184, %188 : vector<256x64xf32>
    %190 = vector.broadcast %23 : vector<256x1xf32> to vector<256x64xf32>
    %191 = arith.mulf %190, %189 : vector<256x64xf32>
    %192 = arith.addf %175, %191 : vector<256x64xf32>
    %c17_133 = arith.constant 17 : index
    %c0_134 = arith.constant 0 : index
    %193 = vector.load %arg18[%c17_133, %c0_134] : memref<320x64xbf16, #tpu.memory_space<vmem>>, vector<256x64xbf16>
    %c2_135 = arith.constant 2 : index
    %c0_136 = arith.constant 0 : index
    %c0_137 = arith.constant 0 : index
    %194 = vector.load %arg12[%c2_135, %c0_136, %c0_137] : memref<9x64x64xbf16, #tpu.memory_space<vmem>>, vector<1x64x64xbf16>
    %195 = vector.shape_cast %194 : vector<1x64x64xbf16> to vector<64x64xbf16>
    %cst_138 = arith.constant dense<0.000000e+00> : vector<256x64xf32>
    %196 = tpu.matmul %193, %195, %cst_138 {dimension_numbers = #tpu.dot_dimension_numbers<[1], [0], [0], [1], [0, 0, 1, 1], [], []>} : vector<256x64xbf16>, vector<64x64xbf16>, vector<256x64xf32> -> vector<256x64xf32>
    %c33_139 = arith.constant 33 : index
    %c0_140 = arith.constant 0 : index
    %197 = vector.load %arg18[%c33_139, %c0_140] : memref<320x64xbf16, #tpu.memory_space<vmem>>, vector<256x64xbf16>
    %c5_141 = arith.constant 5 : index
    %c0_142 = arith.constant 0 : index
    %c0_143 = arith.constant 0 : index
    %198 = vector.load %arg12[%c5_141, %c0_142, %c0_143] : memref<9x64x64xbf16, #tpu.memory_space<vmem>>, vector<1x64x64xbf16>
    %199 = vector.shape_cast %198 : vector<1x64x64xbf16> to vector<64x64xbf16>
    %cst_144 = arith.constant dense<0.000000e+00> : vector<256x64xf32>
    %200 = tpu.matmul %197, %199, %cst_144 {dimension_numbers = #tpu.dot_dimension_numbers<[1], [0], [0], [1], [0, 0, 1, 1], [], []>} : vector<256x64xbf16>, vector<64x64xbf16>, vector<256x64xf32> -> vector<256x64xf32>
    %201 = arith.addf %196, %200 : vector<256x64xf32>
    %c49_145 = arith.constant 49 : index
    %c0_146 = arith.constant 0 : index
    %202 = vector.load %arg18[%c49_145, %c0_146] : memref<320x64xbf16, #tpu.memory_space<vmem>>, vector<256x64xbf16>
    %c8_147 = arith.constant 8 : index
    %c0_148 = arith.constant 0 : index
    %c0_149 = arith.constant 0 : index
    %203 = vector.load %arg12[%c8_147, %c0_148, %c0_149] : memref<9x64x64xbf16, #tpu.memory_space<vmem>>, vector<1x64x64xbf16>
    %204 = vector.shape_cast %203 : vector<1x64x64xbf16> to vector<64x64xbf16>
    %cst_150 = arith.constant dense<0.000000e+00> : vector<256x64xf32>
    %205 = tpu.matmul %202, %204, %cst_150 {dimension_numbers = #tpu.dot_dimension_numbers<[1], [0], [0], [1], [0, 0, 1, 1], [], []>} : vector<256x64xbf16>, vector<64x64xbf16>, vector<256x64xf32> -> vector<256x64xf32>
    %206 = arith.addf %201, %205 : vector<256x64xf32>
    %207 = vector.broadcast %27 : vector<256x1xf32> to vector<256x64xf32>
    %208 = arith.mulf %207, %206 : vector<256x64xf32>
    %209 = arith.addf %192, %208 : vector<256x64xf32>
    %210 = vector.broadcast %161 : vector<1x64xf32> to vector<256x64xf32>
    %211 = arith.addf %209, %210 : vector<256x64xf32>
    %c0_151 = arith.constant 0 : index
    %c0_152 = arith.constant 0 : index
    %212 = vector.load %arg14[%c0_151, %c0_152] : memref<32x64xbf16, #tpu.memory_space<vmem>>, vector<32x64xbf16>
    %cst_153 = arith.constant dense<0.000000e+00> : vector<256x64xf32>
    %213 = tpu.matmul %1, %212, %cst_153 {dimension_numbers = #tpu.dot_dimension_numbers<[1], [0], [0], [1], [0, 0, 1, 1], [], []>} : vector<256x32xbf16>, vector<32x64xbf16>, vector<256x64xf32> -> vector<256x64xf32>
    %c0_154 = arith.constant 0 : index
    %c0_155 = arith.constant 0 : index
    %214 = vector.load %arg15[%c0_154, %c0_155] : memref<1x64xf32, #tpu.memory_space<vmem>>, vector<1x64xf32>
    %215 = vector.broadcast %214 : vector<1x64xf32> to vector<256x64xf32>
    %216 = arith.addf %213, %215 : vector<256x64xf32>
    %217 = arith.addf %216, %211 : vector<256x64xf32>
    %218 = arith.truncf %217 : vector<256x64xf32> to vector<256x64xbf16>
    %c0_156 = arith.constant 0 : index
    %c0_157 = arith.constant 0 : index
    %c0_158 = arith.constant 0 : index
    %219 = vector.load %arg16[%c0_156, %c0_157, %c0_158] : memref<1x256x64xbf16, #tpu.memory_space<vmem>>, vector<1x256x64xbf16>
    %220 = vector.shape_cast %219 : vector<1x256x64xbf16> to vector<256x64xbf16>
    %221 = vector.shape_cast %218 : vector<256x64xbf16> to vector<1x256x64xbf16>
    tpu.vector_store %arg16[%c0_156, %c0_157, %c0_158], %221 {strides = array<i32>} : memref<1x256x64xbf16, #tpu.memory_space<vmem>>, vector<1x256x64xbf16>,
    return
  }
  func.func @transform_0(%arg0: i32) -> (i32, i32, i32) {
    %c0_i32 = arith.constant 0 : i32
    %c0_i32_0 = arith.constant 0 : i32
    %c0_i32_1 = arith.constant 0 : i32
    return %arg0, %c0_i32, %c0_i32_0 : i32, i32, i32
  }
  func.func @transform_1(%arg0: i32) -> (i32, i32) {
    %c0_i32 = arith.constant 0 : i32
    %c0_i32_0 = arith.constant 0 : i32
    %c0_i32_1 = arith.constant 0 : i32
    return %c0_i32, %c0_i32_0 : i32, i32
  }
  func.func @transform_2(%arg0: i32) -> (i32, i32) {
    %c0_i32 = arith.constant 0 : i32
    %c0_i32_0 = arith.constant 0 : i32
    %c0_i32_1 = arith.constant 0 : i32
    return %c0_i32, %c0_i32_0 : i32, i32
  }
  func.func @transform_3(%arg0: i32) -> (i32, i32) {
    %c0_i32 = arith.constant 0 : i32
    %c0_i32_0 = arith.constant 0 : i32
    %c0_i32_1 = arith.constant 0 : i32
    return %c0_i32, %c0_i32_0 : i32, i32
  }
  func.func @transform_4(%arg0: i32) -> (i32, i32) {
    %c0_i32 = arith.constant 0 : i32
    %c0_i32_0 = arith.constant 0 : i32
    %c0_i32_1 = arith.constant 0 : i32
    return %c0_i32, %c0_i32_0 : i32, i32
  }
  func.func @transform_5(%arg0: i32) -> (i32, i32, i32) {
    %c0_i32 = arith.constant 0 : i32
    %c0_i32_0 = arith.constant 0 : i32
    %c0_i32_1 = arith.constant 0 : i32
    %c0_i32_2 = arith.constant 0 : i32
    return %c0_i32, %c0_i32_0, %c0_i32_1 : i32, i32, i32
  }
  func.func @transform_6(%arg0: i32) -> (i32, i32) {
    %c0_i32 = arith.constant 0 : i32
    %c0_i32_0 = arith.constant 0 : i32
    %c0_i32_1 = arith.constant 0 : i32
    return %c0_i32, %c0_i32_0 : i32, i32
  }
  func.func @transform_7(%arg0: i32) -> (i32, i32) {
    %c0_i32 = arith.constant 0 : i32
    %c0_i32_0 = arith.constant 0 : i32
    %c0_i32_1 = arith.constant 0 : i32
    return %c0_i32, %c0_i32_0 : i32, i32
  }
  func.func @transform_8(%arg0: i32) -> (i32, i32) {
    %c0_i32 = arith.constant 0 : i32
    %c0_i32_0 = arith.constant 0 : i32
    %c0_i32_1 = arith.constant 0 : i32
    return %c0_i32, %c0_i32_0 : i32, i32
  }
  func.func @transform_9(%arg0: i32) -> (i32, i32) {
    %c0_i32 = arith.constant 0 : i32
    %c0_i32_0 = arith.constant 0 : i32
    %c0_i32_1 = arith.constant 0 : i32
    return %c0_i32, %c0_i32_0 : i32, i32
  }
  func.func @transform_10(%arg0: i32) -> (i32, i32) {
    %c0_i32 = arith.constant 0 : i32
    %c0_i32_0 = arith.constant 0 : i32
    %c0_i32_1 = arith.constant 0 : i32
    return %c0_i32, %c0_i32_0 : i32, i32
  }
  func.func @transform_11(%arg0: i32) -> (i32, i32, i32) {
    %c0_i32 = arith.constant 0 : i32
    %c0_i32_0 = arith.constant 0 : i32
    %c0_i32_1 = arith.constant 0 : i32
    %c0_i32_2 = arith.constant 0 : i32
    return %c0_i32, %c0_i32_0, %c0_i32_1 : i32, i32, i32
  }
  func.func @transform_12(%arg0: i32) -> (i32, i32) {
    %c0_i32 = arith.constant 0 : i32
    %c0_i32_0 = arith.constant 0 : i32
    %c0_i32_1 = arith.constant 0 : i32
    return %c0_i32, %c0_i32_0 : i32, i32
  }
  func.func @transform_13(%arg0: i32) -> (i32, i32) {
    %c0_i32 = arith.constant 0 : i32
    %c0_i32_0 = arith.constant 0 : i32
    %c0_i32_1 = arith.constant 0 : i32
    return %c0_i32, %c0_i32_0 : i32, i32
  }
  func.func @transform_14(%arg0: i32) -> (i32, i32) {
    %c0_i32 = arith.constant 0 : i32
    %c0_i32_0 = arith.constant 0 : i32
    %c0_i32_1 = arith.constant 0 : i32
    return %c0_i32, %c0_i32_0 : i32, i32
  }
  func.func @transform_15(%arg0: i32) -> (i32, i32, i32) {
    %c0_i32 = arith.constant 0 : i32
    %c0_i32_0 = arith.constant 0 : i32
    %c0_i32_1 = arith.constant 0 : i32
    return %arg0, %c0_i32, %c0_i32_0 : i32, i32, i32
  }
}

</mosaic_0001>

<bundles_post_ra>
// kernel: resnet_block_forward.1
= control target key start
LH: loop header
LB: loop body
LE: loop exit
PB: predicated region body
PF: predicated region fallthrough
CT: control target
= control target key end

     0   :  { %s17701_s0 = inlined_call_operand.vmem [shape: bf16[2,256,32], index: 0, kind: input, shape index: {}]   ;;  %s17702_s1 = inlined_call_operand.vmem [shape: f32[1,32], index: 1, kind: input, shape index: {}]   ;;  %s17703_s2 = inlined_call_operand.vmem [shape: f32[1,32], index: 2, kind: input, shape index: {}]   ;;  %s17704_s3 = inlined_call_operand.vmem [shape: f32[32,32], index: 3, kind: input, shape index: {}]   ;;  %s17705_s4 = inlined_call_operand.vmem [shape: f32[32,32], index: 4, kind: input, shape index: {}]   ;;  %s17706_s5 = inlined_call_operand.vmem [shape: bf16[9,32,64], index: 5, kind: input, shape index: {}]   ;;  %s17707_s6 = inlined_call_operand.vmem [shape: f32[1,64], index: 6, kind: input, shape index: {}]   ;;  %s17708_s7 = inlined_call_operand.vmem [shape: f32[1,64], index: 7, kind: input, shape index: {}]   ;;  %s17709_s8 = inlined_call_operand.vmem [shape: f32[1,64], index: 8, kind: input, shape index: {}]   ;;  %s17710_s9 = inlined_call_operand.vmem [shape: f32[64,32], index: 9, kind: input, shape index: {}]   ;;  %s17711_s10 = inlined_call_operand.vmem [shape: f32[32,64], index: 10, kind: input, shape index: {}]   ;;  %s17712_s11 = inlined_call_operand.vmem [shape: bf16[9,64,64], index: 11, kind: input, shape index: {}]   ;;  %s17713_s12 = inlined_call_operand.vmem [shape: f32[1,64], index: 12, kind: input, shape index: {}]   ;;  %s17714_s13 = inlined_call_operand.vmem [shape: bf16[32,64], index: 13, kind: input, shape index: {}]   ;;  %s17715_s14 = inlined_call_operand.vmem [shape: f32[1,64], index: 14, kind: input, shape index: {}]   ;;  %s17716_s15 = inlined_call_operand.hbm [shape: bf16[2,256,64], index: 15, kind: output, shape index: {}]  }
   0x1   :  { %17767 = sst [smem:[#allocation97_spill]] %s17701_s0 }
   0x2   :  { %17768 = sst [smem:[#allocation98_spill]] %s17702_s1 }
   0x3   :  { %17769 = sst [smem:[#allocation99_spill]] %s17703_s2 }
   0x4   :  { %17770 = sst [smem:[#allocation100_spill]] %s17704_s3 }
   0x5   :  { %20 = vsyncpa [#allocation5], 0 }
   0x6   :  { %22 = vsyncpa [#allocation5 + $0x1], 0  ;;  %s13369_s18 = smov 0   ;;  %s13371_s19 = smov 0  }
   0x7   :  { %s13373_s20 = smov 0   ;;  %s13375_s21 = smov 0  }
   0x8 LB: > { %s13390_s22 = sadd.s32 4294967295, %s13281_s21   ;;  %s10393_s23 = sadd.s32 4294967294, %s13281_s21   ;;  %s13281_s21 = sphi %s13375_s21, %s18190_s21   ;;  %s13277_s20 = sphi %s13373_s20, %s18189_s20   ;;  %s13273_s19 = sphi %s13371_s19, %s18188_s19   ;;  %s13269_s18 = sphi %s13369_s18, %s18187_s18  }
   0x9   : > { %s13394_s24 = sadd.s32 1, %s13281_s21   ;;  %s355_s25 = sadd.s32 1, %s13277_s20 }
   0xa   : > { %s352_s26 = ssub.s32 %s13281_s21, %s13394_s24  ;;  %p365_p0 = scmp.ne.s32.totalorder %s13277_s20, %s13273_s19 }
   0xb   : > { %p353_p1 = scmp.eq.s32.totalorder %s352_s26, 0  ;;  %p366_p2 = scmp.eq.s32.totalorder %s13390_s22, 1 }
   0xc   : > { %p371_p3 = scmp.ne.s32.totalorder %s13273_s19, %s13269_s18  ;;  %p372_p4 = scmp.eq.s32.totalorder %s10393_s23, 1 }
   0xd   : > { %s13405_s27 = scalar_select %p353_p1, %s13277_s20, %s355_s25  }
   0xe   : > { %p13407_p5 = por %p366_p2, %p365_p0  ;;  %p13411_p6 = por %p372_p4, %p371_p3 }
   0xf   : > { %17771 = sst [smem:[#allocation7_spill]] %s13405_s27  ;;  %p10396_p7 = scmp.ge.s32.totalorder %s13281_s21, 1 }
  0x10   : > { %p440_p8 = scmp.lt.s32.totalorder %s13281_s21, 3 }
  0x12   : > { %p441_p9 = pnand %p10396_p7, %p440_p8 }
  0x14   : > { %444 = sbr.rel (%p441_p9) target bundleno = 2189 (0x88d), region = 80 }
  0x19   : > { %s17774_s3 = sld [smem:[#allocation100_spill]]  ;;  %p488_p10 = scmp.lt.s32.totalorder %s13390_s22, 1  ;;  %v17717_v1 = vmov 0.0   ;;  %vm13284_vm0 = vmmov 0   ;;  %v13439_v4 = vld [vmem:[%s17705_s4 + $0x18] sm:$0xff]  ;;  %v13447_v5 = vld [vmem:[%s17705_s4 + $0x10] sm:$0xff] }
  0x1a   : > { %11798 = vmatprep.subr.mxu1 %v17717_v1  ;;  %11806 = vmatprep.mubr.msk.f32.mxu1 %vm13284_vm0, %v17717_v1  ;;  %s17775_s0 = sld [smem:[#allocation97_spill]]  ;;  %vm1186_vm1 = vcmask 261120   ;;  %vm1167_vm2 = vcmask 257024   ;;  %vm5417_vm3 = vcmask 519168   ;;  %vm3044_vm4 = vsmask.f32 4352 }
  0x1b   : > { %s489_s27 = scalar_select %p488_p10, %s13390_s22, 1  ;;  %11820 = vmatprep.subr.mxu0 %v17717_v1  ;;  %11828 = vmatprep.mubr.msk.f32.mxu0 %vm13284_vm0, %v17717_v1  ;;  %vm4255_vm5 = vsmask.f32 7424 }
  0x1c   : > { %11821 = vmatpush3.msra.mxu0 %v13439_v4  ;;  %s17778_s1 = sld [smem:[#allocation98_spill]]  ;;  %s485_s17 = sand.u32 1, %s13273_s19  }
  0x1d   : > { %s11292_s30 = sshll.u32 %s489_s27, 7  ;;  %11822 = vmatprep.subr.mxu0 %v17717_v1  ;;  %s17780_s2 = sld [smem:[#allocation99_spill]] }
  0x1e   : > { %11823 = vmatpush3.msra.mxu0 %v13447_v5  ;;  %s10397_s26 = sshll.u32 %s485_s17, 7 }
  0x1f   : > { %v13420_v0 = vld [vmem:[%s17774_s3 + $0x18] sm:$0xff]  ;;  %v13427_v2 = vld [vmem:[%s17774_s3 + $0x10] sm:$0xff]  ;;  %v13432_v3 = vld [vmem:[%s17774_s3 + $0x8] sm:$0xff]  ;;  %11824 = vmatprep.subr.mxu0 %v17717_v1 }
  0x20   : > { %11799 = vmatpush3.msra.mxu1 %v13420_v0  ;;  %v13455_v6 = vld [vmem:[%s17774_s3] sm:$0xff]  ;;  %s13462_s23 = scalar_lea.vmem %s17775_s0, %s11292_s30  ;;  %s17432_s30 = scalar_lea.vmem [#allocation4], %s10397_s26 }
  0x21   : > { %11800 = vmatprep.subr.mxu1 %v17717_v1  ;;  %v494_v7 = vld [vmem:[%s13462_s23] sm:$0xff]   ;;  %v496_v8 = vld [vmem:[%s13462_s23 + $0x8] sm:$0xff]   ;;  %v498_v9 = vld [vmem:[%s13462_s23 + $0x10] sm:$0xff]   ;;  %s11389_s0 = sshll.u32 %s13390_s22, 11  ;;  %s10331_s3 = sshll.u32 %s17432_s30, 4  ;;  %s17655_s3 = int_to_ptr.vmem [resolvable:$true] %s10331_s3 }
  0x22   : > { %11801 = vmatpush3.msra.mxu1 %v13427_v2  ;;  %v13475_v10 = vunpack.c.l.bf16 %v494_v7  ;;  %v13477_v11 = vunpack.c.h.bf16 %v494_v7  ;;  %v13479_v12 = vunpack.c.l.bf16 %v496_v8  ;;  %v500_v13 = vld [vmem:[%s13462_s23 + $0x18] sm:$0xff]   ;;  %v13482_v14 = vunpack.c.h.bf16 %v496_v8  ;;  %v502_v15 = vld [vmem:[%s13462_s23 + $0x20] sm:$0xff]   ;;  %v504_v20 = vld [vmem:[%s13462_s23 + $0x28] sm:$0xff]   ;;  %s17653_s27 = scalar_lea.hbm %s17716_s15, %s11389_s0  ;;  %s17661_s22 = scalar_lea.sflag [#allocation5], %s485_s17 }
  0x23   : > { %11802 = vmatprep.subr.mxu1 %v17717_v1  ;;  %v13485_v16 = vunpack.c.l.bf16 %v498_v9  ;;  %v506_v21 = vld [vmem:[%s13462_s23 + $0x30] sm:$0xff]   ;;  %v13495_v23 = vunpack.c.h.bf16 %v498_v9  ;;  %v13497_v24 = vunpack.c.l.bf16 %v500_v13  ;;  %v13501_v26 = vunpack.c.h.bf16 %v500_v13  ;;  %v508_v45 = vld [vmem:[%s13462_s23 + $0x38] sm:$0xff]   ;;  %v510_v46 = vld [vmem:[%s13462_s23 + $0x40] sm:$0xff]   ;;  %s13221_s25 = scalar_lea.vmem %s17655_s3, 2048  ;;  %s13286_s26 = smov [#allocation4]  }
  0x24   : > { %11803 = vmatpush3.msra.mxu1 %v13432_v3  ;;  %v1187_v17 = vsel %vm1186_vm1, %v13475_v10, 0.0  ;;  %v1188_v18 = vsel %vm1186_vm1, %v13477_v11, 0.0  ;;  %v1190_v19 = vsel %vm1186_vm1, %v13479_v12, 0.0  ;;  %v1192_v25 = vsel %vm1186_vm1, %v13482_v14, 0.0  ;;  %v512_v47 = vld [vmem:[%s13462_s23 + $0x48] sm:$0xff]   ;;  %v514_v49 = vld [vmem:[%s13462_s23 + $0x50] sm:$0xff]   ;;  %p13222_p11 = scmp.ne.s32.totalorder %s17655_s3, %s13221_s25 }
  0x25   : > { %11804 = vmatprep.subr.mxu1 %v17717_v1  ;;  %v1189_v22 = vadd.f32 %v1188_v18, %v1187_v17  ;;  %v13503_v27 = vunpack.c.l.bf16 %v502_v15  ;;  %v13505_v28 = vunpack.c.h.bf16 %v502_v15  ;;  %v13507_v30 = vunpack.c.l.bf16 %v504_v20  ;;  %v13536_v50 = vld [vmem:[%s13462_s23 + $0x58] sm:$0xff]  }
  0x26   : > { %11805 = vmatpush3.msra.mxu1 %v13455_v6  ;;  %v13509_v31 = vunpack.c.h.bf16 %v504_v20  ;;  %v13511_v32 = vunpack.c.l.bf16 %v506_v21  ;;  %v1194_v33 = vsel %vm1186_vm1, %v13485_v16, 0.0  ;;  %v1196_v35 = vsel %vm1186_vm1, %v13495_v23, 0.0  ;;  %p13223_p12 = pnand %p13222_p11, %p13407_p5 }
  0x27   : > { %11809 = vmatprep.subr.mxu1 %v17717_v1  ;;  %v1191_v29 = vadd.f32 %v1190_v19, %v1189_v22  ;;  %v1198_v37 = vsel %vm1186_vm1, %v13497_v24, 0.0  ;;  %v1200_v38 = vsel %vm1186_vm1, %v13501_v26, 0.0  ;;  %v1202_v39 = vsel %vm1186_vm1, %v13503_v27, 0.0 }
  0x28   : > { %v1204_v40 = vsel %vm1186_vm1, %v13505_v28, 0.0  ;;  %v1206_v41 = vsel %vm1186_vm1, %v13507_v30, 0.0  ;;  %v1208_v42 = vsel %vm1186_vm1, %v13509_v31, 0.0  ;;  %v1210_v43 = vsel %vm1186_vm1, %v13511_v32, 0.0  ;;  %p13224_p13 = pneg %p13223_p12 }
  0x29   : > { %v1193_v34 = vadd.f32 %v1192_v25, %v1191_v29  ;;  %v13538_v52 = vunpack.c.h.bf16 %v506_v21  ;;  %v1256_v53 = vmul.f32 %v13475_v10, %v13475_v10  ;;  %v1257_v54 = vmul.f32 %v13477_v11, %v13477_v11 }
  0x2a   : > { %v1258_v55 = vmul.f32 %v13479_v12, %v13479_v12  ;;  %v13546_v56 = vunpack.c.l.bf16 %v508_v45  ;;  %v13548_v57 = vunpack.c.h.bf16 %v508_v45  ;;  %v13550_v58 = vunpack.c.l.bf16 %v510_v46 }
  0x2b   : > { %v1195_v36 = vadd.f32 %v1194_v33, %v1193_v34  ;;  %v13552_v60 = vunpack.c.h.bf16 %v510_v46  ;;  %v13554_v61 = vunpack.c.l.bf16 %v512_v47  ;;  %v13556_v62 = vunpack.c.h.bf16 %v512_v47 }
  0x2c   : > { %v1259_v63 = vmul.f32 %v13482_v14, %v13482_v14  ;;  %v13560_v7 = vunpack.c.l.bf16 %v514_v49  ;;  %v13562_v8 = vunpack.c.h.bf16 %v514_v49  ;;  %v13565_v9 = vunpack.c.l.bf16 %v13536_v50 }
  0x2d   : > { %v1197_v44 = vadd.f32 %v1196_v35, %v1195_v36  ;;  %v1260_v15 = vmul.f32 %v13485_v16, %v13485_v16  ;;  %v1288_v17 = vsel %vm1186_vm1, %v1256_v53, 0.0  ;;  %v1289_v18 = vsel %vm1186_vm1, %v1257_v54, 0.0 }
  0x2e   : > { %v1291_v19 = vsel %vm1186_vm1, %v1258_v55, 0.0  ;;  %v1212_v21 = vsel %vm1186_vm1, %v13538_v52, 0.0  ;;  %v1214_v22 = vsel %vm1186_vm1, %v13546_v56, 0.0  ;;  %v1290_v25 = vadd.f32 %v1289_v18, %v1288_v17 }
  0x2f   : > { %v1199_v48 = vadd.f32 %v1198_v37, %v1197_v44  ;;  %v1216_v29 = vsel %vm1186_vm1, %v13548_v57, 0.0  ;;  %v1218_v33 = vsel %vm1186_vm1, %v13550_v58, 0.0  ;;  %v1261_v34 = vmul.f32 %v13495_v23, %v13495_v23 }
  0x30   : > { %v1293_v35 = vsel %vm1186_vm1, %v1259_v63, 0.0  ;;  %v1220_v37 = vsel %vm1186_vm1, %v13552_v60, 0.0  ;;  %v1264_v44 = vmul.f32 %v13503_v27, %v13503_v27  ;;  %v1295_v45 = vsel %vm1186_vm1, %v1260_v15, 0.0 }
  0x31   : > { %v1201_v51 = vadd.f32 %v1200_v38, %v1199_v48  ;;  %v1222_v38 = vsel %vm1186_vm1, %v13554_v61, 0.0  ;;  %v1266_v47 = vmul.f32 %v13507_v30, %v13507_v30  ;;  %v1267_v49 = vmul.f32 %v13509_v31, %v13509_v31 }
  0x32   : > { %v1269_v53 = vmul.f32 %v13538_v52, %v13538_v52  ;;  %v1297_v54 = vsel %vm1186_vm1, %v1261_v34, 0.0  ;;  %v1230_v15 = vsel %vm1186_vm1, %v13565_v9, 0.0 }
  0x33   : > { %v1203_v59 = vadd.f32 %v1202_v39, %v1201_v51  ;;  %v1292_v39 = vadd.f32 %v1291_v19, %v1290_v25  ;;  %v1268_v51 = vmul.f32 %v13511_v32, %v13511_v32  ;;  %v1307_v34 = vsel %vm1186_vm1, %v1266_v47, 0.0 }
  0x34   : > { %v13623_v47 = vunpack.c.h.bf16 %v13536_v50 }
  0x35   : > { %v1205_v13 = vadd.f32 %v1204_v40, %v1203_v59  ;;  %v1262_v40 = vmul.f32 %v13497_v24, %v13497_v24  ;;  %v1294_v48 = vadd.f32 %v1293_v35, %v1292_v39  ;;  %v1226_v59 = vsel %vm1186_vm1, %v13560_v7, 0.0 }
  0x36   : > { %v1309_v35 = vsel %vm1186_vm1, %v1267_v49, 0.0  ;;  %v1313_v39 = vsel %vm1186_vm1, %v1269_v53, 0.0  ;;  %v1270_v49 = vmul.f32 %v13546_v56, %v13546_v56  ;;  %v1232_v50 = vsel %vm1186_vm1, %v13623_v47, 0.0 }
  0x37   : > { %v1207_v20 = vadd.f32 %v1206_v41, %v1205_v13  ;;  %v1263_v41 = vmul.f32 %v13501_v26, %v13501_v26  ;;  %v1296_v63 = vadd.f32 %v1295_v45, %v1294_v48  ;;  %v1228_v13 = vsel %vm1186_vm1, %v13562_v8, 0.0 }
  0x38   : > { %v1299_v17 = vsel %vm1186_vm1, %v1262_v40, 0.0 }
  0x39   : > { %v1209_v36 = vadd.f32 %v1208_v42, %v1207_v20  ;;  %v1265_v42 = vmul.f32 %v13505_v28, %v13505_v28  ;;  %v1301_v18 = vsel %vm1186_vm1, %v1263_v41, 0.0  ;;  %v1298_v20 = vadd.f32 %v1297_v54, %v1296_v63  ;;  %v518_v54 = vld [vmem:[%s13462_s23 + $0x60] sm:$0xff]  }
  0x3a   : > { %v13628_v53 = vunpack.c.l.bf16 %v518_v54 }
  0x3b   : > { %v1211_v46 = vadd.f32 %v1210_v43, %v1209_v36  ;;  %v1224_v43 = vsel %vm1186_vm1, %v13556_v62, 0.0  ;;  %v1305_v25 = vsel %vm1186_vm1, %v1265_v42, 0.0  ;;  %v1311_v36 = vsel %vm1186_vm1, %v1268_v51, 0.0  ;;  %v520_v51 = vld [vmem:[%s13462_s23 + $0x68] sm:$0xff]  }
  0x3c   : > { %v1300_v40 = vadd.f32 %v1299_v17, %v1298_v20  ;;  %v13632_v17 = vunpack.c.h.bf16 %v518_v54  ;;  %v13639_v20 = vunpack.c.l.bf16 %v520_v51 }
  0x3d   : > { %v1213_v55 = vadd.f32 %v1212_v21, %v1211_v46  ;;  %v1303_v21 = vsel %vm1186_vm1, %v1264_v44, 0.0 }
  0x3e   : > { %v1302_v48 = vadd.f32 %v1301_v18, %v1300_v40  ;;  %v1315_v18 = vsel %vm1186_vm1, %v1270_v49, 0.0 }
  0x3f   : > { %v1215_v19 = vadd.f32 %v1214_v22, %v1213_v55 }
  0x40   : > { %v1304_v22 = vadd.f32 %v1303_v21, %v1302_v48  ;;  %v1234_v21 = vsel %vm1186_vm1, %v13628_v53, 0.0 }
  0x41   : > { %v1217_v45 = vadd.f32 %v1216_v29, %v1215_v19 }
  0x42   : > { %v1306_v44 = vadd.f32 %v1305_v25, %v1304_v22  ;;  %v522_v25 = vld [vmem:[%s13462_s23 + $0x70] sm:$0xff]   ;;  %v1275_v22 = vmul.f32 %v13556_v62, %v13556_v62 }
  0x43   : > { %v1219_v46 = vadd.f32 %v1218_v33, %v1217_v45  ;;  %v1271_v33 = vmul.f32 %v13548_v57, %v13548_v57  ;;  %v13654_v48 = vunpack.c.l.bf16 %v522_v25 }
  0x44   : > { %v1308_v42 = vadd.f32 %v1307_v34, %v1306_v44 }
  0x45   : > { %v1221_v41 = vadd.f32 %v1220_v37, %v1219_v46 }
  0x46   : > { %v1310_v29 = vadd.f32 %v1309_v35, %v1308_v42  ;;  %v13662_v42 = vunpack.c.h.bf16 %v522_v25 }
  0x47   : > { %v1223_v55 = vadd.f32 %v1222_v38, %v1221_v41  ;;  %v1238_v41 = vsel %vm1186_vm1, %v13639_v20, 0.0 }
  0x48   : > { %v1312_v38 = vadd.f32 %v1311_v36, %v1310_v29  ;;  %v13647_v36 = vunpack.c.h.bf16 %v520_v51  ;;  %v1276_v51 = vmul.f32 %v13560_v7, %v13560_v7 }
  0x49   : > { %v1225_v63 = vadd.f32 %v1224_v43, %v1223_v55  ;;  %v1272_v43 = vmul.f32 %v13550_v58, %v13550_v58  ;;  %v524_v55 = vld [vmem:[%s13462_s23 + $0x78] sm:$0xff]  }
  0x4a   : > { %v1314_v19 = vadd.f32 %v1313_v39, %v1312_v38  ;;  %v1274_v39 = vmul.f32 %v13554_v61, %v13554_v61  ;;  %v1240_v49 = vsel %vm1186_vm1, %v13647_v36, 0.0  ;;  %v13669_v38 = vunpack.c.l.bf16 %v524_v55 }
  0x4b   : > { %v1227_v1 = vadd.f32 %v1226_v59, %v1225_v63  ;;  %v1319_v45 = vsel %vm1186_vm1, %v1272_v43, 0.0  ;;  %v1277_v43 = vmul.f32 %v13562_v8, %v13562_v8  ;;  %v1327_v25 = vsel %vm1186_vm1, %v1276_v51, 0.0 }
  0x4c   : > { %v1316_v35 = vadd.f32 %v1315_v18, %v1314_v19  ;;  %v1323_v29 = vsel %vm1186_vm1, %v1274_v39, 0.0  ;;  %v1325_v18 = vsel %vm1186_vm1, %v1275_v22, 0.0  ;;  %v1279_v39 = vmul.f32 %v13623_v47, %v13623_v47 }
  0x4d   : > { %v1229_v37 = vadd.f32 %v1228_v13, %v1227_v1  ;;  %v1273_v1 = vmul.f32 %v13552_v60, %v13552_v60  ;;  %v1317_v13 = vsel %vm1186_vm1, %v1271_v33, 0.0  ;;  %v1280_v22 = vmul.f32 %v13628_v53, %v13628_v53 }
  0x4e   : > { %v1318_v46 = vadd.f32 %v1317_v13, %v1316_v35  ;;  %v1278_v13 = vmul.f32 %v13565_v9, %v13565_v9 }
  0x4f   : > { %v1231_v59 = vadd.f32 %v1230_v15, %v1229_v37  ;;  %v1236_v15 = vsel %vm1186_vm1, %v13632_v17, 0.0  ;;  %v1321_v54 = vsel %vm1186_vm1, %v1273_v1, 0.0  ;;  %v1244_v1 = vsel %vm1186_vm1, %v13662_v42, 0.0 }
  0x50   : > { %v1320_v63 = vadd.f32 %v1319_v45, %v1318_v46  ;;  %v1329_v45 = vsel %vm1186_vm1, %v1277_v43, 0.0 }
  0x51   : > { %v1233_v34 = vadd.f32 %v1232_v50, %v1231_v59  ;;  %v1242_v50 = vsel %vm1186_vm1, %v13654_v48, 0.0 }
  0x52   : > { %v1322_v37 = vadd.f32 %v1321_v54, %v1320_v63  ;;  %v1331_v54 = vsel %vm1186_vm1, %v1278_v13, 0.0  ;;  %v1281_v63 = vmul.f32 %v13632_v17, %v13632_v17  ;;  %v1284_v13 = vmul.f32 %v13654_v48, %v13654_v48 }
  0x53   : > { %v1235_v40 = vadd.f32 %v1234_v21, %v1233_v34  ;;  %v13676_v21 = vunpack.c.h.bf16 %v524_v55 }
  0x54   : > { %v1324_v19 = vadd.f32 %v1323_v29, %v1322_v37  ;;  %v1335_v37 = vsel %vm1186_vm1, %v1280_v22, 0.0 }
  0x55   : > { %v1237_v44 = vadd.f32 %v1236_v15, %v1235_v40  ;;  %v1246_v15 = vsel %vm1186_vm1, %v13669_v38, 0.0 }
  0x56   : > { %v1326_v35 = vadd.f32 %v1325_v18, %v1324_v19  ;;  %v1283_v18 = vmul.f32 %v13647_v36, %v13647_v36 }
  0x57   : > { %v1239_v33 = vadd.f32 %v1238_v41, %v1237_v44  ;;  %v1248_v41 = vsel %vm1186_vm1, %v13676_v21, 0.0 }
  0x58   : > { %v1328_v46 = vadd.f32 %v1327_v25, %v1326_v35 }
  0x59   : > { %v1241_v59 = vadd.f32 %v1240_v49, %v1239_v33  ;;  %v1333_v49 = vsel %vm1186_vm1, %v1279_v39, 0.0  ;;  %v1282_v33 = vmul.f32 %v13639_v20, %v13639_v20  ;;  %v1341_v39 = vsel %vm1186_vm1, %v1283_v18, 0.0 }
  0x5a   : > { %v1330_v44 = vadd.f32 %v1329_v45, %v1328_v46  ;;  %v1286_v46 = vmul.f32 %v13669_v38, %v13669_v38 }
  0x5b   : > { %v1243_v34 = vadd.f32 %v1242_v50, %v1241_v59  ;;  %v1337_v59 = vsel %vm1186_vm1, %v1281_v63, 0.0  ;;  %v1339_v25 = vsel %vm1186_vm1, %v1282_v33, 0.0  ;;  %v17776_v33 = vmov 0.0  }
  0x5c   : > { %v1332_v29 = vadd.f32 %v1331_v54, %v1330_v44 }
  0x5d   : > { %v1245_v40 = vadd.f32 %v1244_v1, %v1243_v34 }
  0x5e   : > { %v1334_v43 = vadd.f32 %v1333_v49, %v1332_v29 }
  0x5f   : > { %v1247_v55 = vadd.f32 %v1246_v15, %v1245_v40  ;;  %v1285_v15 = vmul.f32 %v13662_v42, %v13662_v42 }
  0x60   : > { %v1336_v1 = vadd.f32 %v1335_v37, %v1334_v43 }
  0x61   : > { %v1249_v51 = vadd.f32 %v1248_v41, %v1247_v55  ;;  %v1343_v41 = vsel %vm1186_vm1, %v1284_v13, 0.0  ;;  %v1287_v55 = vmul.f32 %v13676_v21, %v13676_v21  ;;  %v1345_v44 = vsel %vm1186_vm1, %v1285_v15, 0.0 }
  0x62   : > { %v1338_v35 = vadd.f32 %v1337_v59, %v1336_v1 }
  0x63   : > { %v1250_v50 = vrot.slane %v1249_v51, 4  ;;  %v1349_v37 = vsel %vm1186_vm1, %v1287_v55, 0.0  ;;  %v12669_v55 = vld [vmem:[%s17706_s5 + $0x10] sm:$0xff]  }
  0x64   : > { %v1340_v40 = vadd.f32 %v1339_v25, %v1338_v35 }
  0x65   : > { %v1251_v19 = vadd.f32 %v1250_v50, %v1249_v51  ;;  %v1347_v51 = vsel %vm1186_vm1, %v1286_v46, 0.0  ;;  %v13285_v46 = vmov 0  }
  0x66   : > { %v1342_v54 = vadd.f32 %v1341_v39, %v1340_v40  ;;  %1169 = vst.msk [vmem:[#allocation2 + $0x4] sm:$0xf] %vm1167_vm2, %v13285_v46  ;;  %1170 = vst.msk [vmem:[#allocation2 + $0x8] sm:$0xf] %vm1167_vm2, %v13285_v46 }
  0x67   : > { %v1252_v34 = vrot.slane %v1251_v19, 2  ;;  %1171 = vst.msk [vmem:[#allocation2 + $0xc] sm:$0xf] %vm1167_vm2, %v13285_v46  ;;  %1172 = vst.msk [vmem:[#allocation2 + $0x90] sm:$0xf] %vm1167_vm2, %v13285_v46 }
  0x68   : > { %v1344_v49 = vadd.f32 %v1343_v41, %v1342_v54  ;;  %1173 = vst.msk [vmem:[#allocation2 + $0x94] sm:$0xf] %vm1167_vm2, %v13285_v46  ;;  %1174 = vst.msk [vmem:[#allocation2 + $0x98] sm:$0xf] %vm1167_vm2, %v13285_v46  ;;  %v12666_v41 = vld [vmem:[%s17706_s5 + $0x48] sm:$0xff]   ;;  %v12668_v54 = vld [vmem:[%s17706_s5 + $0x40] sm:$0xff]  }
  0x69   : > { %v1253_v45 = vadd.f32 %v1252_v34, %v1251_v19  ;;  %5419 = vst.msk [vmem:[#allocation3 + $0x4] sm:$0xf] %vm5417_vm3, %v13285_v46  ;;  %5420 = vst.msk [vmem:[#allocation3 + $0x8] sm:$0xf] %vm5417_vm3, %v13285_v46 }
  0x6a   : > { %v1346_v29 = vadd.f32 %v1345_v44, %v1344_v49  ;;  %5421 = vst.msk [vmem:[#allocation3 + $0xc] sm:$0xf] %vm5417_vm3, %v13285_v46  ;;  %5422 = vst.msk [vmem:[#allocation3 + $0x90] sm:$0xf] %vm5417_vm3, %v13285_v46 }
  0x6b   : > { %v1254_v22 = vrot.slane %v1253_v45, 1  ;;  %5423 = vst.msk [vmem:[#allocation3 + $0x94] sm:$0xf] %vm5417_vm3, %v13285_v46  ;;  %5424 = vst.msk [vmem:[#allocation3 + $0x98] sm:$0xf] %vm5417_vm3, %v13285_v46 }
  0x6c   : > { %v1348_v50 = vadd.f32 %v1347_v51, %v1346_v29  ;;  %v13775_v51 = vld [vmem:[%s17706_s5 + $0x78] sm:$0xff]  }
  0x6d   : > { %v1255_v63 = vadd.f32 %v1254_v22, %v1253_v45  ;;  %v12667_v22 = vld [vmem:[%s17706_s5 + $0x18] sm:$0xff]   ;;  %v13762_v44 = vld [vmem:[#allocation2 + $0x8] sm:$0xf] }
  0x6e   : > { %v1350_v43 = vadd.f32 %v1349_v37, %v1348_v50  ;;  %v558_v50 = vlaneseq }
  0x6f   : > { %11807 = vmatmul.mubr.msk.f32.vlgmr.msra.gmra.mxu1 %vm1186_vm1, %v1255_v63  ;;  %v2119_v63 = vld [vmem:[#allocation2 + $0xc] sm:$0xf] }
  0x70   : > { %11810 = vmatpush3.msra.mxu1 %v13420_v0  ;;  %11817 = vmatprep.mubr.msk.f32.mxu1 %vm13284_vm0, %v17776_v33  ;;  %v1351_v18 = vrot.slane %v1350_v43, 4  ;;  %v10542_v49 = vcombine.low %v13762_v44, %v2119_v63 }
  0x71   : > { %11811 = vmatprep.subr.mxu1 %v17776_v33 }
  0x72   : > { %11812 = vmatpush3.msra.mxu1 %v13427_v2  ;;  %v1352_v0 = vadd.f32 %v1351_v18, %v1350_v43  ;;  %v1183_v2 = vld [vmem:[%s17705_s4 + $0x8] sm:$0xff]  ;;  %v13778_v43 = vshrl.u32 %v558_v50, 7  ;;  %v1176_v18 = vld [vmem:[%s17778_s1] sm:$0x1] }
  0x73   : > { %11813 = vmatprep.subr.mxu1 %v17776_v33  ;;  %11825 = vmatpush3.msra.mxu0 %v1183_v2 }
  0x74   : > { %11814 = vmatpush3.msra.mxu1 %v13432_v3  ;;  %v1353_v59 = vrot.slane %v1352_v0, 2  ;;  %v1182_v3 = vld [vmem:[%s17705_s4] sm:$0xff]  ;;  %11826 = vmatprep.subr.mxu0 %v17776_v33  ;;  %17777 = vst [vmem:[#allocation8_spill] sm:$0xff] %v13778_v43 }
  0x75   : > { %11815 = vmatprep.subr.mxu1 %v17776_v33  ;;  %11827 = vmatpush3.msra.mxu0 %v1182_v3 }
  0x76   : > { %11816 = vmatpush3.msra.mxu1 %v13455_v6  ;;  %v1354_v19 = vadd.f32 %v1353_v59, %v1352_v0  ;;  %11842 = vmatprep.subr.bf16.mxu0 %v12666_v41  ;;  %v13784_v0 = vsub.s32 0, %v13778_v43 }
  0x77   : > { %11831 = vmatprep.subr.mxu1 %v17776_v33 }
  0x78   : > { %v1355_v1 = vrot.slane %v1354_v19, 1  ;;  %17779 = vst [vmem:[#allocation9_spill] sm:$0xff] %v13784_v0 }
  0x7a   : > { %v1356_v13 = vadd.f32 %v1355_v1, %v1354_v19  ;;  %v1177_v1 = vld [vmem:[%s17780_s2] sm:$0x1] }
  0x7c   : > { %11818 = vmatmul.mubr.msk.f32.vlgmr.msra.gmra.mxu1 %vm1186_vm1, %v1356_v13 }
  0x7d   : > { %11832 = vmatpush3.msra.mxu1 %v13439_v4  ;;  %11839 = vmatprep.mubr.msk.f32.mxu1 %vm13284_vm0, %v17776_v33 }
  0x7e   : > { %11833 = vmatprep.subr.mxu1 %v17776_v33 }
  0x7f   : > { %11834 = vmatpush3.msra.mxu1 %v13447_v5 }
  0x80   : > { %11835 = vmatprep.subr.mxu1 %v17776_v33 }
  0x81   : > { %11836 = vmatpush3.msra.mxu1 %v1183_v2 }
  0x82   : > { %11837 = vmatprep.subr.mxu1 %v17776_v33 }
  0x83   : > { %11838 = vmatpush3.msra.mxu1 %v1182_v3 }
  0x84   : > { %11878 = vmatprep.subr.bf16.mxu1 %v12667_v22 }
 0x12f   : > { %v1426_v4 = vpop.f32.mrf.mxu1 }
 0x130   : > { %v1431_v5 = vmul.f32 0.00390625, %v1426_v4  ;;  %v13795_v4 = vld [vmem:[%s17706_s5 + $0x38] sm:$0xff]  }
 0x131   : > { %v11808_v6 = vpop.f32.mrf.mxu1 }
 0x132   : > { %11829 = vmatmul.mubr.msk.f32.vlgmr.msra.gmra.mxu0 %vm1186_vm1, %v1431_v5  ;;  %v1506_v34 = vmul.f32 %v1431_v5, %v1431_v5 }
 0x133   : > { %11843 = vmatpush3.bf16.msra.mxu0 %v12666_v41 }
 0x134   : > { %11844 = vmatprep.subr.bf16.mxu0 %v12668_v54 }
 0x137   : > { %11845 = vmatpush3.bf16.msra.mxu0 %v12668_v54 }
 0x138   : > { %11914 = vmatprep.subr.bf16.mxu0 %v13775_v51 }
 0x13c   : > { %v1501_v25 = vpop.f32.mrf.mxu1 }
 0x13d   : > { %v1505_v35 = vmul.f32 0.00390625, %v1501_v25 }
 0x13e   : > { %v11819_v15 = vpop.f32.mrf.mxu1 }
 0x13f   : > { %v1507_v39 = vsub.f32 %v1505_v35, %v1506_v34 }
 0x141   : > { %v1508_v45 = vadd.f32 1e-06, %v1507_v39 }
 0x143   : > { %12938 = vrsqrt.f32 %v1508_v45 }
 0x150   : > { %v12939_v40 = vpop.eup %12938 }
 0x151   : > { %11840 = vmatmul.mubr.msk.f32.vlgmr.msra.gmra.mxu1 %vm1186_vm1, %v12939_v40 }
 0x152   : > { %11879 = vmatpush3.bf16.msra.mxu1 %v12667_v22  ;;  %11882 = vmatprep.mubr.msk.bf16.mxu1 %vm1186_vm1, %v10542_v49 }
 0x153   : > { %11880 = vmatprep.subr.bf16.mxu1 %v12669_v55 }
 0x156   : > { %11881 = vmatpush3.bf16.msra.mxu1 %v12669_v55 }
 0x157   : > { %11950 = vmatprep.subr.bf16.mxu1 %v13795_v4 }
 0x1f2   : > { %v1579_v29 = vpop.f32.mrf.mxu0 }
 0x1f4   : > { %v11830_v37 = vpop.f32.mrf.mxu0 }
 0x211   : > { %v1652_v59 = vpop.f32.mrf.mxu1 }
 0x212   : > { %v1656_v19 = vmul.f32 %v1652_v59, %v1176_v18 }
 0x213   : > { %v11841_v13 = vpop.f32.mrf.mxu1 }
 0x214   : > { %v1657_v2 = vmul.f32 %v1656_v19, %v1579_v29  ;;  %v13790_v3 = vrot.slane %v1656_v19, %v13784_v0 }
 0x216   : > { %v1658_v5 = vsub.f32 %v1177_v1, %v1657_v2  ;;  %v1685_v6 = vmul.f32 %v13790_v3, %v13565_v9  ;;  %v1686_v34 = vmul.f32 %v13790_v3, %v13623_v47  ;;  %v1687_v35 = vmul.f32 %v13790_v3, %v13628_v53 }
 0x217   : > { %v1688_v15 = vmul.f32 %v13790_v3, %v13632_v17  ;;  %v1689_v39 = vmul.f32 %v13790_v3, %v13639_v20  ;;  %v1690_v9 = vmul.f32 %v13790_v3, %v13647_v36  ;;  %v1691_v45 = vmul.f32 %v13790_v3, %v13654_v48 }
 0x218   : > { %v13801_v25 = vrot.slane %v1658_v5, %v13784_v0  ;;  %v1692_v20 = vmul.f32 %v13790_v3, %v13662_v42  ;;  %v1693_v46 = vmul.f32 %v13790_v3, %v13669_v38  ;;  %v1694_v55 = vmul.f32 %v13790_v3, %v13676_v21 }
 0x219   : > { %v1663_v37 = vmul.f32 %v13790_v3, %v13475_v10  ;;  %v1664_v18 = vmul.f32 %v13790_v3, %v13477_v11  ;;  %v1665_v1 = vmul.f32 %v13790_v3, %v13479_v12  ;;  %v1666_v13 = vmul.f32 %v13790_v3, %v13482_v14 }
 0x21a   : > { %v13816_v40 = vadd.f32 %v13801_v25, %v1685_v6  ;;  %v13819_v47 = vadd.f32 %v13801_v25, %v1686_v34  ;;  %v13822_v53 = vadd.f32 %v13801_v25, %v1687_v35  ;;  %v13825_v17 = vadd.f32 %v13801_v25, %v1688_v15 }
 0x21b   : > { %v13830_v36 = vadd.f32 %v13801_v25, %v1689_v39  ;;  %v13833_v48 = vadd.f32 %v13801_v25, %v1690_v9  ;;  %v13838_v41 = vadd.f32 %v13801_v25, %v1691_v45  ;;  %v13845_v42 = vadd.f32 %v13801_v25, %v1692_v20 }
 0x21c   : > { %v10458_v22 = vmul.f32 -1.442695, %v13816_v40  ;;  %v10459_v54 = vmul.f32 -1.442695, %v13819_v47  ;;  %v10460_v63 = vmul.f32 -1.442695, %v13822_v53  ;;  %v13850_v29 = vadd.f32 %v13801_v25, %v1693_v46 }
 0x21d   : > { %v10461_v49 = vmul.f32 -1.442695, %v13825_v17  ;;  %v10462_v38 = vmul.f32 -1.442695, %v13830_v36  ;;  %v13856_v50 = vadd.f32 %v13801_v25, %v1694_v55  ;;  %v10463_v21 = vmul.f32 -1.442695, %v13833_v48 }
 0x21e   : > { %12940 = vpow2.f32 %v10458_v22  ;;  %v10464_v59 = vmul.f32 -1.442695, %v13838_v41  ;;  %v13863_v19 = vadd.f32 %v13801_v25, %v1663_v37  ;;  %v10465_v10 = vmul.f32 -1.442695, %v13845_v42 }
 0x21f   : > { %12942 = vpow2.f32 %v10459_v54  ;;  %v13871_v2 = vadd.f32 %v13801_v25, %v1664_v18  ;;  %v10466_v11 = vmul.f32 -1.442695, %v13850_v29  ;;  %v13875_v5 = vadd.f32 %v13801_v25, %v1665_v1 }
 0x220   : > { %12944 = vpow2.f32 %v10460_v63  ;;  %v1667_v6 = vmul.f32 %v13790_v3, %v13485_v16  ;;  %v10467_v12 = vmul.f32 -1.442695, %v13856_v50  ;;  %v13881_v34 = vadd.f32 %v13801_v25, %v1666_v13 }
 0x221   : > { %12946 = vpow2.f32 %v10461_v49  ;;  %v1668_v14 = vmul.f32 %v13790_v3, %v13495_v23  ;;  %v10436_v35 = vmul.f32 -1.442695, %v13863_v19  ;;  %v10437_v39 = vmul.f32 -1.442695, %v13871_v2 }
 0x222   : > { %12948 = vpow2.f32 %v10462_v38  ;;  %v13887_v15 = vadd.f32 %v13801_v25, %v1667_v6  ;;  %v10438_v9 = vmul.f32 -1.442695, %v13875_v5  ;;  %v10439_v45 = vmul.f32 -1.442695, %v13881_v34 }
 0x223   : > { %12950 = vpow2.f32 %v10463_v21  ;;  %v13891_v16 = vadd.f32 %v13801_v25, %v1668_v14  ;;  %v1669_v46 = vmul.f32 %v13790_v3, %v13497_v24  ;;  %v1670_v63 = vmul.f32 %v13790_v3, %v13501_v26 }
 0x224   : > { %12952 = vpow2.f32 %v10464_v59  ;;  %v10440_v23 = vmul.f32 -1.442695, %v13887_v15  ;;  %v13906_v37 = vmul.f32 %v13790_v3, %v13560_v7  ;;  %v13910_v24 = vmul.f32 %v13790_v3, %v13562_v8 }
 0x225   : > { %12954 = vpow2.f32 %v10465_v10  ;;  %v10441_v20 = vmul.f32 -1.442695, %v13891_v16  ;;  %v13902_v49 = vadd.f32 %v13801_v25, %v1669_v46  ;;  %v13913_v1 = vadd.f32 %v13801_v25, %v1670_v63 }
 0x226   : > { %12956 = vpow2.f32 %v10466_v11  ;;  %v1671_v13 = vmul.f32 %v13790_v3, %v13503_v27  ;;  %v1672_v7 = vmul.f32 %v13790_v3, %v13505_v28 }
 0x227   : > { %12958 = vpow2.f32 %v10467_v12  ;;  %v13920_v8 = vmul.f32 -1.442695, %v13902_v49  ;;  %v1673_v12 = vmul.f32 %v13790_v3, %v13507_v30  ;;  %v10443_v46 = vmul.f32 -1.442695, %v13913_v1 }
 0x228   : > { %12960 = vpow2.f32 %v10436_v35  ;;  %v13928_v27 = vadd.f32 %v13801_v25, %v1672_v7 }
 0x229   : > { %12962 = vpow2.f32 %v10437_v39  ;;  %v13925_v39 = vadd.f32 %v13801_v25, %v1671_v13 }
 0x22a   : > { %12964 = vpow2.f32 %v10438_v9 }
 0x22b   : > { %v12941_v22 = vpop.eup %12940  ;;  %12966 = vpow2.f32 %v10439_v45  ;;  %v1674_v45 = vmul.f32 %v13790_v3, %v13509_v31  ;;  %v1676_v31 = vmul.f32 %v13790_v3, %v13538_v52  ;;  %v1677_v52 = vmul.f32 %v13790_v3, %v13546_v56 }
 0x22c   : > { %v12943_v54 = vpop.eup %12942  ;;  %v1851_v55 = vadd.f32 1.0, %v12941_v22  ;;  %12968 = vpow2.f32 %v10440_v23  ;;  %v13933_v23 = vadd.f32 %v13801_v25, %v1673_v12  ;;  %v1675_v22 = vmul.f32 %v13790_v3, %v13511_v32 }
 0x22d   : > { %v12945_v38 = vpop.eup %12944  ;;  %v1852_v21 = vadd.f32 1.0, %v12943_v54  ;;  %12970 = vpow2.f32 %v10441_v20  ;;  %v13939_v63 = vadd.f32 %v13801_v25, %v1674_v45 }
 0x22e   : > { %v12947_v18 = vpop.eup %12946  ;;  %v1853_v59 = vadd.f32 1.0, %v12945_v38  ;;  %12972 = vrcp.f32 %v1851_v55  ;;  %v13946_v32 = vmul.f32 -1.442695, %v13933_v23  ;;  %v13949_v13 = vadd.f32 %v13801_v25, %v1675_v22 }
 0x22f   : > { %v12949_v26 = vpop.eup %12948  ;;  %v1854_v10 = vadd.f32 1.0, %v12947_v18  ;;  %12974 = vrcp.f32 %v1852_v21  ;;  %v10444_v18 = vmul.f32 -1.442695, %v13925_v39  ;;  %v1680_v22 = vmul.f32 %v13790_v3, %v13552_v60 }
 0x230   : > { %v12951_v11 = vpop.eup %12950  ;;  %v1855_v6 = vadd.f32 1.0, %v12949_v26  ;;  %12976 = vrcp.f32 %v1853_v59  ;;  %v10445_v59 = vmul.f32 -1.442695, %v13928_v27 }
 0x231   : > { %v12953_v14 = vpop.eup %12952  ;;  %v1856_v35 = vadd.f32 1.0, %v12951_v11  ;;  %12978 = vrcp.f32 %v1854_v10 }
 0x232   : > { %v12955_v9 = vpop.eup %12954  ;;  %v1857_v28 = vadd.f32 1.0, %v12953_v14  ;;  %12980 = vrcp.f32 %v1855_v6  ;;  %v1678_v6 = vmul.f32 %v13790_v3, %v13548_v57 }
 0x233   : > { %v12957_v20 = vpop.eup %12956  ;;  %v1858_v30 = vadd.f32 1.0, %v12955_v9  ;;  %12982 = vrcp.f32 %v1856_v35  ;;  %v13956_v35 = vadd.f32 %v13801_v25, %v1676_v31  ;;  %v1679_v9 = vmul.f32 %v13790_v3, %v13550_v58 }
 0x234   : > { %v12959_v54 = vpop.eup %12958  ;;  %v1859_v55 = vadd.f32 1.0, %v12957_v20  ;;  %12984 = vrcp.f32 %v1857_v28  ;;  %v13961_v20 = vadd.f32 %v13801_v25, %v1677_v52  ;;  %v13964_v56 = vadd.f32 %v13801_v25, %v1678_v6 }
 0x235   : > { %v12961_v38 = vpop.eup %12960  ;;  %v1860_v21 = vadd.f32 1.0, %v12959_v54  ;;  %12986 = vrcp.f32 %v1858_v30  ;;  %v13969_v54 = vadd.f32 %v13801_v25, %v1679_v9  ;;  %v10447_v31 = vmul.f32 -1.442695, %v13939_v63 }
 0x236   : > { %v12963_v26 = vpop.eup %12962  ;;  %12988 = vrcp.f32 %v1859_v55  ;;  %v1829_v10 = vadd.f32 1.0, %v12961_v38  ;;  %v10448_v38 = vmul.f32 -1.442695, %v13949_v13  ;;  %v10451_v52 = vmul.f32 -1.442695, %v13964_v56 }
 0x237   : > { %v12965_v7 = vpop.eup %12964  ;;  %12990 = vrcp.f32 %v1860_v21  ;;  %v1830_v11 = vadd.f32 1.0, %v12963_v26  ;;  %v10449_v26 = vmul.f32 -1.442695, %v13956_v35  ;;  %v10452_v9 = vmul.f32 -1.442695, %v13969_v54 }
 0x238   : > { %v12967_v12 = vpop.eup %12966  ;;  %12992 = vrcp.f32 %v1829_v10  ;;  %v1831_v14 = vadd.f32 1.0, %v12965_v7  ;;  %v13975_v10 = vadd.f32 %v13801_v25, %v1680_v22 }
 0x239   : > { %v12969_v28 = vpop.eup %12968  ;;  %v1832_v45 = vadd.f32 1.0, %v12967_v12  ;;  %12994 = vrcp.f32 %v1830_v11  ;;  %v10450_v11 = vmul.f32 -1.442695, %v13961_v20 }
 0x23a   : > { %v12971_v30 = vpop.eup %12970  ;;  %12996 = vrcp.f32 %v1831_v14  ;;  %v1833_v57 = vadd.f32 1.0, %v12969_v28 }
 0x23b   : > { %v12973_v55 = vpop.eup %12972  ;;  %12998 = vrcp.f32 %v1832_v45  ;;  %v1834_v58 = vadd.f32 1.0, %v12971_v30 }
 0x23c   : > { %v12975_v21 = vpop.eup %12974  ;;  %13000 = vrcp.f32 %v1833_v57  ;;  %v1947_v7 = vmul.f32 %v12973_v55, %v13816_v40  ;;  %v1681_v40 = vmul.f32 %v13790_v3, %v13554_v61 }
 0x23d   : > { %v12977_v60 = vpop.eup %12976  ;;  %13002 = vrcp.f32 %v1834_v58  ;;  %v1948_v6 = vmul.f32 %v12975_v21, %v13819_v47 }
 0x23e   : > { %v12979_v12 = vpop.eup %12978  ;;  %v1949_v14 = vmul.f32 %v12977_v60, %v13822_v53  ;;  %13004 = vpow2.f32 %v13920_v8  ;;  %v11315_v28 = vpack.c.bf16 %v1947_v7, %v1947_v7  ;;  %v10453_v53 = vmul.f32 -1.442695, %v13975_v10 }
 0x23f   : > { %v12981_v45 = vpop.eup %12980  ;;  %v1950_v30 = vmul.f32 %v12979_v12, %v13825_v17  ;;  %13006 = vpow2.f32 %v10443_v46  ;;  %v11316_v57 = vpack.c.bf16 %v1948_v6, %v1948_v6  ;;  %v1682_v17 = vmul.f32 %v13790_v3, %v13556_v62 }
 0x240   : > { %v12983_v22 = vpop.eup %12982  ;;  %v1951_v55 = vmul.f32 %v12981_v45, %v13830_v36  ;;  %v11317_v47 = vpack.c.bf16 %v1949_v14, %v1949_v14  ;;  %13008 = vpow2.f32 %v10444_v18  ;;  %2107 = vst.msk [vmem:[#allocation2 + $0x68] sm:$0xf] %vm1167_vm2, %v11315_v28  ;;  %v13998_v18 = vadd.f32 %v13801_v25, %v1681_v40 }
 0x241   : > { %v12985_v8 = vpop.eup %12984  ;;  %v1952_v58 = vmul.f32 %v12983_v22, %v13833_v48  ;;  %v11318_v21 = vpack.c.bf16 %v1950_v30, %v1950_v30  ;;  %13010 = vpow2.f32 %v10445_v59  ;;  %2108 = vst.msk [vmem:[#allocation2 + $0x6c] sm:$0xf] %vm1167_vm2, %v11316_v57  ;;  %v14003_v62 = vadd.f32 %v13801_v25, %v1682_v17 }
 0x242   : > { %v12987_v61 = vpop.eup %12986  ;;  %v1953_v46 = vmul.f32 %v12985_v8, %v13838_v41  ;;  %v11319_v36 = vpack.c.bf16 %v1951_v55, %v1951_v55  ;;  %2109 = vst.msk [vmem:[#allocation2 + $0x70] sm:$0xf] %vm1167_vm2, %v11317_v47  ;;  %13012 = vpow2.f32 %v13946_v32  ;;  %v14009_v32 = vadd.f32 %v13801_v25, %v13906_v37 }
 0x243   : > { %v12989_v7 = vpop.eup %12988  ;;  %v1954_v48 = vmul.f32 %v12987_v61, %v13845_v42  ;;  %v11320_v59 = vpack.c.bf16 %v1952_v58, %v1952_v58  ;;  %2110 = vst.msk [vmem:[#allocation2 + $0x74] sm:$0xf] %vm1167_vm2, %v11318_v21  ;;  %13014 = vpow2.f32 %v10447_v31  ;;  %v14015_v31 = vadd.f32 %v13801_v25, %v13910_v24 }
 0x244   : > { %v12991_v3 = vpop.eup %12990  ;;  %v1955_v41 = vmul.f32 %v12989_v7, %v13850_v29  ;;  %v11321_v60 = vpack.c.bf16 %v1953_v46, %v1953_v46  ;;  %2111 = vst.msk [vmem:[#allocation2 + $0x78] sm:$0xf] %vm1167_vm2, %v11319_v36  ;;  %13016 = vpow2.f32 %v10448_v38  ;;  %v10454_v37 = vmul.f32 -1.442695, %v13998_v18 }
 0x245   : > { %v12993_v6 = vpop.eup %12992  ;;  %v1956_v42 = vmul.f32 %v12991_v3, %v13856_v50  ;;  %v11322_v12 = vpack.c.bf16 %v1954_v48, %v1954_v48  ;;  %2112 = vst.msk [vmem:[#allocation2 + $0x7c] sm:$0xf] %vm1167_vm2, %v11320_v59  ;;  %13018 = vpow2.f32 %v10449_v26  ;;  %v10455_v26 = vmul.f32 -1.442695, %v14003_v62 }
 0x246   : > { %v12995_v29 = vpop.eup %12994  ;;  %v11323_v14 = vpack.c.bf16 %v1955_v41, %v1955_v41  ;;  %2113 = vst.msk [vmem:[#allocation2 + $0x80] sm:$0xf] %vm1167_vm2, %v11321_v60  ;;  %v1925_v38 = vmul.f32 %v12993_v6, %v13863_v19  ;;  %13020 = vpow2.f32 %v10450_v11  ;;  %v10456_v19 = vmul.f32 -1.442695, %v14009_v32 }
 0x247   : > { %v12997_v28 = vpop.eup %12996  ;;  %v11324_v45 = vpack.c.bf16 %v1956_v42, %v1956_v42  ;;  %2114 = vst.msk [vmem:[#allocation2 + $0x84] sm:$0xf] %vm1167_vm2, %v11322_v12  ;;  %v1926_v50 = vmul.f32 %v12995_v29, %v13871_v2  ;;  %13022 = vpow2.f32 %v10451_v52  ;;  %v10457_v2 = vmul.f32 -1.442695, %v14015_v31 }
 0x248   : > { %v12999_v25 = vpop.eup %12998  ;;  %2115 = vst.msk [vmem:[#allocation2 + $0x88] sm:$0xf] %vm1167_vm2, %v11323_v14  ;;  %v11293_v24 = vpack.c.bf16 %v1925_v38, %v1925_v38  ;;  %v1927_v30 = vmul.f32 %v12997_v28, %v13875_v5  ;;  %13024 = vpow2.f32 %v10452_v9 }
 0x249   : > { %v13001_v11 = vpop.eup %13000  ;;  %2116 = vst.msk [vmem:[#allocation2 + $0x8c] sm:$0xf] %vm1167_vm2, %v11324_v45  ;;  %v1928_v40 = vmul.f32 %v12999_v25, %v13881_v34  ;;  %v11294_v57 = vpack.c.bf16 %v1926_v50, %v1926_v50  ;;  %13026 = vpow2.f32 %v10453_v53  ;;  %v12702_v45 = vld [vmem:[%s17706_s5 + $0x30] sm:$0xff]  }
 0x24a   : > { %v13003_v52 = vpop.eup %13002  ;;  %2085 = vst.msk [vmem:[#allocation2 + $0x10] sm:$0xf] %vm1167_vm2, %v11293_v24  ;;  %v11295_v22 = vpack.c.bf16 %v1927_v30, %v1927_v30  ;;  %v1929_v55 = vmul.f32 %v13001_v11, %v13887_v15  ;;  %13028 = vpow2.f32 %v10454_v37  ;;  %v12683_v30 = vld [vmem:[%s17706_s5 + $0x70] sm:$0xff]  }
 0x24b   : > { %v13005_v5 = vpop.eup %13004  ;;  %v11296_v9 = vpack.c.bf16 %v1928_v40, %v1928_v40  ;;  %2086 = vst.msk [vmem:[#allocation2 + $0x14] sm:$0xf] %vm1167_vm2, %v11294_v57  ;;  %v1930_v47 = vmul.f32 %v13003_v52, %v13891_v16  ;;  %13030 = vpow2.f32 %v10455_v26 }
 0x24c   : > { %v13007_v8 = vpop.eup %13006  ;;  %2087 = vst.msk [vmem:[#allocation2 + $0x18] sm:$0xf] %vm1167_vm2, %v11295_v22  ;;  %v11297_v34 = vpack.c.bf16 %v1929_v55, %v1929_v55  ;;  %v1835_v53 = vadd.f32 1.0, %v13005_v5  ;;  %13032 = vpow2.f32 %v10456_v19  ;;  %v14069_v22 = vld [vmem:[%s17706_s5 + $0x68] sm:$0xff]  }
 0x24d   : > { %v13009_v58 = vpop.eup %13008  ;;  %2088 = vst.msk [vmem:[#allocation2 + $0x1c] sm:$0xf] %vm1167_vm2, %v11296_v9  ;;  %v11298_v21 = vpack.c.bf16 %v1930_v47, %v1930_v47  ;;  %v1836_v17 = vadd.f32 1.0, %v13007_v8  ;;  %13034 = vpow2.f32 %v10457_v2  ;;  %v14076_v47 = vld [vmem:[%s17706_s5 + $0x8] sm:$0xff]  }
 0x24e   : > { %v13011_v15 = vpop.eup %13010  ;;  %2089 = vst.msk [vmem:[#allocation2 + $0x20] sm:$0xf] %vm1167_vm2, %v11297_v34  ;;  %13036 = vrcp.f32 %v1835_v53  ;;  %v1837_v61 = vadd.f32 1.0, %v13009_v58 }
 0x24f   : > { %v13013_v46 = vpop.eup %13012  ;;  %2090 = vst.msk [vmem:[#allocation2 + $0x24] sm:$0xf] %vm1167_vm2, %v11298_v21  ;;  %13038 = vrcp.f32 %v1836_v17  ;;  %v1838_v16 = vadd.f32 1.0, %v13011_v15 }
 0x250   : > { %v13015_v36 = vpop.eup %13014  ;;  %13040 = vrcp.f32 %v1837_v61  ;;  %v1839_v7 = vadd.f32 1.0, %v13013_v46 }
 0x251   : > { %v13017_v48 = vpop.eup %13016  ;;  %v14037_v59 = vld [vmem:[#allocation2 + $0x10] sm:$0xf]  ;;  %13042 = vrcp.f32 %v1838_v16  ;;  %v1840_v3 = vadd.f32 1.0, %v13015_v36 }
 0x252   : > { %v13019_v41 = vpop.eup %13018  ;;  %v14039_v60 = vld [vmem:[#allocation2 + $0x14] sm:$0xf]  ;;  %13044 = vrcp.f32 %v1839_v7  ;;  %v1841_v6 = vadd.f32 1.0, %v13017_v48 }
 0x253   : > { %v13021_v42 = vpop.eup %13020  ;;  %v14041_v12 = vld [vmem:[#allocation2 + $0x18] sm:$0xf]  ;;  %v10508_v29 = vcombine.low %v14037_v59, %v14039_v60  ;;  %13046 = vrcp.f32 %v1840_v3  ;;  %v1842_v14 = vadd.f32 1.0, %v13019_v41 }
 0x254   : > { %v13023_v38 = vpop.eup %13022  ;;  %v14045_v37 = vld [vmem:[#allocation2 + $0x1c] sm:$0xf]  ;;  %13048 = vrcp.f32 %v1841_v6  ;;  %v1843_v28 = vadd.f32 1.0, %v13021_v42 }
 0x255   : > { %v13025_v50 = vpop.eup %13024  ;;  %v10509_v26 = vcombine.low %v14041_v12, %v14045_v37  ;;  %11846 = vmatprep.mubr.msk.bf16.mxu0 %vm1186_vm1, %v10508_v29  ;;  %11883 = vmatmul.mubr.msk.bf16.vlgmr.msra.gmra.mxu1 %vm1186_vm1, %v10508_v29  ;;  %v14054_v25 = vld [vmem:[#allocation2 + $0x20] sm:$0xf]  ;;  %13050 = vrcp.f32 %v1842_v14  ;;  %v1844_v24 = vadd.f32 1.0, %v13023_v38 }
 0x256   : > { %v13027_v19 = vpop.eup %13026  ;;  %v14059_v11 = vld [vmem:[#allocation2 + $0x24] sm:$0xf]  ;;  %13052 = vrcp.f32 %v1843_v28  ;;  %v1845_v40 = vadd.f32 1.0, %v13025_v50  ;;  %11951 = vmatpush3.bf16.msra.mxu1 %v13795_v4 }
 0x257   : > { %v13029_v57 = vpop.eup %13028  ;;  %11847 = vmatmul.mubr.msk.bf16.vlgmr.msra.gmra.mxu0 %vm1186_vm1, %v10509_v26  ;;  %11886 = vmatprep.mubr.msk.bf16.mxu1 %vm1186_vm1, %v10509_v26  ;;  %v10510_v2 = vcombine.low %v14054_v25, %v14059_v11  ;;  %13054 = vrcp.f32 %v1844_v24  ;;  %v1846_v52 = vadd.f32 1.0, %v13027_v19 }
 0x258   : > { %v13031_v55 = vpop.eup %13030  ;;  %11915 = vmatpush3.bf16.msra.mxu0 %v13775_v51  ;;  %13056 = vrcp.f32 %v1845_v40  ;;  %v1847_v4 = vadd.f32 1.0, %v13029_v57  ;;  %11952 = vmatprep.subr.bf16.mxu1 %v12702_v45 }
 0x259   : > { %v13033_v5 = vpop.eup %13032  ;;  %11850 = vmatprep.mubr.msk.bf16.mxu0 %vm1186_vm1, %v10510_v2  ;;  %13058 = vrcp.f32 %v1846_v52  ;;  %11916 = vmatprep.subr.bf16.mxu0 %v12683_v30  ;;  %v1848_v9 = vadd.f32 1.0, %v13031_v55 }
 0x25a   : > { %v13035_v8 = vpop.eup %13034  ;;  %13060 = vrcp.f32 %v1847_v4  ;;  %v1849_v34 = vadd.f32 1.0, %v13033_v5  ;;  %11953 = vmatpush3.bf16.msra.mxu1 %v12702_v45 }
 0x25b   : > { %v13037_v53 = vpop.eup %13036  ;;  %13062 = vrcp.f32 %v1848_v9  ;;  %v1850_v51 = vadd.f32 1.0, %v13035_v8  ;;  %12022 = vmatprep.subr.bf16.mxu1 %v14069_v22 }
 0x25c   : > { %v13039_v58 = vpop.eup %13038  ;;  %v1931_v21 = vmul.f32 %v13037_v53, %v13902_v49  ;;  %11917 = vmatpush3.bf16.msra.mxu0 %v12683_v30  ;;  %13064 = vrcp.f32 %v1849_v34 }
 0x25d   : > { %v13041_v17 = vpop.eup %13040  ;;  %11887 = vmatmul.mubr.msk.bf16.gmra.mxu1 %vm1186_vm1, %v10510_v2  ;;  %v1932_v15 = vmul.f32 %v13039_v58, %v13913_v1  ;;  %13066 = vrcp.f32 %v1850_v51  ;;  %11986 = vmatprep.subr.bf16.mxu0 %v14076_v47 }
 0x25e   : > { %v13043_v61 = vpop.eup %13042  ;;  %v11299_v46 = vpack.c.bf16 %v1931_v21, %v1931_v21  ;;  %v1933_v16 = vmul.f32 %v13041_v17, %v13925_v39 }
 0x25f   : > { %v13045_v36 = vpop.eup %13044  ;;  %v11300_v7 = vpack.c.bf16 %v1932_v15, %v1932_v15  ;;  %v1934_v48 = vmul.f32 %v13043_v61, %v13928_v27 }
 0x260   : > { %v13047_v3 = vpop.eup %13046  ;;  %2091 = vst.msk [vmem:[#allocation2 + $0x28] sm:$0xf] %vm1167_vm2, %v11299_v46  ;;  %v11301_v49 = vpack.c.bf16 %v1933_v16, %v1933_v16  ;;  %v1935_v41 = vmul.f32 %v13045_v36, %v13933_v23 }
 0x261   : > { %v13049_v6 = vpop.eup %13048  ;;  %2092 = vst.msk [vmem:[#allocation2 + $0x2c] sm:$0xf] %vm1167_vm2, %v11300_v7  ;;  %v11302_v1 = vpack.c.bf16 %v1934_v48, %v1934_v48  ;;  %v1936_v42 = vmul.f32 %v13047_v3, %v13939_v63  ;;  %v3014_v3 = vld [vmem:[#allocation2 + $0x4] sm:$0x8] }
 0x262   : > { %v13051_v29 = vpop.eup %13050  ;;  %2093 = vst.msk [vmem:[#allocation2 + $0x30] sm:$0xf] %vm1167_vm2, %v11301_v49  ;;  %v11303_v39 = vpack.c.bf16 %v1935_v41, %v1935_v41  ;;  %v1937_v14 = vmul.f32 %v13049_v6, %v13949_v13 }
 0x263   : > { %v13053_v38 = vpop.eup %13052  ;;  %2094 = vst.msk [vmem:[#allocation2 + $0x34] sm:$0xf] %vm1167_vm2, %v11302_v1  ;;  %v11304_v27 = vpack.c.bf16 %v1936_v42, %v1936_v42  ;;  %v1938_v28 = vmul.f32 %v13051_v29, %v13956_v35  ;;  %v10638_v42 = vcombine.low %v3014_v3, %v13762_v44 }
 0x264   : > { %v13055_v45 = vpop.eup %13054  ;;  %2095 = vst.msk [vmem:[#allocation2 + $0x38] sm:$0xf] %vm1167_vm2, %v11303_v39  ;;  %v11305_v23 = vpack.c.bf16 %v1937_v14, %v1937_v14  ;;  %v1939_v50 = vmul.f32 %v13053_v38, %v13961_v20  ;;  %v10604_v14 = vcombine.low %v14039_v60, %v14041_v12  ;;  %v13198_v12 = vld [vmem:[#allocation2 + $0xc] sm:$0xf] }
 0x265   : > { %v13057_v26 = vpop.eup %13056  ;;  %2096 = vst.msk [vmem:[#allocation2 + $0x3c] sm:$0xf] %vm1167_vm2, %v11304_v27  ;;  %v11306_v63 = vpack.c.bf16 %v1938_v28, %v1938_v28  ;;  %v1940_v24 = vmul.f32 %v13055_v45, %v13964_v56  ;;  %v3424_v44 = vshrl.u32 %v10638_v42, 16  ;;  %v3427_v27 = vshll.u32 %v10638_v42, 16  ;;  %v3019_v45 = vld [vmem:[#allocation2 + $0xc] sm:$0x8] }
 0x266   : > { %v13059_v30 = vpop.eup %13058  ;;  %2097 = vst.msk [vmem:[#allocation2 + $0x40] sm:$0xf] %vm1167_vm2, %v11305_v23  ;;  %v11307_v13 = vpack.c.bf16 %v1939_v50, %v1939_v50  ;;  %v1941_v19 = vmul.f32 %v13057_v26, %v13969_v54  ;;  %v14175_v23 = vld [vmem:[#allocation2 + $0x68] sm:$0xf]  ;;  %v14177_v50 = vld [vmem:[#allocation2 + $0x6c] sm:$0xf] }
 0x267   : > { %v13061_v40 = vpop.eup %13060  ;;  %v14099_v35 = vld [vmem:[#allocation2 + $0x28] sm:$0xf]  ;;  %2098 = vst.msk [vmem:[#allocation2 + $0x44] sm:$0xf] %vm1167_vm2, %v11306_v63  ;;  %v11308_v57 = vpack.c.bf16 %v1940_v24, %v1940_v24  ;;  %v1942_v20 = vmul.f32 %v13059_v30, %v13975_v10  ;;  %v3054_v26 = vshrl.u32 %v10604_v14, 16  ;;  %v3057_v63 = vshll.u32 %v10604_v14, 16 }
 0x268   : > { %v13063_v2 = vpop.eup %13062  ;;  %v14103_v52 = vld [vmem:[#allocation2 + $0x2c] sm:$0xf]  ;;  %2099 = vst.msk [vmem:[#allocation2 + $0x48] sm:$0xf] %vm1167_vm2, %v11307_v13  ;;  %v11309_v56 = vpack.c.bf16 %v1941_v19, %v1941_v19  ;;  %v1943_v55 = vmul.f32 %v13061_v40, %v13998_v18  ;;  %v10639_v24 = vcombine.low %v13198_v12, %v14037_v59  ;;  %v10519_v30 = vcombine.low %v14175_v23, %v14177_v50 }
 0x269   : > { %v13065_v4 = vpop.eup %13064  ;;  %v10511_v54 = vcombine.low %v14099_v35, %v14103_v52  ;;  %v14109_v5 = vld [vmem:[#allocation2 + $0x30] sm:$0xf]  ;;  %2100 = vst.msk [vmem:[#allocation2 + $0x4c] sm:$0xf] %vm1167_vm2, %v11308_v57  ;;  %v11310_v9 = vpack.c.bf16 %v1942_v20, %v1942_v20  ;;  %v1944_v8 = vmul.f32 %v13063_v2, %v14003_v62  ;;  %v10603_v13 = vcombine.low %v3019_v45, %v14037_v59 }
 0x26a   : > { %v13067_v10 = vpop.eup %13066  ;;  %v14113_v34 = vld [vmem:[#allocation2 + $0x34] sm:$0xf]  ;;  %2101 = vst.msk [vmem:[#allocation2 + $0x50] sm:$0xf] %vm1167_vm2, %v11309_v56  ;;  %v11311_v53 = vpack.c.bf16 %v1943_v55, %v1943_v55  ;;  %v1945_v51 = vmul.f32 %v13065_v4, %v14009_v32  ;;  %v3426_v19 = vrot.slane %v3424_v44, 3  ;;  %v3429_v40 = vrot.slane %v3427_v27, 4 }
 0x26b   : > { %11851 = vmatmul.mubr.msk.bf16.gmra.mxu0 %vm1186_vm1, %v10511_v54  ;;  %11890 = vmatprep.mubr.msk.bf16.mxu1 %vm1186_vm1, %v10511_v54  ;;  %v10512_v18 = vcombine.low %v14109_v5, %v14113_v34  ;;  %v14121_v58 = vld [vmem:[#allocation2 + $0x38] sm:$0xf]  ;;  %2102 = vst.msk [vmem:[#allocation2 + $0x54] sm:$0xf] %vm1167_vm2, %v11310_v9  ;;  %v11312_v62 = vpack.c.bf16 %v1944_v8, %v1944_v8  ;;  %v3056_v57 = vrot.slane %v3054_v26, 3  ;;  %v3059_v20 = vrot.slane %v3057_v63, 4 }
 0x26c   : > { %v1946_v21 = vmul.f32 %v13067_v10, %v14015_v31  ;;  %v14125_v17 = vld [vmem:[#allocation2 + $0x3c] sm:$0xf]  ;;  %2103 = vst.msk [vmem:[#allocation2 + $0x58] sm:$0xf] %vm1167_vm2, %v11311_v53  ;;  %v11313_v15 = vpack.c.bf16 %v1945_v51, %v1945_v51  ;;  %v14189_v2 = vld [vmem:[#allocation2 + $0x70] sm:$0xf]  ;;  %v3430_v8 = vor.u32 %v3429_v40, %v3426_v19  ;;  %v10607_v26 = vcombine.low %v14103_v52, %v14109_v5 }
 0x26d   : > { %11854 = vmatprep.mubr.msk.bf16.mxu0 %vm1186_vm1, %v10512_v18  ;;  %11891 = vmatmul.mubr.msk.bf16.gmra.mxu1 %vm1186_vm1, %v10512_v18  ;;  %v10513_v32 = vcombine.low %v14121_v58, %v14125_v17  ;;  %2104 = vst.msk [vmem:[#allocation2 + $0x5c] sm:$0xf] %vm1167_vm2, %v11312_v62  ;;  %v14135_v31 = vld [vmem:[#allocation2 + $0x40] sm:$0xf]  ;;  %v14191_v56 = vld [vmem:[#allocation2 + $0x74] sm:$0xf]  ;;  %v3060_v53 = vor.u32 %v3059_v20, %v3056_v57 }
 0x26e   : > { %v11314_v61 = vpack.c.bf16 %v1946_v21, %v1946_v21  ;;  %2105 = vst.msk [vmem:[#allocation2 + $0x60] sm:$0xf] %vm1167_vm2, %v11313_v15  ;;  %v14137_v46 = vld [vmem:[#allocation2 + $0x44] sm:$0xf]  ;;  %v14193_v55 = vld [vmem:[#allocation2 + $0x78] sm:$0xf]  ;;  %v10520_v62 = vcombine.low %v14189_v2, %v14191_v56  ;;  %v10605_v21 = vcombine.low %v14045_v37, %v14054_v25  ;;  %v10608_v63 = vcombine.low %v14113_v34, %v14121_v58 }
 0x26f   : > { %11894 = vmatprep.mubr.msk.bf16.mxu1 %vm1186_vm1, %v10513_v32  ;;  %v14140_v16 = vld [vmem:[#allocation2 + $0x48] sm:$0xf]  ;;  %v10514_v7 = vcombine.low %v14135_v31, %v14137_v46  ;;  %v3432_v4 = vshrl.u32 %v10639_v24, 16  ;;  %v3435_v54 = vshll.u32 %v10639_v24, 16  ;;  %v3046_v9 = vshrl.u32 %v10603_v13, 16 }
 0x270   : > { %2106 = vst.msk [vmem:[#allocation2 + $0x64] sm:$0xf] %vm1167_vm2, %v11314_v61  ;;  %v14142_v36 = vld [vmem:[#allocation2 + $0x4c] sm:$0xf]  ;;  %v2147_v10 = vld [vmem:[#allocation2 + $0x7c] sm:$0xf] }
 0x271   : > { %v10515_v48 = vcombine.low %v14140_v16, %v14142_v36  ;;  %v14152_v49 = vld [vmem:[#allocation2 + $0x50] sm:$0xf]  ;;  %v3049_v59 = vshll.u32 %v10603_v13, 16  ;;  %v3434_v51 = vrot.slane %v3432_v4, 3  ;;  %v3437_v18 = vrot.slane %v3435_v54, 4 }
 0x272   : > { %v14154_v41 = vld [vmem:[#allocation2 + $0x54] sm:$0xf]  ;;  %v3048_v61 = vrot.slane %v3046_v9, 3  ;;  %v3063_v37 = vshrl.u32 %v10605_v21, 16  ;;  %v3066_v25 = vshll.u32 %v10605_v21, 16  ;;  %v3081_v58 = vshrl.u32 %v10607_v26, 16 }
 0x273   : > { %11855 = vmatmul.mubr.msk.bf16.gmra.mxu0 %vm1186_vm1, %v10513_v32  ;;  %v14156_v6 = vld [vmem:[#allocation2 + $0x58] sm:$0xf]  ;;  %v10516_v29 = vcombine.low %v14152_v49, %v14154_v41  ;;  %v3438_v15 = vor.u32 %v3437_v18, %v3434_v51  ;;  %v10521_v32 = vcombine.low %v14193_v55, %v2147_v10  ;;  %v14223_v13 = vld [vmem:[#allocation2 + $0x88] sm:$0xf]  ;;  %v14225_v19 = vld [vmem:[#allocation2 + $0x8c] sm:$0xf]  ;;  %v10609_v51 = vcombine.low %v14125_v17, %v14135_v31 }
 0x274   : > { %11858 = vmatprep.mubr.msk.bf16.mxu0 %vm1186_vm1, %v10514_v7  ;;  %v14158_v1 = vld [vmem:[#allocation2 + $0x5c] sm:$0xf]  ;;  %v3068_v45 = vrot.slane %v3066_v25, 4  ;;  %v14228_v52 = vld [vmem:[#allocation2 + $0x18] sm:$0xf]  ;;  %v3084_v57 = vshll.u32 %v10607_v26, 16  ;;  %v10523_v54 = vcombine.low %v14223_v13, %v14225_v19  ;;  %v10610_v31 = vcombine.low %v14137_v46, %v14140_v16 }
 0x275   : > { %11895 = vmatmul.mubr.msk.bf16.gmra.mxu1 %vm1186_vm1, %v10514_v7  ;;  %v10517_v39 = vcombine.low %v14156_v6, %v14158_v1  ;;  %v14171_v38 = vld [vmem:[#allocation2 + $0x60] sm:$0xf]  ;;  %v10606_v7 = vcombine.low %v14059_v11, %v14099_v35  ;;  %v14206_v3 = vsel %vm3044_vm4, %v3430_v8, %v3438_v15  ;;  %v14209_v42 = vsel %vm3044_vm4, %v3438_v15, %v3060_v53  ;;  %v14230_v5 = vld [vmem:[#allocation2 + $0x1c] sm:$0xf]  ;;  %v14271_v46 = vld [vmem:[%s17706_s5 + $0x28] sm:$0xff]  }
 0x276   : > { %11898 = vmatprep.mubr.msk.bf16.mxu1 %vm1186_vm1, %v10515_v48  ;;  %v3065_v35 = vrot.slane %v3063_v37, 3  ;;  %v3090_v20 = vshrl.u32 %v10608_v63, 16  ;;  %v3093_v4 = vshll.u32 %v10608_v63, 16  ;;  %v14241_v18 = vld [vmem:[#allocation2 + $0x20] sm:$0xf]  ;;  %v3083_v21 = vrot.slane %v3081_v58, 3 }
 0x277   : > { %v14173_v28 = vld [vmem:[#allocation2 + $0x64] sm:$0xf]  ;;  %v3072_v44 = vshrl.u32 %v10606_v7, 16  ;;  %v3075_v27 = vshll.u32 %v10606_v7, 16  ;;  %v3102_v26 = vshll.u32 %v10609_v51, 16  ;;  %v3108_v63 = vshrl.u32 %v10610_v31, 16 }
 0x278   : > { %v10518_v60 = vcombine.low %v14171_v38, %v14173_v28  ;;  %v3069_v34 = vor.u32 %v3068_v45, %v3065_v35  ;;  %v12735_v15 = vld [vmem:[%s17706_s5 + $0x60] sm:$0xff]   ;;  %v3092_v7 = vrot.slane %v3090_v20, 3  ;;  %v3099_v45 = vshrl.u32 %v10609_v51, 16 }
 0x279   : > { %v3074_v24 = vrot.slane %v3072_v44, 3  ;;  %v14266_v44 = vld [vmem:[#allocation2 + $0x2c] sm:$0xf] }
 0x27a   : > { %v3101_v20 = vrot.slane %v3099_v45, 3 }
 0x27b   : > { %11859 = vmatmul.mubr.msk.bf16.gmra.mxu0 %vm1186_vm1, %v10515_v48  ;;  %v3051_v48 = vrot.slane %v3049_v59, 4  ;;  %v10565_v59 = vcombine.low %v14228_v52, %v14230_v5 }
 0x27c   : > { %11862 = vmatprep.mubr.msk.bf16.mxu0 %vm1186_vm1, %v10516_v29 }
 0x27d   : > { %11899 = vmatmul.mubr.msk.bf16.gmra.mxu1 %vm1186_vm1, %v10516_v29  ;;  %v2148_v29 = vld [vmem:[#allocation2 + $0x80] sm:$0xf]  ;;  %v3052_v14 = vor.u32 %v3051_v48, %v3048_v61  ;;  %v3086_v61 = vrot.slane %v3084_v57, 4  ;;  %v3095_v48 = vrot.slane %v3093_v4, 4  ;;  %v3104_v4 = vrot.slane %v3102_v26, 4 }
 0x27e   : > { %11902 = vmatprep.mubr.msk.bf16.mxu1 %vm1186_vm1, %v10517_v39  ;;  %v14334_v26 = vld [vmem:[#allocation2 + $0x40] sm:$0xf] }
 0x27f   : > { %v3061_v12 = vsel %vm3044_vm4, %v3052_v14, %v3060_v53  ;;  %v3096_v35 = vor.u32 %v3095_v48, %v3092_v7 }
 0x283   : > { %11863 = vmatmul.mubr.msk.bf16.gmra.mxu0 %vm1186_vm1, %v10517_v39  ;;  %v14212_v39 = vld [vmem:[#allocation2 + $0x84] sm:$0xf] }
 0x284   : > { %11866 = vmatprep.mubr.msk.bf16.mxu0 %vm1186_vm1, %v10518_v60  ;;  %v10522_v11 = vcombine.low %v2148_v29, %v14212_v39  ;;  %v10640_v40 = vcombine.low %v14212_v39, %v14212_v39 }
 0x285   : > { %11903 = vmatmul.mubr.msk.bf16.gmra.mxu1 %vm1186_vm1, %v10518_v60  ;;  %v10617_v60 = vcombine.low %v2147_v10, %v2148_v29  ;;  %v14261_v29 = vld [vmem:[#allocation2 + $0x28] sm:$0xf] }
 0x286   : > { %11906 = vmatprep.mubr.msk.bf16.mxu1 %vm1186_vm1, %v10519_v30  ;;  %v3442_v17 = vshrl.u32 %v10640_v40, 16 }
 0x287   : > { %v3171_v8 = vshrl.u32 %v10617_v60, 16  ;;  %v3174_v10 = vshll.u32 %v10617_v60, 16  ;;  %v3111_v60 = vshll.u32 %v10610_v31, 16  ;;  %v10613_v31 = vcombine.low %v14158_v1, %v14171_v38  ;;  %v14336_v1 = vld [vmem:[#allocation2 + $0x44] sm:$0xf] }
 0x288   : > { %v3444_v16 = vrot.slane %v3442_v17, 3  ;;  %v14340_v38 = vld [vmem:[#allocation2 + $0x48] sm:$0xf] }
 0x289   : > { %v3173_v37 = vrot.slane %v3171_v8, 3  ;;  %v3176_v25 = vrot.slane %v3174_v10, 4  ;;  %v14311_v8 = vld [vmem:[#allocation2 + $0x38] sm:$0xf]  ;;  %v14313_v10 = vld [vmem:[#allocation2 + $0x3c] sm:$0xf] }
 0x28a   : > { %v10569_v17 = vcombine.low %v14311_v8, %v14313_v10 }
 0x28b   : > { %11867 = vmatmul.mubr.msk.bf16.gmra.mxu0 %vm1186_vm1, %v10519_v30  ;;  %v3077_v30 = vrot.slane %v3075_v27, 4  ;;  %v3445_v27 = vshll.u32 %v10640_v40, 16  ;;  %v10612_v40 = vcombine.low %v14154_v41, %v14156_v6  ;;  %v14305_v6 = vld [vmem:[#allocation2 + $0x30] sm:$0xf] }
 0x28c   : > { %11870 = vmatprep.mubr.msk.bf16.mxu0 %vm1186_vm1, %v10520_v62 }
 0x28d   : > { %11907 = vmatmul.mubr.msk.bf16.gmra.mxu1 %vm1186_vm1, %v10520_v62  ;;  %v3078_v9 = vor.u32 %v3077_v30, %v3074_v24  ;;  %v14244_v62 = vsel %vm3044_vm4, %v3060_v53, %v3069_v34  ;;  %v3447_v24 = vrot.slane %v3445_v27, 4  ;;  %v10567_v30 = vcombine.low %v14261_v29, %v14266_v44 }
 0x28e   : > { %11910 = vmatprep.mubr.msk.bf16.mxu1 %vm1186_vm1, %v10521_v32  ;;  %v3126_v7 = vshrl.u32 %v10612_v40, 16  ;;  %v3129_v48 = vshll.u32 %v10612_v40, 16 }
 0x28f   : > { %v14257_v53 = vsel %vm3044_vm4, %v3069_v34, %v3078_v9  ;;  %v10611_v34 = vcombine.low %v14142_v36, %v14152_v49  ;;  %v3448_v58 = vor.u32 %v3447_v24, %v3444_v16  ;;  %v3110_v49 = vrot.slane %v3108_v63, 3 }
 0x290   : > { %v10614_v16 = vcombine.low %v14173_v28, %v14175_v23  ;;  %v3131_v45 = vrot.slane %v3129_v48, 4  ;;  %v3135_v23 = vshrl.u32 %v10613_v31, 16  ;;  %v3138_v63 = vshll.u32 %v10613_v31, 16 }
 0x291   : > { %v3117_v51 = vshrl.u32 %v10611_v34, 16 }
 0x292   : > { %v3144_v24 = vshrl.u32 %v10614_v16, 16 }
 0x293   : > { %11871 = vmatmul.mubr.msk.bf16.gmra.mxu0 %vm1186_vm1, %v10521_v32  ;;  %v14249_v32 = vld [vmem:[#allocation2 + $0x24] sm:$0xf] }
 0x294   : > { %11874 = vmatprep.mubr.msk.bf16.mxu0 %vm1186_vm1, %v10522_v11  ;;  %v10566_v14 = vcombine.low %v14241_v18, %v14249_v32 }
 0x295   : > { %11911 = vmatmul.mubr.msk.bf16.gmra.mxu1 %vm1186_vm1, %v10522_v11  ;;  %v3087_v11 = vor.u32 %v3086_v61, %v3083_v21  ;;  %v3120_v21 = vshll.u32 %v10611_v34, 16 }
 0x296   : > { %11954 = vmatprep.mubr.msk.bf16.mxu1 %vm1186_vm1, %v3061_v12  ;;  %v14276_v12 = vor.u32 %v3176_v25, %v3173_v37  ;;  %v3119_v25 = vrot.slane %v3117_v51, 3 }
 0x297   : > { %v14289_v57 = vsel %vm3044_vm4, %v3078_v9, %v3087_v11  ;;  %v14294_v36 = vsel %vm3044_vm4, %v3087_v11, %v3096_v35  ;;  %v14307_v9 = vld [vmem:[#allocation2 + $0x34] sm:$0xf]  ;;  %v3128_v11 = vrot.slane %v3126_v7, 3 }
 0x298   : > { %v14303_v41 = vsel %vm3044_vm4, %v14276_v12, %v3448_v58  ;;  %v10615_v58 = vcombine.low %v14177_v50, %v14189_v2  ;;  %v14364_v50 = vld [vmem:[#allocation2 + $0x54] sm:$0xf]  ;;  %v14368_v2 = vld [vmem:[#allocation2 + $0x58] sm:$0xf] }
 0x29b   : > { %11875 = vmatmul.mubr.msk.bf16.gmra.mxu0 %vm1186_vm1, %v10523_v54  ;;  %v3113_v54 = vrot.slane %v3111_v60, 4  ;;  %v10570_v60 = vcombine.low %v14334_v26, %v14336_v1 }
 0x29c   : > { %11918 = vmatprep.mubr.msk.bf16.mxu0 %vm1186_vm1, %v10565_v59  ;;  %v3105_v59 = vor.u32 %v3104_v4, %v3101_v20  ;;  %v3137_v20 = vrot.slane %v3135_v23, 3  ;;  %v3140_v4 = vrot.slane %v3138_v63, 4 }
 0x29d   : > { %11955 = vmatmul.mubr.msk.bf16.vlgmr.msra.gmra.mxu1 %vm1186_vm1, %v14244_v62  ;;  %v3114_v61 = vor.u32 %v3113_v54, %v3110_v49  ;;  %v10616_v49 = vcombine.low %v14191_v56, %v14193_v55  ;;  %v3153_v55 = vshrl.u32 %v10615_v58, 16 }
 0x29e   : > { %11958 = vmatprep.mubr.msk.bf16.mxu1 %vm1186_vm1, %v14257_v53  ;;  %12023 = vmatpush3.bf16.msra.mxu1 %v14069_v22  ;;  %v12718_v22 = vld [vmem:[%s17706_s5] sm:$0xff]   ;;  %v14325_v37 = vsel %vm3044_vm4, %v3096_v35, %v3105_v59  ;;  %v14342_v35 = vld [vmem:[#allocation2 + $0x4c] sm:$0xf]  ;;  %v3141_v56 = vor.u32 %v3140_v4, %v3137_v20  ;;  %v3632_v4 = vld [vmem:[#allocation2 + $0x14] sm:$0x8] }
 0x29f   : > { %12024 = vmatprep.subr.bf16.mxu1 %v12735_v15  ;;  %v14332_v27 = vsel %vm3044_vm4, %v3105_v59, %v3114_v61  ;;  %v10571_v34 = vcombine.low %v14340_v38, %v14342_v35  ;;  %v3146_v59 = vrot.slane %v3144_v24, 3  ;;  %v3165_v31 = vshll.u32 %v10616_v49, 16  ;;  %v14390_v24 = vld [vmem:[#allocation2 + $0x64] sm:$0xf] }
 0x2a1   : > { %v3167_v63 = vrot.slane %v3165_v31, 4  ;;  %v14416_v31 = vld [vmem:[#allocation2 + $0x74] sm:$0xf] }
 0x2a2   : > { %12025 = vmatpush3.bf16.msra.mxu1 %v12735_v15  ;;  %v10568_v15 = vcombine.low %v14305_v6, %v14307_v9 }
 0x2a3   : > { %11919 = vmatmul.mubr.msk.bf16.vlgmr.msra.gmra.mxu0 %vm1186_vm1, %v10566_v14  ;;  %12094 = vmatprep.subr.bf16.mxu1 %v14271_v46  ;;  %v3122_v14 = vrot.slane %v3120_v21, 4  ;;  %v14362_v21 = vld [vmem:[#allocation2 + $0x50] sm:$0xf] }
 0x2a4   : > { %11987 = vmatpush3.bf16.msra.mxu0 %v14076_v47  ;;  %11922 = vmatprep.mubr.msk.bf16.mxu0 %vm1186_vm1, %v10567_v30  ;;  %v14299_v47 = vld [vmem:[%s17706_s5 + $0x58] sm:$0xff]   ;;  %v3147_v30 = vshll.u32 %v10614_v16, 16  ;;  %v10572_v7 = vcombine.low %v14362_v21, %v14364_v50 }
 0x2a5   : > { %11959 = vmatmul.mubr.msk.bf16.gmra.mxu1 %vm1186_vm1, %v14289_v57  ;;  %11988 = vmatprep.subr.bf16.mxu0 %v12718_v22  ;;  %v3123_v28 = vor.u32 %v3122_v14, %v3119_v25  ;;  %v10618_v14 = vcombine.low %v14212_v39, %v14223_v13  ;;  %v14394_v39 = vld [vmem:[#allocation2 + $0x68] sm:$0xf]  ;;  %v14396_v13 = vld [vmem:[#allocation2 + $0x6c] sm:$0xf] }
 0x2a6   : > { %11962 = vmatprep.mubr.msk.bf16.mxu1 %vm1186_vm1, %v14294_v36  ;;  %v3149_v51 = vrot.slane %v3147_v30, 4 }
 0x2a7   : > { %v14353_v40 = vsel %vm3044_vm4, %v3114_v61, %v3123_v28  ;;  %v3156_v61 = vshll.u32 %v10615_v58, 16  ;;  %v3180_v30 = vshrl.u32 %v10618_v14, 16 }
 0x2a8   : > { %11989 = vmatpush3.bf16.msra.mxu0 %v12718_v22  ;;  %v3132_v22 = vor.u32 %v3131_v45, %v3128_v11  ;;  %v3150_v48 = vor.u32 %v3149_v51, %v3146_v59  ;;  %v3155_v11 = vrot.slane %v3153_v55, 3  ;;  %v10619_v59 = vcombine.low %v14225_v19, %v14225_v19 }
 0x2a9   : > { %12058 = vmatprep.subr.bf16.mxu0 %v14299_v47  ;;  %v3158_v45 = vrot.slane %v3156_v61, 4  ;;  %v10663_v61 = vcombine.low %v3632_v4, %v14228_v52  ;;  %v14441_v4 = vld [vmem:[#allocation2 + $0x80] sm:$0xf] }
 0x2aa   : > { %v14360_v54 = vsel %vm3044_vm4, %v3123_v28, %v3132_v22  ;;  %v14381_v16 = vsel %vm3044_vm4, %v3132_v22, %v3141_v56  ;;  %v14386_v28 = vsel %vm3044_vm4, %v3141_v56, %v3150_v48  ;;  %v3182_v56 = vrot.slane %v3180_v30, 3 }
 0x2ab   : > { %11923 = vmatmul.mubr.msk.bf16.gmra.mxu0 %vm1186_vm1, %v10568_v15  ;;  %v14370_v15 = vld [vmem:[#allocation2 + $0x5c] sm:$0xf]  ;;  %v3159_v22 = vor.u32 %v3158_v45, %v3155_v11  ;;  %v3658_v11 = vshrl.u32 %v10663_v61, 16  ;;  %v3661_v45 = vshll.u32 %v10663_v61, 16  ;;  %v10665_v30 = vcombine.low %v14249_v32, %v14261_v29  ;;  %v14447_v32 = vld [vmem:[#allocation2 + $0x84] sm:$0xf] }
 0x2ac   : > { %11926 = vmatprep.mubr.msk.bf16.mxu0 %vm1186_vm1, %v10569_v17  ;;  %v3162_v17 = vshrl.u32 %v10616_v49, 16  ;;  %v10573_v25 = vcombine.low %v14368_v2, %v14370_v15  ;;  %v10575_v49 = vcombine.low %v14394_v39, %v14396_v13  ;;  %v14452_v61 = vld [vmem:[#allocation2 + $0x8c] sm:$0xf] }
 0x2ad   : > { %11963 = vmatmul.mubr.msk.bf16.gmra.mxu1 %vm1186_vm1, %v14325_v37  ;;  %v14407_v51 = vsel %vm3044_vm4, %v3150_v48, %v3159_v22  ;;  %v14423_v48 = vld [vmem:[#allocation2 + $0x78] sm:$0xf]  ;;  %v3660_v29 = vrot.slane %v3658_v11, 3 }
 0x2ae   : > { %11966 = vmatprep.mubr.msk.bf16.mxu1 %vm1186_vm1, %v14332_v27  ;;  %v3164_v23 = vrot.slane %v3162_v17, 3  ;;  %v14414_v17 = vld [vmem:[#allocation2 + $0x70] sm:$0xf] }
 0x2af   : > { %v10576_v52 = vcombine.low %v14414_v17, %v14416_v31 }
 0x2b0   : > { %v3168_v20 = vor.u32 %v3167_v63, %v3164_v23 }
 0x2b2   : > { %v14419_v19 = vsel %vm3044_vm4, %v3159_v22, %v3168_v20 }
 0x2b3   : > { %11927 = vmatmul.mubr.msk.bf16.gmra.mxu0 %vm1186_vm1, %v10570_v60  ;;  %v14388_v60 = vld [vmem:[#allocation2 + $0x60] sm:$0xf] }
 0x2b4   : > { %11930 = vmatprep.mubr.msk.bf16.mxu0 %vm1186_vm1, %v10571_v34  ;;  %v3183_v34 = vshll.u32 %v10618_v14, 16  ;;  %v10574_v58 = vcombine.low %v14388_v60, %v14390_v24  ;;  %v3192_v14 = vshll.u32 %v10619_v59, 16 }
 0x2b5   : > { %11967 = vmatmul.mubr.msk.bf16.gmra.mxu1 %vm1186_vm1, %v14353_v40 }
 0x2b6   : > { %11970 = vmatprep.mubr.msk.bf16.mxu1 %vm1186_vm1, %v14360_v54  ;;  %v3185_v55 = vrot.slane %v3183_v34, 4  ;;  %v10666_v34 = vcombine.low %v14266_v44, %v14305_v6  ;;  %v3663_v44 = vrot.slane %v3661_v45, 4 }
 0x2b8   : > { %v3684_v0 = vshrl.u32 %v10666_v34, 16  ;;  %v3687_v43 = vshll.u32 %v10666_v34, 16 }
 0x2bb   : > { %11931 = vmatmul.mubr.msk.bf16.gmra.mxu0 %vm1186_vm1, %v10572_v7  ;;  %v10664_v7 = vcombine.low %v14230_v5, %v14241_v18  ;;  %v3186_v5 = vor.u32 %v3185_v55, %v3182_v56  ;;  %v3189_v18 = vshrl.u32 %v10619_v59, 16  ;;  %v3194_v56 = vrot.slane %v3192_v14, 4 }
 0x2bc   : > { %11934 = vmatprep.mubr.msk.bf16.mxu0 %vm1186_vm1, %v10573_v25  ;;  %v14425_v25 = vld [vmem:[#allocation2 + $0x7c] sm:$0xf]  ;;  %v3664_v14 = vor.u32 %v3663_v44, %v3660_v29  ;;  %v14467_v29 = vld [vmem:[#allocation2 + $0x90] sm:$0xf]  ;;  %v14469_v44 = vld [vmem:[#allocation2 + $0x94] sm:$0xf] }
 0x2bd   : > { %11971 = vmatmul.mubr.msk.bf16.gmra.mxu1 %vm1186_vm1, %v14381_v16  ;;  %v3666_v23 = vshrl.u32 %v10664_v7, 16  ;;  %v3669_v63 = vshll.u32 %v10664_v7, 16  ;;  %v10577_v22 = vcombine.low %v14423_v48, %v14425_v25  ;;  %v3191_v59 = vrot.slane %v3189_v18, 3 }
 0x2be   : > { %11974 = vmatprep.mubr.msk.bf16.mxu1 %vm1186_vm1, %v14386_v28  ;;  %v3675_v7 = vshrl.u32 %v10665_v30, 16 }
 0x2bf   : > { %v3668_v6 = vrot.slane %v3666_v23, 3  ;;  %v3671_v55 = vrot.slane %v3669_v63, 4  ;;  %v3195_v18 = vor.u32 %v3194_v56, %v3191_v59  ;;  %v10667_v63 = vcombine.low %v14307_v9, %v14311_v8 }
 0x2c0   : > { %v3677_v45 = vrot.slane %v3675_v7, 3  ;;  %v3686_v59 = vrot.slane %v3684_v0, 3  ;;  %v3689_v56 = vrot.slane %v3687_v43, 4  ;;  %v10580_v9 = vcombine.low %v14467_v29, %v14469_v44  ;;  %v12742_v43 = vld [vmem:[%s17706_s5 + $0x20] sm:$0xff]  }
 0x2c1   : > { %v10669_v0 = vcombine.low %v14336_v1, %v14340_v38 }
 0x2c3   : > { %11935 = vmatmul.mubr.msk.bf16.gmra.mxu0 %vm1186_vm1, %v10574_v58  ;;  %v14439_v58 = vsel %vm3044_vm4, %v3168_v20, %v14276_v12  ;;  %v14450_v20 = vld [vmem:[#allocation2 + $0x88] sm:$0xf]  ;;  %v3714_v38 = vshll.u32 %v10669_v0, 16 }
 0x2c4   : > { %11938 = vmatprep.mubr.msk.bf16.mxu0 %vm1186_vm1, %v10575_v49  ;;  %v3187_v49 = vsel %vm3044_vm4, %v14276_v12, %v3186_v5  ;;  %v10578_v12 = vcombine.low %v14441_v4, %v14447_v32  ;;  %v10579_v11 = vcombine.low %v14450_v20, %v14452_v61 }
 0x2c5   : > { %11975 = vmatmul.mubr.msk.bf16.gmra.mxu1 %vm1186_vm1, %v14407_v51 }
 0x2c6   : > { %11978 = vmatprep.mubr.msk.bf16.mxu1 %vm1186_vm1, %v14419_v19 }
 0x2cb   : > { %11939 = vmatmul.mubr.msk.bf16.gmra.mxu0 %vm1186_vm1, %v10576_v52  ;;  %v3678_v52 = vshll.u32 %v10665_v30, 16  ;;  %v3196_v30 = vsel %vm3044_vm4, %v3186_v5, %v3195_v18  ;;  %v3693_v5 = vshrl.u32 %v10667_v63, 16  ;;  %v10670_v18 = vcombine.low %v14342_v35, %v14362_v21  ;;  %v12737_v35 = vld [vmem:[%s17706_s5 + $0x50] sm:$0xff]  }
 0x2cc   : > { %11942 = vmatprep.mubr.msk.bf16.mxu0 %vm1186_vm1, %v10577_v22  ;;  %v3672_v22 = vor.u32 %v3671_v55, %v3668_v6  ;;  %v3696_v6 = vshll.u32 %v10667_v63, 16  ;;  %v3690_v55 = vor.u32 %v3689_v56, %v3686_v59 }
 0x2cd   : > { %11979 = vmatmul.mubr.msk.bf16.gmra.mxu1 %vm1186_vm1, %v14439_v58  ;;  %v3680_v23 = vrot.slane %v3678_v52, 4  ;;  %v3695_v52 = vrot.slane %v3693_v5, 3  ;;  %v3723_v63 = vshll.u32 %v10670_v18, 16 }
 0x2ce   : > { %11982 = vmatprep.mubr.msk.bf16.mxu1 %vm1186_vm1, %v3187_v49  ;;  %v10668_v49 = vcombine.low %v14313_v10, %v14334_v26  ;;  %v3673_v34 = vsel %vm3044_vm4, %v3664_v14, %v3672_v22 }
 0x2cf   : > { %v3681_v8 = vor.u32 %v3680_v23, %v3677_v45  ;;  %v3720_v23 = vshrl.u32 %v10670_v18, 16  ;;  %v3725_v56 = vrot.slane %v3723_v63, 4  ;;  %v10678_v63 = vcombine.low %v14452_v61, %v14467_v29 }
 0x2d0   : > { %v3702_v10 = vshrl.u32 %v10668_v49, 16  ;;  %v3705_v26 = vshll.u32 %v10668_v49, 16  ;;  %v3716_v49 = vrot.slane %v3714_v38, 4  ;;  %v10679_v61 = vcombine.low %v14469_v44, %v14469_v44 }
 0x2d1   : > { %v3682_v7 = vsel %vm3044_vm4, %v3672_v22, %v3681_v8  ;;  %v3691_v14 = vsel %vm3044_vm4, %v3681_v8, %v3690_v55  ;;  %v3722_v59 = vrot.slane %v3720_v23, 3  ;;  %v10673_v8 = vcombine.low %v14390_v24, %v14394_v39 }
 0x2d2   : > { %v3707_v45 = vrot.slane %v3705_v26, 4 }
 0x2d3   : > { %11943 = vmatmul.mubr.msk.bf16.gmra.mxu0 %vm1186_vm1, %v10578_v12  ;;  %v3698_v12 = vrot.slane %v3696_v6, 4  ;;  %v3747_v24 = vshrl.u32 %v10673_v8, 16  ;;  %v3750_v39 = vshll.u32 %v10673_v8, 16 }
 0x2d4   : > { %11946 = vmatprep.mubr.msk.bf16.mxu0 %vm1186_vm1, %v10579_v11  ;;  %v3704_v11 = vrot.slane %v3702_v10, 3  ;;  %v10674_v10 = vcombine.low %v14396_v13, %v14414_v17  ;;  %v10675_v13 = vcombine.low %v14416_v31, %v14423_v48 }
 0x2d5   : > { %11983 = vmatmul.mubr.msk.bf16.gmra.mxu1 %vm1186_vm1, %v3196_v30  ;;  %v3699_v1 = vor.u32 %v3698_v12, %v3695_v52  ;;  %v3749_v12 = vrot.slane %v3747_v24, 3  ;;  %v3752_v18 = vrot.slane %v3750_v39, 4 }
 0x2d6   : > { %12026 = vmatprep.mubr.msk.bf16.mxu1 %vm1186_vm1, %v3673_v34  ;;  %v3708_v22 = vor.u32 %v3707_v45, %v3704_v11  ;;  %v10672_v34 = vcombine.low %v14370_v15, %v14388_v60  ;;  %v3759_v52 = vshll.u32 %v10674_v10, 16  ;;  %v3765_v31 = vshrl.u32 %v10675_v13, 16 }
 0x2d7   : > { %v3700_v21 = vsel %vm3044_vm4, %v3690_v55, %v3699_v1  ;;  %v3768_v48 = vshll.u32 %v10675_v13, 16 }
 0x2d8   : > { %v3738_v15 = vshrl.u32 %v10672_v34, 16  ;;  %v3741_v60 = vshll.u32 %v10672_v34, 16 }
 0x2d9   : > { %v3770_v23 = vrot.slane %v3768_v48, 4 }
 0x2db   : > { %11947 = vmatmul.mubr.msk.bf16.gmra.mxu0 %vm1186_vm1, %v10580_v9  ;;  %v3726_v9 = vor.u32 %v3725_v56, %v3722_v59 }
 0x2dc   : > { %11990 = vmatprep.mubr.msk.bf16.mxu0 %vm1186_vm1, %v14206_v3  ;;  %v3711_v3 = vshrl.u32 %v10669_v0, 16  ;;  %v3743_v0 = vrot.slane %v3741_v60, 4 }
 0x2dd   : > { %12027 = vmatmul.mubr.msk.bf16.vlgmr.msra.gmra.mxu1 %vm1186_vm1, %v3682_v7 }
 0x2de   : > { %12030 = vmatprep.mubr.msk.bf16.mxu1 %vm1186_vm1, %v3691_v14  ;;  %12095 = vmatpush3.bf16.msra.mxu1 %v14271_v46  ;;  %v10671_v46 = vcombine.low %v14364_v50, %v14368_v2  ;;  %v3713_v30 = vrot.slane %v3711_v3, 3  ;;  %v10676_v14 = vcombine.low %v14425_v25, %v14441_v4  ;;  %v10677_v25 = vcombine.low %v14447_v32, %v14450_v20 }
 0x2df   : > { %12096 = vmatprep.subr.bf16.mxu1 %v12742_v43 }
 0x2e0   : > { %v3729_v50 = vshrl.u32 %v10671_v46, 16  ;;  %v3732_v2 = vshll.u32 %v10671_v46, 16  ;;  %v3777_v38 = vshll.u32 %v10676_v14, 16  ;;  %v3783_v32 = vshrl.u32 %v10677_v25, 16 }
 0x2e1   : > { %v3786_v20 = vshll.u32 %v10677_v25, 16 }
 0x2e2   : > { %12097 = vmatpush3.bf16.msra.mxu1 %v12742_v43  ;;  %v3731_v6 = vrot.slane %v3729_v50, 3  ;;  %v3734_v55 = vrot.slane %v3732_v2, 4  ;;  %v3740_v43 = vrot.slane %v3738_v15, 3  ;;  %v3785_v34 = vrot.slane %v3783_v32, 3  ;;  %v12740_v50 = vld [vmem:[#allocation2 + $0x8] sm:$0xff]   ;;  %v12739_v15 = vld [vmem:[#allocation2 + $0x10] sm:$0xff]  }
 0x2e3   : > { %11991 = vmatmul.mubr.msk.bf16.vlgmr.msra.gmra.mxu0 %vm1186_vm1, %v14209_v42  ;;  %12166 = vmatprep.subr.mxu1 %v17776_v33  ;;  %v3709_v42 = vsel %vm3044_vm4, %v3699_v1, %v3708_v22  ;;  %v3761_v1 = vrot.slane %v3759_v52, 4  ;;  %v3801_v2 = vshrl.u32 %v10679_v61, 16  ;;  %v4620_v60 = vshll.u32 %v12740_v50, 16 }
 0x2e4   : > { %12059 = vmatpush3.bf16.msra.mxu0 %v14299_v47  ;;  %11994 = vmatprep.mubr.msk.bf16.mxu0 %vm1186_vm1, %v14244_v62  ;;  %v14508_v47 = vld [vmem:[%s17706_s5 + $0x88] sm:$0xff]   ;;  %v3717_v62 = vor.u32 %v3716_v49, %v3713_v30  ;;  %v3744_v7 = vor.u32 %v3743_v0, %v3740_v43  ;;  %v3795_v49 = vshll.u32 %v10678_v63, 16  ;;  %v12741_v43 = vld [vmem:[#allocation2 + $0x18] sm:$0xff]  }
 0x2e5   : > { %12031 = vmatmul.mubr.msk.bf16.gmra.mxu1 %vm1186_vm1, %v3700_v21  ;;  %12060 = vmatprep.subr.bf16.mxu0 %v12737_v35  ;;  %v3779_v21 = vrot.slane %v3777_v38, 4  ;;  %v3803_v8 = vrot.slane %v3801_v2, 3  ;;  %v4264_v24 = vshll.u32 %v12741_v43, 16  ;;  %v12749_v2 = vld [vmem:[#allocation2 + $0x48] sm:$0xff]  }
 0x2e6   : > { %12034 = vmatprep.mubr.msk.bf16.mxu1 %vm1186_vm1, %v3709_v42  ;;  %v3718_v5 = vsel %vm3044_vm4, %v3708_v22, %v3717_v62  ;;  %v3727_v26 = vsel %vm3044_vm4, %v3717_v62, %v3726_v9  ;;  %v3767_v22 = vrot.slane %v3765_v31, 3  ;;  %v3788_v42 = vrot.slane %v3786_v20, 4 }
 0x2e7   : > { %v3797_v62 = vrot.slane %v3795_v49, 4  ;;  %v4266_v52 = vrot.slane %v4264_v24, 1  ;;  %v12751_v24 = vld [vmem:[#allocation2 + $0x58] sm:$0xff]  }
 0x2e8   : > { %12061 = vmatpush3.bf16.msra.mxu0 %v12737_v35 }
 0x2e9   : > { %12130 = vmatprep.subr.bf16.mxu0 %v14508_v47 }
 0x2eb   : > { %11995 = vmatmul.mubr.msk.bf16.gmra.mxu0 %vm1186_vm1, %v14257_v53  ;;  %v3735_v53 = vor.u32 %v3734_v55, %v3731_v6  ;;  %v4259_v55 = vshll.u32 %v12739_v15, 16 }
 0x2ec   : > { %11998 = vmatprep.mubr.msk.bf16.mxu0 %vm1186_vm1, %v14289_v57  ;;  %v3756_v57 = vshrl.u32 %v10674_v10, 16  ;;  %v4618_v10 = vshrl.u32 %v12740_v50, 16 }
 0x2ed   : > { %12035 = vmatmul.mubr.msk.bf16.gmra.mxu1 %vm1186_vm1, %v3718_v5  ;;  %v3736_v17 = vsel %vm3044_vm4, %v3726_v9, %v3735_v53  ;;  %v3745_v11 = vsel %vm3044_vm4, %v3735_v53, %v3744_v7  ;;  %v3804_v9 = vshll.u32 %v10679_v61, 16  ;;  %v4261_v53 = vrot.slane %v4259_v55, 1  ;;  %v12750_v55 = vld [vmem:[#allocation2 + $0x50] sm:$0xff]  }
 0x2ee   : > { %12038 = vmatprep.mubr.msk.bf16.mxu1 %vm1186_vm1, %v3727_v26  ;;  %v3758_v45 = vrot.slane %v3756_v57, 3  ;;  %v4622_v26 = vrot.slane %v4620_v60, 1  ;;  %v4257_v57 = vshrl.u32 %v12739_v15, 16 }
 0x2ef   : > { %v3806_v5 = vrot.slane %v3804_v9, 4 }
 0x2f0   : > { %v3762_v3 = vor.u32 %v3761_v1, %v3758_v45 }
 0x2f1   : > { %v3807_v0 = vor.u32 %v3806_v5, %v3803_v8 }
 0x2f3   : > { %11999 = vmatmul.mubr.msk.bf16.gmra.mxu0 %vm1186_vm1, %v14294_v36  ;;  %v3753_v36 = vor.u32 %v3752_v18, %v3749_v12  ;;  %v4262_v12 = vor.u32 %v4261_v53, %v4257_v57  ;;  %v4268_v18 = vshrl.u32 %v12741_v43, 16 }
 0x2f4   : > { %12002 = vmatprep.mubr.msk.bf16.mxu0 %vm1186_vm1, %v14325_v37  ;;  %v3774_v37 = vshrl.u32 %v10676_v14, 16 }
 0x2f5   : > { %12039 = vmatmul.mubr.msk.bf16.gmra.mxu1 %vm1186_vm1, %v3736_v17  ;;  %v3754_v4 = vsel %vm3044_vm4, %v3744_v7, %v3753_v36  ;;  %v3763_v35 = vsel %vm3044_vm4, %v3753_v36, %v3762_v3  ;;  %v12745_v17 = vld [vmem:[#allocation2 + $0x28] sm:$0xff]  }
 0x2f6   : > { %12042 = vmatprep.mubr.msk.bf16.mxu1 %vm1186_vm1, %v3745_v11  ;;  %v3776_v46 = vrot.slane %v3774_v37, 3  ;;  %v4280_v1 = vshll.u32 %v12745_v17, 16  ;;  %v4284_v20 = vshrl.u32 %v12745_v17, 16 }
 0x2f8   : > { %v3780_v30 = vor.u32 %v3779_v21, %v3776_v46 }
 0x2fb   : > { %12003 = vmatmul.mubr.msk.bf16.gmra.mxu0 %vm1186_vm1, %v14332_v27  ;;  %v3771_v27 = vor.u32 %v3770_v23, %v3767_v22 }
 0x2fc   : > { %12006 = vmatprep.mubr.msk.bf16.mxu0 %vm1186_vm1, %v14353_v40  ;;  %v3792_v40 = vshrl.u32 %v10678_v63, 16 }
 0x2fd   : > { %12043 = vmatmul.mubr.msk.bf16.gmra.mxu1 %vm1186_vm1, %v3754_v4  ;;  %v3772_v29 = vsel %vm3044_vm4, %v3762_v3, %v3771_v27  ;;  %v3781_v59 = vsel %vm3044_vm4, %v3771_v27, %v3780_v30  ;;  %v4267_v3 = vsel %vm4255_vm5, %v4262_v12, %v4266_v52  ;;  %v12746_v4 = vld [vmem:[#allocation2 + $0x30] sm:$0xff]   ;;  %v12747_v27 = vld [vmem:[#allocation2 + $0x38] sm:$0xff]  }
 0x2fe   : > { %12046 = vmatprep.mubr.msk.bf16.mxu1 %vm1186_vm1, %v3763_v35  ;;  %v3794_v56 = vrot.slane %v3792_v40, 3  ;;  %v4282_v35 = vrot.slane %v4280_v1, 1  ;;  %v4296_v61 = vshll.u32 %v12747_v27, 16 }
 0x300   : > { %v3798_v44 = vor.u32 %v3797_v62, %v3794_v56  ;;  %v4286_v40 = vor.u32 %v4284_v20, %v4282_v35  ;;  %v4292_v62 = vshrl.u32 %v12746_v4, 16  ;;  %v4298_v50 = vrot.slane %v4296_v61, 1 }
 0x301   : > { %v4332_v20 = vshrl.u32 %v12751_v24, 16 }
 0x302   : > { %v3808_v39 = vsel %vm3044_vm4, %v3798_v44, %v3807_v0 }
 0x303   : > { %12007 = vmatmul.mubr.msk.bf16.gmra.mxu0 %vm1186_vm1, %v14360_v54  ;;  %v3789_v54 = vor.u32 %v3788_v42, %v3785_v34 }
 0x304   : > { %12010 = vmatprep.mubr.msk.bf16.mxu0 %vm1186_vm1, %v14381_v16 }
 0x305   : > { %12047 = vmatmul.mubr.msk.bf16.gmra.mxu1 %vm1186_vm1, %v3772_v29  ;;  %v3790_v16 = vsel %vm3044_vm4, %v3780_v30, %v3789_v54  ;;  %v3799_v6 = vsel %vm3044_vm4, %v3789_v54, %v3798_v44  ;;  %v4288_v30 = vshll.u32 %v12746_v4, 16  ;;  %v12752_v29 = vld [vmem:[%s17706_s5 + $0x80] sm:$0xff]   ;;  %v4300_v44 = vshrl.u32 %v12747_v27, 16 }
 0x306   : > { %12050 = vmatprep.mubr.msk.bf16.mxu1 %vm1186_vm1, %v3781_v59  ;;  %v12748_v59 = vld [vmem:[#allocation2 + $0x40] sm:$0xff]  }
 0x307   : > { %v4290_v42 = vrot.slane %v4288_v30, 1  ;;  %v4304_v15 = vshll.u32 %v12748_v59, 16 }
 0x309   : > { %v4291_v56 = vsel %vm4255_vm5, %v4286_v40, %v4290_v42  ;;  %v4294_v9 = vor.u32 %v4292_v62, %v4290_v42 }
 0x30b   : > { %12011 = vmatmul.mubr.msk.bf16.gmra.mxu0 %vm1186_vm1, %v14386_v28  ;;  %v4623_v28 = vor.u32 %v4622_v26, %v4618_v10  ;;  %v4299_v5 = vsel %vm4255_vm5, %v4294_v9, %v4298_v50 }
 0x30c   : > { %12014 = vmatprep.mubr.msk.bf16.mxu0 %vm1186_vm1, %v14407_v51  ;;  %v12744_v51 = vld [vmem:[#allocation2 + $0x20] sm:$0xff]  }
 0x30d   : > { %12051 = vmatmul.mubr.msk.bf16.gmra.mxu1 %vm1186_vm1, %v3790_v16  ;;  %v4624_v7 = vsel %vm4255_vm5, %v4623_v28, %v4261_v53  ;;  %v4276_v63 = vshrl.u32 %v12744_v51, 16  ;;  %v4302_v16 = vor.u32 %v4300_v44, %v4298_v50  ;;  %v4308_v53 = vshrl.u32 %v12748_v59, 16 }
 0x30e   : > { %12054 = vmatprep.mubr.msk.bf16.mxu1 %vm1186_vm1, %v3799_v6  ;;  %v4306_v6 = vrot.slane %v4304_v15, 1 }
 0x310   : > { %v4307_v0 = vsel %vm4255_vm5, %v4302_v16, %v4306_v6  ;;  %v4310_v57 = vor.u32 %v4308_v53, %v4306_v6 }
 0x313   : > { %12015 = vmatmul.mubr.msk.bf16.gmra.mxu0 %vm1186_vm1, %v14419_v19  ;;  %v4272_v19 = vshll.u32 %v12744_v51, 16 }
 0x314   : > { %12018 = vmatprep.mubr.msk.bf16.mxu0 %vm1186_vm1, %v14439_v58  ;;  %v4270_v58 = vor.u32 %v4268_v18, %v4266_v52  ;;  %v4316_v52 = vshrl.u32 %v12749_v2, 16 }
 0x315   : > { %12055 = vmatmul.mubr.msk.bf16.gmra.mxu1 %vm1186_vm1, %v3808_v39  ;;  %v11884_v13 = vpop.f32.mrf.mxu1  ;;  %v4274_v37 = vrot.slane %v4272_v19, 1  ;;  %v4328_v19 = vshll.u32 %v12751_v24, 16 }
 0x316   : > { %12098 = vmatprep.mubr.msk.bf16.mxu1 %vm1186_vm1, %v4624_v7 }
 0x317   : > { %v11848_v14 = vpop.f32.mrf.mxu0  ;;  %v2517_v11 = vpop.f32.mrf.mxu1  ;;  %v4275_v23 = vsel %vm4255_vm5, %v4270_v58, %v4274_v37  ;;  %v4278_v32 = vor.u32 %v4276_v63, %v4274_v37  ;;  %v4330_v63 = vrot.slane %v4328_v19, 1 }
 0x318   : > { %v14574_v45 = vadd.f32 %v11884_v13, %v11848_v14  ;;  %v4320_v13 = vshll.u32 %v12750_v55, 16 }
 0x319   : > { %v2336_v36 = vpop.f32.mrf.mxu0  ;;  %v11885_v31 = vpop.f32.mrf.mxu1  ;;  %v4283_v34 = vsel %vm4255_vm5, %v4278_v32, %v4282_v35  ;;  %v12754_v35 = vld [vmem:[#allocation2 + $0x68] sm:$0xff]   ;;  %v4334_v61 = vor.u32 %v4332_v20, %v4330_v63 }
 0x31a   : > { %v14576_v48 = vadd.f32 %v2517_v11, %v2336_v36  ;;  %v12759_v20 = vld [vmem:[#allocation2 + $0x88] ss:$0 sps:$4 sm:$0x11]  }
 0x31b   : > { %12019 = vmatmul.mubr.msk.bf16.gmra.mxu0 %vm1186_vm1, %v14303_v41  ;;  %v11849_v38 = vpop.f32.mrf.mxu0  ;;  %v2520_v25 = vpop.f32.mrf.mxu1 }
 0x31c   : > { %12062 = vmatprep.mubr.msk.bf16.mxu0 %vm1186_vm1, %v4267_v3  ;;  %v14582_v22 = vadd.f32 %v11885_v31, %v11849_v38  ;;  %v4322_v31 = vrot.slane %v4320_v13, 1 }
 0x31d   : > { %12099 = vmatmul.mubr.msk.bf16.vlgmr.msra.gmra.mxu1 %vm1186_vm1, %v4267_v3  ;;  %v2339_v46 = vpop.f32.mrf.mxu0  ;;  %v11888_v21 = vpop.f32.mrf.mxu1  ;;  %v12753_v3 = vld [vmem:[#allocation2 + $0x60] sm:$0xff]  }
 0x31e   : > { %12102 = vmatprep.mubr.msk.bf16.mxu1 %vm1186_vm1, %v4275_v23  ;;  %v14587_v41 = vadd.f32 %v2520_v25, %v2339_v46  ;;  %v4336_v30 = vshll.u32 %v12753_v3, 16 }
 0x31f   : > { %v2533_v49 = vpop.f32.mrf.mxu1 }
 0x320   : > { %v4338_v50 = vrot.slane %v4336_v30, 1 }
 0x321   : > { %v11889_v54 = vpop.f32.mrf.mxu1 }
 0x322   : > { %v4339_v15 = vsel %vm4255_vm5, %v4334_v61, %v4338_v50 }
 0x323   : > { %12063 = vmatmul.mubr.msk.bf16.vlgmr.msra.gmra.mxu0 %vm1186_vm1, %v4275_v23  ;;  %v2536_v60 = vpop.f32.mrf.mxu1  ;;  %v4324_v23 = vshrl.u32 %v12750_v55, 16 }
 0x324   : > { %12131 = vmatpush3.bf16.msra.mxu0 %v14508_v47  ;;  %12066 = vmatprep.mubr.msk.bf16.mxu0 %vm1186_vm1, %v4283_v34  ;;  %v4312_v47 = vshll.u32 %v12749_v2, 16 }
 0x325   : > { %12103 = vmatmul.mubr.msk.bf16.gmra.mxu1 %vm1186_vm1, %v4283_v34  ;;  %12132 = vmatprep.subr.bf16.mxu0 %v12752_v29  ;;  %v4326_v32 = vor.u32 %v4324_v23, %v4322_v31  ;;  %v4344_v34 = vshll.u32 %v12754_v35, 16 }
 0x326   : > { %12106 = vmatprep.mubr.msk.bf16.mxu1 %vm1186_vm1, %v4291_v56  ;;  %v4314_v28 = vrot.slane %v4312_v47, 1  ;;  %v12756_v47 = vld [vmem:[#allocation2 + $0x78] sm:$0xff]  }
 0x327   : > { %v4346_v16 = vrot.slane %v4344_v34, 1  ;;  %v12761_v34 = vld [vmem:[#allocation2 + $0x18] sm:$0xff]  }
 0x328   : > { %12133 = vmatpush3.bf16.msra.mxu0 %v12752_v29  ;;  %v4318_v18 = vor.u32 %v4316_v52, %v4314_v28  ;;  %v4315_v1 = vsel %vm4255_vm5, %v4310_v57, %v4314_v28 }
 0x32a   : > { %v4323_v4 = vsel %vm4255_vm5, %v4318_v18, %v4322_v31  ;;  %v12757_v18 = vld [vmem:[#allocation2 + $0x80] sm:$0xff]  }
 0x32b   : > { %v11852_v8 = vpop.f32.mrf.mxu0  ;;  %12067 = vmatmul.mubr.msk.bf16.gmra.mxu0 %vm1186_vm1, %v4291_v56  ;;  %v4331_v56 = vsel %vm4255_vm5, %v4326_v32, %v4330_v63  ;;  %v4368_v23 = vshll.u32 %v12757_v18, 16  ;;  %v12758_v32 = vld [vmem:[#allocation2 + $0x88] sm:$0xff]  }
 0x32c   : > { %v14601_v10 = vadd.f32 %v11888_v21, %v11852_v8  ;;  %12070 = vmatprep.mubr.msk.bf16.mxu0 %vm1186_vm1, %v4299_v5 }
 0x32d   : > { %v2352_v26 = vpop.f32.mrf.mxu0  ;;  %v11892_v43 = vpop.f32.mrf.mxu1  ;;  %12107 = vmatmul.mubr.msk.bf16.gmra.mxu1 %vm1186_vm1, %v4299_v5 }
 0x32e   : > { %v14606_v51 = vadd.f32 %v2533_v49, %v2352_v26  ;;  %12110 = vmatprep.mubr.msk.bf16.mxu1 %vm1186_vm1, %v4307_v0  ;;  %v4348_v26 = vshrl.u32 %v12754_v35, 16 }
 0x32f   : > { %v11853_v39 = vpop.f32.mrf.mxu0  ;;  %v2549_v7 = vpop.f32.mrf.mxu1 }
 0x330   : > { %v14609_v17 = vadd.f32 %v11889_v54, %v11853_v39  ;;  %v12755_v54 = vld [vmem:[#allocation2 + $0x70] sm:$0xff]   ;;  %v4350_v28 = vor.u32 %v4348_v26, %v4346_v16  ;;  %v4360_v39 = vshll.u32 %v12756_v47, 16 }
 0x331   : > { %v2355_v12 = vpop.f32.mrf.mxu0  ;;  %v11893_v14 = vpop.f32.mrf.mxu1 }
 0x332   : > { %v14611_v11 = vadd.f32 %v2536_v60, %v2355_v12  ;;  %v4340_v60 = vshrl.u32 %v12753_v3, 16  ;;  %v4362_v31 = vrot.slane %v4360_v39, 1 }
 0x333   : > { %v11856_v58 = vpop.f32.mrf.mxu0  ;;  %12071 = vmatmul.mubr.msk.bf16.gmra.mxu0 %vm1186_vm1, %v4307_v0  ;;  %v2552_v36 = vpop.f32.mrf.mxu1 }
 0x334   : > { %v14615_v37 = vadd.f32 %v11892_v43, %v11856_v58  ;;  %12074 = vmatprep.mubr.msk.bf16.mxu0 %vm1186_vm1, %v4315_v1  ;;  %v4342_v55 = vor.u32 %v4340_v60, %v4338_v50  ;;  %v4352_v43 = vshll.u32 %v12755_v54, 16 }
 0x335   : > { %v2368_v38 = vpop.f32.mrf.mxu0  ;;  %v11896_v25 = vpop.f32.mrf.mxu1  ;;  %12111 = vmatmul.mubr.msk.bf16.gmra.mxu1 %vm1186_vm1, %v4315_v1 }
 0x336   : > { %v14620_v46 = vadd.f32 %v2549_v7, %v2368_v38  ;;  %12114 = vmatprep.mubr.msk.bf16.mxu1 %vm1186_vm1, %v4323_v4  ;;  %v4347_v52 = vsel %vm4255_vm5, %v4342_v55, %v4346_v16  ;;  %v4354_v12 = vrot.slane %v4352_v43, 1 }
 0x337   : > { %v11857_v21 = vpop.f32.mrf.mxu0  ;;  %v2565_v27 = vpop.f32.mrf.mxu1 }
 0x338   : > { %v14623_v40 = vadd.f32 %v11893_v14, %v11857_v21  ;;  %v4355_v1 = vsel %vm4255_vm5, %v4350_v28, %v4354_v12  ;;  %v12762_v28 = vld [vmem:[#allocation2 + $0x20] sm:$0xff]  }
 0x339   : > { %v2371_v49 = vpop.f32.mrf.mxu0  ;;  %v11897_v29 = vpop.f32.mrf.mxu1 }
 0x33a   : > { %v14625_v42 = vadd.f32 %v2552_v36, %v2371_v49  ;;  %v4356_v36 = vshrl.u32 %v12755_v54, 16  ;;  %v4372_v54 = vshrl.u32 %v12757_v18, 16 }
 0x33b   : > { %v11860_v59 = vpop.f32.mrf.mxu0  ;;  %12075 = vmatmul.mubr.msk.bf16.gmra.mxu0 %vm1186_vm1, %v4323_v4  ;;  %v2568_v62 = vpop.f32.mrf.mxu1  ;;  %v4364_v4 = vshrl.u32 %v12756_v47, 16 }
 0x33c   : > { %v14629_v2 = vadd.f32 %v11896_v25, %v11860_v59  ;;  %12078 = vmatprep.mubr.msk.bf16.mxu0 %vm1186_vm1, %v4331_v56  ;;  %v4358_v25 = vor.u32 %v4356_v36, %v4354_v12  ;;  %v4380_v36 = vshrl.u32 %v12758_v32, 16 }
 0x33d   : > { %v2384_v9 = vpop.f32.mrf.mxu0  ;;  %v11900_v44 = vpop.f32.mrf.mxu1  ;;  %12115 = vmatmul.mubr.msk.bf16.gmra.mxu1 %vm1186_vm1, %v4331_v56  ;;  %v4366_v21 = vor.u32 %v4364_v4, %v4362_v31  ;;  %v4931_v4 = vshrl.u32 %v12761_v34, 16 }
 0x33e   : > { %v14634_v8 = vadd.f32 %v2565_v27, %v2384_v9  ;;  %12118 = vmatprep.mubr.msk.bf16.mxu1 %vm1186_vm1, %v4339_v15  ;;  %v4363_v49 = vsel %vm4255_vm5, %v4358_v25, %v4362_v31  ;;  %v4376_v9 = vshll.u32 %v12758_v32, 16 }
 0x33f   : > { %v11861_v5 = vpop.f32.mrf.mxu0  ;;  %v14637_v6 = vpop.f32.mrf.mxu1 }
 0x340   : > { %v14639_v0 = vadd.f32 %v11897_v29, %v11861_v5  ;;  %v4370_v29 = vrot.slane %v4368_v23, 1  ;;  %v4933_v5 = vshll.u32 %v12761_v34, 16  ;;  %v4378_v43 = vrot.slane %v4376_v9, 1 }
 0x341   : > { %v2387_v53 = vpop.f32.mrf.mxu0  ;;  %v11901_v24 = vpop.f32.mrf.mxu1  ;;  %v4938_v23 = vshll.u32 %v12762_v28, 16 }
 0x342   : > { %v14641_v7 = vadd.f32 %v2568_v62, %v2387_v53  ;;  %v4371_v50 = vsel %vm4255_vm5, %v4366_v21, %v4370_v29  ;;  %v4374_v47 = vor.u32 %v4372_v54, %v4370_v29  ;;  %v4935_v18 = vrot.slane %v4933_v5, 1  ;;  %v12765_v5 = vld [vmem:[#allocation2 + $0x38] sm:$0xff]  }
 0x343   : > { %v11864_v57 = vpop.f32.mrf.mxu0  ;;  %12079 = vmatmul.mubr.msk.bf16.gmra.mxu0 %vm1186_vm1, %v4339_v15  ;;  %v14645_v13 = vpop.f32.mrf.mxu1  ;;  %v12760_v15 = vld [vmem:[#allocation2 + $0x90] ss:$0 sps:$4 sm:$0x11]   ;;  %v4382_v21 = vor.u32 %v4380_v36, %v4378_v43  ;;  %v4940_v54 = vrot.slane %v4938_v23, 1  ;;  %v4962_v23 = vshll.u32 %v12765_v5, 16 }
 0x344   : > { %17781 = vst [vmem:[#allocation10_spill] sm:$0xff] %v14645_v13  ;;  %v14647_v14 = vadd.f32 %v11900_v44, %v11864_v57  ;;  %12082 = vmatprep.mubr.msk.bf16.mxu0 %vm1186_vm1, %v4347_v52  ;;  %v4626_v44 = vshll.u32 %v12759_v20, 16  ;;  %v4384_v39 = vshll.u32 %v12760_v15, 16  ;;  %v4936_v32 = vor.u32 %v4935_v18, %v4931_v4  ;;  %v12774_v13 = vld [vmem:[#allocation2 + $0x80] sm:$0xff]  }
 0x345   : > { %v14650_v19 = vpop.f32.mrf.mxu0  ;;  %v11904_v58 = vpop.f32.mrf.mxu1  ;;  %12119 = vmatmul.mubr.msk.bf16.gmra.mxu1 %vm1186_vm1, %v4347_v52  ;;  %v4379_v52 = vsel %vm4255_vm5, %v4374_v47, %v4378_v43 }
 0x346   : > { %12122 = vmatprep.mubr.msk.bf16.mxu1 %vm1186_vm1, %v4355_v1  ;;  %v4386_v20 = vrot.slane %v4384_v39, 1 }
 0x347   : > { %v11865_v3 = vpop.f32.mrf.mxu0  ;;  %v14655_v38 = vpop.f32.mrf.mxu1 }
 0x348   : > { %v14657_v63 = vadd.f32 %v11901_v24, %v11865_v3  ;;  %v4628_v24 = vrot.slane %v4626_v44, 1  ;;  %v12764_v44 = vld [vmem:[#allocation2 + $0x30] sm:$0xff]   ;;  %v4387_v34 = vsel %vm4255_vm5, %v4382_v21, %v4386_v20 }
 0x349   : > { %v14659_v35 = vpop.f32.mrf.mxu0  ;;  %v11905_v27 = vpop.f32.mrf.mxu1 }
 0x34a   : > { %17782 = vst [vmem:[#allocation11_spill] sm:$0xff] %v14659_v35  ;;  %v4629_v31 = vsel %vm4255_vm5, %v4374_v47, %v4628_v24 }
 0x34b   : > { %v11868_v30 = vpop.f32.mrf.mxu0  ;;  %12083 = vmatmul.mubr.msk.bf16.gmra.mxu0 %vm1186_vm1, %v4355_v1  ;;  %v14663_v61 = vpop.f32.mrf.mxu1 }
 0x34c   : > { %17783 = vst [vmem:[#allocation12_spill] sm:$0xff] %v14663_v61  ;;  %v14665_v59 = vadd.f32 %v11904_v58, %v11868_v30  ;;  %12086 = vmatprep.mubr.msk.bf16.mxu0 %vm1186_vm1, %v4363_v49  ;;  %v12763_v58 = vld [vmem:[#allocation2 + $0x28] sm:$0xff]  }
 0x34d   : > { %v14668_v56 = vpop.f32.mrf.mxu0  ;;  %v11908_v62 = vpop.f32.mrf.mxu1  ;;  %12123 = vmatmul.mubr.msk.bf16.gmra.mxu1 %vm1186_vm1, %v4363_v49  ;;  %v4946_v29 = vshll.u32 %v12763_v58, 16 }
 0x34e   : > { %12126 = vmatprep.mubr.msk.bf16.mxu1 %vm1186_vm1, %v4371_v50 }
 0x34f   : > { %v11869_v60 = vpop.f32.mrf.mxu0  ;;  %v2613_v16 = vpop.f32.mrf.mxu1  ;;  %v4948_v47 = vrot.slane %v4946_v29, 1 }
 0x350   : > { %v14673_v55 = vadd.f32 %v11905_v27, %v11869_v60  ;;  %v4941_v60 = vsel %vm4255_vm5, %v4936_v32, %v4940_v54 }
 0x351   : > { %v14675_v26 = vpop.f32.mrf.mxu0  ;;  %v11909_v53 = vpop.f32.mrf.mxu1 }
 0x352   : > { %17784 = vst [vmem:[#allocation13_spill] sm:$0xff] %v14675_v26  ;;  %v12772_v26 = vld [vmem:[#allocation2 + $0x70] sm:$0xff]  }
 0x353   : > { %v11872_v57 = vpop.f32.mrf.mxu0  ;;  %12087 = vmatmul.mubr.msk.bf16.gmra.mxu0 %vm1186_vm1, %v4371_v50  ;;  %v14679_v12 = vpop.f32.mrf.mxu1  ;;  %v5022_v35 = vshrl.u32 %v12772_v26, 16 }
 0x354   : > { %17785 = vst [vmem:[#allocation14_spill] sm:$0xff] %v14679_v12  ;;  %v14681_v1 = vadd.f32 %v11908_v62, %v11872_v57  ;;  %12090 = vmatprep.mubr.msk.bf16.mxu0 %vm1186_vm1, %v4379_v52  ;;  %v4950_v57 = vshrl.u32 %v12763_v58, 16  ;;  %v4954_v52 = vshll.u32 %v12764_v44, 16  ;;  %v12770_v12 = vld [vmem:[#allocation2 + $0x60] sm:$0xff]  }
 0x355   : > { %v2432_v3 = vpop.f32.mrf.mxu0  ;;  %v11912_v25 = vpop.f32.mrf.mxu1  ;;  %12127 = vmatmul.mubr.msk.bf16.gmra.mxu1 %vm1186_vm1, %v4629_v31 }
 0x356   : > { %v14686_v27 = vadd.f32 %v2613_v16, %v2432_v3  ;;  %12182 = vmatprep.mubr.msk.f32.mxu1 %vm13284_vm0, %v17776_v33  ;;  %v4952_v4 = vor.u32 %v4950_v57, %v4948_v47 }
 0x357   : > { %v11873_v30 = vpop.f32.mrf.mxu0  ;;  %v2629_v49 = vpop.f32.mrf.mxu1 }
 0x358   : > { %v14690_v62 = vadd.f32 %v11909_v53, %v11873_v30  ;;  %v4942_v53 = vshrl.u32 %v12762_v28, 16  ;;  %v4956_v28 = vrot.slane %v4954_v52, 1  ;;  %v12766_v30 = vld [vmem:[#allocation2 + $0x40] sm:$0xff]  }
 0x359   : > { %v14692_v50 = vpop.f32.mrf.mxu0  ;;  %v11913_v9 = vpop.f32.mrf.mxu1 }
 0x35a   : > { %17786 = vst [vmem:[#allocation15_spill] sm:$0xff] %v14692_v50  ;;  %v4944_v18 = vor.u32 %v4942_v53, %v4940_v54  ;;  %v4964_v54 = vrot.slane %v4962_v23, 1 }
 0x35b   : > { %v11876_v15 = vpop.f32.mrf.mxu0  ;;  %12091 = vmatmul.mubr.msk.bf16.gmra.mxu0 %vm1186_vm1, %v4387_v34  ;;  %v14697_v16 = vpop.f32.mrf.mxu1  ;;  %v12767_v34 = vld [vmem:[#allocation2 + $0x48] sm:$0xff]  }
 0x35c   : > { %17787 = vst [vmem:[#allocation16_spill] sm:$0xff] %v14697_v16  ;;  %v14699_v43 = vadd.f32 %v11912_v25, %v11876_v15  ;;  %12134 = vmatprep.mubr.msk.bf16.mxu0 %vm1186_vm1, %v4941_v60  ;;  %v4949_v32 = vsel %vm4255_vm5, %v4944_v18, %v4948_v47  ;;  %v4958_v15 = vshrl.u32 %v12764_v44, 16  ;;  %v4970_v47 = vshll.u32 %v12766_v30, 16 }
 0x35d   : > { %v2448_v24 = vpop.f32.mrf.mxu0  ;;  %v14702_v39 = vpop.f32.mrf.mxu1  ;;  %v4978_v23 = vshll.u32 %v12767_v34, 16 }
 0x35e   : > { %v14704_v36 = vadd.f32 %v2629_v49, %v2448_v24  ;;  %v4957_v49 = vsel %vm4255_vm5, %v4952_v4, %v4956_v28  ;;  %v4966_v24 = vshrl.u32 %v12765_v5, 16  ;;  %v4960_v57 = vor.u32 %v4958_v15, %v4956_v28 }
 0x35f   : > { %v11877_v31 = vpop.f32.mrf.mxu0  ;;  %v14706_v3 = vpop.f32.mrf.mxu1 }
 0x360   : > { %v14708_v21 = vadd.f32 %v11913_v9, %v11877_v31  ;;  %v4968_v4 = vor.u32 %v4966_v24, %v4964_v54  ;;  %v4965_v28 = vsel %vm4255_vm5, %v4960_v57, %v4964_v54  ;;  %v4980_v24 = vrot.slane %v4978_v23, 1 }
 0x361   : > { %v14710_v25 = vpop.f32.mrf.mxu0  ;;  %v14712_v20 = vpop.f32.mrf.mxu1 }
 0x362   : > { %17788 = vst [vmem:[#allocation17_spill] sm:$0xff] %v14710_v25 }
 0x363   : > { %v11920_v58 = vpop.f32.mrf.mxu0  ;;  %12135 = vmatmul.mubr.msk.bf16.vlgmr.msra.gmra.mxu0 %vm1186_vm1, %v4949_v32  ;;  %v14717_v29 = vpop.f32.mrf.mxu1  ;;  %v4972_v32 = vrot.slane %v4970_v47, 1  ;;  %v4974_v47 = vshrl.u32 %v12766_v30, 16 }
 0x364   : > { %17789 = vst [vmem:[#allocation18_spill] sm:$0xff] %v14717_v29  ;;  %v14720_v9 = vadd.f32 %v11920_v58, %v14574_v45  ;;  %12138 = vmatprep.mubr.msk.bf16.mxu0 %vm1186_vm1, %v4957_v49  ;;  %v12768_v49 = vld [vmem:[#allocation2 + $0x50] sm:$0xff]  }
 0x365   : > { %v2855_v60 = vpop.f32.mrf.mxu0  ;;  %v14723_v53 = vpop.f32.mrf.mxu1  ;;  %v4973_v15 = vsel %vm4255_vm5, %v4968_v4, %v4972_v32  ;;  %v4986_v54 = vshll.u32 %v12768_v49, 16  ;;  %v4976_v57 = vor.u32 %v4974_v47, %v4972_v32 }
 0x366   : > { %v14726_v52 = vadd.f32 %v2855_v60, %v14576_v48 }
 0x367   : > { %v11921_v18 = vpop.f32.mrf.mxu0  ;;  %v14728_v31 = vpop.f32.mrf.mxu1  ;;  %v4981_v32 = vsel %vm4255_vm5, %v4976_v57, %v4980_v24 }
 0x368   : > { %v14731_v45 = vadd.f32 %v11921_v18, %v14582_v22  ;;  %v12769_v22 = vld [vmem:[#allocation2 + $0x58] sm:$0xff]  }
 0x369   : > { %v2858_v44 = vpop.f32.mrf.mxu0  ;;  %v14733_v58 = vpop.f32.mrf.mxu1  ;;  %v4994_v25 = vshll.u32 %v12769_v22, 16 }
 0x36a   : > { %v14736_v5 = vadd.f32 %v2858_v44, %v14587_v41  ;;  %v4982_v44 = vshrl.u32 %v12767_v34, 16 }
 0x36b   : > { %v11924_v48 = vpop.f32.mrf.mxu0  ;;  %12139 = vmatmul.mubr.msk.bf16.gmra.mxu0 %vm1186_vm1, %v4965_v28  ;;  %v14741_v60 = vpop.f32.mrf.mxu1 }
 0x36c   : > { %17790 = vst [vmem:[#allocation19_spill] sm:$0xff] %v14736_v5  ;;  %17791 = vst [vmem:[#allocation20_spill] sm:$0xff] %v14741_v60  ;;  %v14744_v18 = vadd.f32 %v11924_v48, %v14601_v10  ;;  %12142 = vmatprep.mubr.msk.bf16.mxu0 %vm1186_vm1, %v4973_v15  ;;  %v4984_v23 = vor.u32 %v4982_v44, %v4980_v24  ;;  %v4988_v48 = vrot.slane %v4986_v54, 1  ;;  %v4996_v44 = vrot.slane %v4994_v25, 1 }
 0x36d   : > { %v2871_v16 = vpop.f32.mrf.mxu0  ;;  %v14747_v41 = vpop.f32.mrf.mxu1  ;;  %v4990_v54 = vshrl.u32 %v12768_v49, 16  ;;  %v5002_v24 = vshll.u32 %v12770_v12, 16 }
 0x36e   : > { %v14750_v28 = vadd.f32 %v2871_v16, %v14606_v51  ;;  %v4989_v16 = vsel %vm4255_vm5, %v4984_v23, %v4988_v48 }
 0x36f   : > { %v11925_v4 = vpop.f32.mrf.mxu0  ;;  %v14752_v5 = vpop.f32.mrf.mxu1  ;;  %v4992_v57 = vor.u32 %v4990_v54, %v4988_v48 }
 0x370   : > { %v14755_v10 = vadd.f32 %v11925_v4, %v14609_v17  ;;  %v12771_v17 = vld [vmem:[#allocation2 + $0x68] sm:$0xff]  }
 0x371   : > { %v2874_v30 = vpop.f32.mrf.mxu0  ;;  %v14757_v15 = vpop.f32.mrf.mxu1  ;;  %v5010_v61 = vshll.u32 %v12771_v17, 16  ;;  %v4997_v48 = vsel %vm4255_vm5, %v4992_v57, %v4996_v44 }
 0x372   : > { %v14760_v34 = vadd.f32 %v2874_v30, %v14611_v11  ;;  %v4998_v30 = vshrl.u32 %v12769_v22, 16 }
 0x373   : > { %v11928_v51 = vpop.f32.mrf.mxu0  ;;  %12143 = vmatmul.mubr.msk.bf16.gmra.mxu0 %vm1186_vm1, %v4981_v32  ;;  %v14765_v47 = vpop.f32.mrf.mxu1 }
 0x374   : > { %17792 = vst [vmem:[#allocation21_spill] sm:$0xff] %v14760_v34  ;;  %17793 = vst [vmem:[#allocation22_spill] sm:$0xff] %v14765_v47  ;;  %v14768_v4 = vadd.f32 %v11928_v51, %v14615_v37  ;;  %12146 = vmatprep.mubr.msk.bf16.mxu0 %vm1186_vm1, %v4989_v16  ;;  %v5000_v25 = vor.u32 %v4998_v30, %v4996_v44  ;;  %v5004_v51 = vrot.slane %v5002_v24, 1  ;;  %v5012_v30 = vrot.slane %v5010_v61, 1 }
 0x375   : > { %v2887_v50 = vpop.f32.mrf.mxu0  ;;  %v14771_v11 = vpop.f32.mrf.mxu1  ;;  %v5006_v24 = vshrl.u32 %v12770_v12, 16  ;;  %v5018_v44 = vshll.u32 %v12772_v26, 16 }
 0x376   : > { %v14774_v32 = vadd.f32 %v2887_v50, %v14620_v46  ;;  %v5005_v50 = vsel %vm4255_vm5, %v5000_v25, %v5004_v51 }
 0x377   : > { %v11929_v23 = vpop.f32.mrf.mxu0  ;;  %v14776_v34 = vpop.f32.mrf.mxu1  ;;  %v5008_v57 = vor.u32 %v5006_v24, %v5004_v51 }
 0x378   : > { %v14779_v37 = vadd.f32 %v11929_v23, %v14623_v40  ;;  %v12773_v40 = vld [vmem:[#allocation2 + $0x78] sm:$0xff]  }
 0x379   : > { %v2890_v49 = vpop.f32.mrf.mxu0  ;;  %v14781_v16 = vpop.f32.mrf.mxu1  ;;  %v5013_v51 = vsel %vm4255_vm5, %v5008_v57, %v5012_v30  ;;  %v5030_v57 = vshrl.u32 %v12773_v40, 16 }
 0x37a   : > { %v14784_v22 = vadd.f32 %v2890_v49, %v14625_v42  ;;  %v5014_v49 = vshrl.u32 %v12771_v17, 16 }
 0x37b   : > { %v11932_v46 = vpop.f32.mrf.mxu0  ;;  %12147 = vmatmul.mubr.msk.bf16.gmra.mxu0 %vm1186_vm1, %v4997_v48  ;;  %v14789_v54 = vpop.f32.mrf.mxu1 }
 0x37c   : > { %17794 = vst [vmem:[#allocation23_spill] sm:$0xff] %v14784_v22  ;;  %17795 = vst [vmem:[#allocation24_spill] sm:$0xff] %v14789_v54  ;;  %v14792_v23 = vadd.f32 %v11932_v46, %v14629_v2  ;;  %12150 = vmatprep.mubr.msk.bf16.mxu0 %vm1186_vm1, %v5005_v50  ;;  %v5016_v61 = vor.u32 %v5014_v49, %v5012_v30  ;;  %v5026_v54 = vshll.u32 %v12773_v40, 16  ;;  %v5020_v46 = vrot.slane %v5018_v44, 1 }
 0x37d   : > { %v2903_v47 = vpop.f32.mrf.mxu0  ;;  %v14795_v42 = vpop.f32.mrf.mxu1  ;;  %v2582_v44 = vadd.f32 %v14637_v6, %v14650_v19  ;;  %v12776_v6 = vld [vmem:[#allocation2 + $0x90] sm:$0xff]  }
 0x37e   : > { %v14798_v48 = vadd.f32 %v2903_v47, %v14634_v8  ;;  %v5021_v47 = vsel %vm4255_vm5, %v5016_v61, %v5020_v46  ;;  %v5028_v49 = vrot.slane %v5026_v54, 1 }
 0x37f   : > { %v11933_v25 = vpop.f32.mrf.mxu0  ;;  %v14800_v22 = vpop.f32.mrf.mxu1 }
 0x380   : > { %v14803_v2 = vadd.f32 %v11933_v25, %v14639_v0  ;;  %v12775_v0 = vld [vmem:[#allocation2 + $0x88] sm:$0xff]  }
 0x381   : > { %v2906_v12 = vpop.f32.mrf.mxu0  ;;  %v14805_v50 = vpop.f32.mrf.mxu1  ;;  %v5042_v60 = vshll.u32 %v12775_v0, 16 }
 0x382   : > { %v14808_v17 = vadd.f32 %v2906_v12, %v14641_v7  ;;  %v5034_v12 = vshll.u32 %v12774_v13, 16 }
 0x383   : > { %v11936_v8 = vpop.f32.mrf.mxu0  ;;  %12151 = vmatmul.mubr.msk.bf16.gmra.mxu0 %vm1186_vm1, %v5013_v51  ;;  %v14813_v24 = vpop.f32.mrf.mxu1  ;;  %v5024_v51 = vor.u32 %v5022_v35, %v5020_v46 }
 0x384   : > { %17796 = vst [vmem:[#allocation25_spill] sm:$0xff] %v14808_v17  ;;  %17797 = vst [vmem:[#allocation26_spill] sm:$0xff] %v14813_v24  ;;  %v14818_v25 = vadd.f32 %v11936_v8, %v14647_v14  ;;  %12154 = vmatprep.mubr.msk.bf16.mxu0 %vm1186_vm1, %v5021_v47  ;;  %v5032_v24 = vor.u32 %v5030_v57, %v5028_v49  ;;  %v5036_v26 = vrot.slane %v5034_v12, 1  ;;  %v5038_v57 = vshrl.u32 %v12774_v13, 16 }
 0x385   : > { %v2919_v7 = vpop.f32.mrf.mxu0  ;;  %v14821_v30 = vpop.f32.mrf.mxu1  ;;  %v5029_v40 = vsel %vm4255_vm5, %v5024_v51, %v5028_v49  ;;  %v12777_v12 = vld [vmem:[#allocation2 + $0x98] ss:$0 sps:$4 sm:$0x11]  }
 0x386   : > { %v14823_v61 = vadd.f32 %v2919_v7, %v2582_v44  ;;  %v5037_v35 = vsel %vm4255_vm5, %v5032_v24, %v5036_v26  ;;  %v5044_v44 = vrot.slane %v5042_v60, 1  ;;  %v5050_v7 = vshll.u32 %v12776_v6, 16 }
 0x387   : > { %v11937_v17 = vpop.f32.mrf.mxu0  ;;  %v14825_v54 = vpop.f32.mrf.mxu1  ;;  %v5058_v13 = vshll.u32 %v12777_v12, 16 }
 0x388   : > { %v14828_v14 = vadd.f32 %v11937_v17, %v14657_v63  ;;  %v2598_v63 = vadd.f32 %v14655_v38, %v14668_v56 }
 0x389   : > { %v14830_v19 = vpop.f32.mrf.mxu0  ;;  %v14832_v8 = vpop.f32.mrf.mxu1 }
 0x38a   : > { %17798 = vst [vmem:[#allocation27_spill] sm:$0xff] %v14830_v19  ;;  %17799 = vst [vmem:[#allocation28_spill] sm:$0xff] %v14832_v8  ;;  %v5040_v19 = vor.u32 %v5038_v57, %v5036_v26  ;;  %v5052_v8 = vrot.slane %v5050_v7, 1 }
 0x38b   : > { %v11940_v47 = vpop.f32.mrf.mxu0  ;;  %12155 = vmatmul.mubr.msk.bf16.gmra.mxu0 %vm1186_vm1, %v5029_v40  ;;  %v14837_v46 = vpop.f32.mrf.mxu1  ;;  %v5046_v40 = vshrl.u32 %v12775_v0, 16 }
 0x38c   : > { %17800 = vst [vmem:[#allocation29_spill] sm:$0xff] %v14837_v46  ;;  %v14842_v17 = vadd.f32 %v11940_v47, %v14665_v59  ;;  %12158 = vmatprep.mubr.msk.bf16.mxu0 %vm1186_vm1, %v5037_v35  ;;  %v5054_v59 = vshrl.u32 %v12776_v6, 16  ;;  %v5045_v35 = vsel %vm4255_vm5, %v5040_v19, %v5044_v44  ;;  %v5060_v6 = vrot.slane %v5058_v13, 1 }
 0x38d   : > { %v2935_v49 = vpop.f32.mrf.mxu0  ;;  %v14845_v51 = vpop.f32.mrf.mxu1  ;;  %v5048_v29 = vor.u32 %v5046_v40, %v5044_v44  ;;  %v17807_v40 = vld [vmem:[#allocation8_spill] sm:$0xff] }
 0x38e   : > { %v14847_v24 = vadd.f32 %v2935_v49, %v2598_v63 }
 0x38f   : > { %v11941_v46 = vpop.f32.mrf.mxu0  ;;  %v14849_v60 = vpop.f32.mrf.mxu1  ;;  %v5053_v26 = vsel %vm4255_vm5, %v5048_v29, %v5052_v8 }
 0x390   : > { %v14852_v38 = vadd.f32 %v11941_v46, %v14673_v55  ;;  %v5056_v55 = vor.u32 %v5054_v59, %v5052_v8  ;;  %v561_v59 = vadd.s32 16, %v17807_v40 }
 0x391   : > { %v14854_v56 = vpop.f32.mrf.mxu0  ;;  %v14856_v47 = vpop.f32.mrf.mxu1 }
 0x392   : > { %17801 = vst [vmem:[#allocation30_spill] sm:$0xff] %v14854_v56  ;;  %v5061_v49 = vsel %vm4255_vm5, %v5056_v55, %v5060_v6  ;;  %v609_v55 = vand.u32 15, %v561_v59  ;;  %v563_v59 = vadd.s32 32, %v17807_v40 }
 0x393   : > { %v11944_v0 = vpop.f32.mrf.mxu0  ;;  %12159 = vmatmul.mubr.msk.bf16.gmra.mxu0 %vm1186_vm1, %v5045_v35  ;;  %v14861_v63 = vpop.f32.mrf.mxu1 }
 0x394   : > { %17802 = vst [vmem:[#allocation31_spill] sm:$0xff] %v14861_v63  ;;  %v14864_v7 = vadd.f32 %v11944_v0, %v14681_v1  ;;  %12162 = vmatprep.mubr.msk.bf16.mxu0 %vm1186_vm1, %v5053_v26  ;;  %v595_v63 = vand.u32 15, %v17807_v40  ;;  %vm977_vm6 = vcmp.ne.s32.totalorder %v609_v55, 0 }
 0x395   : > { %v2951_v46 = vpop.f32.mrf.mxu0  ;;  %v14867_v57 = vpop.f32.mrf.mxu1 }
 0x396   : > { %v14870_v12 = vadd.f32 %v2951_v46, %v14686_v27  ;;  %vm975_vm7 = vcmp.ne.s32.totalorder %v595_v63, 0 }
 0x397   : > { %v11945_v19 = vpop.f32.mrf.mxu0  ;;  %v14872_v44 = vpop.f32.mrf.mxu1 }
 0x398   : > { %17803 = vst [vmem:[#allocation32_spill] sm:$0xff] %v14870_v12  ;;  %17804 = vst [vmem:[#allocation33_spill] sm:$0xff] %v14872_v44  ;;  %v14875_v29 = vadd.f32 %v11945_v19, %v14690_v62 }
 0x399   : > { %v14878_v1 = vpop.f32.mrf.mxu0  ;;  %v14880_v8 = vpop.f32.mrf.mxu1 }
 0x39a   : > { %17805 = vst [vmem:[#allocation34_spill] sm:$0xff] %v14878_v1  ;;  %17806 = vst [vmem:[#allocation35_spill] sm:$0xff] %v14880_v8 }
 0x39b   : > { %v11948_v13 = vpop.f32.mrf.mxu0  ;;  %12163 = vmatmul.mubr.msk.bf16.gmra.mxu0 %vm1186_vm1, %v5061_v49  ;;  %v14884_v35 = vpop.f32.mrf.mxu1 }
 0x39c   : > { %17808 = vst [vmem:[#allocation8_spill] sm:$0xff] %v14884_v35  ;;  %v14887_v27 = vadd.f32 %v11948_v13, %v14699_v43  ;;  %v565_v35 = vadd.s32 48, %v17807_v40 }
 0x39d   : > { %v2967_v0 = vpop.f32.mrf.mxu0  ;;  %v12028_v26 = vpop.f32.mrf.mxu1 }
 0x39e   : > { %17809 = vst [vmem:[#allocation36_spill] sm:$0xff] %v14887_v27  ;;  %v14890_v62 = vadd.f32 %v2967_v0, %v14704_v36  ;;  %v14904_v0 = vsel %vm977_vm6, 1.0, %v17776_v33  ;;  %v637_v56 = vand.u32 15, %v565_v35 }
 0x39f   : > { %v11949_v6 = vpop.f32.mrf.mxu0  ;;  %v3903_v46 = vpop.f32.mrf.mxu1  ;;  %17814 = vst [vmem:[#allocation41_spill] sm:$0xff] %v14904_v0 }
 0x3a0   : > { %17810 = vst [vmem:[#allocation37_spill] sm:$0xff] %v14890_v62  ;;  %v14893_v19 = vadd.f32 %v11949_v6, %v14708_v21  ;;  %vm981_vm8 = vcmp.ne.s32.totalorder %v637_v56, 0 }
 0x3a1   : > { %v14896_v1 = vpop.f32.mrf.mxu0  ;;  %v12029_v49 = vpop.f32.mrf.mxu1 }
 0x3a2   : > { %17811 = vst [vmem:[#allocation38_spill] sm:$0xff] %v14893_v19  ;;  %17812 = vst [vmem:[#allocation39_spill] sm:$0xff] %v14896_v1  ;;  %v14908_v19 = vsel %vm975_vm7, 1.0, %v17776_v33 }
 0x3a3   : > { %v11992_v43 = vpop.f32.mrf.mxu0  ;;  %v14899_v13 = vpop.f32.mrf.mxu1  ;;  %17815 = vst [vmem:[#allocation42_spill] sm:$0xff] %v14908_v19 }
 0x3a4   : > { %17813 = vst [vmem:[#allocation40_spill] sm:$0xff] %v14899_v13  ;;  %v3514_v36 = vadd.f32 %v11992_v43, %v14702_v39  ;;  %v623_v43 = vand.u32 15, %v563_v59 }
 0x3a5   : > { %v3505_v21 = vpop.f32.mrf.mxu0  ;;  %v12032_v6 = vpop.f32.mrf.mxu1 }
 0x3a6   : > { %v4032_v62 = vadd.f32 %v12028_v26, %v3514_v36  ;;  %v3506_v1 = vadd.f32 %v3505_v21, %v14706_v3  ;;  %v569_v3 = vadd.s32 80, %v17807_v40  ;;  %vm979_vm9 = vcmp.ne.s32.totalorder %v623_v43, 0 }
 0x3a7   : > { %v11993_v55 = vpop.f32.mrf.mxu0  ;;  %v3919_v27 = vpop.f32.mrf.mxu1 }
 0x3a8   : > { %v4064_v13 = vmul.f32 %v14904_v0, %v4032_v62  ;;  %v4030_v39 = vadd.f32 %v3903_v46, %v3506_v1  ;;  %v3517_v63 = vadd.f32 %v11993_v55, %v14712_v20  ;;  %v567_v1 = vadd.s32 64, %v17807_v40 }
 0x3a9   : > { %v14912_v8 = vpop.f32.mrf.mxu0  ;;  %v12033_v44 = vpop.f32.mrf.mxu1  ;;  %v14930_v46 = vsel %vm981_vm8, 1.0, %v17776_v33  ;;  %v665_v55 = vand.u32 15, %v569_v3 }
 0x3aa   : > { %v4062_v35 = vmul.f32 %v14908_v19, %v4030_v39  ;;  %v4033_v26 = vadd.f32 %v12029_v49, %v3517_v63  ;;  %v14917_v36 = vadd.f32 %v4064_v13, %v14720_v9  ;;  %17817 = vst [vmem:[#allocation44_spill] sm:$0xff] %v14930_v46  ;;  %v14934_v39 = vsel %vm979_vm9, 1.0, %v17776_v33 }
 0x3ab   : > { %v11996_v21 = vpop.f32.mrf.mxu0  ;;  %v14919_v12 = vpop.f32.mrf.mxu1  ;;  %17818 = vst [vmem:[#allocation45_spill] sm:$0xff] %v14934_v39  ;;  %v573_v19 = vadd.s32 112, %v17807_v40  ;;  %vm985_vm10 = vcmp.ne.s32.totalorder %v665_v55, 0 }
 0x3ac   : > { %v14923_v20 = vadd.f32 %v4033_v26, %v14731_v45  ;;  %v3530_v62 = vadd.f32 %v11996_v21, %v14723_v53  ;;  %v14927_v56 = vadd.f32 %v4062_v35, %v14726_v52  ;;  %v651_v26 = vand.u32 15, %v567_v1 }
 0x3ad   : > { %v3521_v49 = vpop.f32.mrf.mxu0  ;;  %v12036_v9 = vpop.f32.mrf.mxu1 }
 0x3ae   : > { %17816 = vst [vmem:[#allocation43_spill] sm:$0xff] %v14923_v20  ;;  %v4036_v13 = vadd.f32 %v12032_v6, %v3530_v62  ;;  %v3522_v59 = vadd.f32 %v3521_v49, %v14728_v31  ;;  %vm983_vm11 = vcmp.ne.s32.totalorder %v651_v26, 0  ;;  %v571_v49 = vadd.s32 96, %v17807_v40  ;;  %v17880_v20 = vld [vmem:[#allocation20_spill] sm:$0xff] }
 0x3af   : > { %v11997_v45 = vpop.f32.mrf.mxu0  ;;  %v3935_v63 = vpop.f32.mrf.mxu1 }
 0x3b0   : > { %v4068_v53 = vmul.f32 %v14930_v46, %v4036_v13  ;;  %v4034_v43 = vadd.f32 %v3919_v27, %v3522_v59  ;;  %v3533_v52 = vadd.f32 %v11997_v45, %v14733_v58  ;;  %v693_v45 = vand.u32 15, %v573_v19 }
 0x3b1   : > { %v14938_v35 = vpop.f32.mrf.mxu0  ;;  %v12037_v21 = vpop.f32.mrf.mxu1 }
 0x3b2   : > { %v4066_v6 = vmul.f32 %v14934_v39, %v4034_v43  ;;  %v4037_v31 = vadd.f32 %v12033_v44, %v3533_v52  ;;  %v14945_v1 = vadd.f32 %v4068_v53, %v14744_v18  ;;  %v14956_v44 = vsel %vm985_vm10, 1.0, %v17776_v33 }
 0x3b3   : > { %v12000_v3 = vpop.f32.mrf.mxu0  ;;  %v14942_v62 = vpop.f32.mrf.mxu1  ;;  %17822 = vst [vmem:[#allocation49_spill] sm:$0xff] %v14956_v44  ;;  %v14960_v53 = vsel %vm983_vm11, 1.0, %v17776_v33  ;;  %vm989_vm12 = vcmp.ne.s32.totalorder %v693_v45, 0 }
 0x3b4   : > { %17819 = vst [vmem:[#allocation46_spill] sm:$0xff] %v14945_v1  ;;  %v14948_v27 = vadd.f32 %v4037_v31, %v14755_v10  ;;  %v3546_v58 = vadd.f32 %v12000_v3, %v14747_v41  ;;  %v14953_v13 = vadd.f32 %v4066_v6, %v14750_v28  ;;  %17823 = vst [vmem:[#allocation50_spill] sm:$0xff] %v14960_v53  ;;  %v679_v6 = vand.u32 15, %v571_v49 }
 0x3b5   : > { %v3537_v59 = vpop.f32.mrf.mxu0  ;;  %v12040_v55 = vpop.f32.mrf.mxu1  ;;  %v575_v49 = vadd.s32 128, %v17807_v40  ;;  %v14979_v45 = vsel %vm989_vm12, 1.0, %v17776_v33  ;;  %v560_v1 = vadd.s32 8, %v17807_v40 }
 0x3b6   : > { %17820 = vst [vmem:[#allocation47_spill] sm:$0xff] %v14948_v27  ;;  %17821 = vst [vmem:[#allocation48_spill] sm:$0xff] %v14953_v13  ;;  %v4040_v26 = vadd.f32 %v12036_v9, %v3546_v58  ;;  %v3538_v18 = vadd.f32 %v3537_v59, %v14752_v5  ;;  %v577_v5 = vadd.s32 144, %v17807_v40  ;;  %vm987_vm13 = vcmp.ne.s32.totalorder %v679_v6, 0 }
 0x3b7   : > { %v12001_v10 = vpop.f32.mrf.mxu0  ;;  %v3951_v43 = vpop.f32.mrf.mxu1  ;;  %17826 = vst [vmem:[#allocation53_spill] sm:$0xff] %v14979_v45 }
 0x3b8   : > { %v4072_v41 = vmul.f32 %v14956_v44, %v4040_v26  ;;  %v4038_v52 = vadd.f32 %v3935_v63, %v3538_v18  ;;  %v3549_v28 = vadd.f32 %v12001_v10, %v14757_v15 }
 0x3b9   : > { %v14964_v31 = vpop.f32.mrf.mxu0  ;;  %v12041_v3 = vpop.f32.mrf.mxu1 }
 0x3ba   : > { %v4070_v19 = vmul.f32 %v14960_v53, %v4038_v52  ;;  %v4041_v9 = vadd.f32 %v12037_v21, %v3549_v28  ;;  %v14969_v58 = vadd.f32 %v4072_v41, %v14768_v4  ;;  %v721_v41 = vand.u32 15, %v577_v5 }
 0x3bb   : > { %v12004_v59 = vpop.f32.mrf.mxu0  ;;  %v14971_v39 = vpop.f32.mrf.mxu1 }
 0x3bc   : > { %17824 = vst [vmem:[#allocation51_spill] sm:$0xff] %v14969_v58  ;;  %v14974_v63 = vadd.f32 %v4041_v9, %v14779_v37  ;;  %v3562_v15 = vadd.f32 %v12004_v59, %v14771_v11  ;;  %v14982_v18 = vadd.f32 %v4070_v19, %v14774_v32  ;;  %v14986_v37 = vsel %vm987_vm13, 1.0, %v17776_v33 }
 0x3bd   : > { %v3553_v21 = vpop.f32.mrf.mxu0  ;;  %v12044_v26 = vpop.f32.mrf.mxu1  ;;  %17828 = vst [vmem:[#allocation55_spill] sm:$0xff] %v14986_v37  ;;  %v707_v59 = vand.u32 15, %v575_v49  ;;  %vm993_vm14 = vcmp.ne.s32.totalorder %v721_v41, 0  ;;  %v579_v49 = vadd.s32 160, %v17807_v40 }
 0x3be   : > { %17825 = vst [vmem:[#allocation52_spill] sm:$0xff] %v14974_v63  ;;  %17827 = vst [vmem:[#allocation54_spill] sm:$0xff] %v14982_v18  ;;  %v4044_v4 = vadd.f32 %v12040_v55, %v3562_v15  ;;  %v3554_v10 = vadd.f32 %v3553_v21, %v14776_v34  ;;  %v581_v34 = vadd.s32 176, %v17807_v40  ;;  %v15005_v21 = vsel %vm993_vm14, 1.0, %v17776_v33 }
 0x3bf   : > { %v12005_v52 = vpop.f32.mrf.mxu0  ;;  %v3967_v11 = vpop.f32.mrf.mxu1  ;;  %vm991_vm15 = vcmp.ne.s32.totalorder %v707_v59, 0  ;;  %17831 = vst [vmem:[#allocation58_spill] sm:$0xff] %v15005_v21  ;;  %v562_v18 = vadd.s32 24, %v17807_v40 }
 0x3c0   : > { %v4076_v28 = vmul.f32 %v14979_v45, %v4044_v4  ;;  %v4042_v6 = vadd.f32 %v3951_v43, %v3554_v10  ;;  %v3565_v9 = vadd.f32 %v12005_v52, %v14781_v16  ;;  %v749_v52 = vand.u32 15, %v581_v34 }
 0x3c1   : > { %v14990_v53 = vpop.f32.mrf.mxu0  ;;  %v12045_v44 = vpop.f32.mrf.mxu1 }
 0x3c2   : > { %v4074_v32 = vmul.f32 %v14986_v37, %v4042_v6  ;;  %v4045_v55 = vadd.f32 %v12041_v3, %v3565_v9  ;;  %v14997_v15 = vadd.f32 %v4076_v28, %v14792_v23  ;;  %vm997_vm2 = vcmp.ne.s32.totalorder %v749_v52, 0 }
 0x3c3   : > { %v12008_v19 = vpop.f32.mrf.mxu0  ;;  %v14994_v5 = vpop.f32.mrf.mxu1 }
 0x3c4   : > { %17829 = vst [vmem:[#allocation56_spill] sm:$0xff] %v14997_v15  ;;  %v15000_v43 = vadd.f32 %v4045_v55, %v14803_v2  ;;  %v3578_v16 = vadd.f32 %v12008_v19, %v14795_v42  ;;  %v15008_v10 = vadd.f32 %v4074_v32, %v14798_v48  ;;  %v15012_v2 = vsel %vm991_vm15, 1.0, %v17776_v33 }
 0x3c5   : > { %v3569_v3 = vpop.f32.mrf.mxu0  ;;  %v12048_v4 = vpop.f32.mrf.mxu1  ;;  %17833 = vst [vmem:[#allocation60_spill] sm:$0xff] %v15012_v2  ;;  %v735_v55 = vand.u32 15, %v579_v49  ;;  %v15034_v49 = vsel %vm997_vm2, 1.0, %v17776_v33 }
 0x3c6   : > { %17830 = vst [vmem:[#allocation57_spill] sm:$0xff] %v15000_v43  ;;  %17832 = vst [vmem:[#allocation59_spill] sm:$0xff] %v15008_v10  ;;  %v4048_v41 = vadd.f32 %v12044_v26, %v3578_v16  ;;  %v3570_v23 = vadd.f32 %v3569_v3, %v14800_v22  ;;  %v585_v22 = vadd.s32 208, %v17807_v40  ;;  %v583_v16 = vadd.s32 192, %v17807_v40  ;;  %v15208_v43 = vld [vmem:[%s17710_s9] sm:$0xff] }
 0x3c7   : > { %v12009_v28 = vpop.f32.mrf.mxu0  ;;  %v3983_v42 = vpop.f32.mrf.mxu1  ;;  %vm995_vm6 = vcmp.ne.s32.totalorder %v735_v55, 0  ;;  %17836 = vst [vmem:[#allocation63_spill] sm:$0xff] %v15034_v49  ;;  %17872 = vst [vmem:[#allocation85_spill] sm:$0xff] %v15208_v43 }
 0x3c8   : > { %v4080_v6 = vmul.f32 %v15005_v21, %v4048_v41  ;;  %v4046_v9 = vadd.f32 %v3967_v11, %v3570_v23  ;;  %v3581_v59 = vadd.f32 %v12009_v28, %v14805_v50  ;;  %v777_v28 = vand.u32 15, %v585_v22 }
 0x3c9   : > { %v15016_v19 = vpop.f32.mrf.mxu0  ;;  %v12049_v37 = vpop.f32.mrf.mxu1 }
 0x3ca   : > { %v4078_v48 = vmul.f32 %v15012_v2, %v4046_v9  ;;  %v4049_v26 = vadd.f32 %v12045_v44, %v3581_v59  ;;  %v15024_v3 = vadd.f32 %v4080_v6, %v14818_v25  ;;  %v5435_v44 = vld [vmem:[%s17710_s9 + $0x38] sm:$0xff]  ;;  %v763_v59 = vand.u32 15, %v583_v16 }
 0x3cb   : > { %v12012_v32 = vpop.f32.mrf.mxu0  ;;  %v15020_v34 = vpop.f32.mrf.mxu1  ;;  %12167 = vmatpush3.msra.mxu1 %v5435_v44  ;;  %vm1001_vm7 = vcmp.ne.s32.totalorder %v777_v28, 0 }
 0x3cc   : > { %17834 = vst [vmem:[#allocation61_spill] sm:$0xff] %v15024_v3  ;;  %v15027_v50 = vadd.f32 %v4049_v26, %v14828_v14  ;;  %v3594_v11 = vadd.f32 %v12012_v32, %v14821_v30  ;;  %v15037_v52 = vadd.f32 %v4078_v48, %v14823_v61  ;;  %12168 = vmatprep.subr.mxu1 %v17776_v33  ;;  %v15042_v30 = vsel %vm995_vm6, 1.0, %v17776_v33  ;;  %v17839_v32 = vld [vmem:[#allocation28_spill] sm:$0xff] }
 0x3cd   : > { %v3585_v41 = vpop.f32.mrf.mxu0  ;;  %v12052_v23 = vpop.f32.mrf.mxu1  ;;  %17838 = vst [vmem:[#allocation65_spill] sm:$0xff] %v15042_v30  ;;  %v589_v48 = vadd.s32 240, %v17807_v40  ;;  %vm999_vm8 = vcmp.ne.s32.totalorder %v763_v59, 0 }
 0x3ce   : > { %17835 = vst [vmem:[#allocation62_spill] sm:$0xff] %v15027_v50  ;;  %17837 = vst [vmem:[#allocation64_spill] sm:$0xff] %v15037_v52  ;;  %v4052_v25 = vadd.f32 %v12048_v4, %v3594_v11  ;;  %v3586_v14 = vadd.f32 %v3585_v41, %v14825_v54  ;;  %v15197_v50 = vld [vmem:[%s17710_s9 + $0x8] sm:$0xff] }
 0x3cf   : > { %v12013_v6 = vpop.f32.mrf.mxu0  ;;  %v3999_v9 = vpop.f32.mrf.mxu1  ;;  %17869 = vst [vmem:[#allocation82_spill] sm:$0xff] %v15197_v50 }
 0x3d0   : > { %v4084_v55 = vmul.f32 %v15034_v49, %v4052_v25  ;;  %v4050_v26 = vadd.f32 %v3983_v42, %v3586_v14  ;;  %v3597_v44 = vadd.f32 %v12013_v6, %v17839_v32  ;;  %v587_v25 = vadd.s32 224, %v17807_v40 }
 0x3d1   : > { %v15046_v2 = vpop.f32.mrf.mxu0  ;;  %v12053_v61 = vpop.f32.mrf.mxu1 }
 0x3d2   : > { %v4082_v4 = vmul.f32 %v15042_v30, %v4050_v26  ;;  %v4053_v54 = vadd.f32 %v12049_v37, %v3597_v44  ;;  %v15053_v16 = vadd.f32 %v4084_v55, %v14842_v17  ;;  %v15064_v37 = vsel %vm1001_vm7, 1.0, %v17776_v33  ;;  %v5434_v17 = vld [vmem:[%s17710_s9 + $0x30] sm:$0xff] }
 0x3d3   : > { %v12016_v22 = vpop.f32.mrf.mxu0  ;;  %v15050_v11 = vpop.f32.mrf.mxu1  ;;  %17843 = vst [vmem:[#allocation68_spill] sm:$0xff] %v15064_v37  ;;  %v805_v55 = vand.u32 15, %v589_v48  ;;  %12169 = vmatpush3.msra.mxu1 %v5434_v17 }
 0x3d4   : > { %17840 = vst [vmem:[#allocation28_spill] sm:$0xff] %v15053_v16  ;;  %v15056_v42 = vadd.f32 %v4053_v54, %v14852_v38  ;;  %v3610_v41 = vadd.f32 %v12016_v22, %v14845_v51  ;;  %v15061_v14 = vadd.f32 %v4082_v4, %v14847_v24  ;;  %v15071_v51 = vsel %vm999_vm8, 1.0, %v17776_v33  ;;  %12170 = vmatprep.subr.mxu1 %v17776_v33  ;;  %v15192_v16 = vld [vmem:[%s17710_s9 + $0x10] sm:$0xff] }
 0x3d5   : > { %v3601_v28 = vpop.f32.mrf.mxu0  ;;  %v12056_v6 = vpop.f32.mrf.mxu1  ;;  %17844 = vst [vmem:[#allocation69_spill] sm:$0xff] %v15071_v51  ;;  %v791_v54 = vand.u32 15, %v587_v25  ;;  %vm1005_vm9 = vcmp.ne.s32.totalorder %v805_v55, 0  ;;  %17868 = vst [vmem:[#allocation81_spill] sm:$0xff] %v15192_v16 }
 0x3d6   : > { %17841 = vst [vmem:[#allocation66_spill] sm:$0xff] %v15056_v42  ;;  %17842 = vst [vmem:[#allocation67_spill] sm:$0xff] %v15061_v14  ;;  %v4056_v59 = vadd.f32 %v12052_v23, %v3610_v41  ;;  %v3602_v38 = vadd.f32 %v3601_v28, %v14849_v60 }
 0x3d7   : > { %v12017_v26 = vpop.f32.mrf.mxu0  ;;  %v4015_v24 = vpop.f32.mrf.mxu1  ;;  %vm1003_vm10 = vcmp.ne.s32.totalorder %v791_v54, 0 }
 0x3d8   : > { %v4088_v32 = vmul.f32 %v15064_v37, %v4056_v59  ;;  %v4054_v44 = vadd.f32 %v3999_v9, %v3602_v38  ;;  %v3613_v4 = vadd.f32 %v12017_v26, %v14856_v47  ;;  %v17847_v47 = vld [vmem:[#allocation32_spill] sm:$0xff]  ;;  %v15092_v59 = vsel %vm1005_vm9, 1.0, %v17776_v33  ;;  %v17850_v26 = vld [vmem:[#allocation33_spill] sm:$0xff]  ;;  %v17855_v37 = vld [vmem:[#allocation38_spill] sm:$0xff] }
 0x3d9   : > { %v15076_v22 = vpop.f32.mrf.mxu0  ;;  %v12057_v23 = vpop.f32.mrf.mxu1  ;;  %17849 = vst [vmem:[#allocation72_spill] sm:$0xff] %v15092_v59 }
 0x3da   : > { %v4086_v60 = vmul.f32 %v15071_v51, %v4054_v44  ;;  %v4057_v48 = vadd.f32 %v12053_v61, %v3613_v4  ;;  %v15082_v17 = vadd.f32 %v4088_v32, %v14864_v7  ;;  %v5433_v7 = vld [vmem:[%s17710_s9 + $0x28] sm:$0xff] }
 0x3db   : > { %v12020_v41 = vpop.f32.mrf.mxu0  ;;  %v15079_v28 = vpop.f32.mrf.mxu1  ;;  %12171 = vmatpush3.msra.mxu1 %v5433_v7 }
 0x3dc   : > { %17845 = vst [vmem:[#allocation70_spill] sm:$0xff] %v15082_v17  ;;  %v15085_v30 = vadd.f32 %v4057_v48, %v14875_v29  ;;  %v3626_v9 = vadd.f32 %v12020_v41, %v14867_v57  ;;  %v15089_v25 = vadd.f32 %v4086_v60, %v17847_v47  ;;  %v15101_v57 = vsel %vm1003_vm10, 1.0, %v17776_v33  ;;  %12172 = vmatprep.subr.mxu1 %v17776_v33  ;;  %v17852_v60 = vld [vmem:[#allocation35_spill] sm:$0xff] }
 0x3dd   : > { %v3617_v61 = vpop.f32.mrf.mxu0  ;;  %v15094_v38 = vpop.f32.mrf.mxu1  ;;  %17851 = vst [vmem:[#allocation33_spill] sm:$0xff] %v15101_v57 }
 0x3de   : > { %17846 = vst [vmem:[#allocation71_spill] sm:$0xff] %v15085_v30  ;;  %17848 = vst [vmem:[#allocation32_spill] sm:$0xff] %v15089_v25  ;;  %v4060_v55 = vadd.f32 %v12056_v6, %v3626_v9  ;;  %v3618_v29 = vadd.f32 %v3617_v61, %v17850_v26  ;;  %v17853_v26 = vld [vmem:[#allocation36_spill] sm:$0xff] }
 0x3df   : > { %v12021_v32 = vpop.f32.mrf.mxu0  ;;  %v15103_v44 = vpop.f32.mrf.mxu1 }
 0x3e0   : > { %v4092_v4 = vmul.f32 %v15092_v59, %v4060_v55  ;;  %v4058_v54 = vadd.f32 %v4015_v24, %v3618_v29  ;;  %v3629_v48 = vadd.f32 %v12021_v32, %v17852_v60  ;;  %v17857_v24 = vld [vmem:[#allocation37_spill] sm:$0xff] }
 0x3e1   : > { %v15108_v41 = vpop.f32.mrf.mxu0  ;;  %v15110_v47 = vpop.f32.mrf.mxu1 }
 0x3e2   : > { %v4090_v6 = vmul.f32 %v15101_v57, %v4058_v54  ;;  %v4061_v9 = vadd.f32 %v12057_v23, %v3629_v48  ;;  %v15118_v51 = vadd.f32 %v4092_v4, %v17853_v26  ;;  %v5432_v54 = vld [vmem:[%s17710_s9 + $0x20] sm:$0xff] }
 0x3e3   : > { %v15113_v61 = vpop.f32.mrf.mxu0  ;;  %v15115_v7 = vpop.f32.mrf.mxu1  ;;  %12173 = vmatpush3.msra.mxu1 %v5432_v54  ;;  %v15157_v54 = vld [vmem:[%s17710_s9 + $0x18] sm:$0xff] }
 0x3e4   : > { %17854 = vst [vmem:[#allocation35_spill] sm:$0xff] %v15118_v51  ;;  %v15121_v49 = vadd.f32 %v4061_v9, %v17855_v37  ;;  %v15124_v55 = vadd.f32 %v4090_v6, %v17857_v24  ;;  %12174 = vmatprep.subr.mxu1 %v17776_v33  ;;  %17859 = vst [vmem:[#allocation37_spill] sm:$0xff] %v15157_v54 }
 0x3e5   : > { %v15126_v29 = vpop.f32.mrf.mxu0  ;;  %v15128_v32 = vpop.f32.mrf.mxu1  ;;  %12175 = vmatpush3.msra.mxu1 %v15157_v54 }
 0x3e6   : > { %17856 = vst [vmem:[#allocation36_spill] sm:$0xff] %v15121_v49  ;;  %17858 = vst [vmem:[#allocation38_spill] sm:$0xff] %v15124_v55  ;;  %12176 = vmatprep.subr.mxu1 %v17776_v33 }
 0x3e7   : > { %v15130_v60 = vpop.f32.mrf.mxu0  ;;  %v15132_v23 = vpop.f32.mrf.mxu1  ;;  %12177 = vmatpush3.msra.mxu1 %v15192_v16 }
 0x3e8   : > { %12178 = vmatprep.subr.mxu1 %v17776_v33 }
 0x3e9   : > { %v15137_v4 = vpop.f32.mrf.mxu0  ;;  %v15139_v37 = vpop.f32.mrf.mxu1  ;;  %12179 = vmatpush3.msra.mxu1 %v15197_v50  ;;  %v17879_v50 = vld [vmem:[#allocation18_spill] sm:$0xff] }
 0x3ea   : > { %12180 = vmatprep.subr.mxu1 %v17776_v33  ;;  %v3509_v13 = vadd.f32 %v14912_v8, %v17879_v50 }
 0x3eb   : > { %v15142_v48 = vpop.f32.mrf.mxu0  ;;  %v15144_v6 = vpop.f32.mrf.mxu1  ;;  %12181 = vmatpush3.msra.mxu1 %v15208_v43  ;;  %v3525_v43 = vadd.f32 %v14938_v35, %v17880_v20  ;;  %v17889_v35 = vld [vmem:[#allocation15_spill] sm:$0xff] }
 0x3ec   : > { %12185 = vmatprep.subr.mxu1 %v17776_v33 }
 0x3ed   : > { %v15146_v9 = vpop.f32.mrf.mxu0  ;;  %v15148_v26 = vpop.f32.mrf.mxu1 }
 0x3ef   : > { %v15150_v24 = vpop.f32.mrf.mxu0  ;;  %v15152_v57 = vpop.f32.mrf.mxu1 }
 0x3f1   : > { %v15160_v59 = vpop.f32.mrf.mxu0  ;;  %v15162_v21 = vpop.f32.mrf.mxu1 }
 0x3f3   : > { %v15165_v45 = vpop.f32.mrf.mxu0  ;;  %v15167_v46 = vpop.f32.mrf.mxu1 }
 0x3f4   : > { %17860 = vst [vmem:[#allocation73_spill] sm:$0xff] %v15167_v46 }
 0x3f5   : > { %v15169_v0 = vpop.f32.mrf.mxu0  ;;  %v15171_v49 = vpop.f32.mrf.mxu1 }
 0x3f6   : > { %17861 = vst [vmem:[#allocation74_spill] sm:$0xff] %v15171_v49  ;;  %v602_v49 = vand.u32 15, %v560_v1  ;;  %v17896_v1 = vld [vmem:[#allocation30_spill] sm:$0xff] }
 0x3f7   : > { %v15173_v55 = vpop.f32.mrf.mxu0  ;;  %v15177_v30 = vpop.f32.mrf.mxu1 }
 0x3f8   : > { %17862 = vst [vmem:[#allocation75_spill] sm:$0xff] %v15177_v30  ;;  %v17891_v30 = vld [vmem:[#allocation40_spill] sm:$0xff]  ;;  %vm1072_vm12 = vcmp.ne.s32.totalorder %v602_v49, 15 }
 0x3f9   : > { %v15175_v51 = vpop.f32.mrf.mxu0  ;;  %v15183_v17 = vpop.f32.mrf.mxu1 }
 0x3fa   : > { %17865 = vst [vmem:[#allocation78_spill] sm:$0xff] %v15183_v17  ;;  %v17887_v17 = vld [vmem:[#allocation13_spill] sm:$0xff] }
 0x3fb   : > { %v15179_v54 = vpop.f32.mrf.mxu0  ;;  %v15199_v52 = vpop.f32.mrf.mxu1 }
 0x3fc   : > { %17863 = vst [vmem:[#allocation76_spill] sm:$0xff] %v15179_v54  ;;  %17870 = vst [vmem:[#allocation83_spill] sm:$0xff] %v15199_v52  ;;  %v17884_v52 = vld [vmem:[#allocation10_spill] sm:$0xff] }
 0x3fd   : > { %v15181_v25 = vpop.f32.mrf.mxu0  ;;  %v15214_v15 = vpop.f32.mrf.mxu1 }
 0x3fe   : > { %17864 = vst [vmem:[#allocation77_spill] sm:$0xff] %v15181_v25  ;;  %17874 = vst [vmem:[#allocation87_spill] sm:$0xff] %v15214_v15  ;;  %v566_v15 = vadd.s32 56, %v17807_v40  ;;  %v4031_v25 = vadd.f32 %v17891_v30, %v3509_v13 }
 0x3ff   : > { %v15185_v42 = vpop.f32.mrf.mxu0  ;;  %v15223_v58 = vpop.f32.mrf.mxu1 }
 0x400   : > { %17866 = vst [vmem:[#allocation79_spill] sm:$0xff] %v15185_v42  ;;  %17877 = vst [vmem:[#allocation90_spill] sm:$0xff] %v15223_v58  ;;  %v17883_v58 = vld [vmem:[#allocation11_spill] sm:$0xff]  ;;  %v17888_v42 = vld [vmem:[#allocation12_spill] sm:$0xff] }
 0x401   : > { %v15187_v14 = vpop.f32.mrf.mxu0  ;;  %v2601_v20 = vadd.f32 %v17888_v42, %v17887_v17  ;;  %v17895_v17 = vld [vmem:[#allocation27_spill] sm:$0xff] }
 0x402   : > { %17867 = vst [vmem:[#allocation80_spill] sm:$0xff] %v15187_v14  ;;  %v17885_v14 = vld [vmem:[#allocation22_spill] sm:$0xff] }
 0x403   : > { %v15202_v3 = vpop.f32.mrf.mxu0  ;;  %v3541_v8 = vadd.f32 %v14964_v31, %v17885_v14  ;;  %v17892_v31 = vld [vmem:[#allocation17_spill] sm:$0xff]  ;;  %v17893_v14 = vld [vmem:[#allocation16_spill] sm:$0xff]  ;;  %v15262_v30 = vadd.f32 %v17896_v1, %v2601_v20 }
 0x404   : > { %17871 = vst [vmem:[#allocation84_spill] sm:$0xff] %v15202_v3  ;;  %v564_v3 = vadd.s32 40, %v17807_v40 }
 0x405   : > { %v15211_v10 = vpop.f32.mrf.mxu0 }
 0x406   : > { %17873 = vst [vmem:[#allocation86_spill] sm:$0xff] %v15211_v10  ;;  %v630_v42 = vand.u32 15, %v564_v3 }
 0x407   : > { %v15217_v16 = vpop.f32.mrf.mxu0 }
 0x408   : > { %17875 = vst [vmem:[#allocation88_spill] sm:$0xff] %v15217_v16  ;;  %v616_v16 = vand.u32 15, %v562_v18  ;;  %vm1076_vm14 = vcmp.ne.s32.totalorder %v630_v42, 15  ;;  %v582_v42 = vadd.s32 184, %v17807_v40 }
 0x409   : > { %v15220_v63 = vpop.f32.mrf.mxu0 }
 0x40a   : > { %17876 = vst [vmem:[#allocation89_spill] sm:$0xff] %v15220_v63  ;;  %v15235_v63 = vpop.f32.mrf.mxu1  ;;  %vm1074_vm11 = vcmp.ne.s32.totalorder %v616_v16, 15 }
 0x40b   : > { %v15225_v27 = vpop.f32.mrf.mxu0  ;;  %17882 = vst [vmem:[#allocation20_spill] sm:$0xff] %v15235_v63  ;;  %v4035_v63 = vadd.f32 %v14919_v12, %v3525_v43  ;;  %v17897_v12 = vld [vmem:[#allocation34_spill] sm:$0xff] }
 0x40c   : > { %17878 = vst [vmem:[#allocation91_spill] sm:$0xff] %v15225_v27  ;;  %v2585_v27 = vadd.f32 %v17884_v52, %v17883_v58  ;;  %v644_v58 = vand.u32 15, %v566_v15  ;;  %v570_v52 = vadd.s32 88, %v17807_v40  ;;  %v15257_v46 = vpop.f32.mrf.mxu1  ;;  %v4039_v15 = vadd.f32 %v14942_v62, %v3541_v8  ;;  %v17906_v8 = vld [vmem:[#allocation26_spill] sm:$0xff] }
 0x40d   : > { %v15232_v10 = vpop.f32.mrf.mxu0  ;;  %v574_v62 = vadd.s32 120, %v17807_v40 }
 0x40e   : > { %17881 = vst [vmem:[#allocation18_spill] sm:$0xff] %v15232_v10  ;;  %v17890_v10 = vld [vmem:[#allocation14_spill] sm:$0xff]  ;;  %v2999_v13 = vadd.f32 %v17895_v17, %v2585_v27  ;;  %v17903_v27 = vld [vmem:[#allocation21_spill] sm:$0xff]  ;;  %vm1078_vm13 = vcmp.ne.s32.totalorder %v644_v58, 15  ;;  %v15286_v1 = vpop.f32.mrf.mxu1  ;;  %v578_v58 = vadd.s32 152, %v17807_v40 }
 0x40f   : > { %v15242_v50 = vpop.f32.mrf.mxu0  ;;  %v2617_v18 = vadd.f32 %v17890_v10, %v17889_v35  ;;  %v568_v10 = vadd.s32 72, %v17807_v40  ;;  %v17899_v35 = vld [vmem:[#allocation19_spill] sm:$0xff]  ;;  %v15279_v20 = vadd.f32 %v4035_v63, %v17903_v27  ;;  %v15301_v27 = vsel %vm1078_vm13, 1.0, %v17776_v33 }
 0x410   : > { %17886 = vst [vmem:[#allocation11_spill] sm:$0xff] %v15242_v50  ;;  %v15255_v50 = vadd.f32 %v17893_v14, %v17892_v31  ;;  %v15271_v31 = vadd.f32 %v4031_v25, %v17899_v35  ;;  %v17901_v14 = vld [vmem:[#allocation24_spill] sm:$0xff]  ;;  %v3573_v25 = vadd.f32 %v15016_v19, %v17906_v8  ;;  %v17907_v35 = vld [vmem:[#allocation23_spill] sm:$0xff]  ;;  %17911 = vst [vmem:[#allocation27_spill] sm:$0xff] %v15301_v27  ;;  %v15315_v27 = vpop.f32.mrf.mxu1 }
 0x411   : > { %v15250_v54 = vpop.f32.mrf.mxu0  ;;  %v15265_v43 = vadd.f32 %v17897_v12, %v2617_v18  ;;  %v3557_v3 = vadd.f32 %v14990_v53, %v17901_v14  ;;  %17904 = vst [vmem:[#allocation15_spill] sm:$0xff] %v15279_v20  ;;  %v672_v18 = vand.u32 15, %v570_v52  ;;  %v658_v53 = vand.u32 15, %v568_v10 }
 0x412   : > { %17894 = vst [vmem:[#allocation10_spill] sm:$0xff] %v15255_v50  ;;  %17900 = vst [vmem:[#allocation13_spill] sm:$0xff] %v15271_v31  ;;  %v15276_v50 = vsel %vm1074_vm11, 1.0, %v17776_v33  ;;  %v572_v12 = vadd.s32 104, %v17807_v40  ;;  %v15290_v49 = vadd.f32 %v4039_v15, %v17907_v35  ;;  %v15295_v14 = vsel %vm1072_vm12, 1.0, %v17776_v33  ;;  %v17912_v15 = vld [vmem:[#allocation29_spill] sm:$0xff] }
 0x413   : > { %v15268_v16 = vpop.f32.mrf.mxu0  ;;  %17902 = vst [vmem:[#allocation12_spill] sm:$0xff] %v15276_v50  ;;  %17910 = vst [vmem:[#allocation16_spill] sm:$0xff] %v15295_v14  ;;  %v576_v52 = vadd.s32 136, %v17807_v40  ;;  %v4043_v19 = vadd.f32 %v14971_v39, %v3557_v3  ;;  %v580_v10 = vadd.s32 168, %v17807_v40  ;;  %v3589_v8 = vadd.f32 %v15046_v2, %v17912_v15  ;;  %v17915_v39 = vld [vmem:[#allocation31_spill] sm:$0xff] }
 0x414   : > { %17898 = vst [vmem:[#allocation22_spill] sm:$0xff] %v15268_v16  ;;  %17908 = vst [vmem:[#allocation40_spill] sm:$0xff] %v15290_v49  ;;  %v15310_v49 = vsel %vm1076_vm14, 1.0, %v17776_v33  ;;  %vm1082_vm15 = vcmp.ne.s32.totalorder %v672_v18, 15  ;;  %v700_v20 = vand.u32 15, %v574_v62  ;;  %v3605_v3 = vadd.f32 %v15076_v22, %v17915_v39  ;;  %v17919_v62 = vld [vmem:[#allocation25_spill] sm:$0xff] }
 0x415   : > { %v15281_v17 = vpop.f32.mrf.mxu0  ;;  %17914 = vst [vmem:[#allocation34_spill] sm:$0xff] %v15310_v49  ;;  %vm15317_vm2 = vcmp.ne.s32.totalorder %v658_v53, 15  ;;  %v686_v31 = vand.u32 15, %v572_v12  ;;  %v728_v15 = vand.u32 15, %v578_v58  ;;  %v586_v49 = vadd.s32 216, %v17807_v40 }
 0x416   : > { %17905 = vst [vmem:[#allocation14_spill] sm:$0xff] %v15281_v17  ;;  %v584_v18 = vadd.s32 200, %v17807_v40  ;;  %v15329_v22 = vsel %vm1082_vm15, 1.0, %v17776_v33  ;;  %v742_v53 = vand.u32 15, %v580_v10  ;;  %v4051_v39 = vadd.f32 %v15020_v34, %v3589_v8 }
 0x417   : > { %v15292_v63 = vpop.f32.mrf.mxu0  ;;  %17920 = vst [vmem:[#allocation24_spill] sm:$0xff] %v15329_v22  ;;  %vm1086_vm6 = vcmp.ne.s32.totalorder %v700_v20, 15  ;;  %v590_v12 = vadd.s32 248, %v17807_v40  ;;  %v588_v58 = vadd.s32 232, %v17807_v40  ;;  %vm1084_vm7 = vcmp.ne.s32.totalorder %v686_v31, 15  ;;  %v17952_v40 = vld [vmem:[#allocation84_spill] sm:$0xff] }
 0x418   : > { %17909 = vst [vmem:[#allocation17_spill] sm:$0xff] %v15292_v63  ;;  %v4047_v63 = vadd.f32 %v14994_v5, %v3573_v25  ;;  %v15326_v5 = vadd.f32 %v4043_v19, %v17919_v62  ;;  %v756_v25 = vand.u32 15, %v582_v42  ;;  %v15339_v19 = vpop.f32.mrf.mxu1  ;;  %v15344_v42 = vsel %vm15317_vm2, 1.0, %v17776_v33 }
 0x419   : > { %v15307_v35 = vpop.f32.mrf.mxu0  ;;  %17921 = vst [vmem:[#allocation21_spill] sm:$0xff] %v15344_v42  ;;  %vm15348_vm8 = vcmp.ne.s32.totalorder %v728_v15, 15  ;;  %v15359_v17 = vsel %vm1086_vm6, 1.0, %v17776_v33  ;;  %vm1092_vm11 = vcmp.ne.s32.totalorder %v742_v53, 15  ;;  %v15362_v31 = vadd.f32 %v4051_v39, %v15262_v30 }
 0x41a   : > { %17913 = vst [vmem:[#allocation30_spill] sm:$0xff] %v15307_v35  ;;  %v714_v35 = vand.u32 15, %v576_v52  ;;  %v15336_v52 = vadd.f32 %v4047_v63, %v2999_v13  ;;  %v784_v13 = vand.u32 15, %v586_v49  ;;  %v17926_v63 = vld [vmem:[#allocation8_spill] sm:$0xff]  ;;  %17927 = vst [vmem:[#allocation26_spill] sm:$0xff] %v15359_v17  ;;  %vm1094_vm10 = vcmp.ne.s32.totalorder %v756_v25, 15 }
 0x41b   : > { %v15321_v2 = vpop.f32.mrf.mxu0  ;;  %v3621_v10 = vadd.f32 %v15108_v41, %v17926_v63  ;;  %v798_v15 = vand.u32 15, %v588_v58  ;;  %v4691_v41 = vadd.f32 %v15094_v38, %v15113_v61  ;;  %v15377_v62 = vsel %vm15348_vm8, 1.0, %v17776_v33 }
 0x41c   : > { %17918 = vst [vmem:[#allocation19_spill] sm:$0xff] %v15321_v2  ;;  %v4055_v2 = vadd.f32 %v15050_v11, %v3605_v3  ;;  %vm15352_vm9 = vcmp.ne.s32.totalorder %v714_v35, 15  ;;  %v770_v11 = vand.u32 15, %v584_v18  ;;  %v15367_v35 = vsel %vm1084_vm7, 1.0, %v17776_v33  ;;  %v4765_v18 = vpop.f32.mrf.mxu1  ;;  %17929 = vst [vmem:[#allocation29_spill] sm:$0xff] %v15377_v62 }
 0x41d   : > { %v15332_v16 = vpop.f32.mrf.mxu0  ;;  %17928 = vst [vmem:[#allocation23_spill] sm:$0xff] %v15367_v35  ;;  %v812_v3 = vand.u32 15, %v590_v12  ;;  %v15382_v30 = vsel %vm15352_vm9, 1.0, %v17776_v33  ;;  %v15385_v53 = vsel %vm1094_vm10, 1.0, %v17776_v33  ;;  %vm1098_vm12 = vcmp.ne.s32.totalorder %v784_v13, 15 }
 0x41e   : > { %v15370_v49 = vadd.f32 %v4055_v2, %v15265_v43  ;;  %17930 = vst [vmem:[#allocation31_spill] sm:$0xff] %v15382_v30  ;;  %17931 = vst [vmem:[#allocation25_spill] sm:$0xff] %v15385_v53  ;;  %v15388_v43 = vsel %vm1092_vm11, 1.0, %v17776_v33  ;;  %vm1096_vm13 = vcmp.ne.s32.totalorder %v770_v11, 15  ;;  %v15391_v38 = vadd.f32 %v15079_v28, %v3621_v10  ;;  %v15429_v13 = vld [vmem:[%s17707_s6] ss:$0 sm:$0xff] }
 0x41f   : > { %v15346_v34 = vpop.f32.mrf.mxu0  ;;  %17932 = vst [vmem:[#allocation8_spill] sm:$0xff] %v15388_v43  ;;  %v4683_v61 = vadd.f32 %v15103_v44, %v15126_v29  ;;  %v4694_v2 = vadd.f32 %v15110_v47, %v15130_v60  ;;  %v4686_v12 = vadd.f32 %v15115_v7, %v15137_v4  ;;  %v4707_v58 = vadd.f32 %v15128_v32, %v15142_v48  ;;  %v12124_v44 = vpop.f32.mrf.mxu1  ;;  %v17953_v28 = vld [vmem:[#allocation87_spill] sm:$0xff] }
 0x420   : > { %17933 = vst [vmem:[#allocation92_spill] sm:$0xff] %v15391_v38  ;;  %vm15401_vm14 = vcmp.ne.s32.totalorder %v812_v3, 15  ;;  %vm15405_vm15 = vcmp.ne.s32.totalorder %v798_v15, 15  ;;  %vm5440_vm2 = vcmask 523264   ;;  %v15411_v60 = vsel %vm1098_vm12, 1.0, %v17776_v33  ;;  %v17945_v15 = vld [vmem:[#allocation77_spill] sm:$0xff] }
 0x421   : > { %v15364_v8 = vpop.f32.mrf.mxu0  ;;  %17938 = vst [vmem:[#allocation93_spill] sm:$0xff] %v15411_v60  ;;  %v15414_v7 = vsel %vm1096_vm13, 1.0, %v17776_v33  ;;  %v4699_v32 = vadd.f32 %v15132_v23, %v15146_v9  ;;  %v4710_v4 = vadd.f32 %v15139_v37, %v15150_v24  ;;  %v4702_v48 = vadd.f32 %v15144_v6, %v15160_v59  ;;  %v17943_v9 = vld [vmem:[#allocation76_spill] sm:$0xff] }
 0x422   : > { %17939 = vst [vmem:[#allocation94_spill] sm:$0xff] %v15414_v7  ;;  %v15435_v23 = vsel %vm15401_vm14, 1.0, %v17776_v33  ;;  %v15440_v59 = vsel %vm15405_vm15, 1.0, %v17776_v33  ;;  %v15448_v37 = vadd.f32 %v15162_v21, %v15173_v55  ;;  %v17950_v55 = vld [vmem:[#allocation80_spill] sm:$0xff] }
 0x423   : > { %v12136_v25 = vpop.f32.mrf.mxu0  ;;  %17940 = vst [vmem:[#allocation95_spill] sm:$0xff] %v15435_v23  ;;  %17941 = vst [vmem:[#allocation96_spill] sm:$0xff] %v15440_v59 }
 0x424   : > { %v5285_v39 = vadd.f32 %v12136_v25, %v4691_v41  ;;  %v17946_v41 = vld [vmem:[#allocation75_spill] sm:$0xff] }
 0x425   : > { %v5156_v20 = vpop.f32.mrf.mxu0  ;;  %v15460_v25 = vadd.f32 %v17946_v41, %v17945_v15  ;;  %v17956_v41 = vld [vmem:[#allocation88_spill] sm:$0xff] }
 0x426   : > { %v5349_v29 = vadd.f32 %v5285_v39, %v14917_v36  ;;  %v5283_v47 = vadd.f32 %v5156_v20, %v4683_v61  ;;  %v15424_v36 = vadd.f32 %v15148_v26, %v15165_v45  ;;  %v15444_v45 = vadd.f32 %v15152_v57, %v15169_v0  ;;  %v17944_v26 = vld [vmem:[#allocation74_spill] sm:$0xff]  ;;  %v17947_v61 = vld [vmem:[#allocation79_spill] sm:$0xff] }
 0x427   : > { %v12137_v11 = vpop.f32.mrf.mxu0  ;;  %v15456_v24 = vadd.f32 %v17944_v26, %v17943_v9  ;;  %v17948_v0 = vld [vmem:[#allocation78_spill] sm:$0xff]  ;;  %v17951_v39 = vld [vmem:[#allocation83_spill] sm:$0xff] }
 0x428   : > { %v5347_v63 = vadd.f32 %v5283_v47, %v14927_v56  ;;  %v5286_v10 = vadd.f32 %v12137_v11, %v4694_v2  ;;  %v17942_v56 = vld [vmem:[#allocation73_spill] sm:$0xff]  ;;  %v15464_v57 = vadd.f32 %v17948_v0, %v17947_v61  ;;  %v4778_v2 = vpop.f32.mrf.mxu1  ;;  %v15467_v21 = vadd.f32 %v15429_v13, %v5349_v29  ;;  %v17954_v11 = vld [vmem:[#allocation86_spill] sm:$0xff]  ;;  %v17957_v61 = vld [vmem:[#allocation20_spill] sm:$0xff] }
 0x429   : > { %v15452_v6 = vadd.f32 %v17942_v56, %v15175_v51  ;;  %v5159_v3 = vpop.f32.mrf.mxu0  ;;  %v15472_v20 = vadd.f32 %v17951_v39, %v17950_v55  ;;  %v15476_v47 = vadd.f32 %v17953_v28, %v17952_v40  ;;  %v17955_v56 = vld [vmem:[#allocation90_spill] sm:$0xff]  ;;  %v15484_v29 = vadd.f32 %v17957_v61, %v17956_v41  ;;  %v17958_v0 = vld [vmem:[#allocation89_spill] sm:$0xff]  ;;  %v17960_v39 = vld [vmem:[#allocation43_spill] sm:$0xff] }
 0x42a   : > { %17949 = vst [vmem:[#allocation73_spill] sm:$0xff] %v15467_v21  ;;  %v5318_v51 = vmul.f32 %v15276_v50, %v5286_v10  ;;  %v15480_v9 = vadd.f32 %v17955_v56, %v17954_v11  ;;  %v5284_v26 = vadd.f32 %v5159_v3, %v4686_v12  ;;  %v15488_v10 = vadd.f32 %v15257_v46, %v17958_v0  ;;  %v17961_v28 = vld [vmem:[#allocation91_spill] sm:$0xff]  ;;  %v17962_v11 = vld [vmem:[#allocation18_spill] sm:$0xff] }
 0x42b   : > { %v12140_v15 = vpop.f32.mrf.mxu0  ;;  %v15491_v55 = vadd.f32 %v15429_v13, %v5347_v63  ;;  %v15496_v50 = vadd.f32 %v15286_v1, %v17961_v28  ;;  %v15500_v12 = vadd.f32 %v15315_v27, %v17962_v11  ;;  %v17963_v61 = vld [vmem:[#allocation11_spill] sm:$0xff]  ;;  %v12125_v63 = vpop.f32.mrf.mxu1  ;;  %v17965_v27 = vld [vmem:[#allocation22_spill] sm:$0xff] }
 0x42c   : > { %v5350_v40 = vadd.f32 %v5318_v51, %v17960_v39  ;;  %v5316_v3 = vmul.f32 %v15295_v14, %v5284_v26  ;;  %v5289_v56 = vadd.f32 %v12140_v15, %v4707_v58  ;;  %v15505_v46 = vadd.f32 %v15339_v19, %v17963_v61  ;;  %v17966_v58 = vld [vmem:[#allocation13_spill] sm:$0xff]  ;;  %v17967_v15 = vld [vmem:[#allocation46_spill] sm:$0xff] }
 0x42d   : > { %17959 = vst [vmem:[#allocation76_spill] sm:$0xff] %v15491_v55  ;;  %v5172_v41 = vpop.f32.mrf.mxu0  ;;  %v5512_v51 = vmul.f32 %v15467_v21, %v15467_v21  ;;  %v15513_v39 = vadd.f32 %v4765_v18, %v15250_v54  ;;  %v15516_v28 = vadd.f32 %v12124_v44, %v17965_v27  ;;  %v17968_v61 = vld [vmem:[#allocation14_spill] sm:$0xff]  ;;  %v5510_v33 = vmul.f32 %v15491_v55, %v15491_v55 }
 0x42e   : > { %v15510_v0 = vadd.f32 %v15429_v13, %v5350_v40  ;;  %v5287_v1 = vadd.f32 %v5172_v41, %v4699_v32  ;;  %v5348_v26 = vadd.f32 %v5316_v3, %v17966_v58  ;;  %v5353_v11 = vadd.f32 %v5289_v56, %v17967_v15  ;;  %v17969_v40 = vld [vmem:[#allocation48_spill] sm:$0xff]  ;;  %v17970_v41 = vld [vmem:[#allocation17_spill] sm:$0xff] }
 0x42f   : > { %v12141_v19 = vpop.f32.mrf.mxu0  ;;  %v15521_v14 = vadd.f32 %v4778_v2, %v17968_v61  ;;  %v15527_v54 = vadd.f32 %v12125_v63, %v17970_v41  ;;  %v5444_v18 = vsel %vm5440_vm2, %v15467_v21, 0.0  ;;  %v5545_v56 = vsel %vm5440_vm2, %v5512_v51, 0.0 }
 0x430   : > { %17964 = vst [vmem:[#allocation74_spill] sm:$0xff] %v15510_v0  ;;  %v5351_v38 = vadd.f32 %v5287_v1, %v17969_v40  ;;  %v5290_v32 = vadd.f32 %v12141_v19, %v4710_v4  ;;  %v15532_v44 = vadd.f32 %v15429_v13, %v5348_v26  ;;  %v15535_v3 = vadd.f32 %v15429_v13, %v5353_v11  ;;  %v17972_v1 = vld [vmem:[#allocation27_spill] sm:$0xff] }
 0x431   : > { %v5175_v2 = vpop.f32.mrf.mxu0  ;;  %v5513_v27 = vmul.f32 %v15510_v0, %v15510_v0  ;;  %v5441_v63 = vsel %vm5440_vm2, %v15491_v55, 0.0  ;;  %v5542_v51 = vsel %vm5440_vm2, %v5510_v33, 0.0  ;;  %v5446_v61 = vsel %vm5440_vm2, %v15510_v0, 0.0 }
 0x432   : > { %17971 = vst [vmem:[#allocation77_spill] sm:$0xff] %v15532_v44  ;;  %v5322_v4 = vmul.f32 %v17972_v1, %v5290_v32  ;;  %v5288_v58 = vadd.f32 %v5175_v2, %v4702_v48  ;;  %v5442_v15 = vsel %vm5440_vm2, %v15532_v44, 0.0  ;;  %v5511_v26 = vmul.f32 %v15532_v44, %v15532_v44  ;;  %v17973_v48 = vld [vmem:[#allocation47_spill] sm:$0xff]  ;;  %v17974_v1 = vld [vmem:[#allocation34_spill] sm:$0xff] }
 0x433   : > { %v15548_v11 = vadd.f32 %v15429_v13, %v5351_v38  ;;  %v12144_v19 = vpop.f32.mrf.mxu0  ;;  %v5443_v40 = vadd.f32 %v5442_v15, %v5441_v63  ;;  %v5516_v2 = vmul.f32 %v15535_v3, %v15535_v3  ;;  %v5547_v55 = vsel %vm5440_vm2, %v5513_v27, 0.0  ;;  %v17975_v63 = vld [vmem:[#allocation15_spill] sm:$0xff] }
 0x434   : > { %v5354_v32 = vadd.f32 %v5322_v4, %v17973_v48  ;;  %v5543_v41 = vsel %vm5440_vm2, %v5511_v26, 0.0  ;;  %v5320_v21 = vmul.f32 %v17974_v1, %v5288_v58  ;;  %v5293_v44 = vadd.f32 %v12144_v19, %v15424_v36  ;;  %v17976_v26 = vld [vmem:[#allocation51_spill] sm:$0xff] }
 0x435   : > { %v5188_v38 = vpop.f32.mrf.mxu0  ;;  %v5544_v59 = vadd.f32 %v5543_v41, %v5542_v51  ;;  %v5445_v33 = vadd.f32 %v5444_v18, %v5443_v40  ;;  %v5514_v4 = vmul.f32 %v15548_v11, %v15548_v11  ;;  %v5452_v36 = vsel %vm5440_vm2, %v15535_v3, 0.0 }
 0x436   : > { %v15561_v23 = vadd.f32 %v15429_v13, %v5354_v32  ;;  %v5352_v15 = vadd.f32 %v5320_v21, %v17975_v63  ;;  %v5357_v48 = vadd.f32 %v5293_v44, %v17976_v26  ;;  %v5291_v0 = vadd.f32 %v5188_v38, %v15444_v45  ;;  %v17977_v32 = vld [vmem:[#allocation54_spill] sm:$0xff] }
 0x437   : > { %v12145_v58 = vpop.f32.mrf.mxu0  ;;  %v5447_v19 = vadd.f32 %v5446_v61, %v5445_v33  ;;  %v5448_v18 = vsel %vm5440_vm2, %v15548_v11, 0.0  ;;  %v5546_v27 = vadd.f32 %v5545_v56, %v5544_v59  ;;  %v5553_v51 = vsel %vm5440_vm2, %v5516_v2, 0.0 }
 0x438   : > { %v15574_v40 = vadd.f32 %v15429_v13, %v5352_v15  ;;  %v5355_v21 = vadd.f32 %v5291_v0, %v17977_v32  ;;  %v5294_v44 = vadd.f32 %v12145_v58, %v15448_v37  ;;  %v5517_v63 = vmul.f32 %v15561_v23, %v15561_v23 }
 0x439   : > { %v5191_v41 = vpop.f32.mrf.mxu0  ;;  %v5449_v45 = vadd.f32 %v5448_v18, %v5447_v19  ;;  %v5548_v38 = vadd.f32 %v5547_v55, %v5546_v27  ;;  %v5549_v33 = vsel %vm5440_vm2, %v5514_v4, 0.0  ;;  %v15587_v0 = vadd.f32 %v15429_v13, %v5357_v48 }
 0x43a   : > { %v5292_v61 = vadd.f32 %v5191_v41, %v15452_v6  ;;  %v5450_v59 = vsel %vm5440_vm2, %v15574_v40, 0.0  ;;  %v5515_v56 = vmul.f32 %v15574_v40, %v15574_v40  ;;  %v15590_v55 = vadd.f32 %v15429_v13, %v5355_v21  ;;  %v17978_v41 = vld [vmem:[#allocation52_spill] sm:$0xff] }
 0x43b   : > { %v12148_v37 = vpop.f32.mrf.mxu0  ;;  %v5550_v2 = vadd.f32 %v5549_v33, %v5548_v38  ;;  %v5451_v15 = vadd.f32 %v5450_v59, %v5449_v45  ;;  %v5326_v26 = vmul.f32 %v15329_v22, %v5294_v44  ;;  %v5454_v6 = vsel %vm5440_vm2, %v15561_v23, 0.0  ;;  %v17979_v44 = vld [vmem:[#allocation40_spill] sm:$0xff] }
 0x43c   : > { %v5551_v4 = vsel %vm5440_vm2, %v5515_v56, 0.0  ;;  %v5324_v58 = vmul.f32 %v15344_v42, %v5292_v61  ;;  %v5297_v19 = vadd.f32 %v12148_v37, %v15456_v24  ;;  %v5555_v48 = vsel %vm5440_vm2, %v5517_v63, 0.0  ;;  %v17980_v33 = vld [vmem:[#allocation56_spill] sm:$0xff] }
 0x43d   : > { %v5204_v18 = vpop.f32.mrf.mxu0  ;;  %v5552_v27 = vadd.f32 %v5551_v4, %v5550_v2  ;;  %v5453_v32 = vadd.f32 %v5452_v36, %v5451_v15  ;;  %v5518_v21 = vmul.f32 %v15590_v55, %v15590_v55  ;;  %v5358_v45 = vadd.f32 %v5326_v26, %v17978_v41  ;;  %v17981_v26 = vld [vmem:[#allocation59_spill] sm:$0xff] }
 0x43e   : > { %v5356_v38 = vadd.f32 %v5324_v58, %v17979_v44  ;;  %v5361_v59 = vadd.f32 %v5297_v19, %v17980_v33  ;;  %v5295_v56 = vadd.f32 %v5204_v18, %v15460_v25  ;;  %v5520_v24 = vmul.f32 %v15587_v0, %v15587_v0  ;;  %v17982_v33 = vld [vmem:[#allocation57_spill] sm:$0xff] }
 0x43f   : > { %v12149_v22 = vpop.f32.mrf.mxu0  ;;  %v5455_v61 = vadd.f32 %v5454_v6, %v5453_v32  ;;  %v5554_v37 = vadd.f32 %v5553_v51, %v5552_v27  ;;  %v5456_v36 = vsel %vm5440_vm2, %v15590_v55, 0.0  ;;  %v15611_v2 = vadd.f32 %v15429_v13, %v5358_v45 }
 0x440   : > { %v5298_v63 = vadd.f32 %v12149_v22, %v15464_v57  ;;  %v15614_v15 = vadd.f32 %v15429_v13, %v5356_v38  ;;  %v5359_v4 = vadd.f32 %v5295_v56, %v17981_v26  ;;  %v5557_v22 = vsel %vm5440_vm2, %v5518_v21, 0.0 }
 0x441   : > { %v5207_v25 = vpop.f32.mrf.mxu0  ;;  %v5457_v58 = vadd.f32 %v5456_v36, %v5455_v61  ;;  %v5556_v19 = vadd.f32 %v5555_v48, %v5554_v37  ;;  %v15625_v27 = vadd.f32 %v15429_v13, %v5361_v59  ;;  %v5460_v41 = vsel %vm5440_vm2, %v15587_v0, 0.0 }
 0x442   : > { %v5330_v18 = vmul.f32 %v15359_v17, %v5298_v63  ;;  %v5296_v51 = vadd.f32 %v5207_v25, %v15472_v20  ;;  %v5458_v57 = vsel %vm5440_vm2, %v15614_v15, 0.0  ;;  %v5519_v6 = vmul.f32 %v15614_v15, %v15614_v15 }
 0x443   : > { %v12152_v32 = vpop.f32.mrf.mxu0  ;;  %v5561_v48 = vsel %vm5440_vm2, %v5520_v24, 0.0  ;;  %v5558_v45 = vadd.f32 %v5557_v22, %v5556_v19  ;;  %v5459_v44 = vadd.f32 %v5458_v57, %v5457_v58  ;;  %v5521_v20 = vmul.f32 %v15611_v2, %v15611_v2 }
 0x444   : > { %v5559_v21 = vsel %vm5440_vm2, %v5519_v6, 0.0  ;;  %v15634_v38 = vadd.f32 %v15429_v13, %v5359_v4  ;;  %v5362_v56 = vadd.f32 %v5330_v18, %v17982_v33  ;;  %v5462_v61 = vsel %vm5440_vm2, %v15611_v2, 0.0 }
 0x445   : > { %v5220_v59 = vpop.f32.mrf.mxu0  ;;  %v5560_v37 = vadd.f32 %v5559_v21, %v5558_v45  ;;  %v5461_v63 = vadd.f32 %v5460_v41, %v5459_v44  ;;  %v5328_v24 = vmul.f32 %v15367_v35, %v5296_v51  ;;  %v5524_v36 = vmul.f32 %v15625_v27, %v15625_v27  ;;  %v17983_v45 = vld [vmem:[#allocation61_spill] sm:$0xff] }
 0x446   : > { %v5522_v26 = vmul.f32 %v15634_v38, %v15634_v38  ;;  %v15645_v25 = vadd.f32 %v15429_v13, %v5362_v56  ;;  %v5301_v4 = vadd.f32 %v12152_v32, %v15476_v47  ;;  %v5299_v57 = vadd.f32 %v5220_v59, %v15480_v9 }
 0x447   : > { %v12153_v58 = vpop.f32.mrf.mxu0  ;;  %v5463_v19 = vadd.f32 %v5462_v61, %v5461_v63  ;;  %v5562_v18 = vadd.f32 %v5561_v48, %v5560_v37  ;;  %v5360_v22 = vadd.f32 %v5328_v24, %v15326_v5  ;;  %v5563_v51 = vsel %vm5440_vm2, %v5521_v20, 0.0  ;;  %v17984_v48 = vld [vmem:[#allocation64_spill] sm:$0xff] }
 0x448   : > { %v5464_v6 = vsel %vm5440_vm2, %v15634_v38, 0.0  ;;  %v5525_v41 = vmul.f32 %v15645_v25, %v15645_v25  ;;  %v5365_v44 = vadd.f32 %v5301_v4, %v17983_v45  ;;  %v5363_v5 = vadd.f32 %v5299_v57, %v17984_v48 }
 0x449   : > { %v5223_v21 = vpop.f32.mrf.mxu0  ;;  %v5465_v33 = vadd.f32 %v5464_v6, %v5463_v19  ;;  %v5564_v47 = vadd.f32 %v5563_v51, %v5562_v18  ;;  %v15657_v32 = vadd.f32 %v15429_v13, %v5360_v22  ;;  %v5565_v9 = vsel %vm5440_vm2, %v5522_v26, 0.0  ;;  %v4781_v6 = vpop.f32.mrf.mxu1 }
 0x44a   : > { %v15662_v20 = vadd.f32 %v15429_v13, %v5365_v44  ;;  %v5302_v56 = vadd.f32 %v12153_v58, %v15484_v29  ;;  %v5300_v59 = vadd.f32 %v5223_v21, %v15488_v10  ;;  %v15671_v4 = vadd.f32 %v15429_v13, %v5363_v5 }
 0x44b   : > { %v12156_v61 = vpop.f32.mrf.mxu0  ;;  %v5566_v37 = vadd.f32 %v5565_v9, %v5564_v47  ;;  %v5466_v63 = vsel %vm5440_vm2, %v15657_v32, 0.0  ;;  %v5523_v24 = vmul.f32 %v15657_v32, %v15657_v32  ;;  %v5468_v26 = vsel %vm5440_vm2, %v15625_v27, 0.0 }
 0x44c   : > { %v5569_v19 = vsel %vm5440_vm2, %v5524_v36, 0.0  ;;  %v5467_v18 = vadd.f32 %v5466_v63, %v5465_v33  ;;  %v5334_v29 = vmul.f32 %v15377_v62, %v5302_v56  ;;  %v5470_v58 = vsel %vm5440_vm2, %v15645_v25, 0.0  ;;  %v17985_v36 = vld [vmem:[#allocation62_spill] sm:$0xff] }
 0x44d   : > { %v5236_v10 = vpop.f32.mrf.mxu0  ;;  %v5571_v22 = vsel %vm5440_vm2, %v5525_v41, 0.0  ;;  %v5567_v57 = vsel %vm5440_vm2, %v5523_v24, 0.0  ;;  %v5332_v51 = vmul.f32 %v15382_v30, %v5300_v59  ;;  %v5526_v21 = vmul.f32 %v15671_v4, %v15671_v4 }
 0x44e   : > { %v5568_v45 = vadd.f32 %v5567_v57, %v5566_v37  ;;  %v5469_v44 = vadd.f32 %v5468_v26, %v5467_v18  ;;  %v5366_v33 = vadd.f32 %v5334_v29, %v17985_v36  ;;  %v5528_v48 = vmul.f32 %v15662_v20, %v15662_v20  ;;  %v17986_v29 = vld [vmem:[#allocation28_spill] sm:$0xff]  ;;  %v17987_v57 = vld [vmem:[#allocation67_spill] sm:$0xff] }
 0x44f   : > { %v12157_v47 = vpop.f32.mrf.mxu0  ;;  %v5364_v5 = vadd.f32 %v5332_v51, %v15336_v52  ;;  %v5305_v41 = vadd.f32 %v12156_v61, %v15496_v50  ;;  %v5303_v9 = vadd.f32 %v5236_v10, %v15500_v12  ;;  %v5472_v26 = vsel %vm5440_vm2, %v15671_v4, 0.0  ;;  %v17988_v61 = vld [vmem:[#allocation30_spill] sm:$0xff]  ;;  %v12128_v10 = vpop.f32.mrf.mxu1 }
 0x450   : > { %v5471_v56 = vadd.f32 %v5470_v58, %v5469_v44  ;;  %v5570_v59 = vadd.f32 %v5569_v19, %v5568_v45  ;;  %v15691_v37 = vadd.f32 %v15429_v13, %v5366_v33  ;;  %v5306_v63 = vadd.f32 %v12157_v47, %v15505_v46 }
 0x451   : > { %v5239_v24 = vpop.f32.mrf.mxu0  ;;  %v15697_v18 = vadd.f32 %v15429_v13, %v5364_v5  ;;  %v5369_v52 = vadd.f32 %v5305_v41, %v17986_v29  ;;  %v5367_v50 = vadd.f32 %v5303_v9, %v17987_v57  ;;  %v4782_v12 = vadd.f32 %v4781_v6, %v17988_v61  ;;  %v17989_v57 = vld [vmem:[#allocation66_spill] sm:$0xff] }
 0x452   : > { %v5473_v19 = vadd.f32 %v5472_v26, %v5471_v56  ;;  %v5572_v58 = vadd.f32 %v5571_v22, %v5570_v59  ;;  %v5573_v51 = vsel %vm5440_vm2, %v5526_v21, 0.0  ;;  %v5304_v33 = vadd.f32 %v5239_v24, %v15513_v39  ;;  %v4794_v26 = vpop.f32.mrf.mxu1 }
 0x453   : > { %v12160_v45 = vpop.f32.mrf.mxu0  ;;  %v5474_v46 = vsel %vm5440_vm2, %v15697_v18, 0.0  ;;  %v5527_v44 = vmul.f32 %v15697_v18, %v15697_v18  ;;  %v15708_v36 = vadd.f32 %v15429_v13, %v5367_v50  ;;  %v5529_v6 = vmul.f32 %v15691_v37, %v15691_v37 }
 0x454   : > { %v5574_v47 = vadd.f32 %v5573_v51, %v5572_v58  ;;  %v5475_v5 = vadd.f32 %v5474_v46, %v5473_v19  ;;  %v5338_v22 = vmul.f32 %v15385_v53, %v5306_v63  ;;  %v5476_v41 = vsel %vm5440_vm2, %v15662_v20, 0.0 }
 0x455   : > { %v5252_v21 = vpop.f32.mrf.mxu0  ;;  %v5577_v9 = vsel %vm5440_vm2, %v5528_v48, 0.0  ;;  %v5478_v56 = vsel %vm5440_vm2, %v15691_v37, 0.0  ;;  %v5575_v59 = vsel %vm5440_vm2, %v5527_v44, 0.0  ;;  %v15721_v24 = vadd.f32 %v15429_v13, %v5369_v52 }
 0x456   : > { %v5576_v39 = vadd.f32 %v5575_v59, %v5574_v47  ;;  %v5477_v29 = vadd.f32 %v5476_v41, %v5475_v5  ;;  %v5370_v50 = vadd.f32 %v5338_v22, %v17989_v57  ;;  %v5530_v61 = vmul.f32 %v15708_v36, %v15708_v36  ;;  %v17990_v22 = vld [vmem:[#allocation70_spill] sm:$0xff]  ;;  %v17991_v59 = vld [vmem:[#allocation32_spill] sm:$0xff] }
 0x457   : > { %v12161_v63 = vpop.f32.mrf.mxu0  ;;  %v5336_v19 = vmul.f32 %v15388_v43, %v5304_v33  ;;  %v5309_v48 = vadd.f32 %v12160_v45, %v15516_v28  ;;  %v5307_v58 = vadd.f32 %v5252_v21, %v15521_v14  ;;  %v5579_v51 = vsel %vm5440_vm2, %v5529_v6, 0.0  ;;  %v17992_v43 = vld [vmem:[#allocation19_spill] sm:$0xff]  ;;  %v12129_v45 = vpop.f32.mrf.mxu1 }
 0x458   : > { %v5479_v46 = vadd.f32 %v5478_v56, %v5477_v29  ;;  %v5480_v52 = vsel %vm5440_vm2, %v15708_v36, 0.0  ;;  %v5578_v44 = vadd.f32 %v5577_v9, %v5576_v39  ;;  %v5310_v33 = vadd.f32 %v12161_v63, %v15527_v54 }
 0x459   : > { %v5255_v47 = vpop.f32.mrf.mxu0  ;;  %v5368_v5 = vadd.f32 %v5336_v19, %v15362_v31  ;;  %v5373_v41 = vadd.f32 %v5309_v48, %v17990_v22  ;;  %v5371_v57 = vadd.f32 %v5307_v58, %v17991_v59  ;;  %v4803_v28 = vadd.f32 %v12128_v10, %v17992_v43  ;;  %v17994_v22 = vld [vmem:[#allocation35_spill] sm:$0xff] }
 0x45a   : > { %v5481_v14 = vadd.f32 %v5480_v52, %v5479_v46  ;;  %v5580_v21 = vadd.f32 %v5579_v51, %v5578_v44  ;;  %v15738_v6 = vadd.f32 %v15429_v13, %v5370_v50  ;;  %v5532_v9 = vmul.f32 %v15721_v24, %v15721_v24 }
 0x45b   : > { %v12164_v56 = vpop.f32.mrf.mxu0  ;;  %v5581_v31 = vsel %vm5440_vm2, %v5530_v61, 0.0  ;;  %v15744_v39 = vadd.f32 %v15429_v13, %v5368_v5  ;;  %v5342_v29 = vmul.f32 %v15411_v60, %v5310_v33  ;;  %v4795_v54 = vadd.f32 %v4794_v26, %v15332_v16  ;;  %v17993_v26 = vld [vmem:[#allocation71_spill] sm:$0xff] }
 0x45c   : > { %v5582_v43 = vadd.f32 %v5581_v31, %v5580_v21  ;;  %v5308_v10 = vadd.f32 %v5255_v47, %v4782_v12  ;;  %v5313_v63 = vadd.f32 %v12164_v56, %v4803_v28  ;;  %v4806_v50 = vadd.f32 %v12129_v45, %v15346_v34  ;;  %v4797_v34 = vpop.f32.mrf.mxu1 }
 0x45d   : > { %v5268_v19 = vpop.f32.mrf.mxu0  ;;  %v5482_v48 = vsel %vm5440_vm2, %v15744_v39, 0.0  ;;  %v5531_v58 = vmul.f32 %v15744_v39, %v15744_v39  ;;  %v15754_v61 = vadd.f32 %v15429_v13, %v5371_v57  ;;  %v5484_v51 = vsel %vm5440_vm2, %v15721_v24, 0.0 }
 0x45e   : > { %v5533_v16 = vmul.f32 %v15738_v6, %v15738_v6  ;;  %v5483_v12 = vadd.f32 %v5482_v48, %v5481_v14  ;;  %v5374_v46 = vadd.f32 %v5342_v29, %v17993_v26  ;;  %v5585_v44 = vsel %vm5440_vm2, %v5532_v9, 0.0 }
 0x45f   : > { %v12165_v52 = vpop.f32.mrf.mxu0  ;;  %v5583_v47 = vsel %vm5440_vm2, %v5531_v58, 0.0  ;;  %v5340_v5 = vmul.f32 %v15414_v7, %v5308_v10  ;;  %v5377_v59 = vadd.f32 %v5313_v63, %v17994_v22  ;;  %v5486_v57 = vsel %vm5440_vm2, %v15738_v6, 0.0  ;;  %v17995_v58 = vld [vmem:[#allocation38_spill] sm:$0xff] }
 0x460   : > { %v5584_v33 = vadd.f32 %v5583_v47, %v5582_v43  ;;  %v15768_v28 = vadd.f32 %v15429_v13, %v5373_v41  ;;  %v5485_v45 = vadd.f32 %v5484_v51, %v5483_v12  ;;  %v5534_v14 = vmul.f32 %v15754_v61, %v15754_v61  ;;  %v17997_v47 = vld [vmem:[#allocation36_spill] sm:$0xff] }
 0x461   : > { %v5372_v21 = vadd.f32 %v5340_v5, %v15370_v49  ;;  %v5311_v56 = vadd.f32 %v5268_v19, %v4795_v54  ;;  %v5314_v9 = vadd.f32 %v12165_v52, %v4806_v50  ;;  %v4798_v31 = vadd.f32 %v4797_v34, %v15364_v8  ;;  %v5271_v49 = vpop.f32.mrf.mxu0  ;;  %v17996_v50 = vld [vmem:[#allocation95_spill] sm:$0xff] }
 0x462   : > { %v5587_v29 = vsel %vm5440_vm2, %v5533_v16, 0.0  ;;  %v5487_v10 = vadd.f32 %v5486_v57, %v5485_v45  ;;  %v5586_v63 = vadd.f32 %v5585_v44, %v5584_v33  ;;  %v5488_v43 = vsel %vm5440_vm2, %v15754_v61, 0.0  ;;  %v17998_v57 = vld [vmem:[#allocation10_spill] sm:$0xff]  ;;  %v17999_v33 = vld [vmem:[#allocation39_spill] sm:$0xff] }
 0x463   : > { %v15778_v41 = vadd.f32 %v15429_v13, %v5374_v46  ;;  %v15781_v48 = vadd.f32 %v15429_v13, %v5372_v21  ;;  %v5375_v51 = vadd.f32 %v5311_v56, %v17995_v58  ;;  %v5536_v54 = vmul.f32 %v15768_v28, %v15768_v28 }
 0x464   : > { %v5489_v8 = vadd.f32 %v5488_v43, %v5487_v10  ;;  %v5588_v19 = vadd.f32 %v5587_v29, %v5586_v63  ;;  %v5346_v16 = vmul.f32 %v17996_v50, %v5314_v9  ;;  %v5589_v12 = vsel %vm5440_vm2, %v5534_v14, 0.0  ;;  %v18000_v10 = vld [vmem:[#allocation96_spill] sm:$0xff] }
 0x465   : > { %v5490_v26 = vsel %vm5440_vm2, %v15781_v48, 0.0  ;;  %v5535_v46 = vmul.f32 %v15781_v48, %v15781_v48  ;;  %v15793_v52 = vadd.f32 %v15429_v13, %v5375_v51  ;;  %v5312_v22 = vadd.f32 %v5271_v49, %v4798_v31  ;;  %v18001_v43 = vld [vmem:[#allocation92_spill] sm:$0xff] }
 0x466   : > { %v5590_v34 = vadd.f32 %v5589_v12, %v5588_v19  ;;  %v5491_v44 = vadd.f32 %v5490_v26, %v5489_v8  ;;  %v5378_v5 = vadd.f32 %v5346_v16, %v17997_v47  ;;  %v3011_v45 = vadd.f32 %v17999_v33, %v17998_v57 }
 0x467   : > { %v5492_v14 = vsel %vm5440_vm2, %v15768_v28, 0.0  ;;  %v5537_v21 = vmul.f32 %v15778_v41, %v15778_v41  ;;  %v5591_v56 = vsel %vm5440_vm2, %v5535_v46, 0.0  ;;  %v5344_v63 = vmul.f32 %v18000_v10, %v5312_v22 }
 0x468   : > { %v5592_v9 = vadd.f32 %v5591_v56, %v5590_v34  ;;  %v5493_v29 = vadd.f32 %v5492_v14, %v5491_v44  ;;  %v4123_v58 = vadd.f32 %v18001_v43, %v3011_v45  ;;  %v5593_v51 = vsel %vm5440_vm2, %v5536_v54, 0.0 }
 0x469   : > { %v5494_v31 = vsel %vm5440_vm2, %v15778_v41, 0.0  ;;  %v5538_v49 = vmul.f32 %v15793_v52, %v15793_v52  ;;  %v5595_v16 = vsel %vm5440_vm2, %v5537_v21, 0.0  ;;  %v15812_v12 = vadd.f32 %v15429_v13, %v5377_v59 }
 0x46a   : > { %v5495_v8 = vadd.f32 %v5494_v31, %v5493_v29  ;;  %v5594_v19 = vadd.f32 %v5593_v51, %v5592_v9  ;;  %v5496_v26 = vsel %vm5440_vm2, %v15793_v52, 0.0  ;;  %v5376_v46 = vadd.f32 %v5344_v63, %v4123_v58 }
 0x46b   : > { %v5597_v54 = vsel %vm5440_vm2, %v5538_v49, 0.0  ;;  %v5540_v57 = vmul.f32 %v15812_v12, %v15812_v12  ;;  %v15823_v33 = vadd.f32 %v15429_v13, %v5378_v5  ;;  %v5500_v21 = vsel %vm5440_vm2, %v15812_v12, 0.0 }
 0x46c   : > { %v5497_v34 = vadd.f32 %v5496_v26, %v5495_v8  ;;  %v5596_v44 = vadd.f32 %v5595_v16, %v5594_v19  ;;  %v15818_v47 = vadd.f32 %v15429_v13, %v5376_v46 }
 0x46d   : > { %v5601_v63 = vsel %vm5440_vm2, %v5540_v57, 0.0  ;;  %v5502_v13 = vsel %vm5440_vm2, %v15823_v33, 0.0  ;;  %v5541_v5 = vmul.f32 %v15823_v33, %v15823_v33 }
 0x46e   : > { %v5598_v22 = vadd.f32 %v5597_v54, %v5596_v44  ;;  %v5498_v59 = vsel %vm5440_vm2, %v15818_v47, 0.0  ;;  %v5539_v45 = vmul.f32 %v15818_v47, %v15818_v47  ;;  %v13199_v54 = vld [vmem:[%s17710_s9 + $0x38] sm:$0xff] }
 0x46f   : > { %v5499_v14 = vadd.f32 %v5498_v59, %v5497_v34  ;;  %v5603_v31 = vsel %vm5440_vm2, %v5541_v5, 0.0  ;;  %v13200_v59 = vld [vmem:[%s17710_s9 + $0x30] sm:$0xff]  ;;  %v5439_v5 = vld [vmem:[%s17711_s10 + $0x18] sm:$0xff] }
 0x470   : > { %v5599_v56 = vsel %vm5440_vm2, %v5539_v45, 0.0  ;;  %v13201_v45 = vld [vmem:[%s17710_s9 + $0x28] sm:$0xff] }
 0x471   : > { %v5501_v9 = vadd.f32 %v5500_v21, %v5499_v14  ;;  %v5600_v29 = vadd.f32 %v5599_v56, %v5598_v22  ;;  %v18002_v22 = vmov 0.0   ;;  %v13202_v21 = vld [vmem:[%s17710_s9 + $0x20] sm:$0xff]  ;;  %v18003_v56 = vld [vmem:[#allocation37_spill] sm:$0xff] }
 0x473   : > { %v5503_v43 = vadd.f32 %v5502_v13, %v5501_v9  ;;  %v5602_v58 = vadd.f32 %v5601_v63, %v5600_v29  ;;  %v18004_v29 = vld [vmem:[#allocation81_spill] sm:$0xff]  ;;  %v18005_v63 = vld [vmem:[#allocation82_spill] sm:$0xff] }
 0x475   : > { %v5504_v51 = vrot.slane %v5503_v43, 4  ;;  %v5604_v8 = vadd.f32 %v5603_v31, %v5602_v58  ;;  %v5438_v58 = vld [vmem:[%s17711_s10 + $0x10] sm:$0xff]  ;;  %v5436_v31 = vld [vmem:[%s17711_s10] sm:$0xff] }
 0x477   : > { %v5505_v49 = vadd.f32 %v5504_v51, %v5503_v43  ;;  %v5605_v26 = vrot.slane %v5604_v8, 4  ;;  %v18006_v43 = vld [vmem:[#allocation85_spill] sm:$0xff] }
 0x478   : > { %v5437_v51 = vld [vmem:[%s17711_s10 + $0x8] sm:$0xff] }
 0x479   : > { %v5506_v19 = vrot.slane %v5505_v49, 2  ;;  %v5606_v44 = vadd.f32 %v5605_v26, %v5604_v8 }
 0x47b   : > { %v5507_v16 = vadd.f32 %v5506_v19, %v5505_v49  ;;  %v5607_v57 = vrot.slane %v5606_v44, 2 }
 0x47d   : > { %v5508_v46 = vrot.slane %v5507_v16, 1  ;;  %v5608_v14 = vadd.f32 %v5607_v57, %v5606_v44 }
 0x47f   : > { %v5509_v34 = vadd.f32 %v5508_v46, %v5507_v16  ;;  %v5609_v9 = vrot.slane %v5608_v14, 1 }
 0x481   : > { %12183 = vmatmul.mubr.msk.f32.vlgmr.msra.gmra.mxu1 %vm5440_vm2, %v5509_v34  ;;  %v5610_v13 = vadd.f32 %v5609_v9, %v5608_v14  ;;  %v12782_v9 = vld [vmem:[%s17712_s11 + $0x90] sm:$0xff]  }
 0x482   : > { %12186 = vmatpush3.msra.mxu1 %v13199_v54  ;;  %12201 = vmatprep.mubr.msk.f32.mxu1 %vm13284_vm0, %v18002_v22 }
 0x483   : > { %12187 = vmatprep.subr.mxu1 %v18002_v22 }
 0x484   : > { %12188 = vmatpush3.msra.mxu1 %v13200_v59  ;;  %v12778_v59 = vld [vmem:[%s17712_s11 + $0x38] sm:$0xff]  }
 0x485   : > { %12189 = vmatprep.subr.mxu1 %v18002_v22  ;;  %12266 = vmatprep.subr.bf16.mxu0 %v12778_v59 }
 0x486   : > { %12190 = vmatpush3.msra.mxu1 %v13201_v45  ;;  %12267 = vmatpush3.bf16.msra.mxu0 %v12778_v59  ;;  %v12780_v45 = vld [vmem:[%s17712_s11 + $0x28] sm:$0xff]   ;;  %v18008_v59 = vld [vmem:[#allocation76_spill] sm:$0xff] }
 0x487   : > { %12191 = vmatprep.subr.mxu1 %v18002_v22 }
 0x488   : > { %12192 = vmatpush3.msra.mxu1 %v13202_v21 }
 0x489   : > { %12193 = vmatprep.subr.mxu1 %v18002_v22 }
 0x48a   : > { %12194 = vmatpush3.msra.mxu1 %v18003_v56  ;;  %v12781_v56 = vld [vmem:[%s17712_s11 + $0x98] sm:$0xff]  }
 0x48b   : > { %12195 = vmatprep.subr.mxu1 %v18002_v22 }
 0x48c   : > { %12196 = vmatpush3.msra.mxu1 %v18004_v29  ;;  %v12783_v29 = vld [vmem:[%s17712_s11 + $0x20] sm:$0xff]  }
 0x48d   : > { %12197 = vmatprep.subr.mxu1 %v18002_v22 }
 0x48e   : > { %12198 = vmatpush3.msra.mxu1 %v18005_v63  ;;  %v6372_v63 = vld [vmem:[#allocation3 + $0x8] sm:$0xf] }
 0x48f   : > { %12199 = vmatprep.subr.mxu1 %v18002_v22 }
 0x490   : > { %12200 = vmatpush3.msra.mxu1 %v18006_v43  ;;  %v15912_v43 = vld [vmem:[%s17712_s11 + $0x78] sm:$0xff]  }
 0x491   : > { %12202 = vmatmul.mubr.msk.f32.vlgmr.msra.gmra.mxu1 %vm5440_vm2, %v5610_v13  ;;  %12204 = vmatprep.subr.mxu1 %v18002_v22  ;;  %v6373_v13 = vld [vmem:[#allocation3 + $0xc] sm:$0xf] }
 0x492   : > { %12205 = vmatpush3.msra.mxu1 %v5439_v5  ;;  %12212 = vmatprep.mubr.msk.f32.mxu1 %vm13284_vm0, %v18002_v22 }
 0x493   : > { %12206 = vmatprep.subr.mxu1 %v18002_v22 }
 0x494   : > { %12207 = vmatpush3.msra.mxu1 %v5438_v58 }
 0x495   : > { %12208 = vmatprep.subr.mxu1 %v18002_v22 }
 0x496   : > { %12209 = vmatpush3.msra.mxu1 %v5437_v51 }
 0x497   : > { %12210 = vmatprep.subr.mxu1 %v18002_v22 }
 0x498   : > { %12211 = vmatpush3.msra.mxu1 %v5436_v31 }
 0x499   : > { %12215 = vmatprep.subr.mxu1 %v18002_v22 }
 0x541   : > { %v5680_v49 = vpop.f32.mrf.mxu1 }
 0x542   : > { %v5685_v8 = vmul.f32 0.001953125, %v5680_v49  ;;  %v5426_v49 = vld [vmem:[%s17708_s7] sm:$0x1] }
 0x543   : > { %v12184_v19 = vpop.f32.mrf.mxu1 }
 0x544   : > { %12213 = vmatmul.mubr.msk.f32.vlgmr.msra.gmra.mxu1 %vm1186_vm1, %v5685_v8  ;;  %v5760_v26 = vmul.f32 %v5685_v8, %v5685_v8 }
 0x545   : > { %12216 = vmatpush3.msra.mxu1 %v5439_v5  ;;  %12223 = vmatprep.mubr.msk.f32.mxu1 %vm13284_vm0, %v18002_v22  ;;  %v10921_v5 = vcombine.low %v6372_v63, %v6373_v13 }
 0x546   : > { %12217 = vmatprep.subr.mxu1 %v18002_v22 }
 0x547   : > { %12218 = vmatpush3.msra.mxu1 %v5438_v58  ;;  %v12784_v58 = vld [vmem:[%s17712_s11 + $0x88] sm:$0xff]   ;;  %12274 = vmatprep.mubr.msk.bf16.mxu0 %vm5440_vm2, %v10921_v5 }
 0x548   : > { %12219 = vmatprep.subr.mxu1 %v18002_v22 }
 0x549   : > { %12220 = vmatpush3.msra.mxu1 %v5437_v51  ;;  %v12785_v51 = vld [vmem:[%s17712_s11 + $0x80] sm:$0xff]  }
 0x54a   : > { %12221 = vmatprep.subr.mxu1 %v18002_v22  ;;  %v12779_v22 = vld [vmem:[%s17712_s11 + $0x30] sm:$0xff]  }
 0x54b   : > { %12222 = vmatpush3.msra.mxu1 %v5436_v31  ;;  %12268 = vmatprep.subr.bf16.mxu0 %v12779_v22  ;;  %v15925_v31 = vld [vmem:[%s17712_s11 + $0xf8] sm:$0xff]  }
 0x54c   : > { %12269 = vmatpush3.bf16.msra.mxu0 %v12779_v22  ;;  %12226 = vmatprep.subr.bf16.mxu1 %v12781_v56 }
 0x54d   : > { %12270 = vmatprep.subr.bf16.mxu0 %v12780_v45 }
 0x550   : > { %12271 = vmatpush3.bf16.msra.mxu0 %v12780_v45  ;;  %v18009_v45 = vld [vmem:[#allocation77_spill] sm:$0xff] }
 0x551   : > { %v5755_v16 = vpop.f32.mrf.mxu1  ;;  %12272 = vmatprep.subr.bf16.mxu0 %v12783_v29 }
 0x552   : > { %v5759_v46 = vmul.f32 0.001953125, %v5755_v16 }
 0x553   : > { %v12203_v34 = vpop.f32.mrf.mxu1 }
 0x554   : > { %v5761_v44 = vsub.f32 %v5759_v46, %v5760_v26  ;;  %12273 = vmatpush3.bf16.msra.mxu0 %v12783_v29  ;;  %v5427_v46 = vld [vmem:[%s17709_s8] sm:$0x1] }
 0x555   : > { %12346 = vmatprep.subr.bf16.mxu0 %v15912_v43 }
 0x556   : > { %v5762_v54 = vadd.f32 1e-06, %v5761_v44  ;;  %v18007_v44 = vld [vmem:[#allocation9_spill] sm:$0xff] }
 0x558   : > { %13068 = vrsqrt.f32 %v5762_v54 }
 0x565   : > { %v13069_v57 = vpop.eup %13068 }
 0x566   : > { %12224 = vmatmul.mubr.msk.f32.vlgmr.msra.gmra.mxu1 %vm1186_vm1, %v13069_v57 }
 0x567   : > { %12227 = vmatpush3.bf16.msra.mxu1 %v12781_v56  ;;  %v18010_v56 = vld [vmem:[#allocation73_spill] sm:$0xff] }
 0x568   : > { %12228 = vmatprep.subr.bf16.mxu1 %v12782_v9 }
 0x56b   : > { %12229 = vmatpush3.bf16.msra.mxu1 %v12782_v9  ;;  %v18011_v9 = vld [vmem:[#allocation74_spill] sm:$0xff] }
 0x56c   : > { %12230 = vmatprep.subr.bf16.mxu1 %v12784_v58 }
 0x56f   : > { %12231 = vmatpush3.bf16.msra.mxu1 %v12784_v58 }
 0x570   : > { %12232 = vmatprep.subr.bf16.mxu1 %v12785_v51 }
 0x573   : > { %12233 = vmatpush3.bf16.msra.mxu1 %v12785_v51 }
 0x574   : > { %12306 = vmatprep.subr.bf16.mxu1 %v15925_v31 }
 0x604   : > { %v5833_v14 = vpop.f32.mrf.mxu1 }
 0x606   : > { %v12214_v21 = vpop.f32.mrf.mxu1 }
 0x626   : > { %v5906_v8 = vpop.f32.mrf.mxu1 }
 0x627   : > { %v5910_v19 = vmul.f32 %v5906_v8, %v5426_v49 }
 0x628   : > { %v12225_v16 = vpop.f32.mrf.mxu1 }
 0x629   : > { %v5911_v26 = vmul.f32 %v5910_v19, %v5833_v14  ;;  %v15935_v54 = vrot.slane %v5910_v19, %v18007_v44 }
 0x62b   : > { %v5912_v34 = vsub.f32 %v5427_v46, %v5911_v26  ;;  %v5917_v22 = vmul.f32 %v15935_v54, %v18008_v59  ;;  %v5918_v21 = vmul.f32 %v15935_v54, %v18009_v45  ;;  %v5919_v14 = vmul.f32 %v15935_v54, %v18010_v56 }
 0x62c   : > { %v5920_v29 = vmul.f32 %v15935_v54, %v18011_v9  ;;  %v5921_v63 = vmul.f32 %v15935_v54, %v15548_v11  ;;  %v5922_v58 = vmul.f32 %v15935_v54, %v15574_v40  ;;  %v5923_v8 = vmul.f32 %v15935_v54, %v15535_v3 }
 0x62d   : > { %v15938_v57 = vrot.slane %v5912_v34, %v18007_v44  ;;  %v5924_v19 = vmul.f32 %v15935_v54, %v15561_v23  ;;  %v5925_v40 = vmul.f32 %v15935_v54, %v15590_v55  ;;  %v5926_v3 = vmul.f32 %v15935_v54, %v15614_v15 }
 0x62e   : > { %v5927_v55 = vmul.f32 %v15935_v54, %v15587_v0 }
 0x62f   : > { %v15951_v13 = vadd.f32 %v15938_v57, %v5917_v22  ;;  %v15954_v5 = vadd.f32 %v15938_v57, %v5918_v21  ;;  %v15959_v51 = vadd.f32 %v15938_v57, %v5919_v14  ;;  %v15962_v49 = vadd.f32 %v15938_v57, %v5920_v29 }
 0x630   : > { %v15967_v11 = vadd.f32 %v15938_v57, %v5921_v63  ;;  %v15972_v16 = vadd.f32 %v15938_v57, %v5922_v58  ;;  %v15977_v26 = vadd.f32 %v15938_v57, %v5923_v8  ;;  %v15984_v44 = vadd.f32 %v15938_v57, %v5924_v19 }
 0x631   : > { %v10805_v46 = vmul.f32 -1.442695, %v15951_v13  ;;  %v10806_v34 = vmul.f32 -1.442695, %v15954_v5  ;;  %v10807_v23 = vmul.f32 -1.442695, %v15959_v51  ;;  %v15991_v22 = vadd.f32 %v15938_v57, %v5925_v40 }
 0x632   : > { %v10808_v59 = vmul.f32 -1.442695, %v15962_v49  ;;  %v10809_v45 = vmul.f32 -1.442695, %v15967_v11  ;;  %v5928_v21 = vmul.f32 %v15935_v54, %v15611_v2  ;;  %v15997_v15 = vadd.f32 %v15938_v57, %v5926_v3 }
 0x633   : > { %13070 = vpow2.f32 %v10805_v46  ;;  %v10810_v56 = vmul.f32 -1.442695, %v15972_v16  ;;  %v5929_v14 = vmul.f32 %v15935_v54, %v15634_v38  ;;  %v16003_v0 = vadd.f32 %v15938_v57, %v5927_v55 }
 0x634   : > { %13072 = vpow2.f32 %v10806_v34  ;;  %v10811_v9 = vmul.f32 -1.442695, %v15977_v26  ;;  %v5930_v29 = vmul.f32 %v15935_v54, %v15657_v32  ;;  %v16009_v2 = vadd.f32 %v15938_v57, %v5928_v21 }
 0x635   : > { %13074 = vpow2.f32 %v10807_v23  ;;  %v10812_v63 = vmul.f32 -1.442695, %v15984_v44  ;;  %v5931_v58 = vmul.f32 %v15935_v54, %v15625_v27  ;;  %v16015_v38 = vadd.f32 %v15938_v57, %v5929_v14 }
 0x636   : > { %13076 = vpow2.f32 %v10808_v59  ;;  %v10813_v8 = vmul.f32 -1.442695, %v15991_v22  ;;  %v5932_v19 = vmul.f32 %v15935_v54, %v15645_v25  ;;  %v16021_v32 = vadd.f32 %v15938_v57, %v5930_v29 }
 0x637   : > { %13078 = vpow2.f32 %v10809_v45  ;;  %v10814_v40 = vmul.f32 -1.442695, %v15997_v15  ;;  %v5933_v46 = vmul.f32 %v15935_v54, %v15671_v4  ;;  %v16027_v27 = vadd.f32 %v15938_v57, %v5931_v58 }
 0x638   : > { %13080 = vpow2.f32 %v10810_v56  ;;  %v10815_v34 = vmul.f32 -1.442695, %v16003_v0  ;;  %v5934_v3 = vmul.f32 %v15935_v54, %v15697_v18  ;;  %v16033_v25 = vadd.f32 %v15938_v57, %v5932_v19 }
 0x639   : > { %13082 = vpow2.f32 %v10811_v9  ;;  %v10816_v23 = vmul.f32 -1.442695, %v16009_v2  ;;  %v5935_v59 = vmul.f32 %v15935_v54, %v15662_v20  ;;  %v16039_v4 = vadd.f32 %v15938_v57, %v5933_v46 }
 0x63a   : > { %13084 = vpow2.f32 %v10812_v63  ;;  %v10817_v55 = vmul.f32 -1.442695, %v16015_v38  ;;  %v5936_v45 = vmul.f32 %v15935_v54, %v15691_v37  ;;  %v16045_v18 = vadd.f32 %v15938_v57, %v5934_v3 }
 0x63b   : > { %13086 = vpow2.f32 %v10813_v8  ;;  %v10818_v21 = vmul.f32 -1.442695, %v16021_v32  ;;  %v5937_v56 = vmul.f32 %v15935_v54, %v15708_v36  ;;  %v16051_v20 = vadd.f32 %v15938_v57, %v5935_v59 }
 0x63c   : > { %13088 = vpow2.f32 %v10814_v40  ;;  %v10819_v14 = vmul.f32 -1.442695, %v16027_v27  ;;  %v5938_v9 = vmul.f32 %v15935_v54, %v15744_v39  ;;  %v16057_v37 = vadd.f32 %v15938_v57, %v5936_v45 }
 0x63d   : > { %13090 = vpow2.f32 %v10815_v34  ;;  %v10820_v29 = vmul.f32 -1.442695, %v16033_v25  ;;  %v5939_v63 = vmul.f32 %v15935_v54, %v15721_v24  ;;  %v16063_v36 = vadd.f32 %v15938_v57, %v5937_v56 }
 0x63e   : > { %13092 = vpow2.f32 %v10816_v23  ;;  %v10821_v58 = vmul.f32 -1.442695, %v16039_v4  ;;  %v5940_v39 = vmul.f32 %v15935_v54, %v15738_v6  ;;  %v16071_v19 = vadd.f32 %v15938_v57, %v5938_v9 }
 0x63f   : > { %13094 = vpow2.f32 %v10817_v55  ;;  %v10822_v40 = vmul.f32 -1.442695, %v16045_v18  ;;  %v5941_v24 = vmul.f32 %v15935_v54, %v15754_v61  ;;  %v16079_v34 = vadd.f32 %v15938_v57, %v5939_v63 }
 0x640   : > { %v16066_v8 = vpop.eup %13070  ;;  %13096 = vpow2.f32 %v10818_v21  ;;  %v10823_v3 = vmul.f32 -1.442695, %v16051_v20  ;;  %v5942_v6 = vmul.f32 %v15935_v54, %v15781_v48  ;;  %v16085_v59 = vadd.f32 %v15938_v57, %v5940_v39 }
 0x641   : > { %v16074_v46 = vpop.eup %13072  ;;  %13098 = vpow2.f32 %v10819_v14  ;;  %v10824_v55 = vmul.f32 -1.442695, %v16057_v37  ;;  %v5943_v61 = vmul.f32 %v15935_v54, %v15768_v28  ;;  %v16091_v21 = vadd.f32 %v15938_v57, %v5941_v24 }
 0x642   : > { %v13075_v23 = vpop.eup %13074  ;;  %13100 = vpow2.f32 %v10820_v29  ;;  %v10825_v56 = vmul.f32 -1.442695, %v16063_v36  ;;  %v5944_v48 = vmul.f32 %v15935_v54, %v15778_v41  ;;  %v16097_v9 = vadd.f32 %v15938_v57, %v5942_v6 }
 0x643   : > { %v13077_v45 = vpop.eup %13076  ;;  %13102 = vpow2.f32 %v10821_v58  ;;  %v10826_v63 = vmul.f32 -1.442695, %v16071_v19  ;;  %v5945_v28 = vmul.f32 %v15935_v54, %v15793_v52  ;;  %v16103_v39 = vadd.f32 %v15938_v57, %v5943_v61 }
 0x644   : > { %v13079_v14 = vpop.eup %13078  ;;  %13104 = vpow2.f32 %v10822_v40  ;;  %v10827_v24 = vmul.f32 -1.442695, %v16079_v34  ;;  %v5946_v41 = vmul.f32 %v15935_v54, %v15818_v47  ;;  %v16109_v6 = vadd.f32 %v15938_v57, %v5944_v48 }
 0x645   : > { %v13081_v29 = vpop.eup %13080  ;;  %13106 = vpow2.f32 %v10823_v3  ;;  %v10828_v10 = vmul.f32 -1.442695, %v16085_v59  ;;  %v5947_v52 = vmul.f32 %v15935_v54, %v15812_v12  ;;  %v16115_v61 = vadd.f32 %v15938_v57, %v5945_v28 }
 0x646   : > { %v13083_v58 = vpop.eup %13082  ;;  %13108 = vpow2.f32 %v10824_v55  ;;  %v10829_v50 = vmul.f32 -1.442695, %v16091_v21  ;;  %v5948_v47 = vmul.f32 %v15935_v54, %v15823_v33  ;;  %v16121_v48 = vadd.f32 %v15938_v57, %v5946_v41 }
 0x647   : > { %v13085_v40 = vpop.eup %13084  ;;  %13110 = vpow2.f32 %v10825_v56  ;;  %v10830_v7 = vmul.f32 -1.442695, %v16097_v9  ;;  %v16125_v60 = vadd.f32 %v15938_v57, %v5947_v52  ;;  %v10831_v12 = vmul.f32 -1.442695, %v16103_v39 }
 0x648   : > { %v13087_v3 = vpop.eup %13086  ;;  %18012 = vst [vmem:[#allocation75_spill] sm:$0xff] %v16121_v48  ;;  %13112 = vpow2.f32 %v10826_v63  ;;  %v16129_v56 = vadd.f32 %v15938_v57, %v5948_v47  ;;  %v10832_v53 = vmul.f32 -1.442695, %v16109_v6  ;;  %v10833_v54 = vmul.f32 -1.442695, %v16115_v61 }
 0x649   : > { %v13089_v55 = vpop.eup %13088  ;;  %18013 = vst [vmem:[#allocation79_spill] sm:$0xff] %v16125_v60  ;;  %13114 = vpow2.f32 %v10827_v24  ;;  %v10834_v63 = vmul.f32 -1.442695, %v16121_v48  ;;  %v10835_v30 = vmul.f32 -1.442695, %v16125_v60  ;;  %v6085_v17 = vadd.f32 1.0, %v13075_v23 }
 0x64a   : > { %v13091_v28 = vpop.eup %13090  ;;  %18014 = vst [vmem:[#allocation78_spill] sm:$0xff] %v16129_v56  ;;  %13116 = vpow2.f32 %v10828_v10  ;;  %v10836_v62 = vmul.f32 -1.442695, %v16129_v56  ;;  %v6083_v10 = vadd.f32 1.0, %v16066_v8  ;;  %v6086_v42 = vadd.f32 1.0, %v13077_v45 }
 0x64b   : > { %v13093_v33 = vpop.eup %13092  ;;  %13118 = vpow2.f32 %v10829_v50  ;;  %v6084_v50 = vadd.f32 1.0, %v16074_v46  ;;  %v6088_v56 = vadd.f32 1.0, %v13081_v29  ;;  %v6090_v48 = vadd.f32 1.0, %v13085_v40 }
 0x64c   : > { %v13095_v41 = vpop.eup %13094  ;;  %13120 = vpow2.f32 %v10830_v7  ;;  %v6091_v46 = vadd.f32 1.0, %v13087_v3  ;;  %v6092_v23 = vadd.f32 1.0, %v13089_v55  ;;  %v6093_v45 = vadd.f32 1.0, %v13091_v28 }
 0x64d   : > { %v13097_v52 = vpop.eup %13096  ;;  %13122 = vpow2.f32 %v10831_v12  ;;  %v6087_v12 = vadd.f32 1.0, %v13079_v14 }
 0x64e   : > { %v13099_v24 = vpop.eup %13098  ;;  %13124 = vpow2.f32 %v10832_v53 }
 0x64f   : > { %v13101_v57 = vpop.eup %13100  ;;  %13126 = vpow2.f32 %v10833_v54  ;;  %v6089_v54 = vadd.f32 1.0, %v13083_v58  ;;  %v6097_v40 = vadd.f32 1.0, %v13099_v24 }
 0x650   : > { %v13103_v47 = vpop.eup %13102  ;;  %13128 = vpow2.f32 %v10834_v63  ;;  %v6098_v55 = vadd.f32 1.0, %v13101_v57 }
 0x651   : > { %v13105_v35 = vpop.eup %13104  ;;  %13130 = vpow2.f32 %v10835_v30 }
 0x652   : > { %v13107_v7 = vpop.eup %13106  ;;  %13132 = vpow2.f32 %v10836_v62 }
 0x653   : > { %v13109_v1 = vpop.eup %13108  ;;  %13134 = vrcp.f32 %v6083_v10  ;;  %v6094_v10 = vadd.f32 1.0, %v13093_v33  ;;  %v6100_v33 = vadd.f32 1.0, %v13105_v35 }
 0x654   : > { %v13111_v60 = vpop.eup %13110  ;;  %13136 = vrcp.f32 %v6084_v50  ;;  %v6095_v50 = vadd.f32 1.0, %v13095_v41 }
 0x655   : > { %v13113_v53 = vpop.eup %13112  ;;  %13138 = vrcp.f32 %v6085_v17  ;;  %v6096_v17 = vadd.f32 1.0, %v13097_v52  ;;  %v6103_v24 = vadd.f32 1.0, %v13111_v60 }
 0x656   : > { %v13115_v8 = vpop.eup %13114  ;;  %13140 = vrcp.f32 %v6086_v42 }
 0x657   : > { %v13117_v63 = vpop.eup %13116  ;;  %13142 = vrcp.f32 %v6087_v12  ;;  %v6101_v12 = vadd.f32 1.0, %v13107_v7  ;;  %v6105_v35 = vadd.f32 1.0, %v13115_v8 }
 0x658   : > { %v13119_v30 = vpop.eup %13118  ;;  %13144 = vrcp.f32 %v6088_v56  ;;  %v6099_v56 = vadd.f32 1.0, %v13103_v47 }
 0x659   : > { %v13121_v62 = vpop.eup %13120  ;;  %13146 = vrcp.f32 %v6089_v54 }
 0x65a   : > { %v13123_v14 = vpop.eup %13122  ;;  %13148 = vrcp.f32 %v6090_v48 }
 0x65b   : > { %v13125_v29 = vpop.eup %13124  ;;  %13150 = vrcp.f32 %v6091_v46  ;;  %v6102_v46 = vadd.f32 1.0, %v13109_v1 }
 0x65c   : > { %v16138_v58 = vpop.eup %13126  ;;  %13152 = vrcp.f32 %v6092_v23 }
 0x65d   : > { %v16140_v42 = vpop.eup %13128  ;;  %13154 = vrcp.f32 %v6093_v45  ;;  %v6104_v45 = vadd.f32 1.0, %v13113_v53  ;;  %v6107_v53 = vadd.f32 1.0, %v13119_v30 }
 0x65e   : > { %v16142_v3 = vpop.eup %13130  ;;  %13156 = vrcp.f32 %v6094_v10 }
 0x65f   : > { %v16144_v28 = vpop.eup %13132  ;;  %13158 = vrcp.f32 %v6095_v50 }
 0x660   : > { %v13135_v48 = vpop.eup %13134  ;;  %13160 = vrcp.f32 %v6096_v17 }
 0x661   : > { %v13137_v41 = vpop.eup %13136  ;;  %13162 = vrcp.f32 %v6097_v40  ;;  %v6179_v52 = vmul.f32 %v13135_v48, %v15951_v13  ;;  %v6106_v13 = vadd.f32 1.0, %v13117_v63  ;;  %v6109_v48 = vadd.f32 1.0, %v13123_v14 }
 0x662   : > { %v13139_v54 = vpop.eup %13138  ;;  %13164 = vrcp.f32 %v6098_v55  ;;  %v6180_v23 = vmul.f32 %v13137_v41, %v15954_v5  ;;  %v6110_v41 = vadd.f32 1.0, %v13125_v29 }
 0x663   : > { %v13141_v57 = vpop.eup %13140  ;;  %13166 = vrcp.f32 %v6099_v56  ;;  %v6181_v47 = vmul.f32 %v13139_v54, %v15959_v51  ;;  %v11325_v10 = vpack.c.bf16 %v6179_v52, %v6179_v52  ;;  %v6108_v56 = vadd.f32 1.0, %v13121_v62 }
 0x664   : > { %v13143_v50 = vpop.eup %13142  ;;  %13168 = vrcp.f32 %v6100_v33  ;;  %v6182_v7 = vmul.f32 %v13141_v57, %v15962_v49  ;;  %v11326_v17 = vpack.c.bf16 %v6180_v23, %v6180_v23  ;;  %v6111_v52 = vadd.f32 1.0, %v16138_v58 }
 0x665   : > { %v13145_v40 = vpop.eup %13144  ;;  %13170 = vrcp.f32 %v6101_v12  ;;  %v6183_v60 = vmul.f32 %v13143_v50, %v15967_v11  ;;  %v11327_v1 = vpack.c.bf16 %v6181_v47, %v6181_v47  ;;  %6339 = vst.msk [vmem:[#allocation3 + $0x10] sm:$0xf] %vm5417_vm3, %v11325_v10  ;;  %v6113_v23 = vadd.f32 1.0, %v16142_v3 }
 0x666   : > { %v13147_v5 = vpop.eup %13146  ;;  %13172 = vrcp.f32 %v6102_v46  ;;  %v6184_v51 = vmul.f32 %v13145_v40, %v15972_v16  ;;  %v11328_v55 = vpack.c.bf16 %v6182_v7, %v6182_v7  ;;  %6340 = vst.msk [vmem:[#allocation3 + $0x14] sm:$0xf] %vm5417_vm3, %v11326_v17  ;;  %v6112_v46 = vadd.f32 1.0, %v16140_v42 }
 0x667   : > { %v13149_v8 = vpop.eup %13148  ;;  %13174 = vrcp.f32 %v6103_v24  ;;  %v6185_v49 = vmul.f32 %v13147_v5, %v15977_v26  ;;  %v11329_v63 = vpack.c.bf16 %v6183_v60, %v6183_v60  ;;  %6341 = vst.msk [vmem:[#allocation3 + $0x18] sm:$0xf] %vm5417_vm3, %v11327_v1  ;;  %v6114_v42 = vadd.f32 1.0, %v16144_v28 }
 0x668   : > { %v13151_v11 = vpop.eup %13150  ;;  %13176 = vrcp.f32 %v6104_v45  ;;  %v6186_v33 = vmul.f32 %v13149_v8, %v15984_v44  ;;  %v11330_v30 = vpack.c.bf16 %v6184_v51, %v6184_v51  ;;  %6342 = vst.msk [vmem:[#allocation3 + $0x1c] sm:$0xf] %vm5417_vm3, %v11328_v55 }
 0x669   : > { %v13153_v16 = vpop.eup %13152  ;;  %13178 = vrcp.f32 %v6105_v35  ;;  %v6187_v12 = vmul.f32 %v13151_v11, %v15991_v22  ;;  %v11331_v62 = vpack.c.bf16 %v6185_v49, %v6185_v49  ;;  %6343 = vst.msk [vmem:[#allocation3 + $0x20] sm:$0xf] %vm5417_vm3, %v11329_v63  ;;  %v16214_v11 = vld [vmem:[%s17712_s11 + $0x68] sm:$0xff]  }
 0x66a   : > { %v13155_v26 = vpop.eup %13154  ;;  %13180 = vrcp.f32 %v6106_v13  ;;  %v6188_v14 = vmul.f32 %v13153_v16, %v15997_v15  ;;  %v11332_v54 = vpack.c.bf16 %v6186_v33, %v6186_v33  ;;  %6344 = vst.msk [vmem:[#allocation3 + $0x24] sm:$0xf] %vm5417_vm3, %v11330_v30 }
 0x66b   : > { %v13157_v44 = vpop.eup %13156  ;;  %13182 = vrcp.f32 %v6107_v53  ;;  %v6189_v29 = vmul.f32 %v13155_v26, %v16003_v0  ;;  %v11333_v24 = vpack.c.bf16 %v6187_v12, %v6187_v12  ;;  %6345 = vst.msk [vmem:[#allocation3 + $0x28] sm:$0xf] %vm5417_vm3, %v11331_v62  ;;  %v12802_v53 = vld [vmem:[%s17712_s11 + $0xf0] sm:$0xff]  }
 0x66c   : > { %v13159_v22 = vpop.eup %13158  ;;  %13184 = vrcp.f32 %v6108_v56  ;;  %v6190_v58 = vmul.f32 %v13157_v44, %v16009_v2  ;;  %v11334_v57 = vpack.c.bf16 %v6188_v14, %v6188_v14  ;;  %6346 = vst.msk [vmem:[#allocation3 + $0x2c] sm:$0xf] %vm5417_vm3, %v11332_v54  ;;  %v16169_v15 = vld [vmem:[#allocation3 + $0x10] sm:$0xf] }
 0x66d   : > { %v13161_v45 = vpop.eup %13160  ;;  %13186 = vrcp.f32 %v6109_v48  ;;  %v6191_v0 = vmul.f32 %v13159_v22, %v16015_v38  ;;  %v11335_v47 = vpack.c.bf16 %v6189_v29, %v6189_v29  ;;  %6347 = vst.msk [vmem:[#allocation3 + $0x30] sm:$0xf] %vm5417_vm3, %v11333_v24  ;;  %v16174_v10 = vld [vmem:[#allocation3 + $0x14] sm:$0xf] }
 0x66e   : > { %v13163_v3 = vpop.eup %13162  ;;  %13188 = vrcp.f32 %v6110_v41  ;;  %v6192_v2 = vmul.f32 %v13161_v45, %v16021_v32  ;;  %v11336_v50 = vpack.c.bf16 %v6190_v58, %v6190_v58  ;;  %6348 = vst.msk [vmem:[#allocation3 + $0x34] sm:$0xf] %vm5417_vm3, %v11334_v57  ;;  %v16178_v35 = vld [vmem:[#allocation3 + $0x18] sm:$0xf]  ;;  %v10885_v28 = vcombine.low %v16169_v15, %v16174_v10  ;;  %v12807_v32 = vld [vmem:[%s17712_s11 + $0x70] sm:$0xff]   ;;  %v12822_v58 = vld [vmem:[%s17712_s11 + $0xe0] sm:$0xff]  }
 0x66f   : > { %v13165_v7 = vpop.eup %13164  ;;  %13190 = vrcp.f32 %v6111_v52  ;;  %v6193_v38 = vmul.f32 %v13163_v3, %v16027_v27  ;;  %v11337_v17 = vpack.c.bf16 %v6191_v0, %v6191_v0  ;;  %6349 = vst.msk [vmem:[#allocation3 + $0x38] sm:$0xf] %vm5417_vm3, %v11335_v47  ;;  %v16184_v40 = vld [vmem:[#allocation3 + $0x1c] sm:$0xf] }
 0x670   : > { %v13167_v13 = vpop.eup %13166  ;;  %13192 = vrcp.f32 %v6112_v46  ;;  %v6194_v60 = vmul.f32 %v13165_v7, %v16033_v25  ;;  %v11338_v1 = vpack.c.bf16 %v6192_v2, %v6192_v2  ;;  %6350 = vst.msk [vmem:[#allocation3 + $0x3c] sm:$0xf] %vm5417_vm3, %v11336_v50  ;;  %v10886_v5 = vcombine.low %v16178_v35, %v16184_v40  ;;  %12234 = vmatprep.mubr.msk.bf16.mxu1 %vm5440_vm2, %v10885_v28  ;;  %v16195_v27 = vld [vmem:[#allocation3 + $0x20] sm:$0xf] }
 0x671   : > { %12275 = vmatmul.mubr.msk.bf16.vlgmr.msra.gmra.mxu0 %vm5440_vm2, %v10885_v28  ;;  %v13169_v51 = vpop.eup %13168  ;;  %13194 = vrcp.f32 %v6113_v23  ;;  %v6195_v25 = vmul.f32 %v13167_v13, %v16039_v4  ;;  %v11339_v55 = vpack.c.bf16 %v6193_v38, %v6193_v38  ;;  %6351 = vst.msk [vmem:[#allocation3 + $0x40] sm:$0xf] %vm5417_vm3, %v11337_v17  ;;  %v16202_v8 = vld [vmem:[#allocation3 + $0x24] sm:$0xf] }
 0x672   : > { %12347 = vmatpush3.bf16.msra.mxu0 %v15912_v43  ;;  %v13171_v56 = vpop.eup %13170  ;;  %13196 = vrcp.f32 %v6114_v42  ;;  %v6196_v49 = vmul.f32 %v13169_v51, %v16045_v18  ;;  %v11340_v63 = vpack.c.bf16 %v6194_v60, %v6194_v60  ;;  %6352 = vst.msk [vmem:[#allocation3 + $0x44] sm:$0xf] %vm5417_vm3, %v11338_v1  ;;  %12235 = vmatmul.mubr.msk.bf16.vlgmr.msra.gmra.mxu1 %vm5440_vm2, %v10886_v5  ;;  %v16221_v41 = vld [vmem:[#allocation3 + $0x28] sm:$0xf]  ;;  %v12827_v42 = vld [vmem:[%s17712_s11 + $0x60] sm:$0xff]   ;;  %v18015_v1 = vld [vmem:[#allocation75_spill] sm:$0xff] }
 0x673   : > { %12278 = vmatprep.mubr.msk.bf16.mxu0 %vm5440_vm2, %v10886_v5  ;;  %v10887_v4 = vcombine.low %v16195_v27, %v16202_v8  ;;  %v13173_v43 = vpop.eup %13172  ;;  %v6197_v48 = vmul.f32 %v13171_v56, %v16051_v20  ;;  %v11341_v33 = vpack.c.bf16 %v6195_v25, %v6195_v25  ;;  %6353 = vst.msk [vmem:[#allocation3 + $0x48] sm:$0xf] %vm5417_vm3, %v11339_v55  ;;  %v16223_v12 = vld [vmem:[#allocation3 + $0x2c] sm:$0xf]  ;;  %v16285_v55 = vld [vmem:[%s17712_s11 + $0xd8] sm:$0xff]  }
 0x674   : > { %12307 = vmatpush3.bf16.msra.mxu1 %v15925_v31  ;;  %12348 = vmatprep.subr.bf16.mxu0 %v12807_v32  ;;  %v13175_v18 = vpop.eup %13174  ;;  %v6198_v30 = vmul.f32 %v13173_v43, %v16057_v37  ;;  %v11342_v16 = vpack.c.bf16 %v6196_v49, %v6196_v49  ;;  %6354 = vst.msk [vmem:[#allocation3 + $0x4c] sm:$0xf] %vm5417_vm3, %v11340_v63  ;;  %v12812_v31 = vld [vmem:[%s17712_s11 + $0xe8] sm:$0xff]   ;;  %v16233_v54 = vld [vmem:[#allocation3 + $0x30] sm:$0xf]  ;;  %v18016_v56 = vld [vmem:[#allocation79_spill] sm:$0xff] }
 0x675   : > { %12238 = vmatprep.mubr.msk.bf16.mxu1 %vm5440_vm2, %v10887_v4  ;;  %12308 = vmatprep.subr.bf16.mxu1 %v12802_v53  ;;  %v13177_v20 = vpop.eup %13176  ;;  %v6199_v62 = vmul.f32 %v13175_v18, %v16063_v36  ;;  %v11343_v26 = vpack.c.bf16 %v6197_v48, %v6197_v48  ;;  %6355 = vst.msk [vmem:[#allocation3 + $0x50] sm:$0xf] %vm5417_vm3, %v11341_v33  ;;  %v16235_v44 = vld [vmem:[#allocation3 + $0x34] sm:$0xf] }
 0x676   : > { %12349 = vmatpush3.bf16.msra.mxu0 %v12807_v32  ;;  %v13179_v37 = vpop.eup %13178  ;;  %v6200_v52 = vmul.f32 %v13177_v20, %v16071_v19  ;;  %v11344_v14 = vpack.c.bf16 %v6198_v30, %v6198_v30  ;;  %6356 = vst.msk [vmem:[#allocation3 + $0x54] sm:$0xf] %vm5417_vm3, %v11342_v16  ;;  %v10888_v24 = vcombine.low %v16221_v41, %v16223_v12 }
 0x677   : > { %12350 = vmatprep.subr.bf16.mxu0 %v16214_v11  ;;  %v13181_v36 = vpop.eup %13180  ;;  %v6201_v46 = vmul.f32 %v13179_v37, %v16079_v34  ;;  %v11345_v29 = vpack.c.bf16 %v6199_v62, %v6199_v62  ;;  %6357 = vst.msk [vmem:[#allocation3 + $0x58] sm:$0xf] %vm5417_vm3, %v11343_v26  ;;  %v16266_v17 = vld [vmem:[#allocation3 + $0x3c] sm:$0xf] }
 0x678   : > { %12309 = vmatpush3.bf16.msra.mxu1 %v12802_v53  ;;  %v13183_v19 = vpop.eup %13182  ;;  %v6202_v22 = vmul.f32 %v13181_v36, %v16085_v59  ;;  %v11346_v23 = vpack.c.bf16 %v6200_v52, %v6200_v52  ;;  %6358 = vst.msk [vmem:[#allocation3 + $0x5c] sm:$0xf] %vm5417_vm3, %v11344_v14  ;;  %v10889_v59 = vcombine.low %v16233_v54, %v16235_v44  ;;  %v16278_v51 = vld [vmem:[#allocation3 + $0x40] sm:$0xf] }
 0x679   : > { %12279 = vmatmul.mubr.msk.bf16.gmra.mxu0 %vm5440_vm2, %v10887_v4  ;;  %v13185_v34 = vpop.eup %13184  ;;  %v6203_v57 = vmul.f32 %v13183_v19, %v16091_v21  ;;  %v11347_v45 = vpack.c.bf16 %v6201_v46, %v6201_v46  ;;  %6359 = vst.msk [vmem:[#allocation3 + $0x60] sm:$0xf] %vm5417_vm3, %v11345_v29  ;;  %12310 = vmatprep.subr.bf16.mxu1 %v12812_v31  ;;  %v16280_v25 = vld [vmem:[#allocation3 + $0x44] sm:$0xf]  ;;  %v7325_v19 = vld [vmem:[#allocation3 + $0xc] sm:$0x8] }
 0x67a   : > { %12282 = vmatprep.mubr.msk.bf16.mxu0 %vm5440_vm2, %v10888_v24  ;;  %v13187_v0 = vpop.eup %13186  ;;  %v6204_v47 = vmul.f32 %v13185_v34, %v16097_v9  ;;  %v11348_v3 = vpack.c.bf16 %v6202_v22, %v6202_v22  ;;  %6360 = vst.msk [vmem:[#allocation3 + $0x64] sm:$0xf] %vm5417_vm3, %v11346_v23  ;;  %12239 = vmatmul.mubr.msk.bf16.gmra.mxu1 %vm5440_vm2, %v10888_v24  ;;  %v16264_v9 = vld [vmem:[#allocation3 + $0x38] sm:$0xf]  ;;  %v16305_v16 = vld [vmem:[#allocation3 + $0x48] sm:$0xf] }
 0x67b   : > { %v13189_v21 = vpop.eup %13188  ;;  %v6205_v2 = vmul.f32 %v13187_v0, %v16103_v39  ;;  %v11349_v50 = vpack.c.bf16 %v6203_v57, %v6203_v57  ;;  %6361 = vst.msk [vmem:[#allocation3 + $0x68] sm:$0xf] %vm5417_vm3, %v11347_v45  ;;  %12242 = vmatprep.mubr.msk.bf16.mxu1 %vm5440_vm2, %v10889_v59  ;;  %12351 = vmatpush3.bf16.msra.mxu0 %v16214_v11  ;;  %v16272_v39 = vld [vmem:[%s17712_s11 + $0x18] sm:$0xff]   ;;  %v18017_v11 = vld [vmem:[#allocation78_spill] sm:$0xff]  ;;  %v16307_v20 = vld [vmem:[#allocation3 + $0x4c] sm:$0xf] }
 0x67c   : > { %12311 = vmatpush3.bf16.msra.mxu1 %v12812_v31  ;;  %v13191_v28 = vpop.eup %13190  ;;  %v6206_v7 = vmul.f32 %v13189_v21, %v16109_v6  ;;  %v11350_v38 = vpack.c.bf16 %v6204_v47, %v6204_v47  ;;  %6362 = vst.msk [vmem:[#allocation3 + $0x6c] sm:$0xf] %vm5417_vm3, %v11348_v3  ;;  %12352 = vmatprep.subr.bf16.mxu0 %v12827_v42  ;;  %v16309_v62 = vld [vmem:[#allocation3 + $0x50] sm:$0xf] }
 0x67d   : > { %12312 = vmatprep.subr.bf16.mxu1 %v12822_v58  ;;  %v13193_v32 = vpop.eup %13192  ;;  %v6207_v13 = vmul.f32 %v13191_v28, %v16115_v61  ;;  %v11351_v60 = vpack.c.bf16 %v6205_v2, %v6205_v2  ;;  %6363 = vst.msk [vmem:[#allocation3 + $0x70] sm:$0xf] %vm5417_vm3, %v11349_v50  ;;  %v10890_v4 = vcombine.low %v16264_v9, %v16266_v17  ;;  %v16311_v26 = vld [vmem:[#allocation3 + $0x54] sm:$0xf]  ;;  %v13203_v50 = vld [vmem:[#allocation3 + $0x8] sm:$0xf] }
 0x67e   : > { %v13195_v6 = vpop.eup %13194  ;;  %v6208_v5 = vmul.f32 %v13193_v32, %v18015_v1  ;;  %v11352_v53 = vpack.c.bf16 %v6206_v7, %v6206_v7  ;;  %6364 = vst.msk [vmem:[#allocation3 + $0x74] sm:$0xf] %vm5417_vm3, %v11350_v38  ;;  %v10891_v18 = vcombine.low %v16278_v51, %v16280_v25  ;;  %v10892_v31 = vcombine.low %v16305_v16, %v16307_v20  ;;  %v16321_v52 = vld [vmem:[#allocation3 + $0x58] sm:$0xf] }
 0x67f   : > { %v13197_v61 = vpop.eup %13196  ;;  %v6209_v49 = vmul.f32 %v13195_v6, %v18016_v56  ;;  %v11353_v63 = vpack.c.bf16 %v6207_v13, %v6207_v13  ;;  %6365 = vst.msk [vmem:[#allocation3 + $0x78] sm:$0xf] %vm5417_vm3, %v11351_v60  ;;  %12353 = vmatpush3.bf16.msra.mxu0 %v12827_v42  ;;  %v10893_v37 = vcombine.low %v16309_v62, %v16311_v26  ;;  %v16323_v14 = vld [vmem:[#allocation3 + $0x5c] sm:$0xf]  ;;  %v7316_v42 = vld [vmem:[#allocation3 + $0x4] sm:$0x8] }
 0x680   : > { %12313 = vmatpush3.bf16.msra.mxu1 %v12822_v58  ;;  %v6210_v43 = vmul.f32 %v13197_v61, %v18017_v11  ;;  %v11354_v48 = vpack.c.bf16 %v6208_v5, %v6208_v5  ;;  %6366 = vst.msk [vmem:[#allocation3 + $0x7c] sm:$0xf] %vm5417_vm3, %v11352_v53  ;;  %12426 = vmatprep.subr.bf16.mxu0 %v16285_v55  ;;  %v16325_v36 = vld [vmem:[#allocation3 + $0x60] sm:$0xf] }
 0x681   : > { %12283 = vmatmul.mubr.msk.bf16.gmra.mxu0 %vm5440_vm2, %v10889_v59  ;;  %12386 = vmatprep.subr.bf16.mxu1 %v16272_v39  ;;  %v11355_v33 = vpack.c.bf16 %v6209_v49, %v6209_v49  ;;  %6367 = vst.msk [vmem:[#allocation3 + $0x80] sm:$0xf] %vm5417_vm3, %v11353_v63  ;;  %v16327_v46 = vld [vmem:[#allocation3 + $0x64] sm:$0xf]  ;;  %v10894_v29 = vcombine.low %v16321_v52, %v16323_v14 }
 0x682   : > { %12286 = vmatprep.mubr.msk.bf16.mxu0 %vm5440_vm2, %v10890_v4  ;;  %v11356_v30 = vpack.c.bf16 %v6210_v43, %v6210_v43  ;;  %6368 = vst.msk [vmem:[#allocation3 + $0x84] sm:$0xf] %vm5417_vm3, %v11354_v48  ;;  %12243 = vmatmul.mubr.msk.bf16.gmra.mxu1 %vm5440_vm2, %v10890_v4  ;;  %v10895_v24 = vcombine.low %v16325_v36, %v16327_v46  ;;  %v16337_v22 = vld [vmem:[#allocation3 + $0x68] sm:$0xf]  ;;  %v16378_v4 = vld [vmem:[#allocation3 + $0x18] sm:$0xf] }
 0x683   : > { %6369 = vst.msk [vmem:[#allocation3 + $0x88] sm:$0xf] %vm5417_vm3, %v11355_v33  ;;  %12246 = vmatprep.mubr.msk.bf16.mxu1 %vm5440_vm2, %v10891_v18  ;;  %v16339_v23 = vld [vmem:[#allocation3 + $0x6c] sm:$0xf]  ;;  %v10995_v34 = vcombine.low %v16174_v10, %v16178_v35  ;;  %v10994_v45 = vcombine.low %v7325_v19, %v16169_v15  ;;  %v11031_v28 = vcombine.low %v7316_v42, %v13203_v50 }
 0x684   : > { %6370 = vst.msk [vmem:[#allocation3 + $0x8c] sm:$0xf] %vm5417_vm3, %v11356_v30  ;;  %v16341_v58 = vld [vmem:[#allocation3 + $0x70] sm:$0xf]  ;;  %v10896_v59 = vcombine.low %v16337_v22, %v16339_v23  ;;  %v10996_v32 = vcombine.low %v16184_v40, %v16195_v27  ;;  %v10997_v13 = vcombine.low %v16202_v8, %v16221_v41  ;;  %v10998_v33 = vcombine.low %v16223_v12, %v16233_v54  ;;  %v13204_v30 = vld [vmem:[#allocation3 + $0xc] sm:$0xf] }
 0x685   : > { %v16345_v57 = vld [vmem:[#allocation3 + $0x74] sm:$0xf]  ;;  %v7355_v47 = vshrl.u32 %v10994_v45, 16  ;;  %v7363_v3 = vshrl.u32 %v10995_v34, 16  ;;  %v7358_v10 = vshll.u32 %v10994_v45, 16  ;;  %v7366_v35 = vshll.u32 %v10995_v34, 16 }
 0x686   : > { %v10897_v0 = vcombine.low %v16341_v58, %v16345_v57  ;;  %v16356_v21 = vld [vmem:[#allocation3 + $0x78] sm:$0xf]  ;;  %v7745_v40 = vshrl.u32 %v11031_v28, 16  ;;  %v7748_v27 = vshll.u32 %v11031_v28, 16  ;;  %v7372_v56 = vshrl.u32 %v10996_v32, 16 }
 0x687   : > { %v16358_v2 = vld [vmem:[#allocation3 + $0x7c] sm:$0xf]  ;;  %v7357_v6 = vrot.slane %v7355_v47, 3  ;;  %v7360_v1 = vrot.slane %v7358_v10, 4  ;;  %v7365_v5 = vrot.slane %v7363_v3, 3  ;;  %v7368_v53 = vrot.slane %v7366_v35, 4 }
 0x688   : > { %v16360_v7 = vld [vmem:[#allocation3 + $0x80] sm:$0xf]  ;;  %v10898_v60 = vcombine.low %v16356_v21, %v16358_v2  ;;  %v7375_v8 = vshll.u32 %v10996_v32, 16  ;;  %v7381_v11 = vshrl.u32 %v10997_v13, 16  ;;  %v7384_v43 = vshll.u32 %v10997_v13, 16 }
 0x689   : > { %12287 = vmatmul.mubr.msk.bf16.gmra.mxu0 %vm5440_vm2, %v10891_v18  ;;  %v16362_v38 = vld [vmem:[#allocation3 + $0x84] sm:$0xf]  ;;  %v7361_v49 = vor.u32 %v7360_v1, %v7357_v6  ;;  %v7369_v63 = vor.u32 %v7368_v53, %v7365_v5  ;;  %v16384_v18 = vld [vmem:[#allocation3 + $0x1c] sm:$0xf]  ;;  %v7750_v54 = vrot.slane %v7748_v27, 4  ;;  %v7390_v42 = vshrl.u32 %v10998_v33, 16 }
 0x68a   : > { %12290 = vmatprep.mubr.msk.bf16.mxu0 %vm5440_vm2, %v10892_v31  ;;  %12247 = vmatmul.mubr.msk.bf16.gmra.mxu1 %vm5440_vm2, %v10892_v31  ;;  %v10899_v61 = vcombine.low %v16360_v7, %v16362_v38  ;;  %v16375_v41 = vld [vmem:[#allocation3 + $0x88] sm:$0xf]  ;;  %v11032_v31 = vcombine.low %v13204_v30, %v16169_v15  ;;  %v7383_v45 = vrot.slane %v7381_v11, 3  ;;  %v10950_v12 = vcombine.low %v16378_v4, %v16384_v18  ;;  %v16399_v47 = vld [vmem:[#allocation3 + $0x24] sm:$0xf] }
 0x68b   : > { %12250 = vmatprep.mubr.msk.bf16.mxu1 %vm5440_vm2, %v10893_v37  ;;  %v16380_v48 = vld [vmem:[#allocation3 + $0x8c] sm:$0xf]  ;;  %v7370_v34 = vsel %vm3044_vm4, %v7361_v49, %v7369_v63  ;;  %v7747_v15 = vrot.slane %v7745_v40, 3  ;;  %v16402_v32 = vld [vmem:[#allocation3 + $0x28] sm:$0xf]  ;;  %v7392_v1 = vrot.slane %v7390_v42, 3  ;;  %v11000_v5 = vcombine.low %v16266_v17, %v16278_v51 }
 0x68c   : > { %v10900_v19 = vcombine.low %v16375_v41, %v16380_v48  ;;  %v7753_v3 = vshrl.u32 %v11032_v31, 16  ;;  %v7756_v10 = vshll.u32 %v11032_v31, 16  ;;  %v16406_v53 = vld [vmem:[#allocation3 + $0x2c] sm:$0xf]  ;;  %v11001_v27 = vcombine.low %v16280_v25, %v16305_v16  ;;  %v12871_v42 = vld [vmem:[%s17712_s11 + $0xc0] sm:$0xff]  }
 0x68d   : > { %v7751_v13 = vor.u32 %v7750_v54, %v7747_v15  ;;  %v11008_v25 = vcombine.low %v16358_v2, %v16360_v7  ;;  %v10952_v16 = vcombine.low %v16402_v32, %v16406_v53  ;;  %v7408_v30 = vshrl.u32 %v11000_v5, 16  ;;  %v12860_v31 = vld [vmem:[%s17712_s11 + $0xc8] sm:$0xff]   ;;  %v16454_v15 = vld [vmem:[#allocation3 + $0x38] sm:$0xf]  ;;  %v16456_v54 = vld [vmem:[#allocation3 + $0x3c] sm:$0xf] }
 0x68e   : > { %v7758_v6 = vrot.slane %v7756_v10, 4  ;;  %v7411_v7 = vshll.u32 %v11000_v5, 16 }
 0x691   : > { %12291 = vmatmul.mubr.msk.bf16.gmra.mxu0 %vm5440_vm2, %v10893_v37  ;;  %v7374_v37 = vrot.slane %v7372_v56, 3 }
 0x692   : > { %12294 = vmatprep.mubr.msk.bf16.mxu0 %vm5440_vm2, %v10894_v29  ;;  %12251 = vmatmul.mubr.msk.bf16.gmra.mxu1 %vm5440_vm2, %v10894_v29  ;;  %v7377_v29 = vrot.slane %v7375_v8, 4 }
 0x693   : > { %12254 = vmatprep.mubr.msk.bf16.mxu1 %vm5440_vm2, %v10895_v24 }
 0x699   : > { %12295 = vmatmul.mubr.msk.bf16.gmra.mxu0 %vm5440_vm2, %v10895_v24  ;;  %v10999_v24 = vcombine.low %v16235_v44, %v16264_v9  ;;  %v7378_v44 = vor.u32 %v7377_v29, %v7374_v37  ;;  %v7393_v9 = vshll.u32 %v10998_v33, 16  ;;  %v7417_v29 = vshrl.u32 %v11001_v27, 16 }
 0x69a   : > { %12298 = vmatprep.mubr.msk.bf16.mxu0 %vm5440_vm2, %v10896_v59  ;;  %12255 = vmatmul.mubr.msk.bf16.gmra.mxu1 %vm5440_vm2, %v10896_v59  ;;  %v7386_v59 = vrot.slane %v7384_v43, 4  ;;  %v12845_v43 = vld [vmem:[%s17712_s11 + $0x10] sm:$0xff]  }
 0x69b   : > { %12258 = vmatprep.mubr.msk.bf16.mxu1 %vm5440_vm2, %v10897_v0  ;;  %v7399_v50 = vshrl.u32 %v10999_v24, 16  ;;  %v7402_v28 = vshll.u32 %v10999_v24, 16  ;;  %v7395_v40 = vrot.slane %v7393_v9, 4  ;;  %v16414_v56 = vsel %vm3044_vm4, %v7369_v63, %v7378_v44 }
 0x69c   : > { %v7387_v35 = vor.u32 %v7386_v59, %v7383_v45  ;;  %v7420_v24 = vshll.u32 %v11001_v27, 16  ;;  %v7483_v45 = vshll.u32 %v11008_v25, 16  ;;  %v16448_v59 = vld [vmem:[#allocation3 + $0x30] sm:$0xf]  ;;  %v11003_v9 = vcombine.low %v16311_v26, %v16321_v52  ;;  %v12865_v26 = vld [vmem:[%s17712_s11] sm:$0xff]  }
 0x69d   : > { %v7401_v51 = vrot.slane %v7399_v50, 3  ;;  %v7404_v11 = vrot.slane %v7402_v28, 4  ;;  %v7419_v50 = vrot.slane %v7417_v29, 3  ;;  %v16504_v29 = vld [vmem:[#allocation3 + $0x4c] sm:$0xf] }
 0x69e   : > { %v16421_v17 = vsel %vm3044_vm4, %v7378_v44, %v7387_v35  ;;  %v7413_v44 = vrot.slane %v7411_v7, 4  ;;  %v7422_v28 = vrot.slane %v7420_v24, 4  ;;  %v11004_v7 = vcombine.low %v16323_v14, %v16325_v36 }
 0x69f   : > { %v7405_v37 = vor.u32 %v7404_v11, %v7401_v51  ;;  %v16492_v51 = vld [vmem:[%s17712_s11 + $0xb8] sm:$0xff]   ;;  %v16494_v11 = vld [vmem:[#allocation3 + $0x40] sm:$0xf] }
 0x6a0   : > { %v7423_v27 = vor.u32 %v7422_v28, %v7419_v50  ;;  %v16530_v50 = vld [vmem:[#allocation3 + $0x50] sm:$0xf]  ;;  %v16532_v28 = vld [vmem:[#allocation3 + $0x54] sm:$0xf] }
 0x6a1   : > { %12299 = vmatmul.mubr.msk.bf16.gmra.mxu0 %vm5440_vm2, %v10897_v0  ;;  %v16397_v0 = vld [vmem:[#allocation3 + $0x20] sm:$0xf] }
 0x6a2   : > { %12302 = vmatprep.mubr.msk.bf16.mxu0 %vm5440_vm2, %v10898_v60  ;;  %12259 = vmatmul.mubr.msk.bf16.gmra.mxu1 %vm5440_vm2, %v10898_v60  ;;  %v7755_v60 = vrot.slane %v7753_v3, 3  ;;  %v10951_v49 = vcombine.low %v16397_v0, %v16399_v47  ;;  %v11033_v3 = vcombine.low %v16362_v38, %v16362_v38 }
 0x6a3   : > { %12262 = vmatprep.mubr.msk.bf16.mxu1 %vm5440_vm2, %v10899_v61 }
 0x6a4   : > { %v7759_v8 = vor.u32 %v7758_v6, %v7755_v60  ;;  %v16486_v6 = vld [vmem:[%s17712_s11 + $0x58] sm:$0xff]  }
 0x6a6   : > { %v16434_v33 = vsel %vm3044_vm4, %v7751_v13, %v7759_v8  ;;  %v16441_v2 = vsel %vm3044_vm4, %v7759_v8, %v7369_v63  ;;  %v16450_v63 = vld [vmem:[#allocation3 + $0x34] sm:$0xf]  ;;  %v10954_v13 = vcombine.low %v16454_v15, %v16456_v54  ;;  %v7435_v8 = vshrl.u32 %v11003_v9, 16 }
 0x6a8   : > { %v7437_v36 = vrot.slane %v7435_v8, 3 }
 0x6a9   : > { %12303 = vmatmul.mubr.msk.bf16.gmra.mxu0 %vm5440_vm2, %v10899_v61  ;;  %v12850_v61 = vld [vmem:[%s17712_s11 + $0xd0] sm:$0xff]  }
 0x6aa   : > { %12354 = vmatprep.mubr.msk.bf16.mxu0 %vm5440_vm2, %v7370_v34  ;;  %12263 = vmatmul.mubr.msk.bf16.gmra.mxu1 %vm5440_vm2, %v10900_v19  ;;  %v12855_v19 = vld [vmem:[%s17712_s11 + $0x8] sm:$0xff]   ;;  %v7480_v34 = vshrl.u32 %v11008_v25, 16 }
 0x6ab   : > { %12314 = vmatprep.mubr.msk.bf16.mxu1 %vm5440_vm2, %v10950_v12  ;;  %v7410_v12 = vrot.slane %v7408_v30, 3 }
 0x6ac   : > { %v7482_v52 = vrot.slane %v7480_v34, 3 }
 0x6ad   : > { %v7414_v5 = vor.u32 %v7413_v44, %v7410_v12 }
 0x6af   : > { %v16510_v34 = vsel %vm3044_vm4, %v7405_v37, %v7414_v5  ;;  %v16517_v14 = vsel %vm3044_vm4, %v7414_v5, %v7423_v27 }
 0x6b1   : > { %12355 = vmatmul.mubr.msk.bf16.vlgmr.msra.gmra.mxu0 %vm5440_vm2, %v16414_v56 }
 0x6b2   : > { %12358 = vmatprep.mubr.msk.bf16.mxu0 %vm5440_vm2, %v16421_v17  ;;  %12427 = vmatpush3.bf16.msra.mxu0 %v16285_v55  ;;  %v7396_v55 = vor.u32 %v7395_v40, %v7392_v1  ;;  %v7766_v40 = vshll.u32 %v11033_v3, 16 }
 0x6b3   : > { %12315 = vmatmul.mubr.msk.bf16.vlgmr.msra.gmra.mxu1 %vm5440_vm2, %v10951_v49  ;;  %12428 = vmatprep.subr.bf16.mxu0 %v12850_v61  ;;  %v7438_v49 = vshll.u32 %v11003_v9, 16 }
 0x6b4   : > { %12387 = vmatpush3.bf16.msra.mxu1 %v16272_v39  ;;  %12318 = vmatprep.mubr.msk.bf16.mxu1 %vm5440_vm2, %v10952_v16  ;;  %v11002_v39 = vcombine.low %v16307_v20, %v16309_v62  ;;  %v16466_v10 = vsel %vm3044_vm4, %v7387_v35, %v7396_v55  ;;  %v10953_v20 = vcombine.low %v16448_v59, %v16450_v63  ;;  %v7485_v35 = vrot.slane %v7483_v45, 4 }
 0x6b5   : > { %12388 = vmatprep.subr.bf16.mxu1 %v12845_v43  ;;  %v16473_v62 = vsel %vm3044_vm4, %v7396_v55, %v7405_v37  ;;  %v7768_v30 = vrot.slane %v7766_v40, 4  ;;  %v16502_v55 = vld [vmem:[#allocation3 + $0x48] sm:$0xf]  ;;  %v7444_v37 = vshrl.u32 %v11004_v7, 16 }
 0x6b6   : > { %12429 = vmatpush3.bf16.msra.mxu0 %v12850_v61  ;;  %v7426_v60 = vshrl.u32 %v11002_v39, 16  ;;  %v7429_v1 = vshll.u32 %v11002_v39, 16  ;;  %v7763_v61 = vshrl.u32 %v11033_v3, 16  ;;  %v16498_v25 = vor.u32 %v7485_v35, %v7482_v52  ;;  %v16534_v52 = vld [vmem:[#allocation3 + $0x58] sm:$0xf] }
 0x6b7   : > { %12430 = vmatprep.subr.bf16.mxu0 %v12860_v31  ;;  %v7440_v39 = vrot.slane %v7438_v49, 4  ;;  %v16536_v35 = vld [vmem:[#allocation3 + $0x5c] sm:$0xf] }
 0x6b8   : > { %12389 = vmatpush3.bf16.msra.mxu1 %v12845_v43  ;;  %v16496_v43 = vld [vmem:[#allocation3 + $0x44] sm:$0xf]  ;;  %v7765_v16 = vrot.slane %v7763_v61, 3  ;;  %v7431_v24 = vrot.slane %v7429_v1, 4  ;;  %v11007_v1 = vcombine.low %v16345_v57, %v16356_v21  ;;  %v10957_v61 = vcombine.low %v16530_v50, %v16532_v28 }
 0x6b9   : > { %12359 = vmatmul.mubr.msk.bf16.gmra.mxu0 %vm5440_vm2, %v16466_v10  ;;  %12390 = vmatprep.subr.bf16.mxu1 %v12855_v19  ;;  %v10955_v12 = vcombine.low %v16494_v11, %v16496_v43  ;;  %v7441_v9 = vor.u32 %v7440_v39, %v7437_v36  ;;  %v11009_v36 = vcombine.low %v16362_v38, %v16375_v41 }
 0x6ba   : > { %12362 = vmatprep.mubr.msk.bf16.mxu0 %vm5440_vm2, %v16473_v62  ;;  %12431 = vmatpush3.bf16.msra.mxu0 %v12860_v31  ;;  %v7428_v31 = vrot.slane %v7426_v60, 3  ;;  %v7769_v45 = vor.u32 %v7768_v30, %v7765_v16  ;;  %v11006_v60 = vcombine.low %v16339_v23, %v16341_v58  ;;  %v10958_v23 = vcombine.low %v16534_v52, %v16536_v35 }
 0x6bb   : > { %12319 = vmatmul.mubr.msk.bf16.gmra.mxu1 %vm5440_vm2, %v10953_v20  ;;  %12432 = vmatprep.subr.bf16.mxu0 %v12871_v42  ;;  %v7471_v16 = vshrl.u32 %v11007_v1, 16  ;;  %v7474_v30 = vshll.u32 %v11007_v1, 16  ;;  %v16588_v1 = vld [vmem:[#allocation3 + $0x78] sm:$0xf] }
 0x6bc   : > { %12322 = vmatprep.mubr.msk.bf16.mxu1 %vm5440_vm2, %v10954_v13  ;;  %12391 = vmatpush3.bf16.msra.mxu1 %v12855_v19  ;;  %v11005_v19 = vcombine.low %v16327_v46, %v16337_v22  ;;  %v10956_v46 = vcombine.low %v16502_v55, %v16504_v29  ;;  %v16526_v22 = vsel %vm3044_vm4, %v16498_v25, %v7769_v45  ;;  %v7462_v58 = vshrl.u32 %v11006_v60, 16 }
 0x6bd   : > { %12392 = vmatprep.subr.bf16.mxu1 %v12865_v26  ;;  %v7432_v44 = vor.u32 %v7431_v24, %v7428_v31  ;;  %v7465_v57 = vshll.u32 %v11006_v60, 16  ;;  %v16558_v31 = vld [vmem:[#allocation3 + $0x60] sm:$0xf]  ;;  %v16562_v24 = vld [vmem:[#allocation3 + $0x68] sm:$0xf] }
 0x6be   : > { %12433 = vmatpush3.bf16.msra.mxu0 %v12871_v42  ;;  %v7447_v42 = vshll.u32 %v11004_v7, 16  ;;  %v7453_v3 = vshrl.u32 %v11005_v19, 16  ;;  %v7456_v20 = vshll.u32 %v11005_v19, 16  ;;  %v16560_v7 = vld [vmem:[#allocation3 + $0x64] sm:$0xf]  ;;  %v7464_v45 = vrot.slane %v7462_v58, 3 }
 0x6bf   : > { %12506 = vmatprep.subr.bf16.mxu0 %v16486_v6  ;;  %v16543_v5 = vsel %vm3044_vm4, %v7423_v27, %v7432_v44  ;;  %v16550_v40 = vsel %vm3044_vm4, %v7432_v44, %v7441_v9  ;;  %v16564_v19 = vld [vmem:[#allocation3 + $0x6c] sm:$0xf]  ;;  %v7476_v44 = vrot.slane %v7474_v30, 4  ;;  %v16586_v60 = vld [vmem:[#allocation3 + $0x74] sm:$0xf] }
 0x6c0   : > { %12393 = vmatpush3.bf16.msra.mxu1 %v12865_v26  ;;  %v7446_v26 = vrot.slane %v7444_v37, 3  ;;  %v7449_v13 = vrot.slane %v7447_v42, 4  ;;  %v7455_v8 = vrot.slane %v7453_v3, 3  ;;  %v7458_v49 = vrot.slane %v7456_v20, 4 }
 0x6c1   : > { %12363 = vmatmul.mubr.msk.bf16.gmra.mxu0 %vm5440_vm2, %v16510_v34  ;;  %12466 = vmatprep.subr.bf16.mxu1 %v16492_v51  ;;  %v7473_v42 = vrot.slane %v7471_v16, 3  ;;  %v10960_v38 = vcombine.low %v16562_v24, %v16564_v19  ;;  %v7492_v3 = vshll.u32 %v11009_v36, 16 }
 0x6c2   : > { %12366 = vmatprep.mubr.msk.bf16.mxu0 %vm5440_vm2, %v16517_v14  ;;  %v7450_v21 = vor.u32 %v7449_v13, %v7446_v26  ;;  %v7459_v27 = vor.u32 %v7458_v49, %v7455_v8  ;;  %v7965_v26 = vld [vmem:[#allocation3 + $0x14] sm:$0x8]  ;;  %v16584_v13 = vld [vmem:[#allocation3 + $0x70] sm:$0xf]  ;;  %v11010_v8 = vcombine.low %v16380_v48, %v16380_v48 }
 0x6c3   : > { %12323 = vmatmul.mubr.msk.bf16.gmra.mxu1 %vm5440_vm2, %v10955_v12  ;;  %v7467_v12 = vrot.slane %v7465_v57, 4  ;;  %v7477_v20 = vor.u32 %v7476_v44, %v7473_v42  ;;  %v7494_v58 = vrot.slane %v7492_v3, 4  ;;  %v11062_v57 = vcombine.low %v7965_v26, %v16378_v4  ;;  %v16612_v4 = vld [vmem:[#allocation3 + $0x80] sm:$0xf]  ;;  %v16625_v3 = vld [vmem:[#allocation3 + $0x8c] sm:$0xf] }
 0x6c4   : > { %12326 = vmatprep.mubr.msk.bf16.mxu1 %vm5440_vm2, %v10956_v46  ;;  %v16569_v39 = vsel %vm3044_vm4, %v7441_v9, %v7450_v21  ;;  %v10959_v46 = vcombine.low %v16558_v31, %v16560_v7  ;;  %v16576_v37 = vsel %vm3044_vm4, %v7450_v21, %v7459_v27  ;;  %v7489_v9 = vshrl.u32 %v11009_v36, 16 }
 0x6c5   : > { %v7468_v41 = vor.u32 %v7467_v12, %v7464_v45  ;;  %v11063_v21 = vcombine.low %v16384_v18, %v16397_v0  ;;  %v10961_v16 = vcombine.low %v16584_v13, %v16586_v60  ;;  %v16614_v18 = vld [vmem:[#allocation3 + $0x84] sm:$0xf]  ;;  %v7501_v45 = vshll.u32 %v11010_v8, 16 }
 0x6c6   : > { %v7995_v12 = vshrl.u32 %v11062_v57, 16  ;;  %v7998_v36 = vshll.u32 %v11062_v57, 16  ;;  %v11064_v44 = vcombine.low %v16399_v47, %v16402_v32  ;;  %v16629_v26 = vsel %vm3044_vm4, %v7477_v20, %v16498_v25 }
 0x6c7   : > { %v16595_v49 = vsel %vm3044_vm4, %v7459_v27, %v7468_v41  ;;  %v16605_v30 = vsel %vm3044_vm4, %v7468_v41, %v7477_v20  ;;  %v7498_v27 = vshrl.u32 %v11010_v8, 16  ;;  %v8006_v42 = vshll.u32 %v11063_v21, 16 }
 0x6c8   : > { %v10963_v41 = vcombine.low %v16612_v4, %v16614_v18  ;;  %v7997_v47 = vrot.slane %v7995_v12, 3  ;;  %v8000_v32 = vrot.slane %v7998_v36, 4  ;;  %v8012_v20 = vshrl.u32 %v11064_v44, 16  ;;  %v16640_v12 = vld [vmem:[#allocation3 + $0x90] sm:$0xf] }
 0x6c9   : > { %12367 = vmatmul.mubr.msk.bf16.gmra.mxu0 %vm5440_vm2, %v16543_v5  ;;  %v16642_v36 = vld [vmem:[#allocation3 + $0x94] sm:$0xf] }
 0x6ca   : > { %12370 = vmatprep.mubr.msk.bf16.mxu0 %vm5440_vm2, %v16550_v40 }
 0x6cb   : > { %12327 = vmatmul.mubr.msk.bf16.gmra.mxu1 %vm5440_vm2, %v10957_v61  ;;  %v16590_v61 = vld [vmem:[#allocation3 + $0x7c] sm:$0xf] }
 0x6cc   : > { %12330 = vmatprep.mubr.msk.bf16.mxu1 %vm5440_vm2, %v10958_v23  ;;  %v7491_v23 = vrot.slane %v7489_v9, 3  ;;  %v10962_v48 = vcombine.low %v16588_v1, %v16590_v61  ;;  %v16623_v9 = vld [vmem:[#allocation3 + $0x88] sm:$0xf] }
 0x6cd   : > { %v10964_v57 = vcombine.low %v16623_v9, %v16625_v3 }
 0x6ce   : > { %v7495_v0 = vor.u32 %v7494_v58, %v7491_v23  ;;  %v7500_v23 = vrot.slane %v7498_v27, 3  ;;  %v7503_v58 = vrot.slane %v7501_v45, 4 }
 0x6d0   : > { %v7496_v8 = vsel %vm3044_vm4, %v16498_v25, %v7495_v0  ;;  %v7504_v25 = vor.u32 %v7503_v58, %v7500_v23  ;;  %v11067_v23 = vcombine.low %v16456_v54, %v16494_v11  ;;  %v12875_v54 = vld [vmem:[%s17712_s11 + $0x50] sm:$0xff]  }
 0x6d1   : > { %12371 = vmatmul.mubr.msk.bf16.gmra.mxu0 %vm5440_vm2, %v16569_v39 }
 0x6d2   : > { %12374 = vmatprep.mubr.msk.bf16.mxu0 %vm5440_vm2, %v16576_v37 }
 0x6d3   : > { %12331 = vmatmul.mubr.msk.bf16.gmra.mxu1 %vm5440_vm2, %v10959_v46  ;;  %v8003_v46 = vshrl.u32 %v11063_v21, 16  ;;  %v8015_v21 = vshll.u32 %v11064_v44, 16  ;;  %v7505_v44 = vsel %vm3044_vm4, %v7495_v0, %v7504_v25  ;;  %v8042_v0 = vshll.u32 %v11067_v23, 16 }
 0x6d4   : > { %12334 = vmatprep.mubr.msk.bf16.mxu1 %vm5440_vm2, %v10960_v38  ;;  %v11065_v38 = vcombine.low %v16406_v53, %v16448_v59  ;;  %v8008_v59 = vrot.slane %v8006_v42, 4  ;;  %v8014_v42 = vrot.slane %v8012_v20, 3  ;;  %v11068_v20 = vcombine.low %v16496_v43, %v16502_v55  ;;  %v12877_v43 = vld [vmem:[%s17712_s11 + $0x48] sm:$0xff]  }
 0x6d5   : > { %v8005_v53 = vrot.slane %v8003_v46, 3  ;;  %v10965_v46 = vcombine.low %v16640_v12, %v16642_v36  ;;  %v11069_v25 = vcombine.low %v16504_v29, %v16530_v50 }
 0x6d6   : > { %v8021_v27 = vshrl.u32 %v11065_v38, 16  ;;  %v8024_v45 = vshll.u32 %v11065_v38, 16  ;;  %v8048_v55 = vshrl.u32 %v11068_v20, 16  ;;  %v8051_v29 = vshll.u32 %v11068_v20, 16 }
 0x6d8   : > { %v8023_v58 = vrot.slane %v8021_v27, 3  ;;  %v8044_v27 = vrot.slane %v8042_v0, 4  ;;  %v11072_v0 = vcombine.low %v16560_v7, %v16562_v24 }
 0x6d9   : > { %12375 = vmatmul.mubr.msk.bf16.gmra.mxu0 %vm5440_vm2, %v16595_v49 }
 0x6da   : > { %12378 = vmatprep.mubr.msk.bf16.mxu0 %vm5440_vm2, %v16605_v30  ;;  %v8084_v7 = vshrl.u32 %v11072_v0, 16  ;;  %v8087_v24 = vshll.u32 %v11072_v0, 16 }
 0x6db   : > { %12335 = vmatmul.mubr.msk.bf16.gmra.mxu1 %vm5440_vm2, %v10961_v16  ;;  %v8001_v16 = vor.u32 %v8000_v32, %v7997_v47  ;;  %v8026_v47 = vrot.slane %v8024_v45, 4  ;;  %v12874_v45 = vld [vmem:[%s17712_s11 + $0xb0] sm:$0xff]  }
 0x6dc   : > { %12338 = vmatprep.mubr.msk.bf16.mxu1 %vm5440_vm2, %v10962_v48  ;;  %v8009_v48 = vor.u32 %v8008_v59, %v8005_v53 }
 0x6de   : > { %v8010_v38 = vsel %vm3044_vm4, %v8001_v16, %v8009_v48 }
 0x6e1   : > { %12379 = vmatmul.mubr.msk.bf16.gmra.mxu0 %vm5440_vm2, %v16629_v26 }
 0x6e2   : > { %12382 = vmatprep.mubr.msk.bf16.mxu0 %vm5440_vm2, %v7496_v8  ;;  %v8017_v8 = vrot.slane %v8015_v21, 4 }
 0x6e3   : > { %12339 = vmatmul.mubr.msk.bf16.gmra.mxu1 %vm5440_vm2, %v10963_v41  ;;  %v11066_v41 = vcombine.low %v16450_v63, %v16454_v15  ;;  %v8027_v63 = vor.u32 %v8026_v47, %v8023_v58  ;;  %v8039_v15 = vshrl.u32 %v11067_v23, 16  ;;  %v12878_v47 = vld [vmem:[%s17712_s11 + $0xa0] sm:$0xff]  }
 0x6e4   : > { %12342 = vmatprep.mubr.msk.bf16.mxu1 %vm5440_vm2, %v10964_v57  ;;  %v8018_v32 = vor.u32 %v8017_v8, %v8014_v42  ;;  %v12879_v42 = vld [vmem:[%s17712_s11 + $0x40] sm:$0xff]   ;;  %v8050_v8 = vrot.slane %v8048_v55, 3 }
 0x6e5   : > { %v8030_v53 = vshrl.u32 %v11066_v41, 16  ;;  %v8033_v59 = vshll.u32 %v11066_v41, 16  ;;  %v8041_v16 = vrot.slane %v8039_v15, 3 }
 0x6e6   : > { %v8019_v21 = vsel %vm3044_vm4, %v8009_v48, %v8018_v32 }
 0x6e7   : > { %v8032_v11 = vrot.slane %v8030_v53, 3  ;;  %v8035_v57 = vrot.slane %v8033_v59, 4  ;;  %v8045_v48 = vor.u32 %v8044_v27, %v8041_v16  ;;  %v8089_v16 = vrot.slane %v8087_v24, 4 }
 0x6e8   : > { %v11074_v27 = vcombine.low %v16586_v60, %v16588_v1 }
 0x6e9   : > { %12383 = vmatmul.mubr.msk.bf16.gmra.mxu0 %vm5440_vm2, %v7505_v44  ;;  %v8036_v50 = vor.u32 %v8035_v57, %v8032_v11  ;;  %v11071_v44 = vcombine.low %v16536_v35, %v16558_v31 }
 0x6ea   : > { %12434 = vmatprep.mubr.msk.bf16.mxu0 %vm5440_vm2, %v8010_v38 }
 0x6eb   : > { %12343 = vmatmul.mubr.msk.bf16.gmra.mxu1 %vm5440_vm2, %v10965_v46  ;;  %v8057_v46 = vshrl.u32 %v11069_v25, 16  ;;  %v8037_v41 = vsel %vm3044_vm4, %v8027_v63, %v8036_v50  ;;  %v8046_v23 = vsel %vm3044_vm4, %v8036_v50, %v8045_v48  ;;  %v8075_v53 = vshrl.u32 %v11071_v44, 16 }
 0x6ec   : > { %12394 = vmatprep.mubr.msk.bf16.mxu1 %vm5440_vm2, %v16434_v33  ;;  %v8028_v33 = vsel %vm3044_vm4, %v8018_v32, %v8027_v63  ;;  %v8078_v59 = vshll.u32 %v11071_v44, 16  ;;  %v8105_v50 = vshll.u32 %v11074_v27, 16 }
 0x6ed   : > { %v8059_v38 = vrot.slane %v8057_v46, 3  ;;  %v8077_v57 = vrot.slane %v8075_v53, 3 }
 0x6ee   : > { %v8080_v20 = vrot.slane %v8078_v59, 4  ;;  %v8107_v46 = vrot.slane %v8105_v50, 4 }
 0x6f1   : > { %12435 = vmatmul.mubr.msk.bf16.vlgmr.msra.gmra.mxu0 %vm5440_vm2, %v8019_v21 }
 0x6f2   : > { %12438 = vmatprep.mubr.msk.bf16.mxu0 %vm5440_vm2, %v8028_v33  ;;  %12507 = vmatpush3.bf16.msra.mxu0 %v16486_v6  ;;  %v8060_v6 = vshll.u32 %v11069_v25, 16  ;;  %v8086_v33 = vrot.slane %v8084_v7, 3 }
 0x6f3   : > { %12395 = vmatmul.mubr.msk.bf16.vlgmr.msra.gmra.mxu1 %vm5440_vm2, %v16441_v2  ;;  %12508 = vmatprep.subr.bf16.mxu0 %v12875_v54  ;;  %v12876_v2 = vld [vmem:[%s17712_s11 + $0xa8] sm:$0xff]  }
 0x6f4   : > { %12467 = vmatpush3.bf16.msra.mxu1 %v16492_v51  ;;  %12398 = vmatprep.mubr.msk.bf16.mxu1 %vm5440_vm2, %v16414_v56  ;;  %v8053_v51 = vrot.slane %v8051_v29, 4  ;;  %v11070_v56 = vcombine.low %v16532_v28, %v16534_v52  ;;  %v8062_v58 = vrot.slane %v8060_v6, 4  ;;  %v16702_v28 = vld [vmem:[%s17714_s13 + $0x8] sm:$0xff]   ;;  %v8102_v29 = vshrl.u32 %v11074_v27, 16 }
 0x6f5   : > { %12468 = vmatprep.subr.bf16.mxu1 %v12874_v45  ;;  %v8090_v60 = vor.u32 %v8089_v16, %v8086_v33  ;;  %v11076_v6 = vcombine.low %v16614_v18, %v16623_v9  ;;  %v12885_v27 = vld [vmem:[#allocation3 + $0x28] sm:$0xff]  }
 0x6f6   : > { %12509 = vmatpush3.bf16.msra.mxu0 %v12875_v54  ;;  %v8066_v52 = vshrl.u32 %v11070_v56, 16  ;;  %v8069_v35 = vshll.u32 %v11070_v56, 16  ;;  %v8054_v31 = vor.u32 %v8053_v51, %v8050_v8  ;;  %v8063_v32 = vor.u32 %v8062_v58, %v8059_v38 }
 0x6f7   : > { %12510 = vmatprep.subr.bf16.mxu0 %v12877_v43  ;;  %v11073_v54 = vcombine.low %v16564_v19, %v16584_v13  ;;  %v8081_v19 = vor.u32 %v8080_v20, %v8077_v57  ;;  %v8120_v51 = vshrl.u32 %v11076_v6, 16  ;;  %v8123_v56 = vshll.u32 %v11076_v6, 16  ;;  %v12884_v57 = vld [vmem:[#allocation3 + $0x20] sm:$0xff]  }
 0x6f8   : > { %12469 = vmatpush3.bf16.msra.mxu1 %v12874_v45  ;;  %v8068_v63 = vrot.slane %v8066_v52, 3  ;;  %v8071_v15 = vrot.slane %v8069_v35, 4  ;;  %v8064_v11 = vsel %vm3044_vm4, %v8054_v31, %v8063_v32  ;;  %v12881_v52 = vld [vmem:[#allocation3 + $0x8] sm:$0xff]  }
 0x6f9   : > { %12439 = vmatmul.mubr.msk.bf16.gmra.mxu0 %vm5440_vm2, %v8037_v41  ;;  %12470 = vmatprep.subr.bf16.mxu1 %v12876_v2  ;;  %v8093_v13 = vshrl.u32 %v11073_v54, 16  ;;  %v8096_v25 = vshll.u32 %v11073_v54, 16  ;;  %v8122_v44 = vrot.slane %v8120_v51, 3  ;;  %v8988_v53 = vshll.u32 %v12881_v52, 16 }
 0x6fa   : > { %12442 = vmatprep.mubr.msk.bf16.mxu0 %vm5440_vm2, %v8046_v23  ;;  %12511 = vmatpush3.bf16.msra.mxu0 %v12877_v43  ;;  %v8072_v21 = vor.u32 %v8071_v15, %v8068_v63  ;;  %v11075_v43 = vcombine.low %v16590_v61, %v16612_v4  ;;  %v8104_v4 = vrot.slane %v8102_v29, 3  ;;  %v8125_v23 = vrot.slane %v8123_v56, 4 }
 0x6fb   : > { %12399 = vmatmul.mubr.msk.bf16.gmra.mxu1 %vm5440_vm2, %v16421_v17  ;;  %12512 = vmatprep.subr.bf16.mxu0 %v12879_v42  ;;  %v16709_v17 = vld [vmem:[%s17712_s11 + $0x118] sm:$0xff]   ;;  %v8095_v55 = vrot.slane %v8093_v13, 3  ;;  %v8986_v54 = vshrl.u32 %v12881_v52, 16  ;;  %v8628_v13 = vshll.u32 %v12884_v57, 16 }
 0x6fc   : > { %12402 = vmatprep.mubr.msk.bf16.mxu1 %vm5440_vm2, %v16466_v10  ;;  %12471 = vmatpush3.bf16.msra.mxu1 %v12876_v2  ;;  %v8055_v10 = vsel %vm3044_vm4, %v8045_v48, %v8054_v31  ;;  %v8073_v45 = vsel %vm3044_vm4, %v8063_v32, %v8072_v21  ;;  %v8111_v48 = vshrl.u32 %v11075_v43, 16  ;;  %v8114_v61 = vshll.u32 %v11075_v43, 16  ;;  %v12887_v43 = vld [vmem:[#allocation3 + $0x30] sm:$0xff]  }
 0x6fd   : > { %12472 = vmatprep.subr.bf16.mxu1 %v12878_v47  ;;  %v8091_v2 = vsel %vm3044_vm4, %v8081_v19, %v8090_v60  ;;  %v8108_v18 = vor.u32 %v8107_v46, %v8104_v4  ;;  %v8644_v50 = vshll.u32 %v12887_v43, 16  ;;  %v12889_v4 = vld [vmem:[%s17712_s11 + $0x110] sm:$0xff]  }
 0x6fe   : > { %12513 = vmatpush3.bf16.msra.mxu0 %v12879_v42  ;;  %v11077_v42 = vcombine.low %v16625_v3, %v16640_v12  ;;  %v8113_v8 = vrot.slane %v8111_v48, 3  ;;  %v11078_v12 = vcombine.low %v16642_v36, %v16642_v36  ;;  %v8126_v36 = vor.u32 %v8125_v23, %v8122_v44 }
 0x6ff   : > { %12586 = vmatprep.subr.bf16.mxu0 %v16702_v28 }
 0x700   : > { %12473 = vmatpush3.bf16.msra.mxu1 %v12878_v47  ;;  %v8129_v41 = vshrl.u32 %v11077_v42, 16  ;;  %v8132_v3 = vshll.u32 %v11077_v42, 16  ;;  %v8138_v35 = vshrl.u32 %v11078_v12, 16  ;;  %v8141_v31 = vshll.u32 %v11078_v12, 16 }
 0x701   : > { %12443 = vmatmul.mubr.msk.bf16.gmra.mxu0 %vm5440_vm2, %v8055_v10  ;;  %12546 = vmatprep.subr.bf16.mxu1 %v16709_v17  ;;  %v8640_v42 = vshrl.u32 %v12885_v27, 16 }
 0x702   : > { %12446 = vmatprep.mubr.msk.bf16.mxu0 %vm5440_vm2, %v8064_v11  ;;  %v8131_v58 = vrot.slane %v8129_v41, 3  ;;  %v8134_v47 = vrot.slane %v8132_v3, 4  ;;  %v8140_v15 = vrot.slane %v8138_v35, 3  ;;  %v8143_v0 = vrot.slane %v8141_v31, 4  ;;  %v12882_v11 = vld [vmem:[#allocation3 + $0x18] sm:$0xff]   ;;  %v12894_v41 = vld [vmem:[%s17712_s11 + $0x108] sm:$0xff]  }
 0x703   : > { %12403 = vmatmul.mubr.msk.bf16.gmra.mxu1 %vm5440_vm2, %v16473_v62  ;;  %v8082_v62 = vsel %vm3044_vm4, %v8072_v21, %v8081_v19  ;;  %v8620_v21 = vshll.u32 %v12882_v11, 16 }
 0x704   : > { %12406 = vmatprep.mubr.msk.bf16.mxu1 %vm5440_vm2, %v16510_v34  ;;  %v8098_v34 = vrot.slane %v8096_v25, 4  ;;  %v8135_v32 = vor.u32 %v8134_v47, %v8131_v58  ;;  %v8144_v20 = vor.u32 %v8143_v0, %v8140_v15  ;;  %v12892_v15 = vld [vmem:[#allocation3 + $0x50] sm:$0xff]  }
 0x705   : > { %v8622_v16 = vrot.slane %v8620_v21, 1  ;;  %v8676_v21 = vshll.u32 %v12892_v15, 16 }
 0x706   : > { %v8099_v1 = vor.u32 %v8098_v34, %v8095_v55  ;;  %v8136_v10 = vsel %vm3044_vm4, %v8126_v36, %v8135_v32  ;;  %v8145_v25 = vsel %vm3044_vm4, %v8135_v32, %v8144_v20  ;;  %v8632_v55 = vshrl.u32 %v12884_v57, 16 }
 0x707   : > { %v8636_v34 = vshll.u32 %v12885_v27, 16  ;;  %v12893_v27 = vld [vmem:[#allocation3 + $0x58] sm:$0xff]  }
 0x708   : > { %v8109_v38 = vsel %vm3044_vm4, %v8099_v1, %v8108_v18 }
 0x709   : > { %12447 = vmatmul.mubr.msk.bf16.gmra.mxu0 %vm5440_vm2, %v8073_v45  ;;  %v8630_v45 = vrot.slane %v8628_v13, 1  ;;  %v8638_v48 = vrot.slane %v8636_v34, 1  ;;  %v12895_v34 = vld [vmem:[#allocation3 + $0x60] sm:$0xff]  }
 0x70a   : > { %12450 = vmatprep.mubr.msk.bf16.mxu0 %vm5440_vm2, %v8082_v62 }
 0x70b   : > { %12407 = vmatmul.mubr.msk.bf16.gmra.mxu1 %vm5440_vm2, %v16517_v14  ;;  %v8100_v14 = vsel %vm3044_vm4, %v8090_v60, %v8099_v1  ;;  %v8634_v29 = vor.u32 %v8632_v55, %v8630_v45  ;;  %v12897_v60 = vld [vmem:[%s17714_s13] sm:$0xff]   ;;  %v8642_v51 = vor.u32 %v8640_v42, %v8638_v48  ;;  %v8678_v55 = vrot.slane %v8676_v21, 1 }
 0x70c   : > { %12410 = vmatprep.mubr.msk.bf16.mxu1 %vm5440_vm2, %v16543_v5  ;;  %v8116_v5 = vrot.slane %v8114_v61, 4  ;;  %v12888_v61 = vld [vmem:[#allocation3 + $0x38] sm:$0xff]  }
 0x70e   : > { %v8117_v9 = vor.u32 %v8116_v5, %v8113_v8  ;;  %v12890_v8 = vld [vmem:[#allocation3 + $0x40] sm:$0xff]  }
 0x710   : > { %v8127_v63 = vsel %vm3044_vm4, %v8117_v9, %v8126_v36  ;;  %v12900_v36 = vld [vmem:[%s17712_s11 + $0x100] sm:$0xff]  }
 0x711   : > { %12451 = vmatmul.mubr.msk.bf16.gmra.mxu0 %vm5440_vm2, %v8091_v2  ;;  %v8639_v2 = vsel %vm4255_vm5, %v8634_v29, %v8638_v48  ;;  %v8684_v48 = vshll.u32 %v12893_v27, 16 }
 0x712   : > { %12454 = vmatprep.mubr.msk.bf16.mxu0 %vm5440_vm2, %v8100_v14  ;;  %v8646_v14 = vrot.slane %v8644_v50, 1 }
 0x713   : > { %12411 = vmatmul.mubr.msk.bf16.gmra.mxu1 %vm5440_vm2, %v16550_v40  ;;  %v8118_v40 = vsel %vm3044_vm4, %v8108_v18, %v8117_v9  ;;  %v8652_v9 = vshll.u32 %v12888_v61, 16 }
 0x714   : > { %12414 = vmatprep.mubr.msk.bf16.mxu1 %vm5440_vm2, %v16569_v39  ;;  %v12880_v39 = vld [vmem:[#allocation3 + $0x10] sm:$0xff]   ;;  %v8647_v47 = vsel %vm4255_vm5, %v8642_v51, %v8646_v14 }
 0x715   : > { %v8615_v59 = vshll.u32 %v12880_v39, 16  ;;  %v8613_v24 = vshrl.u32 %v12880_v39, 16  ;;  %v8654_v52 = vrot.slane %v8652_v9, 1  ;;  %v12891_v39 = vld [vmem:[#allocation3 + $0x48] sm:$0xff]  }
 0x719   : > { %12455 = vmatmul.mubr.msk.bf16.gmra.mxu0 %vm5440_vm2, %v8109_v38  ;;  %v8660_v38 = vshll.u32 %v12890_v8, 16 }
 0x71a   : > { %12458 = vmatprep.mubr.msk.bf16.mxu0 %vm5440_vm2, %v8118_v40 }
 0x71b   : > { %12415 = vmatmul.mubr.msk.bf16.gmra.mxu1 %vm5440_vm2, %v16576_v37  ;;  %v8990_v37 = vrot.slane %v8988_v53, 1 }
 0x71c   : > { %12418 = vmatprep.mubr.msk.bf16.mxu1 %vm5440_vm2, %v16595_v49  ;;  %v8617_v49 = vrot.slane %v8615_v59, 1  ;;  %v8656_v59 = vshrl.u32 %v12888_v61, 16 }
 0x71d   : > { %v8991_v7 = vor.u32 %v8990_v37, %v8986_v54 }
 0x71e   : > { %v8618_v19 = vor.u32 %v8617_v49, %v8613_v24 }
 0x71f   : > { %v8992_v33 = vsel %vm4255_vm5, %v8991_v7, %v8617_v49  ;;  %v8668_v49 = vshll.u32 %v12891_v39, 16 }
 0x721   : > { %12459 = vmatmul.mubr.msk.bf16.gmra.mxu0 %vm5440_vm2, %v8127_v63  ;;  %v8662_v63 = vrot.slane %v8660_v38, 1  ;;  %v12898_v38 = vld [vmem:[#allocation3 + $0x70] sm:$0xff]  }
 0x722   : > { %12462 = vmatprep.mubr.msk.bf16.mxu0 %vm5440_vm2, %v8136_v10  ;;  %v8658_v10 = vor.u32 %v8656_v59, %v8654_v52 }
 0x723   : > { %12419 = vmatmul.mubr.msk.bf16.gmra.mxu1 %vm5440_vm2, %v16605_v30  ;;  %v8623_v30 = vsel %vm4255_vm5, %v8618_v19, %v8622_v16 }
 0x724   : > { %12422 = vmatprep.mubr.msk.bf16.mxu1 %vm5440_vm2, %v16629_v26  ;;  %v8624_v26 = vshrl.u32 %v12882_v11, 16  ;;  %v8664_v11 = vshrl.u32 %v12890_v8, 16 }
 0x726   : > { %v8626_v62 = vor.u32 %v8624_v26, %v8622_v16  ;;  %v8666_v24 = vor.u32 %v8664_v11, %v8662_v63  ;;  %v8670_v16 = vrot.slane %v8668_v49, 1  ;;  %v12899_v49 = vld [vmem:[#allocation3 + $0x78] sm:$0xff]  }
 0x729   : > { %12463 = vmatmul.mubr.msk.bf16.gmra.mxu0 %vm5440_vm2, %v8145_v25 }
 0x72a   : > { %12514 = vmatprep.mubr.msk.bf16.mxu0 %vm5440_vm2, %v8992_v33  ;;  %v8663_v33 = vsel %vm4255_vm5, %v8658_v10, %v8662_v63  ;;  %v8708_v63 = vshll.u32 %v12898_v38, 16 }
 0x72b   : > { %12423 = vmatmul.mubr.msk.bf16.gmra.mxu1 %vm5440_vm2, %v16526_v22  ;;  %v8631_v22 = vsel %vm4255_vm5, %v8626_v62, %v8630_v45  ;;  %v8672_v62 = vshrl.u32 %v12891_v39, 16  ;;  %v8696_v39 = vshrl.u32 %v12895_v34, 16 }
 0x72c   : > { %12474 = vmatprep.mubr.msk.bf16.mxu1 %vm5440_vm2, %v8623_v30 }
 0x72d   : > { %v8674_v50 = vor.u32 %v8672_v62, %v8670_v16  ;;  %v8716_v62 = vshll.u32 %v12899_v49, 16 }
 0x72f   : > { %v8679_v51 = vsel %vm4255_vm5, %v8674_v50, %v8678_v55 }
 0x731   : > { %v12276_v1 = vpop.f32.mrf.mxu0  ;;  %12515 = vmatmul.mubr.msk.bf16.vlgmr.msra.gmra.mxu0 %vm5440_vm2, %v8623_v30 }
 0x732   : > { %12518 = vmatprep.mubr.msk.bf16.mxu0 %vm5440_vm2, %v8631_v22  ;;  %12587 = vmatpush3.bf16.msra.mxu0 %v16702_v28  ;;  %v12236_v46 = vpop.f32.mrf.mxu1  ;;  %v8648_v28 = vshrl.u32 %v12887_v43, 16  ;;  %v8671_v43 = vsel %vm4255_vm5, %v8666_v24, %v8670_v16 }
 0x733   : > { %12475 = vmatmul.mubr.msk.bf16.vlgmr.msra.gmra.mxu1 %vm5440_vm2, %v8631_v22  ;;  %v6803_v6 = vpop.f32.mrf.mxu0  ;;  %12588 = vmatprep.subr.bf16.mxu0 %v12897_v60  ;;  %v16787_v5 = vadd.f32 %v12276_v1, %v12236_v46  ;;  %v8680_v22 = vshrl.u32 %v12892_v15, 16 }
 0x734   : > { %12547 = vmatpush3.bf16.msra.mxu1 %v16709_v17  ;;  %12478 = vmatprep.mubr.msk.bf16.mxu1 %vm5440_vm2, %v8639_v2  ;;  %v6610_v56 = vpop.f32.mrf.mxu1  ;;  %v8650_v23 = vor.u32 %v8648_v28, %v8646_v14 }
 0x735   : > { %v12277_v18 = vpop.f32.mrf.mxu0  ;;  %12548 = vmatprep.subr.bf16.mxu1 %v12889_v4  ;;  %v16794_v3 = vadd.f32 %v6803_v6, %v6610_v56  ;;  %v8682_v6 = vor.u32 %v8680_v22, %v8678_v55  ;;  %v8686_v56 = vrot.slane %v8684_v48, 1 }
 0x736   : > { %12589 = vmatpush3.bf16.msra.mxu0 %v12897_v60  ;;  %v12237_v12 = vpop.f32.mrf.mxu1  ;;  %v8655_v53 = vsel %vm4255_vm5, %v8650_v23, %v8654_v52 }
 0x737   : > { %v6806_v44 = vpop.f32.mrf.mxu0  ;;  %v16796_v17 = vadd.f32 %v12277_v18, %v12237_v12  ;;  %v12896_v18 = vld [vmem:[#allocation3 + $0x68] sm:$0xff]   ;;  %v8687_v12 = vsel %vm4255_vm5, %v8682_v6, %v8686_v56  ;;  %v8718_v6 = vrot.slane %v8716_v62, 1 }
 0x738   : > { %12549 = vmatpush3.bf16.msra.mxu1 %v12889_v4  ;;  %v6613_v40 = vpop.f32.mrf.mxu1 }
 0x739   : > { %v12280_v58 = vpop.f32.mrf.mxu0  ;;  %12519 = vmatmul.mubr.msk.bf16.gmra.mxu0 %vm5440_vm2, %v8639_v2  ;;  %12550 = vmatprep.subr.bf16.mxu1 %v12894_v41  ;;  %v16803_v35 = vadd.f32 %v6806_v44, %v6613_v40  ;;  %v8692_v2 = vshll.u32 %v12895_v34, 16  ;;  %v8688_v44 = vshrl.u32 %v12893_v27, 16 }
 0x73a   : > { %12522 = vmatprep.mubr.msk.bf16.mxu0 %vm5440_vm2, %v8647_v47  ;;  %v12240_v31 = vpop.f32.mrf.mxu1 }
 0x73b   : > { %12479 = vmatmul.mubr.msk.bf16.gmra.mxu1 %vm5440_vm2, %v8647_v47  ;;  %v6819_v32 = vpop.f32.mrf.mxu0  ;;  %v16808_v0 = vadd.f32 %v12280_v58, %v12240_v31  ;;  %v8694_v23 = vrot.slane %v8692_v2, 1  ;;  %v8690_v58 = vor.u32 %v8688_v44, %v8686_v56  ;;  %v12902_v2 = vld [vmem:[#allocation3 + $0x88] sm:$0xff]  }
 0x73c   : > { %12482 = vmatprep.mubr.msk.bf16.mxu1 %vm5440_vm2, %v8655_v53  ;;  %12551 = vmatpush3.bf16.msra.mxu1 %v12894_v41  ;;  %v6626_v54 = vpop.f32.mrf.mxu1  ;;  %v8736_v62 = vshrl.u32 %v12902_v2, 16 }
 0x73d   : > { %v12281_v37 = vpop.f32.mrf.mxu0  ;;  %12552 = vmatprep.subr.bf16.mxu1 %v12900_v36  ;;  %v16811_v57 = vadd.f32 %v6819_v32, %v6626_v54  ;;  %v8698_v59 = vor.u32 %v8696_v39, %v8694_v23 }
 0x73e   : > { %v12241_v20 = vpop.f32.mrf.mxu1 }
 0x73f   : > { %v6822_v7 = vpop.f32.mrf.mxu0  ;;  %v16813_v19 = vadd.f32 %v12281_v37, %v12241_v20  ;;  %v8695_v37 = vsel %vm4255_vm5, %v8690_v58, %v8694_v23 }
 0x740   : > { %12553 = vmatpush3.bf16.msra.mxu1 %v12900_v36  ;;  %v6629_v13 = vpop.f32.mrf.mxu1  ;;  %v8700_v36 = vshll.u32 %v12896_v18, 16 }
 0x741   : > { %v12284_v25 = vpop.f32.mrf.mxu0  ;;  %12523 = vmatmul.mubr.msk.bf16.gmra.mxu0 %vm5440_vm2, %v8655_v53  ;;  %v16817_v30 = vadd.f32 %v6822_v7, %v6629_v13  ;;  %v8704_v13 = vshrl.u32 %v12896_v18, 16  ;;  %v8720_v18 = vshrl.u32 %v12899_v49, 16 }
 0x742   : > { %12526 = vmatprep.mubr.msk.bf16.mxu0 %vm5440_vm2, %v8663_v33  ;;  %v12244_v26 = vpop.f32.mrf.mxu1  ;;  %v8702_v11 = vrot.slane %v8700_v36, 1  ;;  %v12903_v36 = vld [vmem:[#allocation3 + $0x88] ss:$0 sps:$4 sm:$0x11]  }
 0x743   : > { %12483 = vmatmul.mubr.msk.bf16.gmra.mxu1 %vm5440_vm2, %v8663_v33  ;;  %v6835_v45 = vpop.f32.mrf.mxu0  ;;  %v16822_v29 = vadd.f32 %v12284_v25, %v12244_v26  ;;  %v8710_v25 = vrot.slane %v8708_v63, 1  ;;  %v12901_v33 = vld [vmem:[#allocation3 + $0x80] sm:$0xff]   ;;  %v8722_v44 = vor.u32 %v8720_v18, %v8718_v6 }
 0x744   : > { %12486 = vmatprep.mubr.msk.bf16.mxu1 %vm5440_vm2, %v8671_v43  ;;  %v6642_v60 = vpop.f32.mrf.mxu1  ;;  %v8703_v21 = vsel %vm4255_vm5, %v8698_v59, %v8702_v11  ;;  %v8706_v27 = vor.u32 %v8704_v13, %v8702_v11  ;;  %v8728_v58 = vshrl.u32 %v12901_v33, 16  ;;  %v8994_v13 = vshll.u32 %v12903_v36, 16 }
 0x745   : > { %v12285_v1 = vpop.f32.mrf.mxu0  ;;  %v16825_v61 = vadd.f32 %v6835_v45, %v6642_v60 }
 0x746   : > { %v12245_v4 = vpop.f32.mrf.mxu1 }
 0x747   : > { %v6838_v46 = vpop.f32.mrf.mxu0  ;;  %v16827_v42 = vadd.f32 %v12285_v1, %v12245_v4  ;;  %v8724_v1 = vshll.u32 %v12901_v33, 16 }
 0x748   : > { %v6645_v14 = vpop.f32.mrf.mxu1 }
 0x749   : > { %v12288_v8 = vpop.f32.mrf.mxu0  ;;  %12527 = vmatmul.mubr.msk.bf16.gmra.mxu0 %vm5440_vm2, %v8671_v43  ;;  %v16831_v28 = vadd.f32 %v6838_v46, %v6645_v14  ;;  %v8712_v43 = vshrl.u32 %v12898_v38, 16  ;;  %v8711_v46 = vsel %vm4255_vm5, %v8706_v27, %v8710_v25 }
 0x74a   : > { %12530 = vmatprep.mubr.msk.bf16.mxu0 %vm5440_vm2, %v8679_v51  ;;  %v12248_v9 = vpop.f32.mrf.mxu1 }
 0x74b   : > { %12487 = vmatmul.mubr.msk.bf16.gmra.mxu1 %vm5440_vm2, %v8679_v51  ;;  %v6851_v41 = vpop.f32.mrf.mxu0  ;;  %v16836_v40 = vadd.f32 %v12288_v8, %v12248_v9  ;;  %v8714_v60 = vor.u32 %v8712_v43, %v8710_v25  ;;  %v8726_v9 = vrot.slane %v8724_v1, 1 }
 0x74c   : > { %12490 = vmatprep.mubr.msk.bf16.mxu1 %vm5440_vm2, %v8687_v12  ;;  %v6658_v47 = vpop.f32.mrf.mxu1 }
 0x74d   : > { %v12289_v52 = vpop.f32.mrf.mxu0  ;;  %v16839_v31 = vadd.f32 %v6851_v41, %v6658_v47  ;;  %v8719_v56 = vsel %vm4255_vm5, %v8714_v60, %v8718_v6  ;;  %v12905_v41 = vld [vmem:[#allocation3 + $0x18] sm:$0xff]   ;;  %v8732_v47 = vshll.u32 %v12902_v2, 16  ;;  %v8730_v59 = vor.u32 %v8728_v58, %v8726_v9 }
 0x74e   : > { %v12249_v32 = vpop.f32.mrf.mxu1  ;;  %v9317_v63 = vshll.u32 %v12905_v41, 16  ;;  %v8727_v11 = vsel %vm4255_vm5, %v8722_v44, %v8726_v9  ;;  %v9315_v1 = vshrl.u32 %v12905_v41, 16  ;;  %v8996_v6 = vrot.slane %v8994_v13, 1  ;;  %v12908_v41 = vld [vmem:[#allocation3 + $0x30] sm:$0xff]  }
 0x74f   : > { %v6854_v53 = vpop.f32.mrf.mxu0  ;;  %v16841_v15 = vadd.f32 %v12289_v52, %v12249_v32  ;;  %v12904_v52 = vld [vmem:[#allocation3 + $0x90] ss:$0 sps:$4 sm:$0x11]   ;;  %v8734_v49 = vrot.slane %v8732_v47, 1 }
 0x750   : > { %v6661_v10 = vpop.f32.mrf.mxu1  ;;  %v8997_v2 = vsel %vm4255_vm5, %v8730_v59, %v8996_v6  ;;  %v12910_v6 = vld [vmem:[#allocation3 + $0x40] sm:$0xff]  }
 0x751   : > { %v12292_v54 = vpop.f32.mrf.mxu0  ;;  %12531 = vmatmul.mubr.msk.bf16.gmra.mxu0 %vm5440_vm2, %v8687_v12  ;;  %v16845_v20 = vadd.f32 %v6854_v53, %v6661_v10  ;;  %v8735_v27 = vsel %vm4255_vm5, %v8730_v59, %v8734_v49 }
 0x752   : > { %12534 = vmatprep.mubr.msk.bf16.mxu0 %vm5440_vm2, %v8695_v37  ;;  %v12252_v7 = vpop.f32.mrf.mxu1 }
 0x753   : > { %12491 = vmatmul.mubr.msk.bf16.gmra.mxu1 %vm5440_vm2, %v8695_v37  ;;  %v6867_v24 = vpop.f32.mrf.mxu0  ;;  %v16850_v16 = vadd.f32 %v12292_v54, %v12252_v7  ;;  %v8740_v7 = vshll.u32 %v12904_v52, 16 }
 0x754   : > { %12494 = vmatprep.mubr.msk.bf16.mxu1 %vm5440_vm2, %v8703_v21  ;;  %v6674_v26 = vpop.f32.mrf.mxu1 }
 0x755   : > { %v12293_v45 = vpop.f32.mrf.mxu0  ;;  %v16853_v55 = vadd.f32 %v6867_v24, %v6674_v26  ;;  %v12906_v24 = vld [vmem:[#allocation3 + $0x20] sm:$0xff]   ;;  %v9319_v26 = vrot.slane %v9317_v63, 1  ;;  %v8742_v60 = vrot.slane %v8740_v7, 1  ;;  %v12909_v63 = vld [vmem:[#allocation3 + $0x38] sm:$0xff]   ;;  %v13206_v7 = vld [vmem:[%s13462_s23 + $0x8] sm:$0xff]  }
 0x756   : > { %v12253_v34 = vpop.f32.mrf.mxu1 }
 0x757   : > { %v6870_v50 = vpop.f32.mrf.mxu0  ;;  %v16855_v22 = vadd.f32 %v12293_v45, %v12253_v34  ;;  %v12907_v45 = vld [vmem:[#allocation3 + $0x28] sm:$0xff]   ;;  %v9320_v18 = vor.u32 %v9319_v26, %v9315_v1  ;;  %v13207_v26 = vld [vmem:[%s13462_s23 + $0x10] sm:$0xff]  }
 0x758   : > { %v6677_v48 = vpop.f32.mrf.mxu1  ;;  %v9330_v9 = vshll.u32 %v12907_v45, 16  ;;  %v9334_v13 = vshrl.u32 %v12907_v45, 16 }
 0x759   : > { %v12296_v4 = vpop.f32.mrf.mxu0  ;;  %12535 = vmatmul.mubr.msk.bf16.gmra.mxu0 %vm5440_vm2, %v8703_v21  ;;  %v16859_v14 = vadd.f32 %v6870_v50, %v6677_v48  ;;  %v9322_v48 = vshll.u32 %v12906_v24, 16 }
 0x75a   : > { %12538 = vmatprep.mubr.msk.bf16.mxu0 %vm5440_vm2, %v8711_v46  ;;  %v12256_v8 = vpop.f32.mrf.mxu1  ;;  %v9332_v59 = vrot.slane %v9330_v9, 1 }
 0x75b   : > { %12495 = vmatmul.mubr.msk.bf16.gmra.mxu1 %vm5440_vm2, %v8711_v46  ;;  %v6883_v51 = vpop.f32.mrf.mxu0  ;;  %v16864_v12 = vadd.f32 %v12296_v4, %v12256_v8  ;;  %v8738_v4 = vor.u32 %v8736_v62, %v8734_v49  ;;  %v13205_v8 = vld [vmem:[%s13462_s23] sm:$0xff]   ;;  %v9324_v58 = vrot.slane %v9322_v48, 1 }
 0x75c   : > { %12498 = vmatprep.mubr.msk.bf16.mxu1 %vm5440_vm2, %v8719_v56  ;;  %v6690_v23 = vpop.f32.mrf.mxu1 }
 0x75d   : > { %v12297_v38 = vpop.f32.mrf.mxu0  ;;  %v16867_v39 = vadd.f32 %v6883_v51, %v6690_v23  ;;  %v8743_v52 = vsel %vm4255_vm5, %v8738_v4, %v8742_v60  ;;  %v9346_v60 = vshll.u32 %v12909_v63, 16 }
 0x75e   : > { %v12257_v32 = vpop.f32.mrf.mxu1 }
 0x75f   : > { %v6886_v53 = vpop.f32.mrf.mxu0  ;;  %v16869_v10 = vadd.f32 %v12297_v38, %v12257_v32  ;;  %v9348_v9 = vrot.slane %v9346_v60, 1 }
 0x760   : > { %v6693_v54 = vpop.f32.mrf.mxu1 }
 0x761   : > { %v12300_v37 = vpop.f32.mrf.mxu0  ;;  %12539 = vmatmul.mubr.msk.bf16.gmra.mxu0 %vm5440_vm2, %v8719_v56  ;;  %v16873_v21 = vadd.f32 %v6886_v53, %v6693_v54  ;;  %v9325_v53 = vsel %vm4255_vm5, %v9320_v18, %v9324_v58 }
 0x762   : > { %12542 = vmatprep.mubr.msk.bf16.mxu0 %vm5440_vm2, %v8727_v11  ;;  %v12260_v25 = vpop.f32.mrf.mxu1 }
 0x763   : > { %12499 = vmatmul.mubr.msk.bf16.gmra.mxu1 %vm5440_vm2, %v8727_v11  ;;  %v6899_v33 = vpop.f32.mrf.mxu0  ;;  %v16878_v43 = vadd.f32 %v12300_v37, %v12260_v25  ;;  %v9326_v37 = vshrl.u32 %v12906_v24, 16  ;;  %v9338_v25 = vshll.u32 %v12908_v41, 16 }
 0x764   : > { %12502 = vmatprep.mubr.msk.bf16.mxu1 %vm5440_vm2, %v8735_v27  ;;  %v6706_v34 = vpop.f32.mrf.mxu1 }
 0x765   : > { %v12301_v50 = vpop.f32.mrf.mxu0  ;;  %v16881_v46 = vadd.f32 %v6899_v33, %v6706_v34  ;;  %v9328_v33 = vor.u32 %v9326_v37, %v9324_v58  ;;  %v9340_v24 = vrot.slane %v9338_v25, 1 }
 0x766   : > { %v12261_v51 = vpop.f32.mrf.mxu1 }
 0x767   : > { %v6902_v56 = vpop.f32.mrf.mxu0  ;;  %v16884_v44 = vadd.f32 %v12301_v50, %v12261_v51  ;;  %v9336_v50 = vor.u32 %v9334_v13, %v9332_v59 }
 0x768   : > { %v6709_v23 = vpop.f32.mrf.mxu1 }
 0x769   : > { %v12304_v38 = vpop.f32.mrf.mxu0  ;;  %12543 = vmatmul.mubr.msk.bf16.gmra.mxu0 %vm5440_vm2, %v8997_v2  ;;  %v16888_v47 = vadd.f32 %v6902_v56, %v6709_v23  ;;  %v9341_v18 = vsel %vm4255_vm5, %v9336_v50, %v9340_v24  ;;  %v12911_v2 = vld [vmem:[#allocation3 + $0x48] sm:$0xff]  }
 0x76a   : > { %12590 = vmatprep.mubr.msk.bf16.mxu0 %vm1186_vm1, %v13205_v8  ;;  %v12264_v36 = vpop.f32.mrf.mxu1  ;;  %v9333_v8 = vsel %vm4255_vm5, %v9328_v33, %v9332_v59 }
 0x76b   : > { %12503 = vmatmul.mubr.msk.bf16.gmra.mxu1 %vm5440_vm2, %v8743_v52  ;;  %v6915_v32 = vpop.f32.mrf.mxu0  ;;  %v16894_v54 = vadd.f32 %v12304_v38, %v12264_v36  ;;  %v9342_v38 = vshrl.u32 %v12908_v41, 16  ;;  %v13208_v36 = vld [vmem:[%s13462_s23 + $0x18] sm:$0xff]  }
 0x76c   : > { %12554 = vmatprep.mubr.msk.bf16.mxu1 %vm5440_vm2, %v9325_v53  ;;  %v6722_v11 = vpop.f32.mrf.mxu1  ;;  %v9354_v53 = vshll.u32 %v12910_v6, 16 }
 0x76d   : > { %v12305_v49 = vpop.f32.mrf.mxu0  ;;  %v16898_v27 = vadd.f32 %v6915_v32, %v6722_v11  ;;  %v9350_v32 = vshrl.u32 %v12909_v63, 16  ;;  %v9344_v59 = vor.u32 %v9342_v38, %v9340_v24  ;;  %v13209_v11 = vld [vmem:[%s13462_s23 + $0x20] sm:$0xff]  }
 0x76e   : > { %v12265_v62 = vpop.f32.mrf.mxu1  ;;  %v9356_v63 = vrot.slane %v9354_v53, 1 }
 0x76f   : > { %v6918_v34 = vpop.f32.mrf.mxu0  ;;  %v16901_v1 = vadd.f32 %v12305_v49, %v12265_v62  ;;  %v9352_v13 = vor.u32 %v9350_v32, %v9348_v9  ;;  %v9349_v62 = vsel %vm4255_vm5, %v9344_v59, %v9348_v9  ;;  %v9366_v9 = vshrl.u32 %v12911_v2, 16  ;;  %v13211_v32 = vld [vmem:[%s13462_s23 + $0x30] sm:$0xff]  }
 0x770   : > { %v6725_v48 = vpop.f32.mrf.mxu1 }
 0x771   : > { %v16903_v4 = vpop.f32.mrf.mxu0  ;;  %12591 = vmatmul.mubr.msk.bf16.vlgmr.msra.gmra.mxu0 %vm1186_vm1, %v13206_v7  ;;  %v16906_v45 = vadd.f32 %v6918_v34, %v6725_v48  ;;  %v9357_v50 = vsel %vm4255_vm5, %v9352_v13, %v9356_v63  ;;  %v12913_v48 = vld [vmem:[#allocation3 + $0x58] sm:$0xff]  }
 0x772   : > { %12594 = vmatprep.mubr.msk.bf16.mxu0 %vm1186_vm1, %v13207_v26  ;;  %v12912_v26 = vld [vmem:[#allocation3 + $0x50] sm:$0xff]  }
 0x773   : > { %v12316_v51 = vpop.f32.mrf.mxu1  ;;  %12555 = vmatmul.mubr.msk.bf16.vlgmr.msra.gmra.mxu1 %vm5440_vm2, %v9333_v8  ;;  %v16911_v56 = vpop.f32.mrf.mxu0  ;;  %v9358_v8 = vshrl.u32 %v12910_v6, 16  ;;  %v9370_v38 = vshll.u32 %v12912_v26, 16 }
 0x774   : > { %v16915_v23 = vadd.f32 %v12316_v51, %v16787_v5  ;;  %12558 = vmatprep.mubr.msk.bf16.mxu1 %vm5440_vm2, %v9341_v18  ;;  %v9362_v5 = vshll.u32 %v12911_v2, 16  ;;  %v13210_v18 = vld [vmem:[%s13462_s23 + $0x28] sm:$0xff]  }
 0x775   : > { %v7157_v58 = vpop.f32.mrf.mxu1  ;;  %v16918_v52 = vpop.f32.mrf.mxu0  ;;  %v9372_v2 = vrot.slane %v9370_v38, 1 }
 0x776   : > { %v16922_v37 = vadd.f32 %v7157_v58, %v16794_v3  ;;  %v9364_v60 = vrot.slane %v9362_v5, 1  ;;  %v9360_v58 = vor.u32 %v9358_v8, %v9356_v63  ;;  %v12914_v5 = vld [vmem:[#allocation3 + $0x60] sm:$0xff]  }
 0x777   : > { %v12317_v49 = vpop.f32.mrf.mxu1  ;;  %v16925_v7 = vpop.f32.mrf.mxu0  ;;  %v9386_v38 = vshll.u32 %v12914_v5, 16 }
 0x778   : > { %v16928_v41 = vadd.f32 %v12317_v49, %v16796_v17 }
 0x779   : > { %v7160_v25 = vpop.f32.mrf.mxu1  ;;  %v16930_v33 = vpop.f32.mrf.mxu0  ;;  %12595 = vmatmul.mubr.msk.bf16.gmra.mxu0 %vm1186_vm1, %v13208_v36 }
 0x77a   : > { %v16934_v3 = vadd.f32 %v7160_v25, %v16803_v35  ;;  %12598 = vmatprep.mubr.msk.bf16.mxu0 %vm1186_vm1, %v13209_v11  ;;  %v9368_v11 = vor.u32 %v9366_v9, %v9364_v60  ;;  %v9365_v25 = vsel %vm4255_vm5, %v9360_v58, %v9364_v60  ;;  %v9382_v9 = vshrl.u32 %v12913_v48, 16 }
 0x77b   : > { %v12320_v34 = vpop.f32.mrf.mxu1  ;;  %12559 = vmatmul.mubr.msk.bf16.gmra.mxu1 %vm5440_vm2, %v9349_v62  ;;  %v16939_v17 = vpop.f32.mrf.mxu0 }
 0x77c   : > { %v16943_v24 = vadd.f32 %v12320_v34, %v16808_v0  ;;  %12562 = vmatprep.mubr.msk.bf16.mxu1 %vm5440_vm2, %v9357_v50  ;;  %v9378_v0 = vshll.u32 %v12913_v48, 16  ;;  %v9373_v62 = vsel %vm4255_vm5, %v9368_v11, %v9372_v2  ;;  %v12915_v50 = vld [vmem:[#allocation3 + $0x68] sm:$0xff]   ;;  %v9388_v48 = vrot.slane %v9386_v38, 1 }
 0x77d   : > { %v7173_v35 = vpop.f32.mrf.mxu1  ;;  %v16946_v51 = vpop.f32.mrf.mxu0 }
 0x77e   : > { %v16950_v36 = vadd.f32 %v7173_v35, %v16811_v57  ;;  %v9380_v34 = vrot.slane %v9378_v0, 1  ;;  %v9374_v35 = vshrl.u32 %v12912_v26, 16 }
 0x77f   : > { %v12321_v53 = vpop.f32.mrf.mxu1  ;;  %v16953_v59 = vpop.f32.mrf.mxu0 }
 0x780   : > { %v16956_v6 = vadd.f32 %v12321_v53, %v16813_v19  ;;  %v9376_v58 = vor.u32 %v9374_v35, %v9372_v2  ;;  %v13213_v53 = vld [vmem:[%s13462_s23 + $0x40] sm:$0xff]   ;;  %v12916_v2 = vld [vmem:[#allocation3 + $0x70] sm:$0xff]  }
 0x781   : > { %v7176_v49 = vpop.f32.mrf.mxu1  ;;  %v16958_v13 = vpop.f32.mrf.mxu0  ;;  %12599 = vmatmul.mubr.msk.bf16.gmra.mxu0 %vm1186_vm1, %v13210_v18  ;;  %v13212_v18 = vld [vmem:[%s13462_s23 + $0x38] sm:$0xff]  }
 0x782   : > { %v16962_v57 = vadd.f32 %v7176_v49, %v16817_v30  ;;  %12602 = vmatprep.mubr.msk.bf16.mxu0 %vm1186_vm1, %v13211_v32  ;;  %v9384_v49 = vor.u32 %v9382_v9, %v9380_v34 }
 0x783   : > { %v12324_v63 = vpop.f32.mrf.mxu1  ;;  %12563 = vmatmul.mubr.msk.bf16.gmra.mxu1 %vm5440_vm2, %v9365_v25  ;;  %v16967_v19 = vpop.f32.mrf.mxu0 }
 0x784   : > { %v16971_v8 = vadd.f32 %v12324_v63, %v16822_v29  ;;  %12566 = vmatprep.mubr.msk.bf16.mxu1 %vm5440_vm2, %v9373_v62  ;;  %v9394_v29 = vshll.u32 %v12915_v50, 16  ;;  %v9381_v62 = vsel %vm4255_vm5, %v9376_v58, %v9380_v34  ;;  %v13214_v58 = vld [vmem:[%s13462_s23 + $0x48] sm:$0xff]  }
 0x785   : > { %v7189_v30 = vpop.f32.mrf.mxu1  ;;  %v16974_v60 = vpop.f32.mrf.mxu0 }
 0x786   : > { %v16978_v32 = vadd.f32 %v7189_v30, %v16825_v61  ;;  %v9389_v30 = vsel %vm4255_vm5, %v9384_v49, %v9388_v48  ;;  %v9396_v9 = vrot.slane %v9394_v29, 1 }
 0x787   : > { %v12325_v11 = vpop.f32.mrf.mxu1  ;;  %v16981_v0 = vpop.f32.mrf.mxu0 }
 0x788   : > { %18018 = vst [vmem:[#allocation80_spill] sm:$0xff] %v16978_v32  ;;  %v16984_v26 = vadd.f32 %v12325_v11, %v16827_v42  ;;  %v9390_v11 = vshrl.u32 %v12914_v5, 16 }
 0x789   : > { %v7192_v25 = vpop.f32.mrf.mxu1  ;;  %v16986_v63 = vpop.f32.mrf.mxu0  ;;  %12603 = vmatmul.mubr.msk.bf16.gmra.mxu0 %vm1186_vm1, %v13212_v18  ;;  %v12917_v18 = vld [vmem:[#allocation3 + $0x78] sm:$0xff]  }
 0x78a   : > { %v16990_v61 = vadd.f32 %v7192_v25, %v16831_v28  ;;  %12606 = vmatprep.mubr.msk.bf16.mxu0 %vm1186_vm1, %v13213_v53  ;;  %v9398_v53 = vshrl.u32 %v12915_v50, 16  ;;  %v9402_v25 = vshll.u32 %v12916_v2, 16 }
 0x78b   : > { %v12328_v35 = vpop.f32.mrf.mxu1  ;;  %12567 = vmatmul.mubr.msk.bf16.gmra.mxu1 %vm5440_vm2, %v9381_v62  ;;  %v16995_v42 = vpop.f32.mrf.mxu0 }
 0x78c   : > { %18019 = vst [vmem:[#allocation83_spill] sm:$0xff] %v16990_v61  ;;  %18020 = vst [vmem:[#allocation84_spill] sm:$0xff] %v16995_v42  ;;  %v16999_v38 = vadd.f32 %v12328_v35, %v16836_v40  ;;  %12570 = vmatprep.mubr.msk.bf16.mxu1 %vm5440_vm2, %v9389_v30  ;;  %v9392_v61 = vor.u32 %v9390_v11, %v9388_v48  ;;  %v13215_v42 = vld [vmem:[%s13462_s23 + $0x50] sm:$0xff]   ;;  %v9400_v32 = vor.u32 %v9398_v53, %v9396_v9  ;;  %v12918_v48 = vld [vmem:[#allocation3 + $0x80] sm:$0xff]  }
 0x78d   : > { %v7205_v28 = vpop.f32.mrf.mxu1  ;;  %v17002_v34 = vpop.f32.mrf.mxu0  ;;  %v9410_v40 = vshll.u32 %v12917_v18, 16  ;;  %v9404_v50 = vrot.slane %v9402_v25, 1 }
 0x78e   : > { %v17006_v62 = vadd.f32 %v7205_v28, %v16839_v31  ;;  %v9397_v11 = vsel %vm4255_vm5, %v9392_v61, %v9396_v9  ;;  %v9414_v9 = vshrl.u32 %v12917_v18, 16 }
 0x78f   : > { %v12329_v49 = vpop.f32.mrf.mxu1  ;;  %v17009_v29 = vpop.f32.mrf.mxu0  ;;  %v9405_v53 = vsel %vm4255_vm5, %v9400_v32, %v9404_v50 }
 0x790   : > { %18021 = vst [vmem:[#allocation87_spill] sm:$0xff] %v17006_v62  ;;  %v17012_v5 = vadd.f32 %v12329_v49, %v16841_v15  ;;  %v9412_v49 = vrot.slane %v9410_v40, 1  ;;  %v9406_v62 = vshrl.u32 %v12916_v2, 16 }
 0x791   : > { %v7208_v35 = vpop.f32.mrf.mxu1  ;;  %v17014_v30 = vpop.f32.mrf.mxu0  ;;  %12607 = vmatmul.mubr.msk.bf16.gmra.mxu0 %vm1186_vm1, %v13214_v58  ;;  %v12919_v58 = vld [vmem:[#allocation3 + $0x88] sm:$0xff]  }
 0x792   : > { %18022 = vst [vmem:[#allocation86_spill] sm:$0xff] %v17014_v30  ;;  %v17018_v31 = vadd.f32 %v7208_v35, %v16845_v20  ;;  %12610 = vmatprep.mubr.msk.bf16.mxu0 %vm1186_vm1, %v13215_v42  ;;  %v13216_v42 = vld [vmem:[%s13462_s23 + $0x58] sm:$0xff]   ;;  %v9418_v35 = vshll.u32 %v12918_v48, 16  ;;  %v9416_v30 = vor.u32 %v9414_v9, %v9412_v49 }
 0x793   : > { %v12332_v28 = vpop.f32.mrf.mxu1  ;;  %12571 = vmatmul.mubr.msk.bf16.gmra.mxu1 %vm5440_vm2, %v9397_v11  ;;  %v17023_v15 = vpop.f32.mrf.mxu0 }
 0x794   : > { %18023 = vst [vmem:[#allocation90_spill] sm:$0xff] %v17018_v31  ;;  %18024 = vst [vmem:[#allocation88_spill] sm:$0xff] %v17023_v15  ;;  %v17027_v25 = vadd.f32 %v12332_v28, %v16850_v16  ;;  %12574 = vmatprep.mubr.msk.bf16.mxu1 %vm5440_vm2, %v9405_v53  ;;  %v9408_v31 = vor.u32 %v9406_v62, %v9404_v50  ;;  %v13217_v15 = vld [vmem:[%s13462_s23 + $0x60] sm:$0xff]   ;;  %v9426_v16 = vshll.u32 %v12919_v58, 16  ;;  %v12920_v28 = vld [vmem:[#allocation3 + $0x90] sm:$0xff]   ;;  %v9420_v18 = vrot.slane %v9418_v35, 1 }
 0x795   : > { %v7221_v20 = vpop.f32.mrf.mxu1  ;;  %v17030_v61 = vpop.f32.mrf.mxu0  ;;  %v9422_v35 = vshrl.u32 %v12918_v48, 16 }
 0x796   : > { %18025 = vst [vmem:[#allocation20_spill] sm:$0xff] %v17027_v25  ;;  %v17034_v11 = vadd.f32 %v7221_v20, %v16853_v55  ;;  %v9413_v62 = vsel %vm4255_vm5, %v9408_v31, %v9412_v49  ;;  %v9421_v20 = vsel %vm4255_vm5, %v9416_v30, %v9420_v18  ;;  %v9428_v9 = vrot.slane %v9426_v16, 1 }
 0x797   : > { %v12333_v32 = vpop.f32.mrf.mxu1  ;;  %v17037_v40 = vpop.f32.mrf.mxu0 }
 0x798   : > { %18026 = vst [vmem:[#allocation89_spill] sm:$0xff] %v17034_v11  ;;  %v17040_v2 = vadd.f32 %v12333_v32, %v16855_v22  ;;  %v9434_v32 = vshll.u32 %v12920_v28, 16 }
 0x799   : > { %v7224_v53 = vpop.f32.mrf.mxu1  ;;  %v17042_v25 = vpop.f32.mrf.mxu0  ;;  %12611 = vmatmul.mubr.msk.bf16.gmra.mxu0 %vm1186_vm1, %v13216_v42 }
 0x79a   : > { %v17046_v55 = vadd.f32 %v7224_v53, %v16859_v14  ;;  %12614 = vmatprep.mubr.msk.bf16.mxu0 %vm1186_vm1, %v13217_v15  ;;  %v12921_v14 = vld [vmem:[#allocation3 + $0x98] ss:$0 sps:$4 sm:$0x11]   ;;  %v13218_v15 = vld [vmem:[%s13462_s23 + $0x68] sm:$0xff]   ;;  %v9430_v53 = vshrl.u32 %v12919_v58, 16 }
 0x79b   : > { %v12336_v50 = vpop.f32.mrf.mxu1  ;;  %12575 = vmatmul.mubr.msk.bf16.gmra.mxu1 %vm5440_vm2, %v9413_v62  ;;  %v17051_v22 = vpop.f32.mrf.mxu0 }
 0x79c   : > { %18027 = vst [vmem:[#allocation43_spill] sm:$0xff] %v17046_v55  ;;  %18028 = vst [vmem:[#allocation91_spill] sm:$0xff] %v17051_v22  ;;  %v17055_v42 = vadd.f32 %v12336_v50, %v16864_v12  ;;  %12578 = vmatprep.mubr.msk.bf16.mxu1 %vm5440_vm2, %v9421_v20  ;;  %v9424_v55 = vor.u32 %v9422_v35, %v9420_v18  ;;  %v13219_v22 = vld [vmem:[%s13462_s23 + $0x70] sm:$0xff]   ;;  %v9432_v11 = vor.u32 %v9430_v53, %v9428_v9 }
 0x79d   : > { %v7237_v31 = vpop.f32.mrf.mxu1  ;;  %v17058_v49 = vpop.f32.mrf.mxu0  ;;  %v9436_v12 = vrot.slane %v9434_v32, 1  ;;  %v9438_v50 = vshrl.u32 %v12920_v28, 16  ;;  %v9442_v20 = vshll.u32 %v12921_v14, 16 }
 0x79e   : > { %18029 = vst [vmem:[#allocation18_spill] sm:$0xff] %v17055_v42  ;;  %18030 = vst [vmem:[#allocation11_spill] sm:$0xff] %v17058_v49  ;;  %v17062_v62 = vadd.f32 %v7237_v31, %v16867_v39  ;;  %v9429_v58 = vsel %vm4255_vm5, %v9424_v55, %v9428_v9  ;;  %v13220_v55 = vld [vmem:[%s13462_s23 + $0x78] sm:$0xff]   ;;  %s13225_s23 = sshll.u32 %s13286_s26, 4  ;;  %s13226_s23 = int_to_ptr.vmem [resolvable:$false] %s13225_s23 }
 0x79f   : > { %v12337_v30 = vpop.f32.mrf.mxu1  ;;  %v17065_v16 = vpop.f32.mrf.mxu0  ;;  %v9437_v28 = vsel %vm4255_vm5, %v9432_v11, %v9436_v12  ;;  %v9440_v35 = vor.u32 %v9438_v50, %v9436_v12  ;;  %v9444_v14 = vrot.slane %v9442_v20, 1  ;;  %s13227_s0 = scalar_lea.vmem %s13226_s23, 4096  ;;  %p13228_p0 = scmp.lt.s32.totalorder %s17655_s3, %s13226_s23 }
 0x7a0   : > { %v17068_v48 = vadd.f32 %v12337_v30, %v16869_v10  ;;  %p13229_p1 = scmp.lt.s32.totalorder %s13227_s0, %s13221_s25 }
 0x7a1   : > { %v7240_v42 = vpop.f32.mrf.mxu1  ;;  %v17070_v49 = vpop.f32.mrf.mxu0  ;;  %12615 = vmatmul.mubr.msk.bf16.gmra.mxu0 %vm1186_vm1, %v13218_v15 }
 0x7a2   : > { %v17074_v39 = vadd.f32 %v7240_v42, %v16873_v21  ;;  %12618 = vmatprep.mubr.msk.bf16.mxu0 %vm1186_vm1, %v13219_v22  ;;  %p13230_p2 = por %p13229_p1, %p13228_p0 }
 0x7a3   : > { %v12340_v18 = vpop.f32.mrf.mxu1  ;;  %12579 = vmatmul.mubr.msk.bf16.gmra.mxu1 %vm5440_vm2, %v9429_v58  ;;  %v17079_v10 = vpop.f32.mrf.mxu0 }
 0x7a4   : > { %v17083_v32 = vadd.f32 %v12340_v18, %v16878_v43  ;;  %12582 = vmatprep.mubr.msk.bf16.mxu1 %vm5440_vm2, %v9437_v28  ;;  %v9445_v43 = vsel %vm4255_vm5, %v9440_v35, %v9444_v14  ;;  %p13231_p3 = pnand %p13230_p2, %p13224_p13 }
 0x7a5   : > { %v7253_v21 = vpop.f32.mrf.mxu1  ;;  %v17086_v42 = vpop.f32.mrf.mxu0 }
 0x7a6   : > { %v17090_v22 = vadd.f32 %v7253_v21, %v16881_v46 }
 0x7a7   : > { %v12341_v9 = vpop.f32.mrf.mxu1  ;;  %v17092_v31 = vpop.f32.mrf.mxu0 }
 0x7a8   : > { %v17095_v15 = vadd.f32 %v12341_v9, %v16884_v44 }
 0x7a9   : > { %v7256_v11 = vpop.f32.mrf.mxu1  ;;  %v17098_v53 = vpop.f32.mrf.mxu0  ;;  %12619 = vmatmul.mubr.msk.bf16.gmra.mxu0 %vm1186_vm1, %v13220_v55 }
 0x7aa   : > { %v17102_v30 = vadd.f32 %v7256_v11, %v16888_v47 }
 0x7ab   : > { %v12344_v12 = vpop.f32.mrf.mxu1  ;;  %12583 = vmatmul.mubr.msk.bf16.gmra.mxu1 %vm5440_vm2, %v9445_v43  ;;  %v17105_v46 = vpop.f32.mrf.mxu0 }
 0x7ac   : > { %18031 = vst [vmem:[#allocation22_spill] sm:$0xff] %v17105_v46  ;;  %v17108_v50 = vadd.f32 %v12344_v12, %v16894_v54 }
 0x7ad   : > { %v7269_v44 = vpop.f32.mrf.mxu1  ;;  %v17110_v20 = vpop.f32.mrf.mxu0 }
 0x7ae   : > { %18032 = vst [vmem:[#allocation13_spill] sm:$0xff] %v17108_v50  ;;  %18033 = vst [vmem:[#allocation46_spill] sm:$0xff] %v17110_v20  ;;  %v17113_v58 = vadd.f32 %v7269_v44, %v16898_v27  ;;  %v18038_v50 = vld [vmem:[#allocation41_spill] sm:$0xff] }
 0x7af   : > { %v12345_v18 = vpop.f32.mrf.mxu1  ;;  %v17115_v28 = vpop.f32.mrf.mxu0 }
 0x7b0   : > { %18034 = vst [vmem:[#allocation14_spill] sm:$0xff] %v17113_v58  ;;  %18035 = vst [vmem:[#allocation48_spill] sm:$0xff] %v17115_v28  ;;  %v17118_v47 = vadd.f32 %v12345_v18, %v16901_v1 }
 0x7b1   : > { %v7272_v35 = vpop.f32.mrf.mxu1  ;;  %v12436_v14 = vpop.f32.mrf.mxu0 }
 0x7b2   : > { %18036 = vst [vmem:[#allocation17_spill] sm:$0xff] %v17118_v47  ;;  %v17121_v21 = vadd.f32 %v7272_v35, %v16906_v45  ;;  %v18039_v45 = vld [vmem:[#allocation42_spill] sm:$0xff] }
 0x7b3   : > { %v12396_v55 = vpop.f32.mrf.mxu1  ;;  %v8252_v54 = vpop.f32.mrf.mxu0 }
 0x7b4   : > { %18037 = vst [vmem:[#allocation47_spill] sm:$0xff] %v17121_v21  ;;  %v7847_v9 = vadd.f32 %v12396_v55, %v16903_v4 }
 0x7b5   : > { %v7838_v43 = vpop.f32.mrf.mxu1  ;;  %v12437_v11 = vpop.f32.mrf.mxu0 }
 0x7b6   : > { %v8381_v12 = vadd.f32 %v12436_v14, %v7847_v9  ;;  %v7839_v27 = vadd.f32 %v7838_v43, %v16911_v56 }
 0x7b7   : > { %v12397_v44 = vpop.f32.mrf.mxu1  ;;  %v8255_v58 = vpop.f32.mrf.mxu0 }
 0x7b8   : > { %v8413_v28 = vmul.f32 %v18038_v50, %v8381_v12  ;;  %v8379_v1 = vadd.f32 %v8252_v54, %v7839_v27  ;;  %v7850_v18 = vadd.f32 %v12397_v44, %v16918_v52  ;;  %v18040_v12 = vld [vmem:[#allocation44_spill] sm:$0xff] }
 0x7b9   : > { %v7841_v47 = vpop.f32.mrf.mxu1  ;;  %v12440_v20 = vpop.f32.mrf.mxu0 }
 0x7ba   : > { %v8411_v35 = vmul.f32 %v18039_v45, %v8379_v1  ;;  %v8382_v21 = vadd.f32 %v12437_v11, %v7850_v18  ;;  %v7842_v46 = vadd.f32 %v7841_v47, %v16925_v7  ;;  %v17130_v4 = vadd.f32 %v8413_v28, %v16915_v23 }
 0x7bb   : > { %v12400_v14 = vpop.f32.mrf.mxu1  ;;  %v8268_v55 = vpop.f32.mrf.mxu0 }
 0x7bc   : > { %v17133_v56 = vadd.f32 %v8382_v21, %v16928_v41  ;;  %v8380_v9 = vadd.f32 %v8255_v58, %v7842_v46  ;;  %v7863_v50 = vadd.f32 %v12400_v14, %v16930_v33  ;;  %v17137_v52 = vadd.f32 %v8411_v35, %v16922_v37  ;;  %v18041_v21 = vld [vmem:[#allocation45_spill] sm:$0xff] }
 0x7bd   : > { %v7854_v54 = vpop.f32.mrf.mxu1  ;;  %v12441_v43 = vpop.f32.mrf.mxu0 }
 0x7be   : > { %v17140_v11 = vadd.f32 %v8380_v9, %v16934_v3  ;;  %v8385_v7 = vadd.f32 %v12440_v20, %v7863_v50  ;;  %v7855_v23 = vadd.f32 %v7854_v54, %v16939_v17 }
 0x7bf   : > { %v12401_v28 = vpop.f32.mrf.mxu1  ;;  %v8271_v47 = vpop.f32.mrf.mxu0 }
 0x7c0   : > { %v8417_v27 = vmul.f32 %v18040_v12, %v8385_v7  ;;  %v8383_v41 = vadd.f32 %v8268_v55, %v7855_v23  ;;  %v7866_v46 = vadd.f32 %v12401_v28, %v16946_v51 }
 0x7c1   : > { %v7857_v58 = vpop.f32.mrf.mxu1  ;;  %v12444_v33 = vpop.f32.mrf.mxu0 }
 0x7c2   : > { %v8415_v37 = vmul.f32 %v18041_v21, %v8383_v41  ;;  %v8386_v44 = vadd.f32 %v12441_v43, %v7866_v46  ;;  %v7858_v1 = vadd.f32 %v7857_v58, %v16953_v59  ;;  %v17148_v3 = vadd.f32 %v8417_v27, %v16943_v24  ;;  %v18042_v43 = vld [vmem:[#allocation49_spill] sm:$0xff]  ;;  %v18044_v21 = vld [vmem:[#allocation80_spill] sm:$0xff] }
 0x7c3   : > { %v12404_v20 = vpop.f32.mrf.mxu1  ;;  %v8284_v18 = vpop.f32.mrf.mxu0 }
 0x7c4   : > { %v17151_v17 = vadd.f32 %v8386_v44, %v16956_v6  ;;  %v8384_v45 = vadd.f32 %v8271_v47, %v7858_v1  ;;  %v7879_v35 = vadd.f32 %v12404_v20, %v16958_v13  ;;  %v17155_v51 = vadd.f32 %v8415_v37, %v16950_v36  ;;  %v18043_v47 = vld [vmem:[#allocation50_spill] sm:$0xff]  ;;  %v18045_v1 = vld [vmem:[#allocation83_spill] sm:$0xff] }
 0x7c5   : > { %v7870_v14 = vpop.f32.mrf.mxu1  ;;  %v12445_v55 = vpop.f32.mrf.mxu0 }
 0x7c6   : > { %v17158_v9 = vadd.f32 %v8384_v45, %v16962_v57  ;;  %v8389_v59 = vadd.f32 %v12444_v33, %v7879_v35  ;;  %v7871_v24 = vadd.f32 %v7870_v14, %v16967_v19  ;;  %v18047_v14 = vld [vmem:[#allocation53_spill] sm:$0xff] }
 0x7c7   : > { %v12405_v50 = vpop.f32.mrf.mxu1  ;;  %v8287_v54 = vpop.f32.mrf.mxu0 }
 0x7c8   : > { %v8421_v7 = vmul.f32 %v18042_v43, %v8389_v59  ;;  %v8387_v6 = vadd.f32 %v8284_v18, %v7871_v24  ;;  %v7882_v23 = vadd.f32 %v12405_v50, %v16974_v60  ;;  %v18046_v18 = vld [vmem:[#allocation84_spill] sm:$0xff]  ;;  %v18048_v50 = vld [vmem:[#allocation55_spill] sm:$0xff] }
 0x7c9   : > { %v7873_v28 = vpop.f32.mrf.mxu1  ;;  %v12448_v13 = vpop.f32.mrf.mxu0 }
 0x7ca   : > { %v8419_v36 = vmul.f32 %v18043_v47, %v8387_v6  ;;  %v8390_v12 = vadd.f32 %v12445_v55, %v7882_v23  ;;  %v7874_v27 = vadd.f32 %v7873_v28, %v16981_v0  ;;  %v17166_v57 = vadd.f32 %v8421_v7, %v16971_v8 }
 0x7cb   : > { %v12408_v41 = vpop.f32.mrf.mxu1  ;;  %v8300_v46 = vpop.f32.mrf.mxu0 }
 0x7cc   : > { %v17169_v19 = vadd.f32 %v8390_v12, %v16984_v26  ;;  %v8388_v58 = vadd.f32 %v8287_v54, %v7874_v27  ;;  %v7895_v33 = vadd.f32 %v12408_v41, %v16986_v63  ;;  %v17173_v60 = vadd.f32 %v8419_v36, %v18044_v21  ;;  %v18050_v36 = vld [vmem:[#allocation86_spill] sm:$0xff]  ;;  %v18051_v27 = vld [vmem:[#allocation87_spill] sm:$0xff]  ;;  %v18054_v21 = vld [vmem:[#allocation88_spill] sm:$0xff] }
 0x7cd   : > { %v7886_v37 = vpop.f32.mrf.mxu1  ;;  %v12449_v44 = vpop.f32.mrf.mxu0 }
 0x7ce   : > { %v17176_v20 = vadd.f32 %v8388_v58, %v18045_v1  ;;  %v8393_v0 = vadd.f32 %v12448_v13, %v7895_v33  ;;  %v7887_v8 = vadd.f32 %v7886_v37, %v18046_v18  ;;  %v18052_v58 = vld [vmem:[#allocation90_spill] sm:$0xff] }
 0x7cf   : > { %v12409_v45 = vpop.f32.mrf.mxu1  ;;  %v8303_v35 = vpop.f32.mrf.mxu0  ;;  %v18055_v1 = vld [vmem:[#allocation58_spill] sm:$0xff] }
 0x7d0   : > { %v8425_v55 = vmul.f32 %v18047_v14, %v8393_v0  ;;  %v8391_v26 = vadd.f32 %v8300_v46, %v7887_v8  ;;  %v7898_v59 = vadd.f32 %v12409_v45, %v17002_v34 }
 0x7d1   : > { %v7889_v24 = vpop.f32.mrf.mxu1  ;;  %v12452_v63 = vpop.f32.mrf.mxu0 }
 0x7d2   : > { %v8423_v54 = vmul.f32 %v18048_v50, %v8391_v26  ;;  %v8394_v43 = vadd.f32 %v12449_v44, %v7898_v59  ;;  %v7890_v7 = vadd.f32 %v7889_v24, %v17009_v29  ;;  %v17184_v6 = vadd.f32 %v8425_v55, %v16999_v38  ;;  %v18057_v59 = vld [vmem:[#allocation20_spill] sm:$0xff] }
 0x7d3   : > { %v12412_v23 = vpop.f32.mrf.mxu1  ;;  %v8316_v28 = vpop.f32.mrf.mxu0 }
 0x7d4   : > { %v17187_v13 = vadd.f32 %v8394_v43, %v17012_v5  ;;  %v8392_v47 = vadd.f32 %v8303_v35, %v7890_v7  ;;  %v7911_v12 = vadd.f32 %v12412_v23, %v18050_v36  ;;  %v17191_v34 = vadd.f32 %v8423_v54, %v18051_v27  ;;  %v18056_v35 = vld [vmem:[#allocation60_spill] sm:$0xff]  ;;  %v18060_v23 = vld [vmem:[#allocation89_spill] sm:$0xff]  ;;  %v18062_v36 = vld [vmem:[#allocation43_spill] sm:$0xff] }
 0x7d5   : > { %v7902_v41 = vpop.f32.mrf.mxu1  ;;  %v12453_v46 = vpop.f32.mrf.mxu0  ;;  %v18064_v27 = vld [vmem:[#allocation91_spill] sm:$0xff] }
 0x7d6   : > { %18049 = vst [vmem:[#allocation15_spill] sm:$0xff] %v17187_v13  ;;  %v17194_v33 = vadd.f32 %v8392_v47, %v18052_v58  ;;  %v8397_v29 = vadd.f32 %v12452_v63, %v7911_v12  ;;  %v7903_v38 = vadd.f32 %v7902_v41, %v18054_v21 }
 0x7d7   : > { %v12413_v37 = vpop.f32.mrf.mxu1  ;;  %v8319_v44 = vpop.f32.mrf.mxu0 }
 0x7d8   : > { %18053 = vst [vmem:[#allocation51_spill] sm:$0xff] %v17194_v33  ;;  %v8429_v0 = vmul.f32 %v18055_v1, %v8397_v29  ;;  %v8395_v5 = vadd.f32 %v8316_v28, %v7903_v38  ;;  %v7914_v18 = vadd.f32 %v12413_v37, %v17030_v61  ;;  %v18065_v29 = vld [vmem:[#allocation63_spill] sm:$0xff]  ;;  %v18067_v1 = vld [vmem:[#allocation65_spill] sm:$0xff] }
 0x7d9   : > { %v7905_v8 = vpop.f32.mrf.mxu1  ;;  %v12456_v45 = vpop.f32.mrf.mxu0  ;;  %v18066_v38 = vld [vmem:[#allocation11_spill] sm:$0xff] }
 0x7da   : > { %v8427_v14 = vmul.f32 %v18056_v35, %v8395_v5  ;;  %v8398_v55 = vadd.f32 %v12453_v46, %v7914_v18  ;;  %v7906_v26 = vadd.f32 %v7905_v8, %v17037_v40  ;;  %v17202_v24 = vadd.f32 %v8429_v0, %v18057_v59  ;;  %v18068_v8 = vld [vmem:[#allocation18_spill] sm:$0xff] }
 0x7db   : > { %v12416_v63 = vpop.f32.mrf.mxu1  ;;  %v8332_v50 = vpop.f32.mrf.mxu0 }
 0x7dc   : > { %18058 = vst [vmem:[#allocation54_spill] sm:$0xff] %v17202_v24  ;;  %v17205_v54 = vadd.f32 %v8398_v55, %v17040_v2  ;;  %v8396_v43 = vadd.f32 %v8319_v44, %v7906_v26  ;;  %v7927_v7 = vadd.f32 %v12416_v63, %v17042_v25  ;;  %v17209_v61 = vadd.f32 %v8427_v14, %v18060_v23 }
 0x7dd   : > { %v7918_v28 = vpop.f32.mrf.mxu1  ;;  %v12457_v47 = vpop.f32.mrf.mxu0 }
 0x7de   : > { %18059 = vst [vmem:[#allocation52_spill] sm:$0xff] %v17205_v54  ;;  %18061 = vst [vmem:[#allocation40_spill] sm:$0xff] %v17209_v61  ;;  %v17212_v12 = vadd.f32 %v8396_v43, %v18062_v36  ;;  %v8401_v40 = vadd.f32 %v12456_v45, %v7927_v7  ;;  %v7919_v41 = vadd.f32 %v7918_v28, %v18064_v27  ;;  %v18073_v36 = vld [vmem:[#allocation68_spill] sm:$0xff] }
 0x7df   : > { %v12417_v46 = vpop.f32.mrf.mxu1  ;;  %v8335_v58 = vpop.f32.mrf.mxu0 }
 0x7e0   : > { %18063 = vst [vmem:[#allocation56_spill] sm:$0xff] %v17212_v12  ;;  %v8433_v21 = vmul.f32 %v18065_v29, %v8401_v40  ;;  %v8399_v2 = vadd.f32 %v8332_v50, %v7919_v41  ;;  %v7930_v37 = vadd.f32 %v12417_v46, %v18066_v38  ;;  %v18074_v46 = vld [vmem:[#allocation69_spill] sm:$0xff] }
 0x7e1   : > { %v7921_v44 = vpop.f32.mrf.mxu1  ;;  %v12460_v25 = vpop.f32.mrf.mxu0 }
 0x7e2   : > { %v8431_v0 = vmul.f32 %v18067_v1, %v8399_v2  ;;  %v8402_v5 = vadd.f32 %v12457_v47, %v7930_v37  ;;  %v7922_v18 = vadd.f32 %v7921_v44, %v17065_v16  ;;  %v17220_v35 = vadd.f32 %v8433_v21, %v18068_v8  ;;  %v18080_v8 = vld [vmem:[#allocation72_spill] sm:$0xff] }
 0x7e3   : > { %v12420_v45 = vpop.f32.mrf.mxu1  ;;  %v8348_v14 = vpop.f32.mrf.mxu0 }
 0x7e4   : > { %18069 = vst [vmem:[#allocation59_spill] sm:$0xff] %v17220_v35  ;;  %v17223_v55 = vadd.f32 %v8402_v5, %v17068_v48  ;;  %v8400_v26 = vadd.f32 %v8335_v58, %v7922_v18  ;;  %v7943_v59 = vadd.f32 %v12420_v45, %v17070_v49  ;;  %v17227_v63 = vadd.f32 %v8431_v0, %v17062_v62  ;;  %v18079_v0 = vld [vmem:[#allocation22_spill] sm:$0xff] }
 0x7e5   : > { %v7934_v50 = vpop.f32.mrf.mxu1  ;;  %v12461_v43 = vpop.f32.mrf.mxu0 }
 0x7e6   : > { %18070 = vst [vmem:[#allocation57_spill] sm:$0xff] %v17223_v55  ;;  %18071 = vst [vmem:[#allocation61_spill] sm:$0xff] %v17227_v63  ;;  %v17230_v7 = vadd.f32 %v8400_v26, %v17074_v39  ;;  %v8405_v16 = vadd.f32 %v12460_v25, %v7943_v59  ;;  %v7935_v23 = vadd.f32 %v7934_v50, %v17079_v10 }
 0x7e7   : > { %v12421_v28 = vpop.f32.mrf.mxu1  ;;  %v8351_v47 = vpop.f32.mrf.mxu0 }
 0x7e8   : > { %18072 = vst [vmem:[#allocation64_spill] sm:$0xff] %v17230_v7  ;;  %v8437_v40 = vmul.f32 %v18073_v36, %v8405_v16  ;;  %v8403_v48 = vadd.f32 %v8348_v14, %v7935_v23  ;;  %v7946_v27 = vadd.f32 %v12421_v28, %v17086_v42  ;;  %v18081_v14 = vld [vmem:[#allocation46_spill] sm:$0xff]  ;;  %v18083_v16 = vld [vmem:[#allocation48_spill] sm:$0xff] }
 0x7e9   : > { %v7937_v41 = vpop.f32.mrf.mxu1  ;;  %v12464_v49 = vpop.f32.mrf.mxu0 }
 0x7ea   : > { %v8435_v62 = vmul.f32 %v18074_v46, %v8403_v48  ;;  %v8406_v58 = vadd.f32 %v12461_v43, %v7946_v27  ;;  %v7938_v29 = vadd.f32 %v7937_v41, %v17092_v31  ;;  %v17238_v39 = vadd.f32 %v8437_v40, %v17083_v32  ;;  %v18086_v40 = vld [vmem:[#allocation17_spill] sm:$0xff]  ;;  %v18088_v41 = vld [vmem:[#allocation14_spill] sm:$0xff] }
 0x7eb   : > { %v12424_v21 = vpop.f32.mrf.mxu1  ;;  %v8364_v2 = vpop.f32.mrf.mxu0 }
 0x7ec   : > { %18075 = vst [vmem:[#allocation62_spill] sm:$0xff] %v17238_v39  ;;  %v17241_v10 = vadd.f32 %v8406_v58, %v17095_v15  ;;  %v8404_v38 = vadd.f32 %v8351_v47, %v7938_v29  ;;  %v7959_v37 = vadd.f32 %v12424_v21, %v17098_v53  ;;  %v17245_v42 = vadd.f32 %v8435_v62, %v17090_v22  ;;  %v18082_v22 = vld [vmem:[#allocation33_spill] sm:$0xff]  ;;  %v18090_v58 = vld [vmem:[#allocation47_spill] sm:$0xff] }
 0x7ed   : > { %v7950_v44 = vpop.f32.mrf.mxu1  ;;  %v12465_v25 = vpop.f32.mrf.mxu0 }
 0x7ee   : > { %18076 = vst [vmem:[#allocation28_spill] sm:$0xff] %v17241_v10  ;;  %18077 = vst [vmem:[#allocation67_spill] sm:$0xff] %v17245_v42  ;;  %v17248_v1 = vadd.f32 %v8404_v38, %v17102_v30  ;;  %v8409_v31 = vadd.f32 %v12464_v49, %v7959_v37  ;;  %v7951_v32 = vadd.f32 %v7950_v44, %v18079_v0  ;;  %v18084_v30 = vld [vmem:[#allocation13_spill] sm:$0xff] }
 0x7ef   : > { %v12425_v5 = vpop.f32.mrf.mxu1  ;;  %v8367_v18 = vpop.f32.mrf.mxu0 }
 0x7f0   : > { %18078 = vst [vmem:[#allocation30_spill] sm:$0xff] %v17248_v1  ;;  %v8441_v45 = vmul.f32 %v18080_v8, %v8409_v31  ;;  %v8407_v15 = vadd.f32 %v8364_v2, %v7951_v32  ;;  %v7962_v26 = vadd.f32 %v12425_v5, %v18081_v14 }
 0x7f1   : > { %v7953_v59 = vpop.f32.mrf.mxu1  ;;  %v17253_v53 = vpop.f32.mrf.mxu0 }
 0x7f2   : > { %v8439_v50 = vmul.f32 %v18082_v22, %v8407_v15  ;;  %v8410_v43 = vadd.f32 %v12465_v25, %v7962_v26  ;;  %v7954_v23 = vadd.f32 %v7953_v59, %v18083_v16  ;;  %v17258_v28 = vadd.f32 %v8441_v45, %v18084_v30 }
 0x7f3   : > { %v17260_v47 = vpop.f32.mrf.mxu1  ;;  %v17262_v36 = vpop.f32.mrf.mxu0 }
 0x7f4   : > { %18085 = vst [vmem:[#allocation66_spill] sm:$0xff] %v17258_v28  ;;  %v17265_v48 = vadd.f32 %v8410_v43, %v18086_v40  ;;  %v8408_v27 = vadd.f32 %v8367_v18, %v7954_v23  ;;  %v17268_v49 = vadd.f32 %v8439_v50, %v18088_v41 }
 0x7f5   : > { %v17270_v46 = vpop.f32.mrf.mxu1  ;;  %v17272_v62 = vpop.f32.mrf.mxu0 }
 0x7f6   : > { %18087 = vst [vmem:[#allocation70_spill] sm:$0xff] %v17265_v48  ;;  %18089 = vst [vmem:[#allocation32_spill] sm:$0xff] %v17268_v49  ;;  %v17275_v29 = vadd.f32 %v8408_v27, %v18090_v58 }
 0x7f7   : > { %v17277_v21 = vpop.f32.mrf.mxu1  ;;  %v17279_v2 = vpop.f32.mrf.mxu0 }
 0x7f8   : > { %18091 = vst [vmem:[#allocation19_spill] sm:$0xff] %v17275_v29 }
 0x7f9   : > { %v17281_v38 = vpop.f32.mrf.mxu1  ;;  %v17283_v37 = vpop.f32.mrf.mxu0 }
 0x7fb   : > { %v17285_v44 = vpop.f32.mrf.mxu1  ;;  %v17287_v25 = vpop.f32.mrf.mxu0 }
 0x7fd   : > { %v17289_v31 = vpop.f32.mrf.mxu1  ;;  %v17291_v0 = vpop.f32.mrf.mxu0 }
 0x7ff   : > { %v17293_v32 = vpop.f32.mrf.mxu1  ;;  %v17295_v5 = vpop.f32.mrf.mxu0 }
 0x801   : > { %v17297_v18 = vpop.f32.mrf.mxu1  ;;  %v17299_v8 = vpop.f32.mrf.mxu0 }
 0x803   : > { %v17301_v45 = vpop.f32.mrf.mxu1  ;;  %v17303_v15 = vpop.f32.mrf.mxu0 }
 0x805   : > { %v17305_v14 = vpop.f32.mrf.mxu1  ;;  %v17307_v26 = vpop.f32.mrf.mxu0 }
 0x807   : > { %v17309_v59 = vpop.f32.mrf.mxu1  ;;  %v17311_v22 = vpop.f32.mrf.mxu0 }
 0x809   : > { %v17313_v50 = vpop.f32.mrf.mxu1  ;;  %v17315_v43 = vpop.f32.mrf.mxu0 }
 0x80b   : > { %v17317_v16 = vpop.f32.mrf.mxu1  ;;  %v17319_v23 = vpop.f32.mrf.mxu0 }
 0x80d   : > { %v17321_v30 = vpop.f32.mrf.mxu1  ;;  %v17323_v40 = vpop.f32.mrf.mxu0 }
 0x80f   : > { %v17325_v27 = vpop.f32.mrf.mxu1  ;;  %v17327_v41 = vpop.f32.mrf.mxu0 }
 0x811   : > { %v17329_v58 = vpop.f32.mrf.mxu1  ;;  %v17331_v29 = vpop.f32.mrf.mxu0 }
 0x813   : > { %v17333_v48 = vpop.f32.mrf.mxu1  ;;  %v17335_v49 = vpop.f32.mrf.mxu0 }
 0x814   : > { %18092 = vst [vmem:[#allocation71_spill] sm:$0xff] %v17335_v49 }
 0x815   : > { %v17337_v1 = vpop.f32.mrf.mxu1  ;;  %v17339_v28 = vpop.f32.mrf.mxu0 }
 0x816   : > { %18093 = vst [vmem:[#allocation35_spill] sm:$0xff] %v17337_v1  ;;  %18094 = vst [vmem:[#allocation38_spill] sm:$0xff] %v17339_v28 }
 0x817   : > { %v17341_v10 = vpop.f32.mrf.mxu1  ;;  %v17343_v42 = vpop.f32.mrf.mxu0 }
 0x818   : > { %18095 = vst [vmem:[#allocation36_spill] sm:$0xff] %v17341_v10  ;;  %18096 = vst [vmem:[#allocation10_spill] sm:$0xff] %v17343_v42 }
 0x819   : > { %v17345_v7 = vpop.f32.mrf.mxu1  ;;  %v17347_v39 = vpop.f32.mrf.mxu0 }
 0x81a   : > { %18097 = vst [vmem:[#allocation39_spill] sm:$0xff] %v17345_v7  ;;  %18098 = vst [vmem:[#allocation92_spill] sm:$0xff] %v17347_v39 }
 0x81b   : > { %v17349_v55 = vpop.f32.mrf.mxu1  ;;  %v17351_v63 = vpop.f32.mrf.mxu0 }
 0x81c   : > { %18099 = vst [vmem:[#allocation37_spill] sm:$0xff] %v17349_v55  ;;  %18100 = vst [vmem:[#allocation81_spill] sm:$0xff] %v17351_v63 }
 0x81d   : > { %v17353_v12 = vpop.f32.mrf.mxu1  ;;  %v17355_v35 = vpop.f32.mrf.mxu0 }
 0x81e   : > { %18101 = vst [vmem:[#allocation82_spill] sm:$0xff] %v17353_v12  ;;  %18102 = vst [vmem:[#allocation85_spill] sm:$0xff] %v17355_v35 }
 0x81f   : > { %v17357_v54 = vpop.f32.mrf.mxu1  ;;  %v17359_v61 = vpop.f32.mrf.mxu0 }
 0x820   : > { %18103 = vst [vmem:[#allocation9_spill] sm:$0xff] %v17357_v54  ;;  %18104 = vst [vmem:[#allocation76_spill] sm:$0xff] %v17359_v61 }
 0x821   : > { %v17361_v33 = vpop.f32.mrf.mxu1  ;;  %v17363_v24 = vpop.f32.mrf.mxu0 }
 0x822   : > { %18105 = vst [vmem:[#allocation77_spill] sm:$0xff] %v17361_v33  ;;  %18106 = vst [vmem:[#allocation73_spill] sm:$0xff] %v17363_v24 }
 0x823   : > { %v17365_v42 = vpop.f32.mrf.mxu1  ;;  %v17367_v7 = vpop.f32.mrf.mxu0 }
 0x824   : > { %18107 = vst [vmem:[#allocation74_spill] sm:$0xff] %v17365_v42  ;;  %18108 = vst [vmem:[#allocation75_spill] sm:$0xff] %v17367_v7 }
 0x825   : > { %v17369_v39 = vpop.f32.mrf.mxu1  ;;  %v17371_v55 = vpop.f32.mrf.mxu0 }
 0x826   : > { %18109 = vst [vmem:[#allocation79_spill] sm:$0xff] %v17369_v39  ;;  %18110 = vst [vmem:[#allocation78_spill] sm:$0xff] %v17371_v55 }
 0x827   : > { %v17373_v63 = vpop.f32.mrf.mxu1  ;;  %v17375_v12 = vpop.f32.mrf.mxu0 }
 0x828   : > { %18111 = vst [vmem:[#allocation41_spill] sm:$0xff] %v17373_v63  ;;  %18112 = vst [vmem:[#allocation42_spill] sm:$0xff] %v17375_v12 }
 0x829   : > { %v17377_v35 = vpop.f32.mrf.mxu1  ;;  %v17379_v61 = vpop.f32.mrf.mxu0 }
 0x82a   : > { %18113 = vst [vmem:[#allocation44_spill] sm:$0xff] %v17377_v35  ;;  %18114 = vst [vmem:[#allocation45_spill] sm:$0xff] %v17379_v61  ;;  %v9071_v35 = vadd.f32 %v17253_v53, %v17260_v47  ;;  %v9074_v47 = vadd.f32 %v17272_v62, %v17277_v21 }
 0x82b   : > { %v17381_v33 = vpop.f32.mrf.mxu1  ;;  %v17383_v24 = vpop.f32.mrf.mxu0 }
 0x82c   : > { %18115 = vst [vmem:[#allocation49_spill] sm:$0xff] %v17381_v33  ;;  %18116 = vst [vmem:[#allocation50_spill] sm:$0xff] %v17383_v24  ;;  %v17400_v24 = vld [vmem:[%s17715_s14] ss:$0 sm:$0xff] }
 0x82d   : > { %v17385_v42 = vpop.f32.mrf.mxu1  ;;  %v17387_v7 = vpop.f32.mrf.mxu0 }
 0x82e   : > { %18117 = vst [vmem:[#allocation80_spill] sm:$0xff] %v17385_v42  ;;  %18118 = vst [vmem:[#allocation83_spill] sm:$0xff] %v17387_v7  ;;  %v9063_v7 = vadd.f32 %v17262_v36, %v17270_v46  ;;  %v9066_v36 = vadd.f32 %v17279_v2, %v17281_v38  ;;  %v9087_v2 = vadd.f32 %v17283_v37, %v17285_v44 }
 0x82f   : > { %v17389_v39 = vpop.f32.mrf.mxu1  ;;  %v17391_v55 = vpop.f32.mrf.mxu0  ;;  %v9079_v38 = vadd.f32 %v17287_v25, %v17289_v31 }
 0x830   : > { %18119 = vst [vmem:[#allocation84_spill] sm:$0xff] %v17389_v39  ;;  %18120 = vst [vmem:[#allocation53_spill] sm:$0xff] %v17391_v55  ;;  %v17408_v55 = vld [vmem:[%s17713_s12] ss:$0 sm:$0xff] }
 0x831   : > { %v17393_v63 = vpop.f32.mrf.mxu1  ;;  %v12592_v12 = vpop.f32.mrf.mxu0 }
 0x832   : > { %18121 = vst [vmem:[#allocation55_spill] sm:$0xff] %v17393_v63  ;;  %v10007_v33 = vadd.f32 %v12592_v12, %v17400_v24 }
 0x833   : > { %v12556_v54 = vpop.f32.mrf.mxu1  ;;  %v9998_v42 = vpop.f32.mrf.mxu0 }
 0x834   : > { %v9681_v39 = vadd.f32 %v12556_v54, %v9071_v35  ;;  %v9999_v10 = vadd.f32 %v17400_v24, %v9998_v42 }
 0x835   : > { %v9552_v63 = vpop.f32.mrf.mxu1  ;;  %v12593_v53 = vpop.f32.mrf.mxu0 }
 0x836   : > { %v9745_v61 = vadd.f32 %v9681_v39, %v17130_v4  ;;  %v9679_v13 = vadd.f32 %v9552_v63, %v9063_v7  ;;  %v18122_v63 = vld [vmem:[#allocation12_spill] sm:$0xff] }
 0x837   : > { %v12557_v54 = vpop.f32.mrf.mxu1  ;;  %v10001_v35 = vpop.f32.mrf.mxu0 }
 0x838   : > { %v9783_v46 = vadd.f32 %v17408_v55, %v9745_v61  ;;  %v9743_v28 = vadd.f32 %v9679_v13, %v17137_v52  ;;  %v9682_v49 = vadd.f32 %v12557_v54, %v9074_v47  ;;  %v18123_v47 = vld [vmem:[#allocation16_spill] sm:$0xff]  ;;  %v10002_v25 = vadd.f32 %v17400_v24, %v10001_v35 }
 0x839   : > { %v9555_v62 = vpop.f32.mrf.mxu1  ;;  %v12596_v21 = vpop.f32.mrf.mxu0 }
 0x83a   : > { %v10127_v4 = vadd.f32 %v10007_v33, %v9783_v46  ;;  %v9781_v12 = vadd.f32 %v17408_v55, %v9743_v28  ;;  %v9714_v7 = vmul.f32 %v18122_v63, %v9682_v49  ;;  %v9680_v39 = vadd.f32 %v9555_v62, %v9066_v36 }
 0x83b   : > { %v12560_v61 = vpop.f32.mrf.mxu1  ;;  %v10014_v1 = vpop.f32.mrf.mxu0  ;;  %v9090_v33 = vadd.f32 %v17291_v0, %v17293_v32  ;;  %v10010_v28 = vadd.f32 %v12593_v53, %v17400_v24  ;;  %v10023_v0 = vadd.f32 %v12596_v21, %v17400_v24 }
 0x83c   : > { %v11359_v52 = vpack.c.bf16 %v10127_v4, %v10127_v4  ;;  %v10125_v13 = vadd.f32 %v9999_v10, %v9781_v12  ;;  %v9746_v42 = vadd.f32 %v9714_v7, %v17133_v56  ;;  %v9712_v54 = vmul.f32 %v18123_v47, %v9680_v39 }
 0x83d   : > { %v9685_v49 = vadd.f32 %v12560_v61, %v9087_v2  ;;  %v9568_v36 = vpop.f32.mrf.mxu1  ;;  %v12597_v46 = vpop.f32.mrf.mxu0  ;;  %v10015_v32 = vadd.f32 %v17400_v24, %v10014_v1  ;;  %v18124_v61 = vld [vmem:[#allocation27_spill] sm:$0xff] }
 0x83e   : > { %10287 = vst.msk [vmem:[%s17432_s30 + $0x8] sm:$0xf] %vm5417_vm3, %v11359_v52  ;;  %v11357_v37 = vpack.c.bf16 %v10125_v13, %v10125_v13  ;;  %v9784_v10 = vadd.f32 %v17408_v55, %v9746_v42  ;;  %v9744_v56 = vadd.f32 %v9712_v54, %v17140_v11  ;;  %v9683_v44 = vadd.f32 %v9568_v36, %v9079_v38 }
 0x83f   : > { %v9749_v31 = vadd.f32 %v9685_v49, %v17148_v3  ;;  %v12561_v53 = vpop.f32.mrf.mxu1  ;;  %v10017_v62 = vpop.f32.mrf.mxu0  ;;  %v9082_v11 = vadd.f32 %v17295_v5, %v17297_v18  ;;  %v9103_v3 = vadd.f32 %v17299_v8, %v17301_v45  ;;  %v9106_v13 = vadd.f32 %v17307_v26, %v17309_v59 }
 0x840   : > { %10285 = vst.msk [vmem:[%s17432_s30] sm:$0xf] %vm5417_vm3, %v11357_v37  ;;  %v10128_v4 = vadd.f32 %v10010_v28, %v9784_v10  ;;  %v9782_v12 = vadd.f32 %v17408_v55, %v9744_v56  ;;  %v9747_v63 = vadd.f32 %v9683_v44, %v17155_v51  ;;  %v9686_v7 = vadd.f32 %v12561_v53, %v9090_v33 }
 0x841   : > { %v9787_v35 = vadd.f32 %v17408_v55, %v9749_v31  ;;  %v9571_v1 = vpop.f32.mrf.mxu1  ;;  %v12600_v21 = vpop.f32.mrf.mxu0  ;;  %v9095_v51 = vadd.f32 %v17303_v15, %v17305_v14  ;;  %v10026_v15 = vadd.f32 %v12597_v46, %v17400_v24  ;;  %v18125_v14 = vld [vmem:[#allocation34_spill] sm:$0xff] }
 0x842   : > { %v11360_v39 = vpack.c.bf16 %v10128_v4, %v10128_v4  ;;  %v10126_v2 = vadd.f32 %v10002_v25, %v9782_v12  ;;  %v9785_v38 = vadd.f32 %v17408_v55, %v9747_v63  ;;  %v9718_v52 = vmul.f32 %v18124_v61, %v9686_v7 }
 0x843   : > { %v10131_v5 = vadd.f32 %v10023_v0, %v9787_v35  ;;  %v9684_v18 = vadd.f32 %v9571_v1, %v9082_v11  ;;  %v12564_v8 = vpop.f32.mrf.mxu1  ;;  %v10030_v45 = vpop.f32.mrf.mxu0  ;;  %v10039_v26 = vadd.f32 %v12600_v21, %v17400_v24  ;;  %v9119_v12 = vadd.f32 %v17315_v43, %v17317_v16  ;;  %v18126_v21 = vld [vmem:[#allocation24_spill] sm:$0xff] }
 0x844   : > { %10288 = vst.msk [vmem:[%s17432_s30 + $0xc] sm:$0xf] %vm5417_vm3, %v11360_v39  ;;  %v11358_v42 = vpack.c.bf16 %v10126_v2, %v10126_v2  ;;  %v10129_v47 = vadd.f32 %v10015_v32, %v9785_v38  ;;  %v9750_v54 = vadd.f32 %v9718_v52, %v17151_v17  ;;  %v9689_v33 = vadd.f32 %v12564_v8, %v9103_v3 }
 0x845   : > { %v11363_v28 = vpack.c.bf16 %v10131_v5, %v10131_v5  ;;  %v9716_v49 = vmul.f32 %v18125_v14, %v9684_v18  ;;  %v9584_v59 = vpop.f32.mrf.mxu1  ;;  %v12601_v36 = vpop.f32.mrf.mxu0  ;;  %v10031_v46 = vadd.f32 %v17400_v24, %v10030_v45  ;;  %v10018_v63 = vadd.f32 %v17400_v24, %v10017_v62 }
 0x846   : > { %10286 = vst.msk [vmem:[%s17432_s30 + $0x4] sm:$0xf] %vm5417_vm3, %v11358_v42  ;;  %v11361_v37 = vpack.c.bf16 %v10129_v47, %v10129_v47  ;;  %v9788_v10 = vadd.f32 %v17408_v55, %v9750_v54  ;;  %v9753_v56 = vadd.f32 %v9689_v33, %v17166_v57  ;;  %v9687_v44 = vadd.f32 %v9584_v59, %v9095_v51 }
 0x847   : > { %10291 = vst.msk [vmem:[%s17432_s30 + $0x18] sm:$0xf] %vm5417_vm3, %v11363_v28  ;;  %v9748_v17 = vadd.f32 %v9716_v49, %v17158_v9  ;;  %v12565_v25 = vpop.f32.mrf.mxu1  ;;  %v10033_v31 = vpop.f32.mrf.mxu0  ;;  %v9098_v57 = vadd.f32 %v17311_v22, %v17313_v50  ;;  %v9111_v39 = vadd.f32 %v17319_v23, %v17321_v30  ;;  %v9122_v22 = vadd.f32 %v17323_v40, %v17325_v27  ;;  %v18127_v30 = vld [vmem:[#allocation21_spill] sm:$0xff] }
 0x848   : > { %10289 = vst.msk [vmem:[%s17432_s30 + $0x10] sm:$0xf] %vm5417_vm3, %v11361_v37  ;;  %v10132_v0 = vadd.f32 %v10026_v15, %v9788_v10  ;;  %v9791_v32 = vadd.f32 %v17408_v55, %v9753_v56  ;;  %v9751_v53 = vadd.f32 %v9687_v44, %v17173_v60  ;;  %v9690_v4 = vadd.f32 %v12565_v25, %v9106_v13  ;;  %v18130_v25 = vld [vmem:[#allocation71_spill] sm:$0xff] }
 0x849   : > { %v9786_v9 = vadd.f32 %v17408_v55, %v9748_v17  ;;  %v9587_v7 = vpop.f32.mrf.mxu1  ;;  %v12604_v11 = vpop.f32.mrf.mxu0  ;;  %v10042_v23 = vadd.f32 %v12601_v36, %v17400_v24  ;;  %v10034_v59 = vadd.f32 %v17400_v24, %v10033_v31  ;;  %v18128_v17 = vld [vmem:[#allocation26_spill] sm:$0xff] }
 0x84a   : > { %v11364_v3 = vpack.c.bf16 %v10132_v0, %v10132_v0  ;;  %v10135_v35 = vadd.f32 %v10039_v26, %v9791_v32  ;;  %v9789_v1 = vadd.f32 %v17408_v55, %v9751_v53  ;;  %v9722_v60 = vmul.f32 %v18126_v21, %v9690_v4 }
 0x84b   : > { %v10130_v50 = vadd.f32 %v10018_v63, %v9786_v9  ;;  %v9688_v43 = vadd.f32 %v9587_v7, %v9098_v57  ;;  %v12568_v16 = vpop.f32.mrf.mxu1  ;;  %v10046_v2 = vpop.f32.mrf.mxu0  ;;  %v10055_v40 = vadd.f32 %v12604_v11, %v17400_v24  ;;  %v9135_v26 = vadd.f32 %v17331_v29, %v17333_v48 }
 0x84c   : > { %10292 = vst.msk [vmem:[%s17432_s30 + $0x1c] sm:$0xf] %vm5417_vm3, %v11364_v3  ;;  %v11367_v62 = vpack.c.bf16 %v10135_v35, %v10135_v35  ;;  %v10133_v38 = vadd.f32 %v10031_v46, %v9789_v1  ;;  %v9754_v61 = vadd.f32 %v9722_v60, %v17169_v19  ;;  %v9693_v52 = vadd.f32 %v12568_v16, %v9119_v12  ;;  %v18129_v46 = vld [vmem:[#allocation35_spill] sm:$0xff] }
 0x84d   : > { %v11362_v51 = vpack.c.bf16 %v10130_v50, %v10130_v50  ;;  %v9720_v13 = vmul.f32 %v18127_v30, %v9688_v43  ;;  %v9600_v27 = vpop.f32.mrf.mxu1  ;;  %v12605_v5 = vpop.f32.mrf.mxu0  ;;  %v10047_v47 = vadd.f32 %v17400_v24, %v10046_v2  ;;  %v9127_v0 = vadd.f32 %v18130_v25, %v18129_v46  ;;  %v18133_v12 = vld [vmem:[#allocation15_spill] sm:$0xff]  ;;  %v18135_v50 = vld [vmem:[#allocation54_spill] sm:$0xff]  ;;  %v18137_v30 = vld [vmem:[#allocation40_spill] sm:$0xff] }
 0x84e   : > { %10295 = vst.msk [vmem:[%s17432_s30 + $0x28] sm:$0xf] %vm5417_vm3, %v11367_v62  ;;  %v11365_v18 = vpack.c.bf16 %v10133_v38, %v10133_v38  ;;  %v9792_v8 = vadd.f32 %v17408_v55, %v9754_v61  ;;  %v9757_v45 = vadd.f32 %v9693_v52, %v17184_v6  ;;  %v9691_v42 = vadd.f32 %v9600_v27, %v9111_v39  ;;  %v18134_v3 = vld [vmem:[#allocation23_spill] sm:$0xff] }
 0x84f   : > { %10290 = vst.msk [vmem:[%s17432_s30 + $0x14] sm:$0xf] %vm5417_vm3, %v11362_v51  ;;  %v9752_v19 = vadd.f32 %v9720_v13, %v17176_v20  ;;  %v12569_v54 = vpop.f32.mrf.mxu1  ;;  %v10049_v33 = vpop.f32.mrf.mxu0  ;;  %v9114_v6 = vadd.f32 %v17327_v41, %v17329_v58  ;;  %v18131_v41 = vld [vmem:[#allocation36_spill] sm:$0xff]  ;;  %v18132_v58 = vld [vmem:[#allocation38_spill] sm:$0xff]  ;;  %v10058_v11 = vadd.f32 %v12605_v5, %v17400_v24  ;;  %v18136_v2 = vld [vmem:[#allocation51_spill] sm:$0xff] }
 0x850   : > { %10293 = vst.msk [vmem:[%s17432_s30 + $0x20] sm:$0xf] %vm5417_vm3, %v11365_v18  ;;  %v10136_v28 = vadd.f32 %v10042_v23, %v9792_v8  ;;  %v9795_v15 = vadd.f32 %v17408_v55, %v9757_v45  ;;  %v9755_v14 = vadd.f32 %v9691_v42, %v17191_v34  ;;  %v9694_v49 = vadd.f32 %v12569_v54, %v9122_v22  ;;  %v18138_v27 = vld [vmem:[#allocation39_spill] sm:$0xff]  ;;  %v18139_v5 = vld [vmem:[#allocation10_spill] sm:$0xff]  ;;  %v18140_v8 = vld [vmem:[#allocation37_spill] sm:$0xff] }
 0x851   : > { %v9790_v20 = vadd.f32 %v17408_v55, %v9752_v19  ;;  %v9603_v36 = vpop.f32.mrf.mxu1  ;;  %v12608_v37 = vpop.f32.mrf.mxu0  ;;  %v9138_v32 = vadd.f32 %v18132_v58, %v18131_v41  ;;  %v9130_v18 = vadd.f32 %v18139_v5, %v18138_v27  ;;  %v18141_v45 = vld [vmem:[#allocation92_spill] sm:$0xff] }
 0x852   : > { %v11368_v10 = vpack.c.bf16 %v10136_v28, %v10136_v28  ;;  %v10139_v56 = vadd.f32 %v10055_v40, %v9795_v15  ;;  %v9793_v44 = vadd.f32 %v17408_v55, %v9755_v14  ;;  %v9726_v34 = vmul.f32 %v18128_v17, %v9694_v49 }
 0x853   : > { %v10134_v48 = vadd.f32 %v10034_v59, %v9790_v20  ;;  %v9692_v29 = vadd.f32 %v9603_v36, %v9114_v6  ;;  %v12572_v53 = vpop.f32.mrf.mxu1  ;;  %v10062_v4 = vpop.f32.mrf.mxu0  ;;  %v10071_v1 = vadd.f32 %v12608_v37, %v17400_v24  ;;  %v9151_v42 = vadd.f32 %v18141_v45, %v18140_v8  ;;  %v18142_v6 = vld [vmem:[#allocation29_spill] sm:$0xff]  ;;  %v18143_v20 = vld [vmem:[#allocation82_spill] sm:$0xff] }
 0x854   : > { %10296 = vst.msk [vmem:[%s17432_s30 + $0x2c] sm:$0xf] %vm5417_vm3, %v11368_v10  ;;  %v11371_v31 = vpack.c.bf16 %v10139_v56, %v10139_v56  ;;  %v10137_v57 = vadd.f32 %v10047_v47, %v9793_v44  ;;  %v9758_v9 = vadd.f32 %v9726_v34, %v18133_v12  ;;  %v9697_v63 = vadd.f32 %v12572_v53, %v9135_v26  ;;  %v18144_v59 = vld [vmem:[#allocation81_spill] sm:$0xff] }
 0x855   : > { %v11366_v7 = vpack.c.bf16 %v10134_v48, %v10134_v48  ;;  %v9724_v35 = vmul.f32 %v18134_v3, %v9692_v29  ;;  %v9616_v21 = vpop.f32.mrf.mxu1  ;;  %v12609_v60 = vpop.f32.mrf.mxu0  ;;  %v10063_v38 = vadd.f32 %v17400_v24, %v10062_v4  ;;  %v10050_v47 = vadd.f32 %v17400_v24, %v10049_v33  ;;  %v18145_v37 = vld [vmem:[#allocation9_spill] sm:$0xff]  ;;  %v18148_v29 = vld [vmem:[#allocation31_spill] sm:$0xff]  ;;  %v18150_v3 = vld [vmem:[#allocation56_spill] sm:$0xff] }
 0x856   : > { %10299 = vst.msk [vmem:[%s17432_s30 + $0x38] sm:$0xf] %vm5417_vm3, %v11371_v31  ;;  %v11369_v39 = vpack.c.bf16 %v10137_v57, %v10137_v57  ;;  %v9796_v22 = vadd.f32 %v17408_v55, %v9758_v9  ;;  %v9761_v43 = vadd.f32 %v9697_v63, %v18135_v50  ;;  %v9695_v16 = vadd.f32 %v9616_v21, %v9127_v0  ;;  %v18146_v10 = vld [vmem:[#allocation85_spill] sm:$0xff]  ;;  %v18147_v0 = vld [vmem:[#allocation52_spill] sm:$0xff]  ;;  %v18149_v63 = vld [vmem:[#allocation59_spill] sm:$0xff] }
 0x857   : > { %10294 = vst.msk [vmem:[%s17432_s30 + $0x24] sm:$0xf] %vm5417_vm3, %v11366_v7  ;;  %v9756_v62 = vadd.f32 %v9724_v35, %v18136_v2  ;;  %v12573_v61 = vpop.f32.mrf.mxu1  ;;  %v10065_v52 = vpop.f32.mrf.mxu0  ;;  %v9143_v36 = vadd.f32 %v18144_v59, %v18143_v20  ;;  %v9154_v56 = vadd.f32 %v18146_v10, %v18145_v37  ;;  %v10074_v48 = vadd.f32 %v12609_v60, %v17400_v24  ;;  %v18151_v50 = vld [vmem:[#allocation61_spill] sm:$0xff] }
 0x858   : > { %10297 = vst.msk [vmem:[%s17432_s30 + $0x30] sm:$0xf] %vm5417_vm3, %v11369_v39  ;;  %v10140_v51 = vadd.f32 %v10058_v11, %v9796_v22  ;;  %v9799_v23 = vadd.f32 %v17408_v55, %v9761_v43  ;;  %v9759_v13 = vadd.f32 %v9695_v16, %v18137_v30  ;;  %v9698_v40 = vadd.f32 %v12573_v61, %v9138_v32  ;;  %v18152_v2 = vld [vmem:[#allocation77_spill] sm:$0xff]  ;;  %v18154_v61 = vld [vmem:[#allocation74_spill] sm:$0xff] }
 0x859   : > { %v9794_v19 = vadd.f32 %v17408_v55, %v9756_v62  ;;  %v9619_v54 = vpop.f32.mrf.mxu1  ;;  %v12612_v28 = vpop.f32.mrf.mxu0  ;;  %v18153_v62 = vld [vmem:[#allocation76_spill] sm:$0xff]  ;;  %v18156_v45 = vld [vmem:[#allocation25_spill] sm:$0xff] }
 0x85a   : > { %v11372_v15 = vpack.c.bf16 %v10140_v51, %v10140_v51  ;;  %v10143_v14 = vadd.f32 %v10071_v1, %v9799_v23  ;;  %v9797_v49 = vadd.f32 %v17408_v55, %v9759_v13  ;;  %v9730_v26 = vmul.f32 %v18142_v6, %v9698_v40  ;;  %v18155_v51 = vld [vmem:[#allocation73_spill] sm:$0xff] }
 0x85b   : > { %v10138_v44 = vadd.f32 %v10050_v47, %v9794_v19  ;;  %v9696_v17 = vadd.f32 %v9619_v54, %v9130_v18  ;;  %v12576_v34 = vpop.f32.mrf.mxu1  ;;  %v10078_v46 = vpop.f32.mrf.mxu0  ;;  %v10087_v4 = vadd.f32 %v12612_v28, %v17400_v24  ;;  %v9167_v23 = vadd.f32 %v18155_v51, %v18154_v61  ;;  %v18157_v19 = vld [vmem:[#allocation79_spill] sm:$0xff]  ;;  %v18159_v28 = vld [vmem:[#allocation41_spill] sm:$0xff] }
 0x85c   : > { %10300 = vst.msk [vmem:[%s17432_s30 + $0x3c] sm:$0xf] %vm5417_vm3, %v11372_v15  ;;  %v11375_v33 = vpack.c.bf16 %v10143_v14, %v10143_v14  ;;  %v10141_v25 = vadd.f32 %v10063_v38, %v9797_v49  ;;  %v9762_v41 = vadd.f32 %v9730_v26, %v18147_v0  ;;  %v9701_v58 = vadd.f32 %v12576_v34, %v9151_v42  ;;  %v18158_v47 = vld [vmem:[#allocation75_spill] sm:$0xff]  ;;  %v18160_v15 = vld [vmem:[#allocation78_spill] sm:$0xff]  ;;  %v18170_v61 = vld [vmem:[#allocation93_spill] sm:$0xff] }
 0x85d   : > { %v11370_v32 = vpack.c.bf16 %v10138_v44, %v10138_v44  ;;  %v9728_v53 = vmul.f32 %v18148_v29, %v9696_v17  ;;  %v9632_v31 = vpop.f32.mrf.mxu1  ;;  %v12613_v57 = vpop.f32.mrf.mxu0  ;;  %v10079_v1 = vadd.f32 %v17400_v24, %v10078_v46  ;;  %v9146_v38 = vadd.f32 %v18153_v62, %v18152_v2  ;;  %v18162_v17 = vld [vmem:[#allocation8_spill] sm:$0xff] }
 0x85e   : > { %10303 = vst.msk [vmem:[%s17432_s30 + $0x48] sm:$0xf] %vm5417_vm3, %v11375_v33  ;;  %v11373_v12 = vpack.c.bf16 %v10141_v25, %v10141_v25  ;;  %v9800_v9 = vadd.f32 %v17408_v55, %v9762_v41  ;;  %v9765_v7 = vadd.f32 %v9701_v58, %v18149_v63  ;;  %v9699_v11 = vadd.f32 %v9632_v31, %v9143_v36  ;;  %v18161_v36 = vld [vmem:[#allocation57_spill] sm:$0xff]  ;;  %v18163_v58 = vld [vmem:[#allocation62_spill] sm:$0xff]  ;;  %v18164_v29 = vld [vmem:[#allocation64_spill] sm:$0xff] }
 0x85f   : > { %10298 = vst.msk [vmem:[%s17432_s30 + $0x34] sm:$0xf] %vm5417_vm3, %v11370_v32  ;;  %v9760_v35 = vadd.f32 %v9728_v53, %v18150_v3  ;;  %v12577_v21 = vpop.f32.mrf.mxu1  ;;  %v10081_v60 = vpop.f32.mrf.mxu0  ;;  %v10066_v13 = vadd.f32 %v17400_v24, %v10065_v52  ;;  %v9159_v54 = vadd.f32 %v18158_v47, %v18157_v19  ;;  %v9170_v14 = vadd.f32 %v18160_v15, %v18159_v28  ;;  %v18165_v63 = vld [vmem:[#allocation67_spill] sm:$0xff]  ;;  %v18166_v3 = vld [vmem:[#allocation44_spill] sm:$0xff] }
 0x860   : > { %10301 = vst.msk [vmem:[%s17432_s30 + $0x40] sm:$0xf] %vm5417_vm3, %v11373_v12  ;;  %v10144_v39 = vadd.f32 %v10074_v48, %v9800_v9  ;;  %v9803_v22 = vadd.f32 %v17408_v55, %v9765_v7  ;;  %v9763_v43 = vadd.f32 %v9699_v11, %v18151_v50  ;;  %v9702_v16 = vadd.f32 %v12577_v21, %v9154_v56  ;;  %v18168_v21 = vld [vmem:[#allocation49_spill] sm:$0xff]  ;;  %v18175_v47 = vld [vmem:[#allocation28_spill] sm:$0xff] }
 0x861   : > { %v9798_v30 = vadd.f32 %v17408_v55, %v9760_v35  ;;  %v9635_v40 = vpop.f32.mrf.mxu1  ;;  %v12616_v27 = vpop.f32.mrf.mxu0  ;;  %v10090_v44 = vadd.f32 %v12613_v57, %v17400_v24  ;;  %v18167_v35 = vld [vmem:[#allocation42_spill] sm:$0xff] }
 0x862   : > { %v11376_v5 = vpack.c.bf16 %v10144_v39, %v10144_v39  ;;  %v10147_v18 = vadd.f32 %v10087_v4, %v9803_v22  ;;  %v9801_v8 = vadd.f32 %v17408_v55, %v9763_v43  ;;  %v9734_v42 = vmul.f32 %v18156_v45, %v9702_v16  ;;  %v18169_v39 = vld [vmem:[#allocation45_spill] sm:$0xff] }
 0x863   : > { %v10142_v49 = vadd.f32 %v10066_v13, %v9798_v30  ;;  %v9700_v6 = vadd.f32 %v9635_v40, %v9146_v38  ;;  %v12580_v26 = vpop.f32.mrf.mxu1  ;;  %v10094_v20 = vpop.f32.mrf.mxu0  ;;  %v10103_v46 = vadd.f32 %v12616_v27, %v17400_v24  ;;  %v9183_v22 = vadd.f32 %v18169_v39, %v18168_v21  ;;  %v18171_v30 = vld [vmem:[#allocation80_spill] sm:$0xff]  ;;  %v18172_v13 = vld [vmem:[#allocation50_spill] sm:$0xff] }
 0x864   : > { %10304 = vst.msk [vmem:[%s17432_s30 + $0x4c] sm:$0xf] %vm5417_vm3, %v11376_v5  ;;  %v11379_v52 = vpack.c.bf16 %v10147_v18, %v10147_v18  ;;  %v10145_v59 = vadd.f32 %v10079_v1, %v9801_v8  ;;  %v9766_v37 = vadd.f32 %v9734_v42, %v18161_v36  ;;  %v9705_v10 = vadd.f32 %v12580_v26, %v9167_v23  ;;  %v18173_v27 = vld [vmem:[#allocation84_spill] sm:$0xff]  ;;  %v18174_v5 = vld [vmem:[#allocation83_spill] sm:$0xff]  ;;  %v18177_v36 = vld [vmem:[#allocation66_spill] sm:$0xff] }
 0x865   : > { %v11374_v56 = vpack.c.bf16 %v10142_v49, %v10142_v49  ;;  %v9732_v34 = vmul.f32 %v18162_v17, %v9700_v6  ;;  %v9648_v33 = vpop.f32.mrf.mxu1  ;;  %v12617_v25 = vpop.f32.mrf.mxu0  ;;  %v10095_v4 = vadd.f32 %v17400_v24, %v10094_v20  ;;  %v9162_v1 = vadd.f32 %v18167_v35, %v18166_v3  ;;  %v18176_v49 = vld [vmem:[#allocation94_spill] sm:$0xff] }
 0x866   : > { %10307 = vst.msk [vmem:[%s17432_s30 + $0x58] sm:$0xf] %vm5417_vm3, %v11379_v52  ;;  %v11377_v0 = vpack.c.bf16 %v10145_v59, %v10145_v59  ;;  %v9804_v41 = vadd.f32 %v17408_v55, %v9766_v37  ;;  %v9769_v32 = vadd.f32 %v9705_v10, %v18163_v58  ;;  %v9703_v48 = vadd.f32 %v9648_v33, %v9159_v54 }
 0x867   : > { %10302 = vst.msk [vmem:[%s17432_s30 + $0x44] sm:$0xf] %vm5417_vm3, %v11374_v56  ;;  %v9764_v53 = vadd.f32 %v9732_v34, %v18164_v29  ;;  %v12581_v31 = vpop.f32.mrf.mxu1  ;;  %v10097_v57 = vpop.f32.mrf.mxu0  ;;  %v10082_v43 = vadd.f32 %v17400_v24, %v10081_v60  ;;  %v9175_v40 = vadd.f32 %v18172_v13, %v18171_v30  ;;  %v9186_v18 = vadd.f32 %v18174_v5, %v18173_v27 }
 0x868   : > { %10305 = vst.msk [vmem:[%s17432_s30 + $0x50] sm:$0xf] %vm5417_vm3, %v11377_v0  ;;  %v10148_v12 = vadd.f32 %v10090_v44, %v9804_v41  ;;  %v9807_v9 = vadd.f32 %v17408_v55, %v9769_v32  ;;  %v9767_v7 = vadd.f32 %v9703_v48, %v18165_v63  ;;  %v9706_v11 = vadd.f32 %v12581_v31, %v9170_v14  ;;  %v18178_v44 = vld [vmem:[#allocation30_spill] sm:$0xff]  ;;  %v18179_v0 = vld [vmem:[#allocation32_spill] sm:$0xff]  ;;  %v18180_v32 = vld [vmem:[#allocation55_spill] sm:$0xff] }
 0x869   : > { %v9802_v50 = vadd.f32 %v17408_v55, %v9764_v53  ;;  %v9651_v16 = vpop.f32.mrf.mxu1  ;;  %v12620_v23 = vpop.f32.mrf.mxu0  ;;  %v10106_v14 = vadd.f32 %v12617_v25, %v17400_v24  ;;  %v18181_v48 = vld [vmem:[#allocation53_spill] sm:$0xff] }
 0x86a   : > { %v11380_v2 = vpack.c.bf16 %v10148_v12, %v10148_v12  ;;  %v10151_v62 = vadd.f32 %v10103_v46, %v9807_v9  ;;  %v9805_v38 = vadd.f32 %v17408_v55, %v9767_v7  ;;  %v9738_v51 = vmul.f32 %v18170_v61, %v9706_v11  ;;  %v18182_v7 = vld [vmem:[#allocation95_spill] sm:$0xff] }
 0x86b   : > { %v10146_v8 = vadd.f32 %v10082_v43, %v9802_v50  ;;  %v9704_v45 = vadd.f32 %v9651_v16, %v9162_v1  ;;  %v12584_v42 = vpop.f32.mrf.mxu1  ;;  %v10119_v26 = vadd.f32 %v12620_v23, %v17400_v24  ;;  %v10110_v56 = vpop.f32.mrf.mxu0  ;;  %v9178_v29 = vadd.f32 %v18181_v48, %v18180_v32  ;;  %v18184_v43 = vld [vmem:[#allocation96_spill] sm:$0xff] }
 0x86c   : > { %10308 = vst.msk [vmem:[%s17432_s30 + $0x5c] sm:$0xf] %vm5417_vm3, %v11380_v2  ;;  %v11383_v60 = vpack.c.bf16 %v10151_v62, %v10151_v62  ;;  %v10149_v19 = vadd.f32 %v10095_v4, %v9805_v38  ;;  %v9770_v54 = vadd.f32 %v9738_v51, %v18175_v47  ;;  %v9709_v28 = vadd.f32 %v12584_v42, %v9183_v22  ;;  %v18183_v22 = vld [vmem:[#allocation70_spill] sm:$0xff]  ;;  %v18185_v51 = vld [vmem:[#allocation19_spill] sm:$0xff] }
 0x86d   : > { %v11378_v15 = vpack.c.bf16 %v10146_v8, %v10146_v8  ;;  %v9736_v6 = vmul.f32 %v18176_v49, %v9704_v45  ;;  %v9664_v20 = vpop.f32.mrf.mxu1  ;;  %v10111_v34 = vadd.f32 %v17400_v24, %v10110_v56  ;;  %v10098_v4 = vadd.f32 %v17400_v24, %v10097_v57  ;;  %v12621_v3 = vpop.f32.mrf.mxu0 }
 0x86e   : > { %10311 = vst.msk [vmem:[%s17432_s30 + $0x68] sm:$0xf] %vm5417_vm3, %v11383_v60  ;;  %v11381_v52 = vpack.c.bf16 %v10149_v19, %v10149_v19  ;;  %v9808_v59 = vadd.f32 %v17408_v55, %v9770_v54  ;;  %v9773_v37 = vadd.f32 %v9709_v28, %v18177_v36  ;;  %v9707_v10 = vadd.f32 %v9664_v20, %v9175_v40 }
 0x86f   : > { %10306 = vst.msk [vmem:[%s17432_s30 + $0x54] sm:$0xf] %vm5417_vm3, %v11378_v15  ;;  %v9768_v17 = vadd.f32 %v9736_v6, %v18178_v44  ;;  %v12585_v46 = vpop.f32.mrf.mxu1  ;;  %v10122_v38 = vadd.f32 %v12621_v3, %v17400_v24  ;;  %v10113_v61 = vpop.f32.mrf.mxu0 }
 0x870   : > { %10309 = vst.msk [vmem:[%s17432_s30 + $0x60] sm:$0xf] %vm5417_vm3, %v11381_v52  ;;  %v10152_v33 = vadd.f32 %v10106_v14, %v9808_v59  ;;  %v9811_v25 = vadd.f32 %v17408_v55, %v9773_v37  ;;  %v9771_v41 = vadd.f32 %v9707_v10, %v18179_v0  ;;  %v9710_v58 = vadd.f32 %v12585_v46, %v9186_v18 }
 0x871   : > { %v9806_v53 = vadd.f32 %v17408_v55, %v9768_v17  ;;  %v9667_v31 = vpop.f32.mrf.mxu1  ;;  %v10114_v40 = vadd.f32 %v17400_v24, %v10113_v61 }
 0x872   : > { %v11384_v12 = vpack.c.bf16 %v10152_v33, %v10152_v33  ;;  %v10155_v9 = vadd.f32 %v10119_v26, %v9811_v25  ;;  %v9809_v63 = vadd.f32 %v17408_v55, %v9771_v41  ;;  %v9742_v11 = vmul.f32 %v18182_v7, %v9710_v58 }
 0x873   : > { %v10150_v35 = vadd.f32 %v10098_v4, %v9806_v53  ;;  %v9708_v1 = vadd.f32 %v9667_v31, %v9178_v29 }
 0x874   : > { %10312 = vst.msk [vmem:[%s17432_s30 + $0x6c] sm:$0xf] %vm5417_vm3, %v11384_v12  ;;  %v11387_v21 = vpack.c.bf16 %v10155_v9, %v10155_v9  ;;  %v10153_v39 = vadd.f32 %v10111_v34, %v9809_v63  ;;  %v9774_v57 = vadd.f32 %v9742_v11, %v18183_v22 }
 0x875   : > { %v11382_v50 = vpack.c.bf16 %v10150_v35, %v10150_v35  ;;  %v9740_v16 = vmul.f32 %v18184_v43, %v9708_v1 }
 0x876   : > { %10315 = vst.msk [vmem:[%s17432_s30 + $0x78] sm:$0xf] %vm5417_vm3, %v11387_v21  ;;  %v11385_v2 = vpack.c.bf16 %v10153_v39, %v10153_v39  ;;  %v9812_v62 = vadd.f32 %v17408_v55, %v9774_v57 }
 0x877   : > { %10310 = vst.msk [vmem:[%s17432_s30 + $0x64] sm:$0xf] %vm5417_vm3, %v11382_v50  ;;  %v9772_v23 = vadd.f32 %v9740_v16, %v18185_v51 }
 0x878   : > { %10313 = vst.msk [vmem:[%s17432_s30 + $0x70] sm:$0xf] %vm5417_vm3, %v11385_v2  ;;  %v10156_v30 = vadd.f32 %v10122_v38, %v9812_v62 }
 0x879   : > { %v9810_v13 = vadd.f32 %v17408_v55, %v9772_v23 }
 0x87a   : > { %v11388_v27 = vpack.c.bf16 %v10156_v30, %v10156_v30 }
 0x87b   : > { %v10154_v5 = vadd.f32 %v10114_v40, %v9810_v13 }
 0x87c   : > { %10316 = vst.msk [vmem:[%s17432_s30 + $0x7c] sm:$0xf] %vm5417_vm3, %v11388_v27 }
 0x87d   : > { %v11386_v18 = vpack.c.bf16 %v10154_v5, %v10154_v5 }
 0x87f   : > { %10314 = vst.msk [vmem:[%s17432_s30 + $0x74] sm:$0xf] %vm5417_vm3, %v11386_v18 }
 0x880   : > { %13234 = shalt.err (!%p13231_p3)
}
 0x881   : > { %s13235_s17 = scalar_lea.hbm %s17653_s27, 2048  ;;  %s13239_s26 = scalar_lea.hbm %s17716_s15, 4096 }
 0x882   : > { %p13236_p4 = scmp.ne.s32.totalorder %s17653_s27, %s13235_s17  ;;  %p13240_p9 = scmp.lt.s32.totalorder %s17653_s27, %s17716_s15 }
 0x883   : > { %p13241_p10 = scmp.lt.s32.totalorder %s13239_s26, %s13235_s17 }
 0x884   : > { %p13237_p7 = pnand %p13236_p4, %p13407_p5 }
 0x885   : > { %p13242_p11 = por %p13241_p10, %p13240_p9 }
 0x886   : > { %p13238_p8 = pneg %p13237_p7 }
 0x888   : > { %p13243_p12 = pnand %p13242_p11, %p13238_p8 }
 0x88a   : > { %13246 = shalt.err (!%p13243_p12)
}
 0x88b   : > { %s13287_s25 = smov 64   ;;  %s13288_s23 = smov 4  }
 0x88c   : > { %12622 = dma.vmem_to_hbm [thread:$0]  (%p13407_p5), %s17655_s3, 2048, %s17653_s27, %s17661_s22, %s13287_s25, %s13287_s25, %s13288_s23  }
 0x88d PF: > { %p12628_p13 = scmp.ge.s32.totalorder %s13281_s21, 2  ;;  %s10346_s0 = sand.u32 1, %s13269_s18  }
 0x88e   : > { %s10347_s1 = scalar_lea.sflag [#allocation5], %s10346_s0 }
 0x88f   : > { %p12625_p0 = pnand %p12628_p13, %p13411_p6 }
 0x891   : > { %p12626_p1 = pneg %p12625_p0 }
 0x893   : > { %13264 = dma.done.wait (%p12626_p1), %s10347_s1, 2048  }
 0x894   : > { %13266 = vsyncadd (%p12626_p1), %s10347_s1, 4294965248  ;;  %s18186_s2 = sld [smem:[#allocation7_spill]]  ;;  %p25_p2 = scmp.ge.s32.totalorder %s13394_s24, 4  }
 0x895   : > { %s18187_s18 = smov %s13273_s19  ;;  %s18188_s19 = smov %s13277_s20 }
 0x896   : > { %s18190_s21 = smov %s13394_s24  ;;  %27 = sbr.rel (!%p25_p2) target bundleno = 8 (0x8), region = 131 }
 0x89a   : > { %s18189_s20 = smov %s18186_s2 }
 0x89b   :  { %10352 = vsyncpa [#allocation5], 1 }
 0x89c   :  { %10354 = vsyncpa [#allocation5 + $0x1], 1 }

</bundles_post_ra>
